<compile_context>
chip_gen: v7x
topology: tpu7x:2x2x1
jax: 0.10.0
libtpu: 0.0.40
codegen_flags: <defaults>
</compile_context>

<pallas_src>
import math

import numpy as np
import jax
import jax.numpy as jnp
from jax.experimental import pallas as pl
from jax.experimental.pallas import tpu as pltpu

EPS = 1e-5


# ----------------------------- Pallas kernel ------------------------------- #
def _downblock(a, t_ref, bias_t_ref, gamma_ref, beta_t_ref):
    """Conv(k=3,s=2,p=1) + bias + ReLU + BatchNorm2d, fully in VMEM.

    a:          (N, H*W*Cin)        f32 NHWC-flattened activation
    t_ref:      (H*W*Cin, Ho*Wo*C)  bf16 Toeplitz conv matrix
    bias_t_ref: (1, Ho*Wo*C)        f32 conv bias tiled over spatial positions
    gamma_ref:  (1, C)              f32 BN gamma
    beta_t_ref: (1, Ho*Wo*C)        f32 BN beta tiled over spatial positions
    returns     (N, Ho*Wo*C)        f32
    """
    tmat = t_ref[...]
    y = jnp.dot(a.astype(tmat.dtype), tmat, preferred_element_type=jnp.float32)
    y = jnp.maximum(y + bias_t_ref[...], 0.0)            # conv bias + ReLU

    n, p = y.shape
    c = gamma_ref.shape[-1]                              # Cout (power of two here)
    m = float(n * (p // c))                              # elements per channel

    # One-hot channel fold (P, C) / unfold (C, P) for the channel-minor layout:
    # flattened position j belongs to channel j % C  (C is a power of two -> &).
    fold = (
        (jax.lax.broadcasted_iota(jnp.int32, (p, c), 0) & (c - 1))
        == jax.lax.broadcasted_iota(jnp.int32, (p, c), 1)
    ).astype(jnp.float32)
    unfold = (
        (jax.lax.broadcasted_iota(jnp.int32, (c, p), 1) & (c - 1))
        == jax.lax.broadcasted_iota(jnp.int32, (c, p), 0)
    ).astype(jnp.float32)

    # BatchNorm2d training-mode forward: biased per-channel stats over N*Ho*Wo.
    ch_sum = jnp.dot(jnp.sum(y, axis=0, keepdims=True), fold,
                     preferred_element_type=jnp.float32)              # (1, C)
    mean = ch_sum * (1.0 / m)
    mean_t = jnp.dot(mean, unfold, preferred_element_type=jnp.float32)  # (1, P)
    centered = y - mean_t
    var = jnp.dot(jnp.sum(centered * centered, axis=0, keepdims=True), fold,
                  preferred_element_type=jnp.float32) * (1.0 / m)       # (1, C)
    scale = gamma_ref[...] * jax.lax.rsqrt(var + EPS)                   # (1, C)
    scale_t = jnp.dot(scale, unfold, preferred_element_type=jnp.float32)  # (1, P)
    return centered * scale_t + beta_t_ref[...]


def _encoder_kernel(x_ref, *refs):
    o_ref = refs[-1]
    block_refs = refs[:-1]
    n_blocks = len(block_refs) // 4
    a = x_ref[...]                                        # (N, H*W*Cin) f32
    for bi in range(n_blocks):                            # unrolled at trace time
        t_ref, bias_ref, gamma_ref, beta_ref = block_refs[4 * bi:4 * bi + 4]
        a = _downblock(a, t_ref, bias_ref, gamma_ref, beta_ref)
    o_ref[...] = a.astype(o_ref.dtype)                    # (N, 128), lane-dense


# ---------------------- host-side weight lowering --------------------------- #
def _conv_as_toeplitz(w, H, W, stride=2, pad=1):
    """Lower Conv2d weight (Cout, Cin, K, K) to a dense matrix (H*W*Cin, Ho*Wo*Cout)
    acting on NHWC-flattened inputs; zero-padding is encoded by skipped taps."""
    Cout, Cin, K, _ = w.shape
    Ho = (H + 2 * pad - K) // stride + 1
    Wo = (W + 2 * pad - K) // stride + 1
    wt = np.transpose(np.asarray(w, np.float32), (2, 3, 1, 0))   # (K, K, Cin, Cout)
    T = np.zeros((H * W * Cin, Ho * Wo * Cout), np.float32)
    for ho in range(Ho):
        for wo in range(Wo):
            col = (ho * Wo + wo) * Cout
            for kh in range(K):
                hi = stride * ho + kh - pad
                if hi < 0 or hi >= H:
                    continue
                for kw in range(K):
                    wi = stride * wo + kw - pad
                    if wi < 0 or wi >= W:
                        continue
                    row = (hi * W + wi) * Cin
                    T[row:row + Cin, col:col + Cout] = wt[kh, kw]
    return T, Ho, Wo


def build_encoder(params, n, h, w):
    """Precompute per-block constants (once per weight set) and return a jitted
    forward(x_nchw) that runs the whole encoder in a single Pallas kernel."""
    const_args = []
    cur_h, cur_w = h, w
    for (wgt, b, gamma, beta) in params:
        cout = int(wgt.shape[0])
        assert cout & (cout - 1) == 0, "kernel assumes power-of-two channel counts"
        T, ho, wo = _conv_as_toeplitz(np.asarray(jax.device_get(wgt)), cur_h, cur_w)
        bias_t = np.tile(np.asarray(jax.device_get(b), np.float32), ho * wo)[None, :]
        beta_t = np.tile(np.asarray(jax.device_get(beta), np.float32), ho * wo)[None, :]
        gamma2 = np.asarray(jax.device_get(gamma), np.float32)[None, :]
        const_args += [
            jnp.asarray(T, jnp.bfloat16),          # bf16 MXU input, f32 accumulate
            jnp.asarray(bias_t, jnp.float32),
            jnp.asarray(gamma2, jnp.float32),
            jnp.asarray(beta_t, jnp.float32),
        ]
        cur_h, cur_w = ho, wo

    c_in = int(params[0][0].shape[1])
    c_out = int(params[-1][0].shape[0])
    flat_in = h * w * c_in
    out_h, out_w = cur_h, cur_w

    in_shapes = [(n, flat_in)] + [tuple(a.shape) for a in const_args]
    call = pl.pallas_call(
        _encoder_kernel,
        out_shape=jax.ShapeDtypeStruct((n, out_h * out_w * c_out), jnp.float32),
        grid=(1,),
        in_specs=[pl.BlockSpec(s, lambda i: (0, 0)) for s in in_shapes],
        out_specs=pl.BlockSpec((n, out_h * out_w * c_out), lambda i: (0, 0)),
        compiler_params=pltpu.CompilerParams(dimension_semantics=("arbitrary",)),
    )

    @jax.jit
    def forward(x_nchw):
        xf = jnp.transpose(x_nchw, (0, 2, 3, 1)).reshape(n, flat_in)  # NHWC flat
        out = call(xf, *const_args)                                   # (N, ho*wo*C)
        out = out.reshape(n, out_h, out_w, c_out)
        return jnp.transpose(out, (0, 3, 1, 2))                       # back to NCHW

    return forward


# ------------------------------ params ------------------------------------- #
def _make_params(key):
    """Deterministic parameter init for the 4 downblocks (same as reference)."""
    channels = [(3, 16), (16, 32), (32, 64), (64, 128)]
    params = []
    for li, (cin, cout) in enumerate(channels):
        kw, kb = jax.random.split(jax.random.fold_in(key, li))
        fan_in = cin * 9
        w = jax.random.normal(kw, (cout, cin, 3, 3), jnp.float32) / math.sqrt(fan_in)
        b = jax.random.normal(kb, (cout,), jnp.float32) * 0.01
        gamma = jnp.ones((cout,), jnp.float32)
        beta = jnp.zeros((cout,), jnp.float32)
        params.append((w, b, gamma, beta))
    return params


if __name__ == "__main__":
    key = jax.random.PRNGKey(0)
    kx, kp = jax.random.split(key)
    x = jax.random.normal(kx, (2, 3, 16, 16), jnp.float32)   # NCHW, like PyTorch
    params = _make_params(kp)

    forward = build_encoder(params, n=2, h=16, w=16)
    y = jax.block_until_ready(forward(x))
    assert y.shape == (2, 128, 1, 1), y.shape
    assert bool(jnp.all(jnp.isfinite(y)))
    print("KERNEL_OK")
</pallas_src>

<mosaic_0001>
module attributes {stable_mosaic.version = 11 : i64} {
  func.func @_encoder_kernel(%arg0: i32, %arg1: memref<2x768xf32, #tpu.memory_space<vmem>>, %arg2: memref<768x1024xbf16, #tpu.memory_space<vmem>>, %arg3: memref<1x1024xf32, #tpu.memory_space<vmem>>, %arg4: memref<1x16xf32, #tpu.memory_space<vmem>>, %arg5: memref<1x1024xf32, #tpu.memory_space<vmem>>, %arg6: memref<1024x512xbf16, #tpu.memory_space<vmem>>, %arg7: memref<1x512xf32, #tpu.memory_space<vmem>>, %arg8: memref<1x32xf32, #tpu.memory_space<vmem>>, %arg9: memref<1x512xf32, #tpu.memory_space<vmem>>, %arg10: memref<512x256xbf16, #tpu.memory_space<vmem>>, %arg11: memref<1x256xf32, #tpu.memory_space<vmem>>, %arg12: memref<1x64xf32, #tpu.memory_space<vmem>>, %arg13: memref<1x256xf32, #tpu.memory_space<vmem>>, %arg14: memref<256x128xbf16, #tpu.memory_space<vmem>>, %arg15: memref<1x128xf32, #tpu.memory_space<vmem>>, %arg16: memref<1x128xf32, #tpu.memory_space<vmem>>, %arg17: memref<1x128xf32, #tpu.memory_space<vmem>>, %arg18: memref<2x128xf32, #tpu.memory_space<vmem>>) attributes {dimension_semantics = [#tpu.dimension_semantics<arbitrary>], iteration_bounds = array<i64: 1>, scalar_prefetch = 0 : i64, scratch_operands = 0 : i64, tpu.core_type = #tpu.core_type<tc>, window_params = [{pipeline_mode = #tpu.pipeline_mode<synchronous>, transform_indices = @transform_0, window_bounds = array<i64: 2, 768>}, {pipeline_mode = #tpu.pipeline_mode<synchronous>, transform_indices = @transform_1, window_bounds = array<i64: 768, 1024>}, {pipeline_mode = #tpu.pipeline_mode<synchronous>, transform_indices = @transform_2, window_bounds = array<i64: 1, 1024>}, {pipeline_mode = #tpu.pipeline_mode<synchronous>, transform_indices = @transform_3, window_bounds = array<i64: 1, 16>}, {pipeline_mode = #tpu.pipeline_mode<synchronous>, transform_indices = @transform_4, window_bounds = array<i64: 1, 1024>}, {pipeline_mode = #tpu.pipeline_mode<synchronous>, transform_indices = @transform_5, window_bounds = array<i64: 1024, 512>}, {pipeline_mode = #tpu.pipeline_mode<synchronous>, transform_indices = @transform_6, window_bounds = array<i64: 1, 512>}, {pipeline_mode = #tpu.pipeline_mode<synchronous>, transform_indices = @transform_7, window_bounds = array<i64: 1, 32>}, {pipeline_mode = #tpu.pipeline_mode<synchronous>, transform_indices = @transform_8, window_bounds = array<i64: 1, 512>}, {pipeline_mode = #tpu.pipeline_mode<synchronous>, transform_indices = @transform_9, window_bounds = array<i64: 512, 256>}, {pipeline_mode = #tpu.pipeline_mode<synchronous>, transform_indices = @transform_10, window_bounds = array<i64: 1, 256>}, {pipeline_mode = #tpu.pipeline_mode<synchronous>, transform_indices = @transform_11, window_bounds = array<i64: 1, 64>}, {pipeline_mode = #tpu.pipeline_mode<synchronous>, transform_indices = @transform_12, window_bounds = array<i64: 1, 256>}, {pipeline_mode = #tpu.pipeline_mode<synchronous>, transform_indices = @transform_13, window_bounds = array<i64: 256, 128>}, {pipeline_mode = #tpu.pipeline_mode<synchronous>, transform_indices = @transform_14, window_bounds = array<i64: 1, 128>}, {pipeline_mode = #tpu.pipeline_mode<synchronous>, transform_indices = @transform_15, window_bounds = array<i64: 1, 128>}, {pipeline_mode = #tpu.pipeline_mode<synchronous>, transform_indices = @transform_16, window_bounds = array<i64: 1, 128>}, {pipeline_mode = #tpu.pipeline_mode<synchronous>, transform_indices = @transform_17, window_bounds = array<i64: 2, 128>}]} {
    %c0 = arith.constant 0 : index
    %c0_0 = arith.constant 0 : index
    %0 = vector.load %arg1[%c0, %c0_0] : memref<2x768xf32, #tpu.memory_space<vmem>>, vector<2x768xf32>
    %c0_1 = arith.constant 0 : index
    %c0_2 = arith.constant 0 : index
    %1 = vector.load %arg2[%c0_1, %c0_2] : memref<768x1024xbf16, #tpu.memory_space<vmem>>, vector<768x1024xbf16>
    %2 = arith.truncf %0 : vector<2x768xf32> to vector<2x768xbf16>
    %cst = arith.constant dense<0.000000e+00> : vector<2x1024xf32>
    %3 = tpu.matmul %2, %1, %cst {dimension_numbers = #tpu.dot_dimension_numbers<[1], [0], [0], [1], [0, 0, 1, 1], [], []>} : vector<2x768xbf16>, vector<768x1024xbf16>, vector<2x1024xf32> -> vector<2x1024xf32>
    %c0_3 = arith.constant 0 : index
    %c0_4 = arith.constant 0 : index
    %4 = vector.load %arg3[%c0_3, %c0_4] : memref<1x1024xf32, #tpu.memory_space<vmem>>, vector<1x1024xf32>
    %5 = vector.broadcast %4 : vector<1x1024xf32> to vector<2x1024xf32>
    %6 = arith.addf %3, %5 : vector<2x1024xf32>
    %cst_5 = arith.constant 0.000000e+00 : f32
    %7 = vector.broadcast %cst_5 : f32 to vector<2x1024xf32>
    %8 = arith.maximumf %6, %7 : vector<2x1024xf32>
    %9 = tpu.iota {dimensions = array<i32: 0>} : vector<1024x16xi32>
    %c15_i32 = arith.constant 15 : i32
    %10 = vector.broadcast %c15_i32 : i32 to vector<1024x16xi32>
    %11 = arith.andi %9, %10 : vector<1024x16xi32>
    %12 = tpu.iota {dimensions = array<i32: 1>} : vector<1024x16xi32>
    %13 = arith.cmpi eq, %11, %12 : vector<1024x16xi32>
    %14 = arith.extui %13 : vector<1024x16xi1> to vector<1024x16xi32>
    %15 = arith.sitofp %14 : vector<1024x16xi32> to vector<1024x16xf32>
    %16 = tpu.iota {dimensions = array<i32: 1>} : vector<16x1024xi32>
    %c15_i32_6 = arith.constant 15 : i32
    %17 = vector.broadcast %c15_i32_6 : i32 to vector<16x1024xi32>
    %18 = arith.andi %16, %17 : vector<16x1024xi32>
    %19 = tpu.iota {dimensions = array<i32: 0>} : vector<16x1024xi32>
    %20 = arith.cmpi eq, %18, %19 : vector<16x1024xi32>
    %21 = arith.extui %20 : vector<16x1024xi1> to vector<16x1024xi32>
    %22 = arith.sitofp %21 : vector<16x1024xi32> to vector<16x1024xf32>
    %cst_7 = arith.constant dense<0.000000e+00> : vector<1024xf32>
    %23 = vector.multi_reduction <add>, %8, %cst_7 [0] : vector<2x1024xf32> to vector<1024xf32>
    %24 = vector.shape_cast %23 : vector<1024xf32> to vector<1x1024xf32>
    %cst_8 = arith.constant dense<0.000000e+00> : vector<1x16xf32>
    %25 = tpu.matmul %24, %15, %cst_8 {dimension_numbers = #tpu.dot_dimension_numbers<[1], [0], [0], [1], [0, 0, 1, 1], [], []>} : vector<1x1024xf32>, vector<1024x16xf32>, vector<1x16xf32> -> vector<1x16xf32>
    %cst_9 = arith.constant 7.812500e-03 : f32
    %26 = vector.broadcast %cst_9 : f32 to vector<1x16xf32>
    %27 = arith.mulf %25, %26 : vector<1x16xf32>
    %cst_10 = arith.constant dense<0.000000e+00> : vector<1x1024xf32>
    %28 = tpu.matmul %27, %22, %cst_10 {dimension_numbers = #tpu.dot_dimension_numbers<[1], [0], [0], [1], [0, 0, 1, 1], [], []>} : vector<1x16xf32>, vector<16x1024xf32>, vector<1x1024xf32> -> vector<1x1024xf32>
    %29 = vector.broadcast %28 : vector<1x1024xf32> to vector<2x1024xf32>
    %30 = arith.subf %8, %29 : vector<2x1024xf32>
    %31 = arith.mulf %30, %30 : vector<2x1024xf32>
    %cst_11 = arith.constant dense<0.000000e+00> : vector<1024xf32>
    %32 = vector.multi_reduction <add>, %31, %cst_11 [0] : vector<2x1024xf32> to vector<1024xf32>
    %33 = vector.shape_cast %32 : vector<1024xf32> to vector<1x1024xf32>
    %cst_12 = arith.constant dense<0.000000e+00> : vector<1x16xf32>
    %34 = tpu.matmul %33, %15, %cst_12 {dimension_numbers = #tpu.dot_dimension_numbers<[1], [0], [0], [1], [0, 0, 1, 1], [], []>} : vector<1x1024xf32>, vector<1024x16xf32>, vector<1x16xf32> -> vector<1x16xf32>
    %cst_13 = arith.constant 7.812500e-03 : f32
    %35 = vector.broadcast %cst_13 : f32 to vector<1x16xf32>
    %36 = arith.mulf %34, %35 : vector<1x16xf32>
    %c0_14 = arith.constant 0 : index
    %c0_15 = arith.constant 0 : index
    %37 = vector.load %arg4[%c0_14, %c0_15] : memref<1x16xf32, #tpu.memory_space<vmem>>, vector<1x16xf32>
    %cst_16 = arith.constant 9.99999974E-6 : f32
    %38 = vector.broadcast %cst_16 : f32 to vector<1x16xf32>
    %39 = arith.addf %36, %38 : vector<1x16xf32>
    %40 = math.rsqrt %39 : vector<1x16xf32>
    %41 = arith.mulf %37, %40 : vector<1x16xf32>
    %cst_17 = arith.constant dense<0.000000e+00> : vector<1x1024xf32>
    %42 = tpu.matmul %41, %22, %cst_17 {dimension_numbers = #tpu.dot_dimension_numbers<[1], [0], [0], [1], [0, 0, 1, 1], [], []>} : vector<1x16xf32>, vector<16x1024xf32>, vector<1x1024xf32> -> vector<1x1024xf32>
    %43 = vector.broadcast %42 : vector<1x1024xf32> to vector<2x1024xf32>
    %44 = arith.mulf %30, %43 : vector<2x1024xf32>
    %c0_18 = arith.constant 0 : index
    %c0_19 = arith.constant 0 : index
    %45 = vector.load %arg5[%c0_18, %c0_19] : memref<1x1024xf32, #tpu.memory_space<vmem>>, vector<1x1024xf32>
    %46 = vector.broadcast %45 : vector<1x1024xf32> to vector<2x1024xf32>
    %47 = arith.addf %44, %46 : vector<2x1024xf32>
    %c0_20 = arith.constant 0 : index
    %c0_21 = arith.constant 0 : index
    %48 = vector.load %arg6[%c0_20, %c0_21] : memref<1024x512xbf16, #tpu.memory_space<vmem>>, vector<1024x512xbf16>
    %49 = arith.truncf %47 : vector<2x1024xf32> to vector<2x1024xbf16>
    %cst_22 = arith.constant dense<0.000000e+00> : vector<2x512xf32>
    %50 = tpu.matmul %49, %48, %cst_22 {dimension_numbers = #tpu.dot_dimension_numbers<[1], [0], [0], [1], [0, 0, 1, 1], [], []>} : vector<2x1024xbf16>, vector<1024x512xbf16>, vector<2x512xf32> -> vector<2x512xf32>
    %c0_23 = arith.constant 0 : index
    %c0_24 = arith.constant 0 : index
    %51 = vector.load %arg7[%c0_23, %c0_24] : memref<1x512xf32, #tpu.memory_space<vmem>>, vector<1x512xf32>
    %52 = vector.broadcast %51 : vector<1x512xf32> to vector<2x512xf32>
    %53 = arith.addf %50, %52 : vector<2x512xf32>
    %cst_25 = arith.constant 0.000000e+00 : f32
    %54 = vector.broadcast %cst_25 : f32 to vector<2x512xf32>
    %55 = arith.maximumf %53, %54 : vector<2x512xf32>
    %56 = tpu.iota {dimensions = array<i32: 0>} : vector<512x32xi32>
    %c31_i32 = arith.constant 31 : i32
    %57 = vector.broadcast %c31_i32 : i32 to vector<512x32xi32>
    %58 = arith.andi %56, %57 : vector<512x32xi32>
    %59 = tpu.iota {dimensions = array<i32: 1>} : vector<512x32xi32>
    %60 = arith.cmpi eq, %58, %59 : vector<512x32xi32>
    %61 = arith.extui %60 : vector<512x32xi1> to vector<512x32xi32>
    %62 = arith.sitofp %61 : vector<512x32xi32> to vector<512x32xf32>
    %63 = tpu.iota {dimensions = array<i32: 1>} : vector<32x512xi32>
    %c31_i32_26 = arith.constant 31 : i32
    %64 = vector.broadcast %c31_i32_26 : i32 to vector<32x512xi32>
    %65 = arith.andi %63, %64 : vector<32x512xi32>
    %66 = tpu.iota {dimensions = array<i32: 0>} : vector<32x512xi32>
    %67 = arith.cmpi eq, %65, %66 : vector<32x512xi32>
    %68 = arith.extui %67 : vector<32x512xi1> to vector<32x512xi32>
    %69 = arith.sitofp %68 : vector<32x512xi32> to vector<32x512xf32>
    %cst_27 = arith.constant dense<0.000000e+00> : vector<512xf32>
    %70 = vector.multi_reduction <add>, %55, %cst_27 [0] : vector<2x512xf32> to vector<512xf32>
    %71 = vector.shape_cast %70 : vector<512xf32> to vector<1x512xf32>
    %cst_28 = arith.constant dense<0.000000e+00> : vector<1x32xf32>
    %72 = tpu.matmul %71, %62, %cst_28 {dimension_numbers = #tpu.dot_dimension_numbers<[1], [0], [0], [1], [0, 0, 1, 1], [], []>} : vector<1x512xf32>, vector<512x32xf32>, vector<1x32xf32> -> vector<1x32xf32>
    %cst_29 = arith.constant 3.125000e-02 : f32
    %73 = vector.broadcast %cst_29 : f32 to vector<1x32xf32>
    %74 = arith.mulf %72, %73 : vector<1x32xf32>
    %cst_30 = arith.constant dense<0.000000e+00> : vector<1x512xf32>
    %75 = tpu.matmul %74, %69, %cst_30 {dimension_numbers = #tpu.dot_dimension_numbers<[1], [0], [0], [1], [0, 0, 1, 1], [], []>} : vector<1x32xf32>, vector<32x512xf32>, vector<1x512xf32> -> vector<1x512xf32>
    %76 = vector.broadcast %75 : vector<1x512xf32> to vector<2x512xf32>
    %77 = arith.subf %55, %76 : vector<2x512xf32>
    %78 = arith.mulf %77, %77 : vector<2x512xf32>
    %cst_31 = arith.constant dense<0.000000e+00> : vector<512xf32>
    %79 = vector.multi_reduction <add>, %78, %cst_31 [0] : vector<2x512xf32> to vector<512xf32>
    %80 = vector.shape_cast %79 : vector<512xf32> to vector<1x512xf32>
    %cst_32 = arith.constant dense<0.000000e+00> : vector<1x32xf32>
    %81 = tpu.matmul %80, %62, %cst_32 {dimension_numbers = #tpu.dot_dimension_numbers<[1], [0], [0], [1], [0, 0, 1, 1], [], []>} : vector<1x512xf32>, vector<512x32xf32>, vector<1x32xf32> -> vector<1x32xf32>
    %cst_33 = arith.constant 3.125000e-02 : f32
    %82 = vector.broadcast %cst_33 : f32 to vector<1x32xf32>
    %83 = arith.mulf %81, %82 : vector<1x32xf32>
    %c0_34 = arith.constant 0 : index
    %c0_35 = arith.constant 0 : index
    %84 = vector.load %arg8[%c0_34, %c0_35] : memref<1x32xf32, #tpu.memory_space<vmem>>, vector<1x32xf32>
    %cst_36 = arith.constant 9.99999974E-6 : f32
    %85 = vector.broadcast %cst_36 : f32 to vector<1x32xf32>
    %86 = arith.addf %83, %85 : vector<1x32xf32>
    %87 = math.rsqrt %86 : vector<1x32xf32>
    %88 = arith.mulf %84, %87 : vector<1x32xf32>
    %cst_37 = arith.constant dense<0.000000e+00> : vector<1x512xf32>
    %89 = tpu.matmul %88, %69, %cst_37 {dimension_numbers = #tpu.dot_dimension_numbers<[1], [0], [0], [1], [0, 0, 1, 1], [], []>} : vector<1x32xf32>, vector<32x512xf32>, vector<1x512xf32> -> vector<1x512xf32>
    %90 = vector.broadcast %89 : vector<1x512xf32> to vector<2x512xf32>
    %91 = arith.mulf %77, %90 : vector<2x512xf32>
    %c0_38 = arith.constant 0 : index
    %c0_39 = arith.constant 0 : index
    %92 = vector.load %arg9[%c0_38, %c0_39] : memref<1x512xf32, #tpu.memory_space<vmem>>, vector<1x512xf32>
    %93 = vector.broadcast %92 : vector<1x512xf32> to vector<2x512xf32>
    %94 = arith.addf %91, %93 : vector<2x512xf32>
    %c0_40 = arith.constant 0 : index
    %c0_41 = arith.constant 0 : index
    %95 = vector.load %arg10[%c0_40, %c0_41] : memref<512x256xbf16, #tpu.memory_space<vmem>>, vector<512x256xbf16>
    %96 = arith.truncf %94 : vector<2x512xf32> to vector<2x512xbf16>
    %cst_42 = arith.constant dense<0.000000e+00> : vector<2x256xf32>
    %97 = tpu.matmul %96, %95, %cst_42 {dimension_numbers = #tpu.dot_dimension_numbers<[1], [0], [0], [1], [0, 0, 1, 1], [], []>} : vector<2x512xbf16>, vector<512x256xbf16>, vector<2x256xf32> -> vector<2x256xf32>
    %c0_43 = arith.constant 0 : index
    %c0_44 = arith.constant 0 : index
    %98 = vector.load %arg11[%c0_43, %c0_44] : memref<1x256xf32, #tpu.memory_space<vmem>>, vector<1x256xf32>
    %99 = vector.broadcast %98 : vector<1x256xf32> to vector<2x256xf32>
    %100 = arith.addf %97, %99 : vector<2x256xf32>
    %cst_45 = arith.constant 0.000000e+00 : f32
    %101 = vector.broadcast %cst_45 : f32 to vector<2x256xf32>
    %102 = arith.maximumf %100, %101 : vector<2x256xf32>
    %103 = tpu.iota {dimensions = array<i32: 0>} : vector<256x64xi32>
    %c63_i32 = arith.constant 63 : i32
    %104 = vector.broadcast %c63_i32 : i32 to vector<256x64xi32>
    %105 = arith.andi %103, %104 : vector<256x64xi32>
    %106 = tpu.iota {dimensions = array<i32: 1>} : vector<256x64xi32>
    %107 = arith.cmpi eq, %105, %106 : vector<256x64xi32>
    %108 = arith.extui %107 : vector<256x64xi1> to vector<256x64xi32>
    %109 = arith.sitofp %108 : vector<256x64xi32> to vector<256x64xf32>
    %110 = tpu.iota {dimensions = array<i32: 1>} : vector<64x256xi32>
    %c63_i32_46 = arith.constant 63 : i32
    %111 = vector.broadcast %c63_i32_46 : i32 to vector<64x256xi32>
    %112 = arith.andi %110, %111 : vector<64x256xi32>
    %113 = tpu.iota {dimensions = array<i32: 0>} : vector<64x256xi32>
    %114 = arith.cmpi eq, %112, %113 : vector<64x256xi32>
    %115 = arith.extui %114 : vector<64x256xi1> to vector<64x256xi32>
    %116 = arith.sitofp %115 : vector<64x256xi32> to vector<64x256xf32>
    %cst_47 = arith.constant dense<0.000000e+00> : vector<256xf32>
    %117 = vector.multi_reduction <add>, %102, %cst_47 [0] : vector<2x256xf32> to vector<256xf32>
    %118 = vector.shape_cast %117 : vector<256xf32> to vector<1x256xf32>
    %cst_48 = arith.constant dense<0.000000e+00> : vector<1x64xf32>
    %119 = tpu.matmul %118, %109, %cst_48 {dimension_numbers = #tpu.dot_dimension_numbers<[1], [0], [0], [1], [0, 0, 1, 1], [], []>} : vector<1x256xf32>, vector<256x64xf32>, vector<1x64xf32> -> vector<1x64xf32>
    %cst_49 = arith.constant 1.250000e-01 : f32
    %120 = vector.broadcast %cst_49 : f32 to vector<1x64xf32>
    %121 = arith.mulf %119, %120 : vector<1x64xf32>
    %cst_50 = arith.constant dense<0.000000e+00> : vector<1x256xf32>
    %122 = tpu.matmul %121, %116, %cst_50 {dimension_numbers = #tpu.dot_dimension_numbers<[1], [0], [0], [1], [0, 0, 1, 1], [], []>} : vector<1x64xf32>, vector<64x256xf32>, vector<1x256xf32> -> vector<1x256xf32>
    %123 = vector.broadcast %122 : vector<1x256xf32> to vector<2x256xf32>
    %124 = arith.subf %102, %123 : vector<2x256xf32>
    %125 = arith.mulf %124, %124 : vector<2x256xf32>
    %cst_51 = arith.constant dense<0.000000e+00> : vector<256xf32>
    %126 = vector.multi_reduction <add>, %125, %cst_51 [0] : vector<2x256xf32> to vector<256xf32>
    %127 = vector.shape_cast %126 : vector<256xf32> to vector<1x256xf32>
    %cst_52 = arith.constant dense<0.000000e+00> : vector<1x64xf32>
    %128 = tpu.matmul %127, %109, %cst_52 {dimension_numbers = #tpu.dot_dimension_numbers<[1], [0], [0], [1], [0, 0, 1, 1], [], []>} : vector<1x256xf32>, vector<256x64xf32>, vector<1x64xf32> -> vector<1x64xf32>
    %cst_53 = arith.constant 1.250000e-01 : f32
    %129 = vector.broadcast %cst_53 : f32 to vector<1x64xf32>
    %130 = arith.mulf %128, %129 : vector<1x64xf32>
    %c0_54 = arith.constant 0 : index
    %c0_55 = arith.constant 0 : index
    %131 = vector.load %arg12[%c0_54, %c0_55] : memref<1x64xf32, #tpu.memory_space<vmem>>, vector<1x64xf32>
    %cst_56 = arith.constant 9.99999974E-6 : f32
    %132 = vector.broadcast %cst_56 : f32 to vector<1x64xf32>
    %133 = arith.addf %130, %132 : vector<1x64xf32>
    %134 = math.rsqrt %133 : vector<1x64xf32>
    %135 = arith.mulf %131, %134 : vector<1x64xf32>
    %cst_57 = arith.constant dense<0.000000e+00> : vector<1x256xf32>
    %136 = tpu.matmul %135, %116, %cst_57 {dimension_numbers = #tpu.dot_dimension_numbers<[1], [0], [0], [1], [0, 0, 1, 1], [], []>} : vector<1x64xf32>, vector<64x256xf32>, vector<1x256xf32> -> vector<1x256xf32>
    %137 = vector.broadcast %136 : vector<1x256xf32> to vector<2x256xf32>
    %138 = arith.mulf %124, %137 : vector<2x256xf32>
    %c0_58 = arith.constant 0 : index
    %c0_59 = arith.constant 0 : index
    %139 = vector.load %arg13[%c0_58, %c0_59] : memref<1x256xf32, #tpu.memory_space<vmem>>, vector<1x256xf32>
    %140 = vector.broadcast %139 : vector<1x256xf32> to vector<2x256xf32>
    %141 = arith.addf %138, %140 : vector<2x256xf32>
    %c0_60 = arith.constant 0 : index
    %c0_61 = arith.constant 0 : index
    %142 = vector.load %arg14[%c0_60, %c0_61] : memref<256x128xbf16, #tpu.memory_space<vmem>>, vector<256x128xbf16>
    %143 = arith.truncf %141 : vector<2x256xf32> to vector<2x256xbf16>
    %cst_62 = arith.constant dense<0.000000e+00> : vector<2x128xf32>
    %144 = tpu.matmul %143, %142, %cst_62 {dimension_numbers = #tpu.dot_dimension_numbers<[1], [0], [0], [1], [0, 0, 1, 1], [], []>} : vector<2x256xbf16>, vector<256x128xbf16>, vector<2x128xf32> -> vector<2x128xf32>
    %c0_63 = arith.constant 0 : index
    %c0_64 = arith.constant 0 : index
    %145 = vector.load %arg15[%c0_63, %c0_64] : memref<1x128xf32, #tpu.memory_space<vmem>>, vector<1x128xf32>
    %146 = vector.broadcast %145 : vector<1x128xf32> to vector<2x128xf32>
    %147 = arith.addf %144, %146 : vector<2x128xf32>
    %cst_65 = arith.constant 0.000000e+00 : f32
    %148 = vector.broadcast %cst_65 : f32 to vector<2x128xf32>
    %149 = arith.maximumf %147, %148 : vector<2x128xf32>
    %150 = tpu.iota {dimensions = array<i32: 0>} : vector<128x128xi32>
    %c127_i32 = arith.constant 127 : i32
    %151 = vector.broadcast %c127_i32 : i32 to vector<128x128xi32>
    %152 = arith.andi %150, %151 : vector<128x128xi32>
    %153 = tpu.iota {dimensions = array<i32: 1>} : vector<128x128xi32>
    %154 = arith.cmpi eq, %152, %153 : vector<128x128xi32>
    %155 = arith.extui %154 : vector<128x128xi1> to vector<128x128xi32>
    %156 = arith.sitofp %155 : vector<128x128xi32> to vector<128x128xf32>
    %157 = tpu.iota {dimensions = array<i32: 1>} : vector<128x128xi32>
    %c127_i32_66 = arith.constant 127 : i32
    %158 = vector.broadcast %c127_i32_66 : i32 to vector<128x128xi32>
    %159 = arith.andi %157, %158 : vector<128x128xi32>
    %160 = tpu.iota {dimensions = array<i32: 0>} : vector<128x128xi32>
    %161 = arith.cmpi eq, %159, %160 : vector<128x128xi32>
    %162 = arith.extui %161 : vector<128x128xi1> to vector<128x128xi32>
    %163 = arith.sitofp %162 : vector<128x128xi32> to vector<128x128xf32>
    %cst_67 = arith.constant dense<0.000000e+00> : vector<128xf32>
    %164 = vector.multi_reduction <add>, %149, %cst_67 [0] : vector<2x128xf32> to vector<128xf32>
    %165 = vector.shape_cast %164 : vector<128xf32> to vector<1x128xf32>
    %cst_68 = arith.constant dense<0.000000e+00> : vector<1x128xf32>
    %166 = tpu.matmul %165, %156, %cst_68 {dimension_numbers = #tpu.dot_dimension_numbers<[1], [0], [0], [1], [0, 0, 1, 1], [], []>} : vector<1x128xf32>, vector<128x128xf32>, vector<1x128xf32> -> vector<1x128xf32>
    %cst_69 = arith.constant 5.000000e-01 : f32
    %167 = vector.broadcast %cst_69 : f32 to vector<1x128xf32>
    %168 = arith.mulf %166, %167 : vector<1x128xf32>
    %cst_70 = arith.constant dense<0.000000e+00> : vector<1x128xf32>
    %169 = tpu.matmul %168, %163, %cst_70 {dimension_numbers = #tpu.dot_dimension_numbers<[1], [0], [0], [1], [0, 0, 1, 1], [], []>} : vector<1x128xf32>, vector<128x128xf32>, vector<1x128xf32> -> vector<1x128xf32>
    %170 = vector.broadcast %169 : vector<1x128xf32> to vector<2x128xf32>
    %171 = arith.subf %149, %170 : vector<2x128xf32>
    %172 = arith.mulf %171, %171 : vector<2x128xf32>
    %cst_71 = arith.constant dense<0.000000e+00> : vector<128xf32>
    %173 = vector.multi_reduction <add>, %172, %cst_71 [0] : vector<2x128xf32> to vector<128xf32>
    %174 = vector.shape_cast %173 : vector<128xf32> to vector<1x128xf32>
    %cst_72 = arith.constant dense<0.000000e+00> : vector<1x128xf32>
    %175 = tpu.matmul %174, %156, %cst_72 {dimension_numbers = #tpu.dot_dimension_numbers<[1], [0], [0], [1], [0, 0, 1, 1], [], []>} : vector<1x128xf32>, vector<128x128xf32>, vector<1x128xf32> -> vector<1x128xf32>
    %cst_73 = arith.constant 5.000000e-01 : f32
    %176 = vector.broadcast %cst_73 : f32 to vector<1x128xf32>
    %177 = arith.mulf %175, %176 : vector<1x128xf32>
    %c0_74 = arith.constant 0 : index
    %c0_75 = arith.constant 0 : index
    %178 = vector.load %arg16[%c0_74, %c0_75] : memref<1x128xf32, #tpu.memory_space<vmem>>, vector<1x128xf32>
    %cst_76 = arith.constant 9.99999974E-6 : f32
    %179 = vector.broadcast %cst_76 : f32 to vector<1x128xf32>
    %180 = arith.addf %177, %179 : vector<1x128xf32>
    %181 = math.rsqrt %180 : vector<1x128xf32>
    %182 = arith.mulf %178, %181 : vector<1x128xf32>
    %cst_77 = arith.constant dense<0.000000e+00> : vector<1x128xf32>
    %183 = tpu.matmul %182, %163, %cst_77 {dimension_numbers = #tpu.dot_dimension_numbers<[1], [0], [0], [1], [0, 0, 1, 1], [], []>} : vector<1x128xf32>, vector<128x128xf32>, vector<1x128xf32> -> vector<1x128xf32>
    %184 = vector.broadcast %183 : vector<1x128xf32> to vector<2x128xf32>
    %185 = arith.mulf %171, %184 : vector<2x128xf32>
    %c0_78 = arith.constant 0 : index
    %c0_79 = arith.constant 0 : index
    %186 = vector.load %arg17[%c0_78, %c0_79] : memref<1x128xf32, #tpu.memory_space<vmem>>, vector<1x128xf32>
    %187 = vector.broadcast %186 : vector<1x128xf32> to vector<2x128xf32>
    %188 = arith.addf %185, %187 : vector<2x128xf32>
    %c0_80 = arith.constant 0 : index
    %c0_81 = arith.constant 0 : index
    %189 = vector.load %arg18[%c0_80, %c0_81] : memref<2x128xf32, #tpu.memory_space<vmem>>, vector<2x128xf32>
    tpu.vector_store %arg18[%c0_80, %c0_81], %188 {strides = array<i32>} : memref<2x128xf32, #tpu.memory_space<vmem>>, vector<2x128xf32>,
    return
  }
  func.func @transform_0(%arg0: i32) -> (i32, i32) {
    %c0_i32 = arith.constant 0 : i32
    %c0_i32_0 = arith.constant 0 : i32
    %c0_i32_1 = arith.constant 0 : i32
    return %c0_i32, %c0_i32_0 : i32, i32
  }
  func.func @transform_1(%arg0: i32) -> (i32, i32) {
    %c0_i32 = arith.constant 0 : i32
    %c0_i32_0 = arith.constant 0 : i32
    %c0_i32_1 = arith.constant 0 : i32
    return %c0_i32, %c0_i32_0 : i32, i32
  }
  func.func @transform_2(%arg0: i32) -> (i32, i32) {
    %c0_i32 = arith.constant 0 : i32
    %c0_i32_0 = arith.constant 0 : i32
    %c0_i32_1 = arith.constant 0 : i32
    return %c0_i32, %c0_i32_0 : i32, i32
  }
  func.func @transform_3(%arg0: i32) -> (i32, i32) {
    %c0_i32 = arith.constant 0 : i32
    %c0_i32_0 = arith.constant 0 : i32
    %c0_i32_1 = arith.constant 0 : i32
    return %c0_i32, %c0_i32_0 : i32, i32
  }
  func.func @transform_4(%arg0: i32) -> (i32, i32) {
    %c0_i32 = arith.constant 0 : i32
    %c0_i32_0 = arith.constant 0 : i32
    %c0_i32_1 = arith.constant 0 : i32
    return %c0_i32, %c0_i32_0 : i32, i32
  }
  func.func @transform_5(%arg0: i32) -> (i32, i32) {
    %c0_i32 = arith.constant 0 : i32
    %c0_i32_0 = arith.constant 0 : i32
    %c0_i32_1 = arith.constant 0 : i32
    return %c0_i32, %c0_i32_0 : i32, i32
  }
  func.func @transform_6(%arg0: i32) -> (i32, i32) {
    %c0_i32 = arith.constant 0 : i32
    %c0_i32_0 = arith.constant 0 : i32
    %c0_i32_1 = arith.constant 0 : i32
    return %c0_i32, %c0_i32_0 : i32, i32
  }
  func.func @transform_7(%arg0: i32) -> (i32, i32) {
    %c0_i32 = arith.constant 0 : i32
    %c0_i32_0 = arith.constant 0 : i32
    %c0_i32_1 = arith.constant 0 : i32
    return %c0_i32, %c0_i32_0 : i32, i32
  }
  func.func @transform_8(%arg0: i32) -> (i32, i32) {
    %c0_i32 = arith.constant 0 : i32
    %c0_i32_0 = arith.constant 0 : i32
    %c0_i32_1 = arith.constant 0 : i32
    return %c0_i32, %c0_i32_0 : i32, i32
  }
  func.func @transform_9(%arg0: i32) -> (i32, i32) {
    %c0_i32 = arith.constant 0 : i32
    %c0_i32_0 = arith.constant 0 : i32
    %c0_i32_1 = arith.constant 0 : i32
    return %c0_i32, %c0_i32_0 : i32, i32
  }
  func.func @transform_10(%arg0: i32) -> (i32, i32) {
    %c0_i32 = arith.constant 0 : i32
    %c0_i32_0 = arith.constant 0 : i32
    %c0_i32_1 = arith.constant 0 : i32
    return %c0_i32, %c0_i32_0 : i32, i32
  }
  func.func @transform_11(%arg0: i32) -> (i32, i32) {
    %c0_i32 = arith.constant 0 : i32
    %c0_i32_0 = arith.constant 0 : i32
    %c0_i32_1 = arith.constant 0 : i32
    return %c0_i32, %c0_i32_0 : i32, i32
  }
  func.func @transform_12(%arg0: i32) -> (i32, i32) {
    %c0_i32 = arith.constant 0 : i32
    %c0_i32_0 = arith.constant 0 : i32
    %c0_i32_1 = arith.constant 0 : i32
    return %c0_i32, %c0_i32_0 : i32, i32
  }
  func.func @transform_13(%arg0: i32) -> (i32, i32) {
    %c0_i32 = arith.constant 0 : i32
    %c0_i32_0 = arith.constant 0 : i32
    %c0_i32_1 = arith.constant 0 : i32
    return %c0_i32, %c0_i32_0 : i32, i32
  }
  func.func @transform_14(%arg0: i32) -> (i32, i32) {
    %c0_i32 = arith.constant 0 : i32
    %c0_i32_0 = arith.constant 0 : i32
    %c0_i32_1 = arith.constant 0 : i32
    return %c0_i32, %c0_i32_0 : i32, i32
  }
  func.func @transform_15(%arg0: i32) -> (i32, i32) {
    %c0_i32 = arith.constant 0 : i32
    %c0_i32_0 = arith.constant 0 : i32
    %c0_i32_1 = arith.constant 0 : i32
    return %c0_i32, %c0_i32_0 : i32, i32
  }
  func.func @transform_16(%arg0: i32) -> (i32, i32) {
    %c0_i32 = arith.constant 0 : i32
    %c0_i32_0 = arith.constant 0 : i32
    %c0_i32_1 = arith.constant 0 : i32
    return %c0_i32, %c0_i32_0 : i32, i32
  }
  func.func @transform_17(%arg0: i32) -> (i32, i32) {
    %c0_i32 = arith.constant 0 : i32
    %c0_i32_0 = arith.constant 0 : i32
    %c0_i32_1 = arith.constant 0 : i32
    return %c0_i32, %c0_i32_0 : i32, i32
  }
}

</mosaic_0001>

<bundles_post_ra>
// kernel: forward.1
= control target key start
LH: loop header
LB: loop body
LE: loop exit
PB: predicated region body
PF: predicated region fallthrough
CT: control target
= control target key end

     0   :  { %s20212_s0 = inlined_call_operand.vmem [shape: f32[2,768], index: 0, kind: input, shape index: {}]   ;;  %s20213_s1 = inlined_call_operand.vmem [shape: bf16[768,1024], index: 1, kind: input, shape index: {}]   ;;  %s20214_s2 = inlined_call_operand.vmem [shape: f32[1,1024], index: 2, kind: input, shape index: {}]   ;;  %s20215_s3 = inlined_call_operand.vmem [shape: f32[1,16], index: 3, kind: input, shape index: {}]   ;;  %s20216_s4 = inlined_call_operand.vmem [shape: f32[1,1024], index: 4, kind: input, shape index: {}]   ;;  %s20217_s5 = inlined_call_operand.vmem [shape: bf16[1024,512], index: 5, kind: input, shape index: {}]   ;;  %s20218_s6 = inlined_call_operand.vmem [shape: f32[1,512], index: 6, kind: input, shape index: {}]   ;;  %s20219_s7 = inlined_call_operand.vmem [shape: f32[1,32], index: 7, kind: input, shape index: {}]   ;;  %s20220_s8 = inlined_call_operand.vmem [shape: f32[1,512], index: 8, kind: input, shape index: {}]   ;;  %s20221_s9 = inlined_call_operand.vmem [shape: bf16[512,256], index: 9, kind: input, shape index: {}]   ;;  %s20222_s10 = inlined_call_operand.vmem [shape: f32[1,256], index: 10, kind: input, shape index: {}]   ;;  %s20223_s11 = inlined_call_operand.vmem [shape: f32[1,64], index: 11, kind: input, shape index: {}]   ;;  %s20224_s12 = inlined_call_operand.vmem [shape: f32[1,256], index: 12, kind: input, shape index: {}]   ;;  %s20225_s13 = inlined_call_operand.vmem [shape: bf16[256,128], index: 13, kind: input, shape index: {}]   ;;  %s20226_s14 = inlined_call_operand.vmem [shape: f32[1,128], index: 14, kind: input, shape index: {}]   ;;  %s20227_s15 = inlined_call_operand.vmem [shape: f32[1,128], index: 15, kind: input, shape index: {}]   ;;  %s20228_s16 = inlined_call_operand.vmem [shape: f32[1,128], index: 16, kind: input, shape index: {}]   ;;  %s20229_s17 = inlined_call_operand.hbm [shape: f32[2,128], index: 17, kind: output, shape index: {}]  }
   0x1   :  { %20882 = sst [smem:[#allocation177_spill]] %s20212_s0 }
   0x2   :  { %20883 = sst [smem:[#allocation178_spill]] %s20213_s1 }
   0x3   :  { %s20884_s26 = sld [smem:[#allocation178_spill]]  ;;  %v13217_v32 = vmov 1983009808   ;;  %v450_v34 = vlaneseq  ;;  %s20885_s27 = sld [smem:[#allocation177_spill]] }
   0x4   :  { %v448_v33 = vunpack.c.l.s4 %v13217_v32 }
   0x5   :  { %v13380_v44 = vshrl.u32 %v450_v34, 7 }
   0x6   :  { %v449_v43 = vunpack.c.0.s8 %v448_v33 }
   0x8   :  { %v13395_v53 = vsub.s32 %v449_v43, %v13380_v44 }
   0x9   :  { %v60_v0 = vld [vmem:[%s20884_s26] sm:$0xff]  ;;  %v61_v2 = vld [vmem:[%s20884_s26 + $0x8] sm:$0xff] }
   0xa   :  { %v64_v1 = vld [vmem:[%s20884_s26 + $0x20] sm:$0xff]  ;;  %v65_v4 = vld [vmem:[%s20884_s26 + $0x28] sm:$0xff] }
   0xb   :  { %v9600_v3 = vcombine.high %v60_v0, %v64_v1  ;;  %v9599_v5 = vcombine.low %v60_v0, %v64_v1  ;;  %v68_v6 = vld [vmem:[%s20884_s26 + $0x40] sm:$0xff]  ;;  %v9602_v8 = vcombine.high %v61_v2, %v65_v4  ;;  %v9601_v9 = vcombine.low %v61_v2, %v65_v4  ;;  %v69_v11 = vld [vmem:[%s20884_s26 + $0x48] sm:$0xff] }
   0xc   :  { %v72_v7 = vld [vmem:[%s20884_s26 + $0x60] sm:$0xff]  ;;  %v73_v12 = vld [vmem:[%s20884_s26 + $0x68] sm:$0xff] }
   0xd   :  { %v9608_v10 = vcombine.high %v68_v6, %v72_v7  ;;  %v76_v13 = vld [vmem:[%s20884_s26 + $0x80] sm:$0xff]  ;;  %2445 = vmatprep.subr.bf16.mxu0 %v9600_v3  ;;  %v9610_v14 = vcombine.high %v69_v11, %v73_v12  ;;  %v77_v16 = vld [vmem:[%s20884_s26 + $0x88] sm:$0xff]  ;;  %2568 = vmatprep.subr.bf16.mxu1 %v9602_v8  ;;  %v9607_v18 = vcombine.low %v68_v6, %v72_v7 }
   0xe   :  { %v80_v15 = vld [vmem:[%s20884_s26 + $0xa0] sm:$0xff]  ;;  %v81_v17 = vld [vmem:[%s20884_s26 + $0xa8] sm:$0xff]  ;;  %2446 = vmatpush1.bf16.msra.mxu0 %v9599_v5  ;;  %2569 = vmatpush1.bf16.msra.mxu1 %v9601_v9  ;;  %v9609_v19 = vcombine.low %v69_v11, %v73_v12 }
   0xf   :  { %2447 = vmatprep.subr.bf16.mxu0 %v9608_v10  ;;  %v9616_v20 = vcombine.high %v76_v13, %v80_v15  ;;  %2570 = vmatprep.subr.bf16.mxu1 %v9610_v14  ;;  %v9618_v21 = vcombine.high %v77_v16, %v81_v17  ;;  %v84_v22 = vld [vmem:[%s20884_s26 + $0xc0] sm:$0xff]  ;;  %v85_v24 = vld [vmem:[%s20884_s26 + $0xc8] sm:$0xff]  ;;  %v9615_v26 = vcombine.low %v76_v13, %v80_v15 }
  0x10   :  { %v88_v23 = vld [vmem:[%s20884_s26 + $0xe0] sm:$0xff]  ;;  %v89_v25 = vld [vmem:[%s20884_s26 + $0xe8] sm:$0xff]  ;;  %v9617_v27 = vcombine.low %v77_v16, %v81_v17 }
  0x11   :  { %v9624_v28 = vcombine.high %v84_v22, %v88_v23  ;;  %v9626_v29 = vcombine.high %v85_v24, %v89_v25  ;;  %v92_v30 = vld [vmem:[%s20884_s26 + $0x100] sm:$0xff]  ;;  %v93_v35 = vld [vmem:[%s20884_s26 + $0x108] sm:$0xff]  ;;  %v9623_v37 = vcombine.low %v84_v22, %v88_v23  ;;  %v9625_v38 = vcombine.low %v85_v24, %v89_v25 }
  0x12   :  { %2448 = vmatpush1.bf16.msra.mxu0 %v9607_v18  ;;  %2571 = vmatpush1.bf16.msra.mxu1 %v9609_v19  ;;  %v96_v31 = vld [vmem:[%s20884_s26 + $0x120] sm:$0xff]  ;;  %v97_v36 = vld [vmem:[%s20884_s26 + $0x128] sm:$0xff] }
  0x13   :  { %2449 = vmatprep.subr.bf16.mxu0 %v9616_v20  ;;  %2572 = vmatprep.subr.bf16.mxu1 %v9618_v21  ;;  %v9632_v39 = vcombine.high %v92_v30, %v96_v31  ;;  %v9634_v40 = vcombine.high %v93_v35, %v97_v36  ;;  %v100_v41 = vld [vmem:[%s20884_s26 + $0x140] sm:$0xff]  ;;  %v101_v45 = vld [vmem:[%s20884_s26 + $0x148] sm:$0xff]  ;;  %v9631_v47 = vcombine.low %v92_v30, %v96_v31 }
  0x14   :  { %v104_v42 = vld [vmem:[%s20884_s26 + $0x160] sm:$0xff]  ;;  %v105_v46 = vld [vmem:[%s20884_s26 + $0x168] sm:$0xff]  ;;  %v9633_v48 = vcombine.low %v93_v35, %v97_v36 }
  0x15   :  { %v9640_v49 = vcombine.high %v100_v41, %v104_v42  ;;  %v9642_v50 = vcombine.high %v101_v45, %v105_v46  ;;  %v108_v51 = vld [vmem:[%s20884_s26 + $0x180] sm:$0xff]  ;;  %v109_v54 = vld [vmem:[%s20884_s26 + $0x188] sm:$0xff]  ;;  %v9639_v56 = vcombine.low %v100_v41, %v104_v42  ;;  %v9641_v57 = vcombine.low %v101_v45, %v105_v46 }
  0x16   :  { %2450 = vmatpush1.bf16.msra.mxu0 %v9615_v26  ;;  %2573 = vmatpush1.bf16.msra.mxu1 %v9617_v27  ;;  %v112_v52 = vld [vmem:[%s20884_s26 + $0x1a0] sm:$0xff]  ;;  %v113_v55 = vld [vmem:[%s20884_s26 + $0x1a8] sm:$0xff] }
  0x17   :  { %2451 = vmatprep.subr.bf16.mxu0 %v9624_v28  ;;  %2574 = vmatprep.subr.bf16.mxu1 %v9626_v29  ;;  %v9648_v58 = vcombine.high %v108_v51, %v112_v52  ;;  %v13406_v59 = vld [vmem:[%s20885_s27] sm:$0xff]  ;;  %v9650_v60 = vcombine.high %v109_v54, %v113_v55  ;;  %v117_v0 = vld [vmem:[%s20884_s26 + $0x1c8] sm:$0xff]  ;;  %v9647_v2 = vcombine.low %v108_v51, %v112_v52 }
  0x18   :  { %v116_v61 = vld [vmem:[%s20884_s26 + $0x1c0] sm:$0xff]  ;;  %v13416_v63 = vrot.slane %v13406_v59, %v13395_v53  ;;  %v121_v1 = vld [vmem:[%s20884_s26 + $0x1e8] sm:$0xff]  ;;  %v9649_v4 = vcombine.low %v109_v54, %v113_v55 }
  0x19   :  { %v120_v62 = vld [vmem:[%s20884_s26 + $0x1e0] sm:$0xff]  ;;  %v9658_v6 = vcombine.high %v117_v0, %v121_v1  ;;  %v125_v10 = vld [vmem:[%s20884_s26 + $0x208] sm:$0xff]  ;;  %v9657_v13 = vcombine.low %v117_v0, %v121_v1 }
  0x1a   :  { %2452 = vmatpush1.bf16.msra.mxu0 %v9623_v37  ;;  %2575 = vmatpush1.bf16.msra.mxu1 %v9625_v38  ;;  %v461_v3 = vcombine.high %v13416_v63, %v13416_v63  ;;  %v9656_v5 = vcombine.high %v116_v61, %v120_v62  ;;  %v124_v7 = vld [vmem:[%s20884_s26 + $0x200] sm:$0xff]  ;;  %v129_v11 = vld [vmem:[%s20884_s26 + $0x228] sm:$0xff]  ;;  %v9655_v12 = vcombine.low %v116_v61, %v120_v62 }
  0x1b   :  { %2453 = vmatprep.subr.bf16.mxu0 %v9632_v39  ;;  %2576 = vmatprep.subr.bf16.mxu1 %v9634_v40  ;;  %v128_v8 = vld [vmem:[%s20884_s26 + $0x220] sm:$0xff]  ;;  %v9666_v15 = vcombine.high %v125_v10, %v129_v11  ;;  %v133_v18 = vld [vmem:[%s20884_s26 + $0x248] sm:$0xff]  ;;  %v9665_v21 = vcombine.low %v125_v10, %v129_v11 }
  0x1c   :  { %v13432_v9 = vpack.c.bf16 %v461_v3, %v461_v3  ;;  %v9664_v14 = vcombine.high %v124_v7, %v128_v8  ;;  %v132_v16 = vld [vmem:[%s20884_s26 + $0x240] sm:$0xff]  ;;  %v137_v19 = vld [vmem:[%s20884_s26 + $0x268] sm:$0xff]  ;;  %v9663_v20 = vcombine.low %v124_v7, %v128_v8  ;;  %v446_v7 = vcombine.high %v13406_v59, %v13406_v59 }
  0x1d   :  { %v136_v17 = vld [vmem:[%s20884_s26 + $0x260] sm:$0xff]  ;;  %v9674_v23 = vcombine.high %v133_v18, %v137_v19  ;;  %v141_v26 = vld [vmem:[%s20884_s26 + $0x288] sm:$0xff]  ;;  %v9673_v29 = vcombine.low %v133_v18, %v137_v19 }
  0x1e   :  { %2454 = vmatpush1.bf16.msra.mxu0 %v9631_v47  ;;  %2577 = vmatpush1.bf16.msra.mxu1 %v9633_v48  ;;  %v9672_v22 = vcombine.high %v132_v16, %v136_v17  ;;  %v140_v24 = vld [vmem:[%s20884_s26 + $0x280] sm:$0xff]  ;;  %v145_v27 = vld [vmem:[%s20884_s26 + $0x2a8] sm:$0xff]  ;;  %v9671_v28 = vcombine.low %v132_v16, %v136_v17  ;;  %v13535_v16 = vrot.slane %v446_v7, %v13395_v53 }
  0x1f   :  { %2455 = vmatprep.subr.bf16.mxu0 %v9640_v49  ;;  %2578 = vmatprep.subr.bf16.mxu1 %v9642_v50  ;;  %v144_v25 = vld [vmem:[%s20884_s26 + $0x2a0] sm:$0xff]  ;;  %v9682_v31 = vcombine.high %v141_v26, %v145_v27  ;;  %v149_v35 = vld [vmem:[%s20884_s26 + $0x2c8] sm:$0xff]  ;;  %v9681_v38 = vcombine.low %v141_v26, %v145_v27 }
  0x20   :  { %2477 = vmatprep.mubr.bf16.mxu0 %v13432_v9  ;;  %2600 = vmatprep.mubr.bf16.mxu1 %v13432_v9  ;;  %v9680_v30 = vcombine.high %v140_v24, %v144_v25  ;;  %v148_v32 = vld [vmem:[%s20884_s26 + $0x2c0] sm:$0xff]  ;;  %v153_v36 = vld [vmem:[%s20884_s26 + $0x2e8] sm:$0xff]  ;;  %v9679_v37 = vcombine.low %v140_v24, %v144_v25  ;;  %v462_v24 = vcombine.high %v13535_v16, %v13535_v16 }
  0x21   :  { %v152_v33 = vld [vmem:[%s20884_s26 + $0x2e0] sm:$0xff]  ;;  %v9690_v40 = vcombine.high %v149_v35, %v153_v36  ;;  %v157_v43 = vld [vmem:[%s20884_s26 + $0x308] sm:$0xff]  ;;  %v9689_v47 = vcombine.low %v149_v35, %v153_v36  ;;  %v13553_v25 = vpack.c.bf16 %v13416_v63, %v13416_v63 }
  0x22   :  { %2456 = vmatpush1.bf16.msra.mxu0 %v9639_v56  ;;  %2579 = vmatpush1.bf16.msra.mxu1 %v9641_v57  ;;  %v9688_v39 = vcombine.high %v148_v32, %v152_v33  ;;  %v156_v41 = vld [vmem:[%s20884_s26 + $0x300] sm:$0xff]  ;;  %v161_v45 = vld [vmem:[%s20884_s26 + $0x328] sm:$0xff]  ;;  %v9687_v46 = vcombine.low %v148_v32, %v152_v33  ;;  %v13573_v36 = vpack.c.bf16 %v462_v24, %v462_v24 }
  0x23   :  { %2457 = vmatprep.subr.bf16.mxu0 %v9648_v58  ;;  %2580 = vmatprep.subr.bf16.mxu1 %v9650_v60  ;;  %v160_v42 = vld [vmem:[%s20884_s26 + $0x320] sm:$0xff]  ;;  %v9698_v49 = vcombine.high %v157_v43, %v161_v45  ;;  %v165_v52 = vld [vmem:[%s20884_s26 + $0x348] sm:$0xff]  ;;  %v9697_v56 = vcombine.low %v157_v43, %v161_v45 }
  0x24   :  { %v9696_v48 = vcombine.high %v156_v41, %v160_v42  ;;  %v164_v50 = vld [vmem:[%s20884_s26 + $0x340] sm:$0xff]  ;;  %v169_v54 = vld [vmem:[%s20884_s26 + $0x368] sm:$0xff]  ;;  %v9695_v55 = vcombine.low %v156_v41, %v160_v42 }
  0x25   :  { %v168_v51 = vld [vmem:[%s20884_s26 + $0x360] sm:$0xff]  ;;  %v9706_v58 = vcombine.high %v165_v52, %v169_v54  ;;  %v173_v62 = vld [vmem:[%s20884_s26 + $0x388] sm:$0xff] }
  0x26   :  { %2458 = vmatpush1.bf16.msra.mxu0 %v9647_v2  ;;  %2581 = vmatpush1.bf16.msra.mxu1 %v9649_v4  ;;  %v9704_v57 = vcombine.high %v164_v50, %v168_v51  ;;  %v172_v60 = vld [vmem:[%s20884_s26 + $0x380] sm:$0xff]  ;;  %v177_v0 = vld [vmem:[%s20884_s26 + $0x3a8] sm:$0xff]  ;;  %v9703_v1 = vcombine.low %v164_v50, %v168_v51  ;;  %v9705_v2 = vcombine.low %v165_v52, %v169_v54 }
  0x27   :  { %2459 = vmatprep.subr.bf16.mxu0 %v9656_v5  ;;  %2582 = vmatprep.subr.bf16.mxu1 %v9658_v6  ;;  %v176_v61 = vld [vmem:[%s20884_s26 + $0x3a0] sm:$0xff]  ;;  %v9714_v4 = vcombine.high %v173_v62, %v177_v0  ;;  %v181_v8 = vld [vmem:[%s20884_s26 + $0x3c8] sm:$0xff] }
  0x28   :  { %v9712_v3 = vcombine.high %v172_v60, %v176_v61  ;;  %v180_v5 = vld [vmem:[%s20884_s26 + $0x3c0] sm:$0xff]  ;;  %v185_v10 = vld [vmem:[%s20884_s26 + $0x3e8] sm:$0xff]  ;;  %v9711_v11 = vcombine.low %v172_v60, %v176_v61 }
  0x29   :  { %v184_v6 = vld [vmem:[%s20884_s26 + $0x3e0] sm:$0xff]  ;;  %v189_v17 = vld [vmem:[%s20884_s26 + $0x408] sm:$0xff] }
  0x2a   :  { %2460 = vmatpush1.bf16.msra.mxu0 %v9655_v12  ;;  %2583 = vmatpush1.bf16.msra.mxu1 %v9657_v13  ;;  %v9713_v12 = vcombine.low %v173_v62, %v177_v0  ;;  %v9720_v13 = vcombine.high %v180_v5, %v184_v6  ;;  %v188_v59 = vld [vmem:[%s20884_s26 + $0x400] sm:$0xff]  ;;  %v193_v18 = vld [vmem:[%s20884_s26 + $0x428] sm:$0xff]  ;;  %v9719_v19 = vcombine.low %v180_v5, %v184_v6 }
  0x2b   :  { %2461 = vmatprep.subr.bf16.mxu0 %v9664_v14  ;;  %2584 = vmatprep.subr.bf16.mxu1 %v9666_v15  ;;  %v9722_v14 = vcombine.high %v181_v8, %v185_v10  ;;  %v192_v15 = vld [vmem:[%s20884_s26 + $0x420] sm:$0xff]  ;;  %v197_v26 = vld [vmem:[%s20884_s26 + $0x448] sm:$0xff] }
  0x2c   :  { %v196_v53 = vld [vmem:[%s20884_s26 + $0x440] sm:$0xff]  ;;  %v201_v27 = vld [vmem:[%s20884_s26 + $0x468] sm:$0xff] }
  0x2d   :  { %v208_v63 = vld [vmem:[%s20884_s26 + $0x4a0] sm:$0xff]  ;;  %v205_v32 = vld [vmem:[%s20884_s26 + $0x488] sm:$0xff]  ;;  %v9738_v33 = vcombine.high %v197_v26, %v201_v27 }
  0x2e   :  { %2462 = vmatpush1.bf16.msra.mxu0 %v9663_v20  ;;  %2585 = vmatpush1.bf16.msra.mxu1 %v9665_v21  ;;  %v9721_v20 = vcombine.low %v181_v8, %v185_v10  ;;  %v9728_v21 = vcombine.high %v188_v59, %v192_v15  ;;  %v209_v35 = vld [vmem:[%s20884_s26 + $0x4a8] sm:$0xff]  ;;  %v216_v41 = vld [vmem:[%s20884_s26 + $0x4e0] sm:$0xff] }
  0x2f   :  { %2463 = vmatprep.subr.bf16.mxu0 %v9672_v22  ;;  %2586 = vmatprep.subr.bf16.mxu1 %v9674_v23  ;;  %v9730_v22 = vcombine.high %v189_v17, %v193_v18  ;;  %v200_v23 = vld [vmem:[%s20884_s26 + $0x460] sm:$0xff]  ;;  %v213_v42 = vld [vmem:[%s20884_s26 + $0x4c8] sm:$0xff]  ;;  %v9746_v43 = vcombine.high %v205_v32, %v209_v35 }
  0x30   :  { %v217_v45 = vld [vmem:[%s20884_s26 + $0x4e8] sm:$0xff]  ;;  %v224_v50 = vld [vmem:[%s20884_s26 + $0x520] sm:$0xff] }
  0x31   :  { %v221_v51 = vld [vmem:[%s20884_s26 + $0x508] sm:$0xff]  ;;  %v9754_v52 = vcombine.high %v213_v42, %v217_v45  ;;  %v232_v60 = vld [vmem:[%s20884_s26 + $0x560] sm:$0xff] }
  0x32   :  { %2464 = vmatpush1.bf16.msra.mxu0 %v9671_v28  ;;  %2587 = vmatpush1.bf16.msra.mxu1 %v9673_v29  ;;  %v9727_v28 = vcombine.low %v188_v59, %v192_v15  ;;  %v9729_v29 = vcombine.low %v189_v17, %v193_v18  ;;  %v225_v54 = vld [vmem:[%s20884_s26 + $0x528] sm:$0xff]  ;;  %v240_v5 = vld [vmem:[%s20884_s26 + $0x5a0] sm:$0xff] }
  0x33   :  { %2465 = vmatprep.subr.bf16.mxu0 %v9680_v30  ;;  %2588 = vmatprep.subr.bf16.mxu1 %v9682_v31  ;;  %v9736_v30 = vcombine.high %v196_v53, %v200_v23  ;;  %v204_v31 = vld [vmem:[%s20884_s26 + $0x480] sm:$0xff]  ;;  %v229_v61 = vld [vmem:[%s20884_s26 + $0x548] sm:$0xff]  ;;  %v9762_v62 = vcombine.high %v221_v51, %v225_v54 }
  0x34   :  { %v233_v0 = vld [vmem:[%s20884_s26 + $0x568] sm:$0xff] }
  0x35   :  { %v237_v6 = vld [vmem:[%s20884_s26 + $0x588] sm:$0xff]  ;;  %v9770_v7 = vcombine.high %v229_v61, %v233_v0 }
  0x36   :  { %2466 = vmatpush1.bf16.msra.mxu0 %v9679_v37  ;;  %2589 = vmatpush1.bf16.msra.mxu1 %v9681_v38  ;;  %v9735_v37 = vcombine.low %v196_v53, %v200_v23  ;;  %v9737_v38 = vcombine.low %v197_v26, %v201_v27  ;;  %v241_v8 = vld [vmem:[%s20884_s26 + $0x5a8] sm:$0xff] }
  0x37   :  { %2467 = vmatprep.subr.bf16.mxu0 %v9688_v39  ;;  %2590 = vmatprep.subr.bf16.mxu1 %v9690_v40  ;;  %v9744_v39 = vcombine.high %v204_v31, %v208_v63  ;;  %v212_v40 = vld [vmem:[%s20884_s26 + $0x4c0] sm:$0xff]  ;;  %v245_v59 = vld [vmem:[%s20884_s26 + $0x5c8] sm:$0xff]  ;;  %v9778_v15 = vcombine.high %v237_v6, %v241_v8 }
  0x38   :  { %v249_v17 = vld [vmem:[%s20884_s26 + $0x5e8] sm:$0xff] }
  0x39   :  { %v253_v53 = vld [vmem:[%s20884_s26 + $0x608] sm:$0xff]  ;;  %v9786_v23 = vcombine.high %v245_v59, %v249_v17  ;;  %v9785_v27 = vcombine.low %v245_v59, %v249_v17 }
  0x3a   :  { %2468 = vmatpush1.bf16.msra.mxu0 %v9687_v46  ;;  %2591 = vmatpush1.bf16.msra.mxu1 %v9689_v47  ;;  %v9743_v46 = vcombine.low %v204_v31, %v208_v63  ;;  %v9745_v47 = vcombine.low %v205_v32, %v209_v35  ;;  %v257_v24 = vld [vmem:[%s20884_s26 + $0x628] sm:$0xff] }
  0x3b   :  { %2469 = vmatprep.subr.bf16.mxu0 %v9696_v48  ;;  %2592 = vmatprep.subr.bf16.mxu1 %v9698_v49  ;;  %v9752_v48 = vcombine.high %v212_v40, %v216_v41  ;;  %v220_v49 = vld [vmem:[%s20884_s26 + $0x500] sm:$0xff]  ;;  %v261_v31 = vld [vmem:[%s20884_s26 + $0x648] sm:$0xff]  ;;  %v9794_v63 = vcombine.high %v253_v53, %v257_v24  ;;  %v9793_v35 = vcombine.low %v253_v53, %v257_v24 }
  0x3c   :  { %v265_v32 = vld [vmem:[%s20884_s26 + $0x668] sm:$0xff]  ;;  %v316_v24 = vld [vmem:[%s20884_s26 + $0x800] sm:$0xff] }
  0x3d   :  { %v305_v59 = vld [vmem:[%s20884_s26 + $0x7a8] sm:$0xff] }
  0x3e   :  { %2470 = vmatpush1.bf16.msra.mxu0 %v9695_v55  ;;  %2593 = vmatpush1.bf16.msra.mxu1 %v9697_v56  ;;  %v9751_v55 = vcombine.low %v212_v40, %v216_v41  ;;  %v9753_v56 = vcombine.low %v213_v42, %v217_v45  ;;  %v269_v40 = vld [vmem:[%s20884_s26 + $0x688] sm:$0xff]  ;;  %v9802_v41 = vcombine.high %v261_v31, %v265_v32 }
  0x3f   :  { %2471 = vmatprep.subr.bf16.mxu0 %v9704_v57  ;;  %2594 = vmatprep.subr.bf16.mxu1 %v9706_v58  ;;  %v9760_v57 = vcombine.high %v220_v49, %v224_v50  ;;  %v228_v58 = vld [vmem:[%s20884_s26 + $0x540] sm:$0xff]  ;;  %v273_v42 = vld [vmem:[%s20884_s26 + $0x6a8] sm:$0xff]  ;;  %v9801_v45 = vcombine.low %v261_v31, %v265_v32 }
  0x40   :  { %v9767_v10 = vcombine.low %v228_v58, %v232_v60  ;;  %v313_v53 = vld [vmem:[%s20884_s26 + $0x7e8] sm:$0xff] }
  0x42   :  { %2472 = vmatpush1.bf16.msra.mxu0 %v9703_v1  ;;  %2595 = vmatpush1.bf16.msra.mxu1 %v9705_v2  ;;  %v9759_v1 = vcombine.low %v220_v49, %v224_v50  ;;  %v9761_v2 = vcombine.low %v221_v51, %v225_v54  ;;  %v277_v49 = vld [vmem:[%s20884_s26 + $0x6c8] sm:$0xff]  ;;  %v9810_v50 = vcombine.high %v269_v40, %v273_v42 }
  0x43   :  { %2473 = vmatprep.subr.bf16.mxu0 %v9712_v3  ;;  %2596 = vmatprep.subr.bf16.mxu1 %v9714_v4  ;;  %v9768_v3 = vcombine.high %v228_v58, %v232_v60  ;;  %v236_v4 = vld [vmem:[%s20884_s26 + $0x580] sm:$0xff]  ;;  %v281_v51 = vld [vmem:[%s20884_s26 + $0x6e8] sm:$0xff]  ;;  %v9809_v54 = vcombine.low %v269_v40, %v273_v42 }
  0x44   :  { %v9775_v18 = vcombine.low %v236_v4, %v240_v5  ;;  %v285_v58 = vld [vmem:[%s20884_s26 + $0x708] sm:$0xff]  ;;  %v9818_v60 = vcombine.high %v277_v49, %v281_v51 }
  0x46   :  { %2474 = vmatpush1.bf16.msra.mxu0 %v9711_v11  ;;  %2597 = vmatpush1.bf16.msra.mxu1 %v9713_v12  ;;  %v9769_v11 = vcombine.low %v229_v61, %v233_v0  ;;  %v9776_v12 = vcombine.high %v236_v4, %v240_v5  ;;  %v289_v61 = vld [vmem:[%s20884_s26 + $0x728] sm:$0xff]  ;;  %v9817_v0 = vcombine.low %v277_v49, %v281_v51  ;;  %v336_v49 = vld [vmem:[%s20884_s26 + $0x8a0] sm:$0xff] }
  0x47   :  { %2475 = vmatprep.subr.bf16.mxu0 %v9720_v13  ;;  %2598 = vmatprep.subr.bf16.mxu1 %v9722_v14  ;;  %v244_v13 = vld [vmem:[%s20884_s26 + $0x5c0] sm:$0xff]  ;;  %v293_v4 = vld [vmem:[%s20884_s26 + $0x748] sm:$0xff]  ;;  %v9826_v5 = vcombine.high %v285_v58, %v289_v61 }
  0x48   :  { %v248_v14 = vld [vmem:[%s20884_s26 + $0x5e0] sm:$0xff]  ;;  %v337_v51 = vld [vmem:[%s20884_s26 + $0x8a8] sm:$0xff] }
  0x49   :  { %v9783_v26 = vcombine.low %v244_v13, %v248_v14 }
  0x4a   :  { %2476 = vmatpush1.bf16.msra.mxu0 %v9719_v19  ;;  %2599 = vmatpush1.bf16.msra.mxu1 %v9721_v20  ;;  %v9777_v19 = vcombine.low %v237_v6, %v241_v8  ;;  %v9784_v20 = vcombine.high %v244_v13, %v248_v14  ;;  %v297_v6 = vld [vmem:[%s20884_s26 + $0x768] sm:$0xff]  ;;  %v9825_v8 = vcombine.low %v285_v58, %v289_v61  ;;  %v344_v58 = vld [vmem:[%s20884_s26 + $0x8e0] sm:$0xff] }
  0x4b   :  { %2486 = vmatprep.subr.bf16.mxu0 %v9728_v21  ;;  %2609 = vmatprep.subr.bf16.mxu1 %v9730_v22  ;;  %v252_v21 = vld [vmem:[%s20884_s26 + $0x600] sm:$0xff]  ;;  %v301_v13 = vld [vmem:[%s20884_s26 + $0x788] sm:$0xff]  ;;  %v9834_v14 = vcombine.high %v293_v4, %v297_v6  ;;  %v9833_v17 = vcombine.low %v293_v4, %v297_v6 }
  0x4c   :  { %v256_v22 = vld [vmem:[%s20884_s26 + $0x620] sm:$0xff] }
  0x4d   :  { %2478 = vmatmul.mubr.bf16.vlgmr.msra.gmra.mrb[0].mxu0 %v13553_v25  ;;  %2601 = vmatmul.mubr.bf16.vlgmr.msra.gmra.mrb[0].mxu1 %v13553_v25  ;;  %v352_v4 = vld [vmem:[%s20884_s26 + $0x920] sm:$0xff] }
  0x4e   :  { %2487 = vmatpush1.bf16.msra.mxu0 %v9727_v28  ;;  %2610 = vmatpush1.bf16.msra.mxu1 %v9729_v29  ;;  %v9792_v28 = vcombine.high %v252_v21, %v256_v22  ;;  %v260_v29 = vld [vmem:[%s20884_s26 + $0x640] sm:$0xff] }
  0x4f   :  { %2488 = vmatprep.subr.bf16.mxu0 %v9736_v30  ;;  %2611 = vmatprep.subr.bf16.mxu1 %v9738_v33  ;;  %v264_v30 = vld [vmem:[%s20884_s26 + $0x660] sm:$0xff]  ;;  %v9791_v33 = vcombine.low %v252_v21, %v256_v22  ;;  %v309_v21 = vld [vmem:[%s20884_s26 + $0x7c8] sm:$0xff]  ;;  %v9842_v22 = vcombine.high %v301_v13, %v305_v59 }
  0x50   :  { %2518 = vmatprep.mubr.bf16.mxu0 %v13573_v36  ;;  %2641 = vmatprep.mubr.bf16.mxu1 %v13573_v36  ;;  %v9850_v31 = vcombine.high %v309_v21, %v313_v53 }
  0x52   :  { %2489 = vmatpush1.bf16.msra.mxu0 %v9735_v37  ;;  %2612 = vmatpush1.bf16.msra.mxu1 %v9737_v38  ;;  %v9800_v37 = vcombine.high %v260_v29, %v264_v30  ;;  %v268_v38 = vld [vmem:[%s20884_s26 + $0x680] sm:$0xff] }
  0x53   :  { %2490 = vmatprep.subr.bf16.mxu0 %v9744_v39  ;;  %2613 = vmatprep.subr.bf16.mxu1 %v9746_v43  ;;  %v272_v39 = vld [vmem:[%s20884_s26 + $0x6a0] sm:$0xff]  ;;  %v9799_v43 = vcombine.low %v260_v29, %v264_v30  ;;  %v317_v29 = vld [vmem:[%s20884_s26 + $0x808] sm:$0xff] }
  0x54   :  { %v321_v30 = vld [vmem:[%s20884_s26 + $0x828] sm:$0xff] }
  0x55   :  { %v9858_v40 = vcombine.high %v317_v29, %v321_v30 }
  0x56   :  { %2491 = vmatpush1.bf16.msra.mxu0 %v9743_v46  ;;  %2614 = vmatpush1.bf16.msra.mxu1 %v9745_v47  ;;  %v9808_v46 = vcombine.high %v268_v38, %v272_v39  ;;  %v276_v47 = vld [vmem:[%s20884_s26 + $0x6c0] sm:$0xff] }
  0x57   :  { %2492 = vmatprep.subr.bf16.mxu0 %v9752_v48  ;;  %2615 = vmatprep.subr.bf16.mxu1 %v9754_v52  ;;  %v280_v48 = vld [vmem:[%s20884_s26 + $0x6e0] sm:$0xff]  ;;  %v9807_v52 = vcombine.low %v268_v38, %v272_v39  ;;  %v325_v39 = vld [vmem:[%s20884_s26 + $0x848] sm:$0xff] }
  0x58   :  { %v328_v38 = vld [vmem:[%s20884_s26 + $0x860] sm:$0xff] }
  0x5a   :  { %2493 = vmatpush1.bf16.msra.mxu0 %v9751_v55  ;;  %2616 = vmatpush1.bf16.msra.mxu1 %v9753_v56  ;;  %v9816_v55 = vcombine.high %v276_v47, %v280_v48  ;;  %v284_v56 = vld [vmem:[%s20884_s26 + $0x700] sm:$0xff] }
  0x5b   :  { %2494 = vmatprep.subr.bf16.mxu0 %v9760_v57  ;;  %2617 = vmatprep.subr.bf16.mxu1 %v9762_v62  ;;  %v288_v57 = vld [vmem:[%s20884_s26 + $0x720] sm:$0xff]  ;;  %v9815_v62 = vcombine.low %v276_v47, %v280_v48 }
  0x5c   :  { %v332_v48 = vld [vmem:[%s20884_s26 + $0x880] sm:$0xff] }
  0x5e   :  { %2495 = vmatpush1.bf16.msra.mxu0 %v9759_v1  ;;  %2618 = vmatpush1.bf16.msra.mxu1 %v9761_v2  ;;  %v9824_v1 = vcombine.high %v284_v56, %v288_v57  ;;  %v292_v2 = vld [vmem:[%s20884_s26 + $0x740] sm:$0xff] }
  0x5f   :  { %2496 = vmatprep.subr.bf16.mxu0 %v9768_v3  ;;  %2619 = vmatprep.subr.bf16.mxu1 %v9770_v7  ;;  %v296_v3 = vld [vmem:[%s20884_s26 + $0x760] sm:$0xff]  ;;  %v9823_v7 = vcombine.low %v284_v56, %v288_v57  ;;  %v9872_v56 = vcombine.high %v332_v48, %v336_v49 }
  0x60   :  { %v340_v57 = vld [vmem:[%s20884_s26 + $0x8c0] sm:$0xff] }
  0x62   :  { %2497 = vmatpush1.bf16.msra.mxu0 %v9767_v10  ;;  %2620 = vmatpush1.bf16.msra.mxu1 %v9769_v11  ;;  %v9832_v10 = vcombine.high %v292_v2, %v296_v3  ;;  %v300_v11 = vld [vmem:[%s20884_s26 + $0x780] sm:$0xff] }
  0x63   :  { %2498 = vmatprep.subr.bf16.mxu0 %v9776_v12  ;;  %2621 = vmatprep.subr.bf16.mxu1 %v9778_v15  ;;  %v304_v12 = vld [vmem:[%s20884_s26 + $0x7a0] sm:$0xff]  ;;  %v9831_v15 = vcombine.low %v292_v2, %v296_v3  ;;  %v9880_v2 = vcombine.high %v340_v57, %v344_v58 }
  0x64   :  { %v348_v3 = vld [vmem:[%s20884_s26 + $0x900] sm:$0xff] }
  0x66   :  { %2499 = vmatpush1.bf16.msra.mxu0 %v9775_v18  ;;  %2622 = vmatpush1.bf16.msra.mxu1 %v9777_v19  ;;  %v9840_v18 = vcombine.high %v300_v11, %v304_v12  ;;  %v308_v19 = vld [vmem:[%s20884_s26 + $0x7c0] sm:$0xff] }
  0x67   :  { %2500 = vmatprep.subr.bf16.mxu0 %v9784_v20  ;;  %2623 = vmatprep.subr.bf16.mxu1 %v9786_v23  ;;  %v312_v20 = vld [vmem:[%s20884_s26 + $0x7e0] sm:$0xff]  ;;  %v9839_v23 = vcombine.low %v300_v11, %v304_v12  ;;  %v9888_v11 = vcombine.high %v348_v3, %v352_v4 }
  0x68   :  { %v9847_v32 = vcombine.low %v308_v19, %v312_v20  ;;  %v356_v12 = vld [vmem:[%s20884_s26 + $0x940] sm:$0xff] }
  0x6a   :  { %2501 = vmatpush1.bf16.msra.mxu0 %v9783_v26  ;;  %2624 = vmatpush1.bf16.msra.mxu1 %v9785_v27  ;;  %v9841_v26 = vcombine.low %v301_v13, %v305_v59  ;;  %v9848_v27 = vcombine.high %v308_v19, %v312_v20  ;;  %v360_v13 = vld [vmem:[%s20884_s26 + $0x960] sm:$0xff] }
  0x6b   :  { %2502 = vmatprep.subr.bf16.mxu0 %v9792_v28  ;;  %2625 = vmatprep.subr.bf16.mxu1 %v9794_v63  ;;  %v320_v28 = vld [vmem:[%s20884_s26 + $0x820] sm:$0xff]  ;;  %v13750_v63 = vld.sshfl [vmem:[%s20885_s27 + $0x8] sm:$0x33 pattern:$0x76325410]  ;;  %v9896_v19 = vcombine.high %v356_v12, %v360_v13 }
  0x6c   :  { %v470_v42 = vcombine.high %v13750_v63, %v13750_v63  ;;  %v364_v20 = vld [vmem:[%s20884_s26 + $0x980] sm:$0xff] }
  0x6e   :  { %2503 = vmatpush1.bf16.msra.mxu0 %v9791_v33  ;;  %2626 = vmatpush1.bf16.msra.mxu1 %v9793_v35  ;;  %v9849_v33 = vcombine.low %v309_v21, %v313_v53  ;;  %v9856_v35 = vcombine.high %v316_v24, %v320_v28  ;;  %v368_v21 = vld [vmem:[%s20884_s26 + $0x9a0] sm:$0xff] }
  0x6f   :  { %2504 = vmatprep.subr.bf16.mxu0 %v9800_v37  ;;  %2627 = vmatprep.subr.bf16.mxu1 %v9802_v41  ;;  %v324_v37 = vld [vmem:[%s20884_s26 + $0x840] sm:$0xff]  ;;  %v329_v41 = vld [vmem:[%s20884_s26 + $0x868] sm:$0xff] }
  0x70   :  { %v9864_v47 = vcombine.high %v324_v37, %v328_v38 }
  0x72   :  { %2505 = vmatpush1.bf16.msra.mxu0 %v9799_v43  ;;  %2628 = vmatpush1.bf16.msra.mxu1 %v9801_v45  ;;  %v13768_v43 = vpack.c.bf16 %v13535_v16, %v13535_v16  ;;  %v9855_v45 = vcombine.low %v316_v24, %v320_v28  ;;  %v9866_v16 = vcombine.high %v325_v39, %v329_v41  ;;  %v372_v28 = vld [vmem:[%s20884_s26 + $0x9c0] sm:$0xff] }
  0x73   :  { %2506 = vmatprep.subr.bf16.mxu0 %v9808_v46  ;;  %2629 = vmatprep.subr.bf16.mxu1 %v9810_v50  ;;  %v9857_v46 = vcombine.low %v317_v29, %v321_v30  ;;  %v333_v50 = vld [vmem:[%s20884_s26 + $0x888] sm:$0xff]  ;;  %v9895_v24 = vcombine.low %v356_v12, %v360_v13  ;;  %v376_v29 = vld [vmem:[%s20884_s26 + $0x9e0] sm:$0xff] }
  0x74   :  { %v9874_v61 = vcombine.high %v333_v50, %v337_v51  ;;  %v373_v30 = vld [vmem:[%s20884_s26 + $0x9c8] sm:$0xff]  ;;  %v412_v12 = vld [vmem:[%s20884_s26 + $0xb00] sm:$0xff] }
  0x75   :  { %v416_v13 = vld [vmem:[%s20884_s26 + $0xb20] sm:$0xff] }
  0x76   :  { %2507 = vmatpush1.bf16.msra.mxu0 %v9807_v52  ;;  %2630 = vmatpush1.bf16.msra.mxu1 %v9809_v54  ;;  %v13782_v52 = vpack.c.bf16 %v470_v42, %v470_v42  ;;  %v9863_v54 = vcombine.low %v324_v37, %v328_v38  ;;  %v9912_v37 = vcombine.high %v372_v28, %v376_v29  ;;  %v380_v38 = vld [vmem:[%s20884_s26 + $0xa00] sm:$0xff]  ;;  %v385_v42 = vld [vmem:[%s20884_s26 + $0xa28] sm:$0xff] }
  0x77   :  { %2508 = vmatprep.subr.bf16.mxu0 %v9816_v55  ;;  %2631 = vmatprep.subr.bf16.mxu1 %v9818_v60  ;;  %v9865_v55 = vcombine.low %v325_v39, %v329_v41  ;;  %v341_v60 = vld [vmem:[%s20884_s26 + $0x8c8] sm:$0xff]  ;;  %v384_v39 = vld [vmem:[%s20884_s26 + $0xa20] sm:$0xff] }
  0x7a   :  { %2509 = vmatpush1.bf16.msra.mxu0 %v9815_v62  ;;  %2632 = vmatpush1.bf16.msra.mxu1 %v9817_v0  ;;  %v345_v62 = vld [vmem:[%s20884_s26 + $0x8e8] sm:$0xff]  ;;  %v9871_v0 = vcombine.low %v332_v48, %v336_v49  ;;  %v388_v48 = vld [vmem:[%s20884_s26 + $0xa40] sm:$0xff] }
  0x7b   :  { %2510 = vmatprep.subr.bf16.mxu0 %v9824_v1  ;;  %2633 = vmatprep.subr.bf16.mxu1 %v9826_v5  ;;  %v9873_v1 = vcombine.low %v333_v50, %v337_v51  ;;  %v349_v5 = vld [vmem:[%s20884_s26 + $0x908] sm:$0xff]  ;;  %v9882_v6 = vcombine.high %v341_v60, %v345_v62  ;;  %v392_v49 = vld [vmem:[%s20884_s26 + $0xa60] sm:$0xff] }
  0x7c   :  { %v389_v50 = vld [vmem:[%s20884_s26 + $0xa48] sm:$0xff] }
  0x7d   :  { %v393_v51 = vld [vmem:[%s20884_s26 + $0xa68] sm:$0xff] }
  0x7e   :  { %2511 = vmatpush1.bf16.msra.mxu0 %v9823_v7  ;;  %2634 = vmatpush1.bf16.msra.mxu1 %v9825_v8  ;;  %v353_v7 = vld [vmem:[%s20884_s26 + $0x928] sm:$0xff]  ;;  %v9879_v8 = vcombine.low %v340_v57, %v344_v58  ;;  %v396_v57 = vld [vmem:[%s20884_s26 + $0xa80] sm:$0xff] }
  0x7f   :  { %2512 = vmatprep.subr.bf16.mxu0 %v9832_v10  ;;  %2635 = vmatprep.subr.bf16.mxu1 %v9834_v14  ;;  %v9881_v10 = vcombine.low %v341_v60, %v345_v62  ;;  %v357_v14 = vld [vmem:[%s20884_s26 + $0x948] sm:$0xff]  ;;  %v9890_v59 = vcombine.high %v349_v5, %v353_v7  ;;  %v400_v58 = vld [vmem:[%s20884_s26 + $0xaa0] sm:$0xff] }
  0x80   :  { %v397_v60 = vld [vmem:[%s20884_s26 + $0xa88] sm:$0xff] }
  0x81   :  { %v401_v62 = vld [vmem:[%s20884_s26 + $0xaa8] sm:$0xff] }
  0x82   :  { %2513 = vmatpush1.bf16.msra.mxu0 %v9831_v15  ;;  %2636 = vmatpush1.bf16.msra.mxu1 %v9833_v17  ;;  %v361_v15 = vld [vmem:[%s20884_s26 + $0x968] sm:$0xff]  ;;  %v9887_v17 = vcombine.low %v348_v3, %v352_v4  ;;  %v404_v3 = vld [vmem:[%s20884_s26 + $0xac0] sm:$0xff] }
  0x83   :  { %2514 = vmatprep.subr.bf16.mxu0 %v9840_v18  ;;  %2637 = vmatprep.subr.bf16.mxu1 %v9842_v22  ;;  %v9889_v18 = vcombine.low %v349_v5, %v353_v7  ;;  %v365_v22 = vld [vmem:[%s20884_s26 + $0x988] sm:$0xff]  ;;  %v9898_v53 = vcombine.high %v357_v14, %v361_v15  ;;  %v408_v4 = vld [vmem:[%s20884_s26 + $0xae0] sm:$0xff] }
  0x84   :  { %v405_v5 = vld [vmem:[%s20884_s26 + $0xac8] sm:$0xff] }
  0x85   :  { %v409_v7 = vld [vmem:[%s20884_s26 + $0xae8] sm:$0xff] }
  0x86   :  { %2515 = vmatpush1.bf16.msra.mxu0 %v9839_v23  ;;  %2638 = vmatpush1.bf16.msra.mxu1 %v9841_v26  ;;  %v369_v23 = vld [vmem:[%s20884_s26 + $0x9a8] sm:$0xff]  ;;  %v9897_v26 = vcombine.low %v357_v14, %v361_v15 }
  0x87   :  { %2516 = vmatprep.subr.bf16.mxu0 %v9848_v27  ;;  %2639 = vmatprep.subr.bf16.mxu1 %v9850_v31  ;;  %v9904_v27 = vcombine.high %v364_v20, %v368_v21  ;;  %v9906_v31 = vcombine.high %v365_v22, %v369_v23  ;;  %v413_v14 = vld [vmem:[%s20884_s26 + $0xb08] sm:$0xff] }
  0x88   :  { %v417_v15 = vld [vmem:[%s20884_s26 + $0xb28] sm:$0xff] }
  0x8a   :  { %2517 = vmatpush1.bf16.msra.mxu0 %v9847_v32  ;;  %2640 = vmatpush1.bf16.msra.mxu1 %v9849_v33  ;;  %v377_v32 = vld [vmem:[%s20884_s26 + $0x9e8] sm:$0xff]  ;;  %v9903_v33 = vcombine.low %v364_v20, %v368_v21  ;;  %v420_v20 = vld [vmem:[%s20884_s26 + $0xb40] sm:$0xff] }
  0x8b   :  { %2527 = vmatprep.subr.bf16.mxu0 %v9856_v35  ;;  %2650 = vmatprep.subr.bf16.mxu1 %v9858_v40  ;;  %v9905_v35 = vcombine.low %v365_v22, %v369_v23  ;;  %v381_v40 = vld [vmem:[%s20884_s26 + $0xa08] sm:$0xff]  ;;  %v9914_v41 = vcombine.high %v373_v30, %v377_v32  ;;  %v424_v21 = vld [vmem:[%s20884_s26 + $0xb60] sm:$0xff] }
  0x8c   :  { %v421_v22 = vld [vmem:[%s20884_s26 + $0xb48] sm:$0xff] }
  0x8d   :  { %2519 = vmatmul.mubr.bf16.vlgmr.msra.gmra.mrb[0].mxu0 %v13768_v43  ;;  %2642 = vmatmul.mubr.bf16.vlgmr.msra.gmra.mrb[0].mxu1 %v13768_v43  ;;  %v425_v23 = vld [vmem:[%s20884_s26 + $0xb68] sm:$0xff] }
  0x8e   :  { %2528 = vmatpush1.bf16.msra.mxu0 %v9855_v45  ;;  %2651 = vmatpush1.bf16.msra.mxu1 %v9857_v46  ;;  %v9911_v45 = vcombine.low %v372_v28, %v376_v29  ;;  %v9913_v46 = vcombine.low %v373_v30, %v377_v32  ;;  %v428_v28 = vld [vmem:[%s20884_s26 + $0xb80] sm:$0xff]  ;;  %v429_v30 = vld [vmem:[%s20884_s26 + $0xb88] sm:$0xff] }
  0x8f   :  { %2529 = vmatprep.subr.bf16.mxu0 %v9864_v47  ;;  %2652 = vmatprep.subr.bf16.mxu1 %v9866_v16  ;;  %v9920_v47 = vcombine.high %v380_v38, %v384_v39  ;;  %v9922_v16 = vcombine.high %v381_v40, %v385_v42  ;;  %v432_v29 = vld [vmem:[%s20884_s26 + $0xba0] sm:$0xff]  ;;  %v433_v32 = vld [vmem:[%s20884_s26 + $0xba8] sm:$0xff] }
  0x90   :  { %2559 = vmatprep.mubr.bf16.mxu0 %v13782_v52  ;;  %2682 = vmatprep.mubr.bf16.mxu1 %v13782_v52 }
  0x92   :  { %2530 = vmatpush1.bf16.msra.mxu0 %v9863_v54  ;;  %2653 = vmatpush1.bf16.msra.mxu1 %v9865_v55  ;;  %v9919_v54 = vcombine.low %v380_v38, %v384_v39  ;;  %v9921_v55 = vcombine.low %v381_v40, %v385_v42  ;;  %v436_v38 = vld [vmem:[%s20884_s26 + $0xbc0] sm:$0xff]  ;;  %v437_v40 = vld [vmem:[%s20884_s26 + $0xbc8] sm:$0xff] }
  0x93   :  { %2531 = vmatprep.subr.bf16.mxu0 %v9872_v56  ;;  %2654 = vmatprep.subr.bf16.mxu1 %v9874_v61  ;;  %v9928_v56 = vcombine.high %v388_v48, %v392_v49  ;;  %v9930_v61 = vcombine.high %v389_v50, %v393_v51  ;;  %v440_v39 = vld [vmem:[%s20884_s26 + $0xbe0] sm:$0xff]  ;;  %v441_v42 = vld [vmem:[%s20884_s26 + $0xbe8] sm:$0xff] }
  0x96   :  { %2532 = vmatpush1.bf16.msra.mxu0 %v9871_v0  ;;  %2655 = vmatpush1.bf16.msra.mxu1 %v9873_v1  ;;  %v9927_v0 = vcombine.low %v388_v48, %v392_v49  ;;  %v9929_v1 = vcombine.low %v389_v50, %v393_v51  ;;  %v62_v48 = vld [vmem:[%s20884_s26 + $0x10] sm:$0xff]  ;;  %v63_v50 = vld [vmem:[%s20884_s26 + $0x18] sm:$0xff] }
  0x97   :  { %2533 = vmatprep.subr.bf16.mxu0 %v9880_v2  ;;  %2656 = vmatprep.subr.bf16.mxu1 %v9882_v6  ;;  %v9936_v2 = vcombine.high %v396_v57, %v400_v58  ;;  %v9938_v6 = vcombine.high %v397_v60, %v401_v62  ;;  %v66_v49 = vld [vmem:[%s20884_s26 + $0x30] sm:$0xff]  ;;  %v67_v51 = vld [vmem:[%s20884_s26 + $0x38] sm:$0xff] }
  0x9a   :  { %2534 = vmatpush1.bf16.msra.mxu0 %v9879_v8  ;;  %2657 = vmatpush1.bf16.msra.mxu1 %v9881_v10  ;;  %v9935_v8 = vcombine.low %v396_v57, %v400_v58  ;;  %v9937_v10 = vcombine.low %v397_v60, %v401_v62  ;;  %v70_v57 = vld [vmem:[%s20884_s26 + $0x50] sm:$0xff]  ;;  %v71_v60 = vld [vmem:[%s20884_s26 + $0x58] sm:$0xff] }
  0x9b   :  { %2535 = vmatprep.subr.bf16.mxu0 %v9888_v11  ;;  %2658 = vmatprep.subr.bf16.mxu1 %v9890_v59  ;;  %v9944_v11 = vcombine.high %v404_v3, %v408_v4  ;;  %v9946_v59 = vcombine.high %v405_v5, %v409_v7  ;;  %v74_v58 = vld [vmem:[%s20884_s26 + $0x70] sm:$0xff]  ;;  %v75_v62 = vld [vmem:[%s20884_s26 + $0x78] sm:$0xff] }
  0x9e   :  { %2536 = vmatpush1.bf16.msra.mxu0 %v9887_v17  ;;  %2659 = vmatpush1.bf16.msra.mxu1 %v9889_v18  ;;  %v9943_v17 = vcombine.low %v404_v3, %v408_v4  ;;  %v9945_v18 = vcombine.low %v405_v5, %v409_v7  ;;  %v9612_v3 = vcombine.high %v70_v57, %v74_v58  ;;  %v78_v4 = vld [vmem:[%s20884_s26 + $0x90] sm:$0xff]  ;;  %v83_v7 = vld [vmem:[%s20884_s26 + $0xb8] sm:$0xff] }
  0x9f   :  { %2537 = vmatprep.subr.bf16.mxu0 %v9896_v19  ;;  %2660 = vmatprep.subr.bf16.mxu1 %v9898_v53  ;;  %v9952_v19 = vcombine.high %v412_v12, %v416_v13  ;;  %v9954_v53 = vcombine.high %v413_v14, %v417_v15  ;;  %v82_v5 = vld [vmem:[%s20884_s26 + $0xb0] sm:$0xff] }
  0xa2   :  { %2538 = vmatpush1.bf16.msra.mxu0 %v9895_v24  ;;  %2661 = vmatpush1.bf16.msra.mxu1 %v9897_v26  ;;  %v9951_v24 = vcombine.low %v412_v12, %v416_v13  ;;  %v9953_v26 = vcombine.low %v413_v14, %v417_v15  ;;  %v86_v12 = vld [vmem:[%s20884_s26 + $0xd0] sm:$0xff]  ;;  %v87_v14 = vld [vmem:[%s20884_s26 + $0xd8] sm:$0xff] }
  0xa3   :  { %2539 = vmatprep.subr.bf16.mxu0 %v9904_v27  ;;  %2662 = vmatprep.subr.bf16.mxu1 %v9906_v31  ;;  %v9960_v27 = vcombine.high %v420_v20, %v424_v21  ;;  %v9962_v31 = vcombine.high %v421_v22, %v425_v23  ;;  %v90_v13 = vld [vmem:[%s20884_s26 + $0xf0] sm:$0xff]  ;;  %v91_v15 = vld [vmem:[%s20884_s26 + $0xf8] sm:$0xff] }
  0xa6   :  { %2540 = vmatpush1.bf16.msra.mxu0 %v9903_v33  ;;  %2663 = vmatpush1.bf16.msra.mxu1 %v9905_v35  ;;  %v9959_v33 = vcombine.low %v420_v20, %v424_v21  ;;  %v9961_v35 = vcombine.low %v421_v22, %v425_v23  ;;  %v94_v20 = vld [vmem:[%s20884_s26 + $0x110] sm:$0xff]  ;;  %v95_v22 = vld [vmem:[%s20884_s26 + $0x118] sm:$0xff]  ;;  %v9627_v23 = vcombine.low %v86_v12, %v90_v13 }
  0xa7   :  { %2541 = vmatprep.subr.bf16.mxu0 %v9912_v37  ;;  %2664 = vmatprep.subr.bf16.mxu1 %v9914_v41  ;;  %v9968_v37 = vcombine.high %v428_v28, %v432_v29  ;;  %v9970_v41 = vcombine.high %v429_v30, %v433_v32  ;;  %v98_v21 = vld [vmem:[%s20884_s26 + $0x130] sm:$0xff] }
  0xaa   :  { %2542 = vmatpush1.bf16.msra.mxu0 %v9911_v45  ;;  %2665 = vmatpush1.bf16.msra.mxu1 %v9913_v46  ;;  %v9967_v45 = vcombine.low %v428_v28, %v432_v29  ;;  %v9969_v46 = vcombine.low %v429_v30, %v433_v32  ;;  %v106_v28 = vld [vmem:[%s20884_s26 + $0x170] sm:$0xff]  ;;  %v103_v29 = vld [vmem:[%s20884_s26 + $0x158] sm:$0xff]  ;;  %v9635_v32 = vcombine.low %v94_v20, %v98_v21 }
  0xab   :  { %2543 = vmatprep.subr.bf16.mxu0 %v9920_v47  ;;  %2666 = vmatprep.subr.bf16.mxu1 %v9922_v16  ;;  %v9976_v47 = vcombine.high %v436_v38, %v440_v39  ;;  %v9978_v16 = vcombine.high %v437_v40, %v441_v42 }
  0xae   :  { %2544 = vmatpush1.bf16.msra.mxu0 %v9919_v54  ;;  %2667 = vmatpush1.bf16.msra.mxu1 %v9921_v55  ;;  %v9975_v54 = vcombine.low %v436_v38, %v440_v39  ;;  %v9977_v55 = vcombine.low %v437_v40, %v441_v42  ;;  %v114_v38 = vld [vmem:[%s20884_s26 + $0x1b0] sm:$0xff]  ;;  %v111_v39 = vld [vmem:[%s20884_s26 + $0x198] sm:$0xff] }
  0xaf   :  { %2545 = vmatprep.subr.bf16.mxu0 %v9928_v56  ;;  %2668 = vmatprep.subr.bf16.mxu1 %v9930_v61  ;;  %v9604_v56 = vcombine.high %v62_v48, %v66_v49  ;;  %v9606_v61 = vcombine.high %v63_v50, %v67_v51 }
  0xb2   :  { %2546 = vmatpush1.bf16.msra.mxu0 %v9927_v0  ;;  %2669 = vmatpush1.bf16.msra.mxu1 %v9929_v1  ;;  %v13970_v0 = vpack.c.bf16 %v13750_v63, %v13750_v63  ;;  %v9603_v1 = vcombine.low %v62_v48, %v66_v49  ;;  %v9614_v63 = vcombine.high %v71_v60, %v75_v62  ;;  %v122_v48 = vld [vmem:[%s20884_s26 + $0x1f0] sm:$0xff]  ;;  %v119_v49 = vld [vmem:[%s20884_s26 + $0x1d8] sm:$0xff] }
  0xb3   :  { %2547 = vmatprep.subr.bf16.mxu0 %v9936_v2  ;;  %2670 = vmatprep.subr.bf16.mxu1 %v9938_v6  ;;  %v9605_v2 = vcombine.low %v63_v50, %v67_v51  ;;  %v79_v6 = vld [vmem:[%s20884_s26 + $0x98] sm:$0xff] }
  0xb6   :  { %2548 = vmatpush1.bf16.msra.mxu0 %v9935_v8  ;;  %2671 = vmatpush1.bf16.msra.mxu1 %v9937_v10  ;;  %v9611_v8 = vcombine.low %v70_v57, %v74_v58  ;;  %v9613_v10 = vcombine.low %v71_v60, %v75_v62  ;;  %v130_v57 = vld [vmem:[%s20884_s26 + $0x230] sm:$0xff]  ;;  %v127_v58 = vld [vmem:[%s20884_s26 + $0x218] sm:$0xff] }
  0xb7   :  { %2549 = vmatprep.subr.bf16.mxu0 %v9944_v11  ;;  %2672 = vmatprep.subr.bf16.mxu1 %v9946_v59  ;;  %v9620_v11 = vcombine.high %v78_v4, %v82_v5  ;;  %v9622_v59 = vcombine.high %v79_v6, %v83_v7 }
  0xba   :  { %2550 = vmatpush1.bf16.msra.mxu0 %v9943_v17  ;;  %2673 = vmatpush1.bf16.msra.mxu1 %v9945_v18  ;;  %v9619_v17 = vcombine.low %v78_v4, %v82_v5  ;;  %v9621_v18 = vcombine.low %v79_v6, %v83_v7  ;;  %v138_v4 = vld [vmem:[%s20884_s26 + $0x270] sm:$0xff]  ;;  %v135_v5 = vld [vmem:[%s20884_s26 + $0x258] sm:$0xff] }
  0xbb   :  { %2551 = vmatprep.subr.bf16.mxu0 %v9952_v19  ;;  %2674 = vmatprep.subr.bf16.mxu1 %v9954_v53  ;;  %v9628_v19 = vcombine.high %v86_v12, %v90_v13  ;;  %v99_v53 = vld [vmem:[%s20884_s26 + $0x138] sm:$0xff]  ;;  %v146_v12 = vld [vmem:[%s20884_s26 + $0x2b0] sm:$0xff] }
  0xbc   :  { %v9638_v30 = vcombine.high %v95_v22, %v99_v53  ;;  %v143_v13 = vld [vmem:[%s20884_s26 + $0x298] sm:$0xff] }
  0xbe   :  { %2552 = vmatpush1.bf16.msra.mxu0 %v9951_v24  ;;  %2675 = vmatpush1.bf16.msra.mxu1 %v9953_v26  ;;  %v9629_v24 = vcombine.low %v87_v14, %v91_v15  ;;  %v9636_v26 = vcombine.high %v94_v20, %v98_v21  ;;  %v154_v20 = vld [vmem:[%s20884_s26 + $0x2f0] sm:$0xff]  ;;  %v151_v21 = vld [vmem:[%s20884_s26 + $0x2d8] sm:$0xff] }
  0xbf   :  { %2553 = vmatprep.subr.bf16.mxu0 %v9960_v27  ;;  %2676 = vmatprep.subr.bf16.mxu1 %v9962_v31  ;;  %v102_v27 = vld [vmem:[%s20884_s26 + $0x150] sm:$0xff]  ;;  %v107_v31 = vld [vmem:[%s20884_s26 + $0x178] sm:$0xff] }
  0xc0   :  { %v9646_v40 = vcombine.high %v103_v29, %v107_v31  ;;  %v9643_v42 = vcombine.low %v102_v27, %v106_v28 }
  0xc2   :  { %2554 = vmatpush1.bf16.msra.mxu0 %v9959_v33  ;;  %2677 = vmatpush1.bf16.msra.mxu1 %v9961_v35  ;;  %v9637_v33 = vcombine.low %v95_v22, %v99_v53  ;;  %v9644_v35 = vcombine.high %v102_v27, %v106_v28  ;;  %v162_v27 = vld [vmem:[%s20884_s26 + $0x330] sm:$0xff]  ;;  %v159_v28 = vld [vmem:[%s20884_s26 + $0x318] sm:$0xff] }
  0xc3   :  { %2555 = vmatprep.subr.bf16.mxu0 %v9968_v37  ;;  %2678 = vmatprep.subr.bf16.mxu1 %v9970_v41  ;;  %v110_v37 = vld [vmem:[%s20884_s26 + $0x190] sm:$0xff]  ;;  %v115_v41 = vld [vmem:[%s20884_s26 + $0x1b8] sm:$0xff] }
  0xc4   :  { %v9654_v50 = vcombine.high %v111_v39, %v115_v41  ;;  %v9651_v51 = vcombine.low %v110_v37, %v114_v38 }
  0xc6   :  { %2556 = vmatpush1.bf16.msra.mxu0 %v9967_v45  ;;  %2679 = vmatpush1.bf16.msra.mxu1 %v9969_v46  ;;  %v9645_v45 = vcombine.low %v103_v29, %v107_v31  ;;  %v9652_v46 = vcombine.high %v110_v37, %v114_v38  ;;  %v170_v37 = vld [vmem:[%s20884_s26 + $0x370] sm:$0xff]  ;;  %v167_v38 = vld [vmem:[%s20884_s26 + $0x358] sm:$0xff] }
  0xc7   :  { %2557 = vmatprep.subr.bf16.mxu0 %v9976_v47  ;;  %2680 = vmatprep.subr.bf16.mxu1 %v9978_v16  ;;  %v118_v47 = vld [vmem:[%s20884_s26 + $0x1d0] sm:$0xff]  ;;  %v123_v16 = vld [vmem:[%s20884_s26 + $0x1f8] sm:$0xff] }
  0xc8   :  { %v9662_v60 = vcombine.high %v119_v49, %v123_v16  ;;  %v9659_v62 = vcombine.low %v118_v47, %v122_v48 }
  0xca   :  { %2558 = vmatpush1.bf16.msra.mxu0 %v9975_v54  ;;  %2681 = vmatpush1.bf16.msra.mxu1 %v9977_v55  ;;  %v9653_v54 = vcombine.low %v111_v39, %v115_v41  ;;  %v9660_v55 = vcombine.high %v118_v47, %v122_v48 }
  0xcb   :  { %2691 = vmatprep.subr.bf16.mxu0 %v9604_v56  ;;  %2814 = vmatprep.subr.bf16.mxu1 %v9606_v61  ;;  %v126_v56 = vld [vmem:[%s20884_s26 + $0x210] sm:$0xff]  ;;  %v131_v61 = vld [vmem:[%s20884_s26 + $0x238] sm:$0xff] }
  0xcc   :  { %v9670_v6 = vcombine.high %v127_v58, %v131_v61  ;;  %v9667_v7 = vcombine.low %v126_v56, %v130_v57 }
  0xcd   :  { %2560 = vmatmul.mubr.bf16.vlgmr.msra.gmra.mrb[0].mxu0 %v13970_v0  ;;  %2683 = vmatmul.mubr.bf16.vlgmr.msra.gmra.mrb[0].mxu1 %v13970_v0 }
  0xce   :  { %2692 = vmatpush1.bf16.msra.mxu0 %v9603_v1  ;;  %2815 = vmatpush1.bf16.msra.mxu1 %v9605_v2  ;;  %v9661_v1 = vcombine.low %v119_v49, %v123_v16  ;;  %v9668_v2 = vcombine.high %v126_v56, %v130_v57 }
  0xcf   :  { %2693 = vmatprep.subr.bf16.mxu0 %v9612_v3  ;;  %2816 = vmatprep.subr.bf16.mxu1 %v9614_v63  ;;  %v134_v3 = vld [vmem:[%s20884_s26 + $0x250] sm:$0xff]  ;;  %v139_v63 = vld [vmem:[%s20884_s26 + $0x278] sm:$0xff] }
  0xd0   :  { %2723 = vmatprep.mubr.bf16.mxu0 %v13432_v9  ;;  %2846 = vmatprep.mubr.bf16.mxu1 %v13432_v9  ;;  %v9630_v9 = vcombine.high %v87_v14, %v91_v15  ;;  %v9678_v14 = vcombine.high %v135_v5, %v139_v63  ;;  %v9675_v15 = vcombine.low %v134_v3, %v138_v4 }
  0xd2   :  { %2694 = vmatpush1.bf16.msra.mxu0 %v9611_v8  ;;  %2817 = vmatpush1.bf16.msra.mxu1 %v9613_v10  ;;  %v9669_v8 = vcombine.low %v127_v58, %v131_v61  ;;  %v9676_v10 = vcombine.high %v134_v3, %v138_v4 }
  0xd3   :  { %2695 = vmatprep.subr.bf16.mxu0 %v9620_v11  ;;  %2818 = vmatprep.subr.bf16.mxu1 %v9622_v59  ;;  %v142_v11 = vld [vmem:[%s20884_s26 + $0x290] sm:$0xff]  ;;  %v147_v59 = vld [vmem:[%s20884_s26 + $0x2b8] sm:$0xff] }
  0xd4   :  { %v9686_v22 = vcombine.high %v143_v13, %v147_v59  ;;  %v9683_v53 = vcombine.low %v142_v11, %v146_v12 }
  0xd6   :  { %2696 = vmatpush1.bf16.msra.mxu0 %v9619_v17  ;;  %2819 = vmatpush1.bf16.msra.mxu1 %v9621_v18  ;;  %v9677_v17 = vcombine.low %v135_v5, %v139_v63  ;;  %v9684_v18 = vcombine.high %v142_v11, %v146_v12 }
  0xd7   :  { %2697 = vmatprep.subr.bf16.mxu0 %v9628_v19  ;;  %2820 = vmatprep.subr.bf16.mxu1 %v9630_v9  ;;  %v150_v19 = vld [vmem:[%s20884_s26 + $0x2d0] sm:$0xff]  ;;  %v155_v9 = vld [vmem:[%s20884_s26 + $0x2f8] sm:$0xff] }
  0xd8   :  { %v9694_v29 = vcombine.high %v151_v21, %v155_v9  ;;  %v9691_v31 = vcombine.low %v150_v19, %v154_v20 }
  0xda   :  { %2698 = vmatpush1.bf16.msra.mxu0 %v9627_v23  ;;  %2821 = vmatpush1.bf16.msra.mxu1 %v9629_v24  ;;  %v9685_v23 = vcombine.low %v143_v13, %v147_v59  ;;  %v9692_v24 = vcombine.high %v150_v19, %v154_v20 }
  0xdb   :  { %2699 = vmatprep.subr.bf16.mxu0 %v9636_v26  ;;  %2822 = vmatprep.subr.bf16.mxu1 %v9638_v30  ;;  %v158_v26 = vld [vmem:[%s20884_s26 + $0x310] sm:$0xff]  ;;  %v163_v30 = vld [vmem:[%s20884_s26 + $0x338] sm:$0xff] }
  0xdc   :  { %v9702_v39 = vcombine.high %v159_v28, %v163_v30  ;;  %v9699_v41 = vcombine.low %v158_v26, %v162_v27 }
  0xde   :  { %2700 = vmatpush1.bf16.msra.mxu0 %v9635_v32  ;;  %2823 = vmatpush1.bf16.msra.mxu1 %v9637_v33  ;;  %v9693_v32 = vcombine.low %v151_v21, %v155_v9  ;;  %v9700_v33 = vcombine.high %v158_v26, %v162_v27 }
  0xdf   :  { %2701 = vmatprep.subr.bf16.mxu0 %v9644_v35  ;;  %2824 = vmatprep.subr.bf16.mxu1 %v9646_v40  ;;  %v166_v35 = vld [vmem:[%s20884_s26 + $0x350] sm:$0xff]  ;;  %v171_v40 = vld [vmem:[%s20884_s26 + $0x378] sm:$0xff] }
  0xe2   :  { %2702 = vmatpush1.bf16.msra.mxu0 %v9643_v42  ;;  %2825 = vmatpush1.bf16.msra.mxu1 %v9645_v45 }
  0xe3   :  { %2703 = vmatprep.subr.bf16.mxu0 %v9652_v46  ;;  %2826 = vmatprep.subr.bf16.mxu1 %v9654_v50 }
  0xe6   :  { %2704 = vmatpush1.bf16.msra.mxu0 %v9651_v51  ;;  %2827 = vmatpush1.bf16.msra.mxu1 %v9653_v54 }
  0xe7   :  { %2705 = vmatprep.subr.bf16.mxu0 %v9660_v55  ;;  %2828 = vmatprep.subr.bf16.mxu1 %v9662_v60 }
  0xea   :  { %2706 = vmatpush1.bf16.msra.mxu0 %v9659_v62  ;;  %2829 = vmatpush1.bf16.msra.mxu1 %v9661_v1 }
  0xeb   :  { %2707 = vmatprep.subr.bf16.mxu0 %v9668_v2  ;;  %2830 = vmatprep.subr.bf16.mxu1 %v9670_v6 }
  0xee   :  { %2708 = vmatpush1.bf16.msra.mxu0 %v9667_v7  ;;  %2831 = vmatpush1.bf16.msra.mxu1 %v9669_v8 }
  0xef   :  { %2709 = vmatprep.subr.bf16.mxu0 %v9676_v10  ;;  %2832 = vmatprep.subr.bf16.mxu1 %v9678_v14 }
  0xf2   :  { %2710 = vmatpush1.bf16.msra.mxu0 %v9675_v15  ;;  %2833 = vmatpush1.bf16.msra.mxu1 %v9677_v17 }
  0xf3   :  { %2711 = vmatprep.subr.bf16.mxu0 %v9684_v18  ;;  %2834 = vmatprep.subr.bf16.mxu1 %v9686_v22 }
  0xf6   :  { %2712 = vmatpush1.bf16.msra.mxu0 %v9683_v53  ;;  %2835 = vmatpush1.bf16.msra.mxu1 %v9685_v23 }
  0xf7   :  { %2713 = vmatprep.subr.bf16.mxu0 %v9692_v24  ;;  %2836 = vmatprep.subr.bf16.mxu1 %v9694_v29 }
  0xfa   :  { %2714 = vmatpush1.bf16.msra.mxu0 %v9691_v31 }
  0xfb   :  { %22 = vsyncpa [#allocation3], 0  ;;  %2837 = vmatpush1.bf16.msra.mxu1 %v9693_v32  ;;  %2715 = vmatprep.subr.bf16.mxu0 %v9700_v33  ;;  %v9701_v42 = vcombine.low %v159_v28, %v163_v30  ;;  %v9708_v45 = vcombine.high %v166_v35, %v170_v37  ;;  %v9710_v46 = vcombine.high %v167_v38, %v171_v40  ;;  %v174_v47 = vld [vmem:[%s20884_s26 + $0x390] sm:$0xff]  ;;  %v175_v49 = vld [vmem:[%s20884_s26 + $0x398] sm:$0xff]  ;;  %s13222_s30 = smov [#allocation2]  }
  0xfc   :  { %2838 = vmatprep.subr.bf16.mxu1 %v9702_v39  ;;  %v178_v48 = vld [vmem:[%s20884_s26 + $0x3b0] sm:$0xff]  ;;  %v179_v50 = vld [vmem:[%s20884_s26 + $0x3b8] sm:$0xff]  ;;  %v9707_v16 = vcombine.low %v166_v35, %v170_v37  ;;  %v9709_v51 = vcombine.low %v167_v38, %v171_v40  ;;  %s9590_s18 = sshll.u32 %s13222_s30, 4  ;;  %s9591_s18 = int_to_ptr.vmem [resolvable:$true] %s9590_s18 }
  0xfd   :  { %v9716_v54 = vcombine.high %v174_v47, %v178_v48  ;;  %v9718_v55 = vcombine.high %v175_v49, %v179_v50  ;;  %v182_v56 = vld [vmem:[%s20884_s26 + $0x3d0] sm:$0xff]  ;;  %v183_v58 = vld [vmem:[%s20884_s26 + $0x3d8] sm:$0xff]  ;;  %v9715_v61 = vcombine.low %v174_v47, %v178_v48  ;;  %v9717_v62 = vcombine.low %v175_v49, %v179_v50  ;;  %p13198_p1 = scmp.lt.s32.totalorder %s9591_s18, %s9591_s18 }
  0xfe   :  { %2716 = vmatpush1.bf16.msra.mxu0 %v9699_v41  ;;  %v186_v57 = vld [vmem:[%s20884_s26 + $0x3f0] sm:$0xff]  ;;  %v187_v60 = vld [vmem:[%s20884_s26 + $0x3f8] sm:$0xff] }
  0xff   :  { %2839 = vmatpush1.bf16.msra.mxu1 %v9701_v42  ;;  %2717 = vmatprep.subr.bf16.mxu0 %v9708_v45  ;;  %v9724_v1 = vcombine.high %v182_v56, %v186_v57  ;;  %v9726_v2 = vcombine.high %v183_v58, %v187_v60  ;;  %v190_v3 = vld [vmem:[%s20884_s26 + $0x410] sm:$0xff]  ;;  %v191_v5 = vld [vmem:[%s20884_s26 + $0x418] sm:$0xff]  ;;  %v9723_v63 = vcombine.low %v182_v56, %v186_v57 }
 0x100   :  { %2840 = vmatprep.subr.bf16.mxu1 %v9710_v46  ;;  %v194_v4 = vld [vmem:[%s20884_s26 + $0x430] sm:$0xff]  ;;  %v195_v6 = vld [vmem:[%s20884_s26 + $0x438] sm:$0xff]  ;;  %v9725_v7 = vcombine.low %v183_v58, %v187_v60 }
 0x101   :  { %v9732_v8 = vcombine.high %v190_v3, %v194_v4  ;;  %v9734_v10 = vcombine.high %v191_v5, %v195_v6  ;;  %v198_v11 = vld [vmem:[%s20884_s26 + $0x450] sm:$0xff]  ;;  %v199_v13 = vld [vmem:[%s20884_s26 + $0x458] sm:$0xff]  ;;  %v9731_v59 = vcombine.low %v190_v3, %v194_v4  ;;  %v9733_v15 = vcombine.low %v191_v5, %v195_v6 }
 0x102   :  { %2718 = vmatpush1.bf16.msra.mxu0 %v9707_v16  ;;  %v202_v12 = vld [vmem:[%s20884_s26 + $0x470] sm:$0xff]  ;;  %v203_v14 = vld [vmem:[%s20884_s26 + $0x478] sm:$0xff] }
 0x103   :  { %2841 = vmatpush1.bf16.msra.mxu1 %v9709_v51  ;;  %2719 = vmatprep.subr.bf16.mxu0 %v9716_v54  ;;  %v9740_v17 = vcombine.high %v198_v11, %v202_v12  ;;  %v9742_v18 = vcombine.high %v199_v13, %v203_v14  ;;  %v206_v19 = vld [vmem:[%s20884_s26 + $0x490] sm:$0xff]  ;;  %v207_v21 = vld [vmem:[%s20884_s26 + $0x498] sm:$0xff]  ;;  %v9739_v9 = vcombine.low %v198_v11, %v202_v12 }
 0x104   :  { %2842 = vmatprep.subr.bf16.mxu1 %v9718_v55  ;;  %v210_v20 = vld [vmem:[%s20884_s26 + $0x4b0] sm:$0xff]  ;;  %v211_v22 = vld [vmem:[%s20884_s26 + $0x4b8] sm:$0xff]  ;;  %v9741_v53 = vcombine.low %v199_v13, %v203_v14 }
 0x105   :  { %v9748_v23 = vcombine.high %v206_v19, %v210_v20  ;;  %v9750_v24 = vcombine.high %v207_v21, %v211_v22  ;;  %v214_v26 = vld [vmem:[%s20884_s26 + $0x4d0] sm:$0xff]  ;;  %v219_v28 = vld [vmem:[%s20884_s26 + $0x4f8] sm:$0xff]  ;;  %v9747_v29 = vcombine.low %v206_v19, %v210_v20  ;;  %v9749_v30 = vcombine.low %v207_v21, %v211_v22 }
 0x106   :  { %2720 = vmatpush1.bf16.msra.mxu0 %v9715_v61  ;;  %v218_v27 = vld [vmem:[%s20884_s26 + $0x4f0] sm:$0xff]  ;;  %v227_v37 = vld [vmem:[%s20884_s26 + $0x538] sm:$0xff] }
 0x107   :  { %2843 = vmatpush1.bf16.msra.mxu1 %v9717_v62  ;;  %2721 = vmatprep.subr.bf16.mxu0 %v9724_v1  ;;  %v9756_v31 = vcombine.high %v214_v26, %v218_v27  ;;  %v222_v33 = vld [vmem:[%s20884_s26 + $0x510] sm:$0xff]  ;;  %v9755_v38 = vcombine.low %v214_v26, %v218_v27  ;;  %v231_v46 = vld [vmem:[%s20884_s26 + $0x558] sm:$0xff] }
 0x108   :  { %2844 = vmatprep.subr.bf16.mxu1 %v9726_v2  ;;  %v226_v35 = vld [vmem:[%s20884_s26 + $0x530] sm:$0xff]  ;;  %v235_v47 = vld [vmem:[%s20884_s26 + $0x578] sm:$0xff] }
 0x109   :  { %v9764_v40 = vcombine.high %v222_v33, %v226_v35  ;;  %v230_v42 = vld [vmem:[%s20884_s26 + $0x550] sm:$0xff]  ;;  %v9763_v48 = vcombine.low %v222_v33, %v226_v35  ;;  %v9774_v16 = vcombine.high %v231_v46, %v235_v47  ;;  %v239_v55 = vld [vmem:[%s20884_s26 + $0x598] sm:$0xff]  ;;  %v9773_v58 = vcombine.low %v231_v46, %v235_v47 }
 0x10a   :  { %2722 = vmatpush1.bf16.msra.mxu0 %v9723_v63  ;;  %v234_v45 = vld [vmem:[%s20884_s26 + $0x570] sm:$0xff]  ;;  %v243_v56 = vld [vmem:[%s20884_s26 + $0x5b8] sm:$0xff] }
 0x10b   :  { %2845 = vmatpush1.bf16.msra.mxu1 %v9725_v7  ;;  %2732 = vmatprep.subr.bf16.mxu0 %v9732_v8  ;;  %v9772_v50 = vcombine.high %v230_v42, %v234_v45  ;;  %v238_v51 = vld [vmem:[%s20884_s26 + $0x590] sm:$0xff]  ;;  %v9771_v57 = vcombine.low %v230_v42, %v234_v45  ;;  %v9782_v61 = vcombine.high %v239_v55, %v243_v56  ;;  %v247_v2 = vld [vmem:[%s20884_s26 + $0x5d8] sm:$0xff] }
 0x10c   :  { %2855 = vmatprep.subr.bf16.mxu1 %v9734_v10  ;;  %v242_v54 = vld [vmem:[%s20884_s26 + $0x5b0] sm:$0xff]  ;;  %v251_v3 = vld [vmem:[%s20884_s26 + $0x5f8] sm:$0xff]  ;;  %v9781_v5 = vcombine.low %v239_v55, %v243_v56 }
 0x10d   :  { %2724 = vmatmul.mubr.bf16.vlgmr.msra.gmra.mrb[4].mxu0 %v13553_v25  ;;  %v9780_v60 = vcombine.high %v238_v51, %v242_v54  ;;  %v246_v62 = vld [vmem:[%s20884_s26 + $0x5d0] sm:$0xff]  ;;  %v9779_v4 = vcombine.low %v238_v51, %v242_v54  ;;  %v9790_v63 = vcombine.high %v247_v2, %v251_v3  ;;  %v255_v10 = vld [vmem:[%s20884_s26 + $0x618] sm:$0xff]  ;;  %v9789_v13 = vcombine.low %v247_v2, %v251_v3 }
 0x10e   :  { %2733 = vmatpush1.bf16.msra.mxu0 %v9731_v59  ;;  %2847 = vmatmul.mubr.bf16.vlgmr.msra.gmra.mrb[4].mxu1 %v13553_v25  ;;  %v215_v25 = vld [vmem:[%s20884_s26 + $0x4d8] sm:$0xff]  ;;  %v250_v1 = vld [vmem:[%s20884_s26 + $0x5f0] sm:$0xff] }
 0x10f   :  { %2856 = vmatpush1.bf16.msra.mxu1 %v9733_v15  ;;  %2734 = vmatprep.subr.bf16.mxu0 %v9740_v17  ;;  %v9758_v32 = vcombine.high %v215_v25, %v219_v28  ;;  %v9757_v39 = vcombine.low %v215_v25, %v219_v28  ;;  %v9788_v6 = vcombine.high %v246_v62, %v250_v1  ;;  %v254_v7 = vld [vmem:[%s20884_s26 + $0x610] sm:$0xff]  ;;  %v259_v11 = vld [vmem:[%s20884_s26 + $0x638] sm:$0xff] }
 0x110   :  { %2857 = vmatprep.subr.bf16.mxu1 %v9742_v18  ;;  %2764 = vmatprep.mubr.bf16.mxu0 %v13573_v36  ;;  %v258_v8 = vld [vmem:[%s20884_s26 + $0x630] sm:$0xff]  ;;  %v9787_v12 = vcombine.low %v246_v62, %v250_v1  ;;  %v9798_v59 = vcombine.high %v255_v10, %v259_v11  ;;  %v263_v18 = vld [vmem:[%s20884_s26 + $0x658] sm:$0xff]  ;;  %v9797_v21 = vcombine.low %v255_v10, %v259_v11 }
 0x111   :  { %2887 = vmatprep.mubr.bf16.mxu1 %v13573_v36  ;;  %v223_v36 = vld [vmem:[%s20884_s26 + $0x518] sm:$0xff]  ;;  %v9796_v14 = vcombine.high %v254_v7, %v258_v8  ;;  %v262_v15 = vld [vmem:[%s20884_s26 + $0x650] sm:$0xff]  ;;  %v9795_v20 = vcombine.low %v254_v7, %v258_v8 }
 0x112   :  { %2735 = vmatpush1.bf16.msra.mxu0 %v9739_v9  ;;  %v9766_v41 = vcombine.high %v223_v36, %v227_v37  ;;  %v9765_v49 = vcombine.low %v223_v36, %v227_v37  ;;  %v266_v17 = vld [vmem:[%s20884_s26 + $0x670] sm:$0xff]  ;;  %v267_v19 = vld [vmem:[%s20884_s26 + $0x678] sm:$0xff] }
 0x113   :  { %2858 = vmatpush1.bf16.msra.mxu1 %v9741_v53  ;;  %2736 = vmatprep.subr.bf16.mxu0 %v9748_v23  ;;  %v9804_v22 = vcombine.high %v262_v15, %v266_v17  ;;  %v9806_v9 = vcombine.high %v263_v18, %v267_v19  ;;  %v270_v53 = vld [vmem:[%s20884_s26 + $0x690] sm:$0xff]  ;;  %v275_v26 = vld [vmem:[%s20884_s26 + $0x6b8] sm:$0xff]  ;;  %v9803_v27 = vcombine.low %v262_v15, %v266_v17 }
 0x114   :  { %2859 = vmatprep.subr.bf16.mxu1 %v9750_v24  ;;  %v274_v23 = vld [vmem:[%s20884_s26 + $0x6b0] sm:$0xff]  ;;  %v271_v24 = vld [vmem:[%s20884_s26 + $0x698] sm:$0xff]  ;;  %v9805_v25 = vcombine.low %v263_v18, %v267_v19 }
 0x115   :  { %v9812_v28 = vcombine.high %v270_v53, %v274_v23  ;;  %v283_v33 = vld [vmem:[%s20884_s26 + $0x6f8] sm:$0xff]  ;;  %v9811_v35 = vcombine.low %v270_v53, %v274_v23  ;;  %v9813_v36 = vcombine.low %v271_v24, %v275_v26 }
 0x116   :  { %2737 = vmatpush1.bf16.msra.mxu0 %v9747_v29  ;;  %v9814_v29 = vcombine.high %v271_v24, %v275_v26  ;;  %v291_v42 = vld [vmem:[%s20884_s26 + $0x738] sm:$0xff] }
 0x117   :  { %2860 = vmatpush1.bf16.msra.mxu1 %v9749_v30  ;;  %2738 = vmatprep.subr.bf16.mxu0 %v9756_v31  ;;  %v278_v30 = vld [vmem:[%s20884_s26 + $0x6d0] sm:$0xff]  ;;  %v299_v51 = vld [vmem:[%s20884_s26 + $0x778] sm:$0xff] }
 0x118   :  { %2861 = vmatprep.subr.bf16.mxu1 %v9758_v32  ;;  %v282_v31 = vld [vmem:[%s20884_s26 + $0x6f0] sm:$0xff]  ;;  %v279_v32 = vld [vmem:[%s20884_s26 + $0x6d8] sm:$0xff] }
 0x119   :  { %v9820_v37 = vcombine.high %v278_v30, %v282_v31  ;;  %v9819_v45 = vcombine.low %v278_v30, %v282_v31  ;;  %v9821_v46 = vcombine.low %v279_v32, %v283_v33  ;;  %v307_v62 = vld [vmem:[%s20884_s26 + $0x7b8] sm:$0xff] }
 0x11a   :  { %2739 = vmatpush1.bf16.msra.mxu0 %v9755_v38  ;;  %v9822_v38 = vcombine.high %v279_v32, %v283_v33  ;;  %v315_v7 = vld [vmem:[%s20884_s26 + $0x7f8] sm:$0xff] }
 0x11b   :  { %2862 = vmatpush1.bf16.msra.mxu1 %v9757_v39  ;;  %2740 = vmatprep.subr.bf16.mxu0 %v9764_v40  ;;  %v286_v39 = vld [vmem:[%s20884_s26 + $0x710] sm:$0xff]  ;;  %v323_v15 = vld [vmem:[%s20884_s26 + $0x838] sm:$0xff] }
 0x11c   :  { %2863 = vmatprep.subr.bf16.mxu1 %v9766_v41  ;;  %v290_v40 = vld [vmem:[%s20884_s26 + $0x730] sm:$0xff]  ;;  %v287_v41 = vld [vmem:[%s20884_s26 + $0x718] sm:$0xff] }
 0x11d   :  { %v9828_v47 = vcombine.high %v286_v39, %v290_v40  ;;  %v9827_v54 = vcombine.low %v286_v39, %v290_v40  ;;  %v9829_v55 = vcombine.low %v287_v41, %v291_v42  ;;  %v331_v53 = vld [vmem:[%s20884_s26 + $0x878] sm:$0xff] }
 0x11e   :  { %2741 = vmatpush1.bf16.msra.mxu0 %v9763_v48  ;;  %v9830_v48 = vcombine.high %v287_v41, %v291_v42  ;;  %v339_v30 = vld [vmem:[%s20884_s26 + $0x8b8] sm:$0xff] }
 0x11f   :  { %2864 = vmatpush1.bf16.msra.mxu1 %v9765_v49  ;;  %2742 = vmatprep.subr.bf16.mxu0 %v9772_v50  ;;  %v294_v49 = vld [vmem:[%s20884_s26 + $0x750] sm:$0xff] }
 0x120   :  { %2865 = vmatprep.subr.bf16.mxu1 %v9774_v16  ;;  %v298_v50 = vld [vmem:[%s20884_s26 + $0x770] sm:$0xff]  ;;  %v295_v16 = vld [vmem:[%s20884_s26 + $0x758] sm:$0xff] }
 0x121   :  { %v9836_v56 = vcombine.high %v294_v49, %v298_v50  ;;  %v9835_v1 = vcombine.low %v294_v49, %v298_v50  ;;  %v9837_v2 = vcombine.low %v295_v16, %v299_v51 }
 0x122   :  { %2743 = vmatpush1.bf16.msra.mxu0 %v9771_v57  ;;  %v9838_v57 = vcombine.high %v295_v16, %v299_v51  ;;  %v358_v51 = vld [vmem:[%s20884_s26 + $0x950] sm:$0xff] }
 0x123   :  { %2866 = vmatpush1.bf16.msra.mxu1 %v9773_v58  ;;  %2744 = vmatprep.subr.bf16.mxu0 %v9780_v60  ;;  %v302_v58 = vld [vmem:[%s20884_s26 + $0x790] sm:$0xff] }
 0x124   :  { %2867 = vmatprep.subr.bf16.mxu1 %v9782_v61  ;;  %v306_v60 = vld [vmem:[%s20884_s26 + $0x7b0] sm:$0xff]  ;;  %v303_v61 = vld [vmem:[%s20884_s26 + $0x798] sm:$0xff] }
 0x125   :  { %v9844_v3 = vcombine.high %v302_v58, %v306_v60  ;;  %v9843_v8 = vcombine.low %v302_v58, %v306_v60  ;;  %v9845_v10 = vcombine.low %v303_v61, %v307_v62 }
 0x126   :  { %2745 = vmatpush1.bf16.msra.mxu0 %v9779_v4  ;;  %v9846_v4 = vcombine.high %v303_v61, %v307_v62  ;;  %v366_v62 = vld [vmem:[%s20884_s26 + $0x990] sm:$0xff] }
 0x127   :  { %2868 = vmatpush1.bf16.msra.mxu1 %v9781_v5  ;;  %2746 = vmatprep.subr.bf16.mxu0 %v9788_v6  ;;  %v310_v5 = vld [vmem:[%s20884_s26 + $0x7d0] sm:$0xff] }
 0x128   :  { %2869 = vmatprep.subr.bf16.mxu1 %v9790_v63  ;;  %v314_v6 = vld [vmem:[%s20884_s26 + $0x7f0] sm:$0xff]  ;;  %v311_v63 = vld [vmem:[%s20884_s26 + $0x7d8] sm:$0xff] }
 0x129   :  { %v9852_v11 = vcombine.high %v310_v5, %v314_v6  ;;  %v9851_v17 = vcombine.low %v310_v5, %v314_v6  ;;  %v9853_v18 = vcombine.low %v311_v63, %v315_v7 }
 0x12a   :  { %2747 = vmatpush1.bf16.msra.mxu0 %v9787_v12  ;;  %v9854_v12 = vcombine.high %v311_v63, %v315_v7  ;;  %v374_v7 = vld [vmem:[%s20884_s26 + $0x9d0] sm:$0xff] }
 0x12b   :  { %2870 = vmatpush1.bf16.msra.mxu1 %v9789_v13  ;;  %2748 = vmatprep.subr.bf16.mxu0 %v9796_v14  ;;  %v318_v13 = vld [vmem:[%s20884_s26 + $0x810] sm:$0xff] }
 0x12c   :  { %2871 = vmatprep.subr.bf16.mxu1 %v9798_v59  ;;  %v322_v14 = vld [vmem:[%s20884_s26 + $0x830] sm:$0xff]  ;;  %v319_v59 = vld [vmem:[%s20884_s26 + $0x818] sm:$0xff] }
 0x12d   :  { %v9860_v19 = vcombine.high %v318_v13, %v322_v14  ;;  %v9859_v23 = vcombine.low %v318_v13, %v322_v14  ;;  %v9861_v24 = vcombine.low %v319_v59, %v323_v15 }
 0x12e   :  { %2749 = vmatpush1.bf16.msra.mxu0 %v9795_v20  ;;  %v9862_v20 = vcombine.high %v319_v59, %v323_v15  ;;  %v382_v15 = vld [vmem:[%s20884_s26 + $0xa10] sm:$0xff] }
 0x12f   :  { %2872 = vmatpush1.bf16.msra.mxu1 %v9797_v21  ;;  %2750 = vmatprep.subr.bf16.mxu0 %v9804_v22  ;;  %v326_v21 = vld [vmem:[%s20884_s26 + $0x850] sm:$0xff] }
 0x130   :  { %2873 = vmatprep.subr.bf16.mxu1 %v9806_v9  ;;  %v330_v22 = vld [vmem:[%s20884_s26 + $0x870] sm:$0xff]  ;;  %v327_v9 = vld [vmem:[%s20884_s26 + $0x858] sm:$0xff] }
 0x131   :  { %v9868_v26 = vcombine.high %v326_v21, %v330_v22  ;;  %v9867_v31 = vcombine.low %v326_v21, %v330_v22  ;;  %v9869_v32 = vcombine.low %v327_v9, %v331_v53 }
 0x132   :  { %2751 = vmatpush1.bf16.msra.mxu0 %v9803_v27  ;;  %v9870_v27 = vcombine.high %v327_v9, %v331_v53  ;;  %v390_v53 = vld [vmem:[%s20884_s26 + $0xa50] sm:$0xff] }
 0x133   :  { %2874 = vmatpush1.bf16.msra.mxu1 %v9805_v25  ;;  %2752 = vmatprep.subr.bf16.mxu0 %v9812_v28  ;;  %v334_v25 = vld [vmem:[%s20884_s26 + $0x890] sm:$0xff] }
 0x134   :  { %2875 = vmatprep.subr.bf16.mxu1 %v9814_v29  ;;  %v338_v28 = vld [vmem:[%s20884_s26 + $0x8b0] sm:$0xff]  ;;  %v335_v29 = vld [vmem:[%s20884_s26 + $0x898] sm:$0xff] }
 0x135   :  { %v9876_v33 = vcombine.high %v334_v25, %v338_v28  ;;  %v9875_v39 = vcombine.low %v334_v25, %v338_v28  ;;  %v9877_v40 = vcombine.low %v335_v29, %v339_v30  ;;  %v14467_v25 = vld [vmem:[%s20884_s26 + $0xa90] sm:$0xff] }
 0x136   :  { %2753 = vmatpush1.bf16.msra.mxu0 %v9811_v35  ;;  %v9878_v35 = vcombine.high %v335_v29, %v339_v30  ;;  %v14472_v28 = vld [vmem:[%s20884_s26 + $0xab0] sm:$0xff] }
 0x137   :  { %2876 = vmatpush1.bf16.msra.mxu1 %v9813_v36  ;;  %2754 = vmatprep.subr.bf16.mxu0 %v9820_v37  ;;  %v342_v36 = vld [vmem:[%s20884_s26 + $0x8d0] sm:$0xff] }
 0x138   :  { %2877 = vmatprep.subr.bf16.mxu1 %v9822_v38  ;;  %v346_v37 = vld [vmem:[%s20884_s26 + $0x8f0] sm:$0xff]  ;;  %v347_v38 = vld [vmem:[%s20884_s26 + $0x8f8] sm:$0xff] }
 0x139   :  { %v9884_v41 = vcombine.high %v342_v36, %v346_v37 }
 0x13a   :  { %2755 = vmatpush1.bf16.msra.mxu0 %v9819_v45  ;;  %v350_v45 = vld [vmem:[%s20884_s26 + $0x910] sm:$0xff] }
 0x13b   :  { %2878 = vmatpush1.bf16.msra.mxu1 %v9821_v46  ;;  %2756 = vmatprep.subr.bf16.mxu0 %v9828_v47  ;;  %v354_v46 = vld [vmem:[%s20884_s26 + $0x930] sm:$0xff]  ;;  %v355_v47 = vld [vmem:[%s20884_s26 + $0x938] sm:$0xff] }
 0x13c   :  { %2879 = vmatprep.subr.bf16.mxu1 %v9830_v48  ;;  %v9883_v48 = vcombine.low %v342_v36, %v346_v37  ;;  %v9892_v50 = vcombine.high %v350_v45, %v354_v46  ;;  %v14492_v36 = vld [vmem:[%s20884_s26 + $0xaf0] sm:$0xff]  ;;  %v14497_v37 = vld [vmem:[%s20884_s26 + $0xad8] sm:$0xff] }
 0x13e   :  { %2757 = vmatpush1.bf16.msra.mxu0 %v9827_v54  ;;  %v362_v54 = vld [vmem:[%s20884_s26 + $0x970] sm:$0xff] }
 0x13f   :  { %2880 = vmatpush1.bf16.msra.mxu1 %v9829_v55  ;;  %2758 = vmatprep.subr.bf16.mxu0 %v9836_v56  ;;  %v359_v55 = vld [vmem:[%s20884_s26 + $0x958] sm:$0xff]  ;;  %v9900_v60 = vcombine.high %v358_v51, %v362_v54 }
 0x140   :  { %2881 = vmatprep.subr.bf16.mxu1 %v9838_v57  ;;  %v363_v56 = vld [vmem:[%s20884_s26 + $0x978] sm:$0xff]  ;;  %v9891_v57 = vcombine.low %v350_v45, %v354_v46  ;;  %v9939_v45 = vcombine.low %v14467_v25, %v14472_v28 }
 0x141   :  { %v9902_v61 = vcombine.high %v359_v55, %v363_v56  ;;  %v9901_v5 = vcombine.low %v359_v55, %v363_v56  ;;  %v14524_v46 = vld [vmem:[%s20884_s26 + $0xb38] sm:$0xff] }
 0x142   :  { %2759 = vmatpush1.bf16.msra.mxu0 %v9835_v1  ;;  %v370_v1 = vld [vmem:[%s20884_s26 + $0x9b0] sm:$0xff] }
 0x143   :  { %2882 = vmatpush1.bf16.msra.mxu1 %v9837_v2  ;;  %2760 = vmatprep.subr.bf16.mxu0 %v9844_v3  ;;  %v367_v2 = vld [vmem:[%s20884_s26 + $0x998] sm:$0xff]  ;;  %v9908_v6 = vcombine.high %v366_v62, %v370_v1 }
 0x144   :  { %2883 = vmatprep.subr.bf16.mxu1 %v9846_v4  ;;  %v371_v3 = vld [vmem:[%s20884_s26 + $0x9b8] sm:$0xff]  ;;  %v9899_v4 = vcombine.low %v358_v51, %v362_v54  ;;  %v14558_v54 = vld [vmem:[%s20884_s26 + $0xb90] sm:$0xff] }
 0x145   :  { %v9910_v63 = vcombine.high %v367_v2, %v371_v3  ;;  %v9909_v13 = vcombine.low %v367_v2, %v371_v3  ;;  %v14548_v51 = vld [vmem:[%s20884_s26 + $0xb58] sm:$0xff] }
 0x146   :  { %2761 = vmatpush1.bf16.msra.mxu0 %v9843_v8  ;;  %v378_v8 = vld [vmem:[%s20884_s26 + $0x9f0] sm:$0xff] }
 0x147   :  { %2884 = vmatpush1.bf16.msra.mxu1 %v9845_v10  ;;  %2762 = vmatprep.subr.bf16.mxu0 %v9852_v11  ;;  %v375_v10 = vld [vmem:[%s20884_s26 + $0x9d8] sm:$0xff]  ;;  %v9916_v14 = vcombine.high %v374_v7, %v378_v8 }
 0x148   :  { %2885 = vmatprep.subr.bf16.mxu1 %v9854_v12  ;;  %v379_v11 = vld [vmem:[%s20884_s26 + $0x9f8] sm:$0xff]  ;;  %v9907_v12 = vcombine.low %v366_v62, %v370_v1 }
 0x149   :  { %v9918_v59 = vcombine.high %v375_v10, %v379_v11  ;;  %v9917_v21 = vcombine.low %v375_v10, %v379_v11  ;;  %v14581_v62 = vld [vmem:[%s20884_s26 + $0xbb8] sm:$0xff] }
 0x14a   :  { %2763 = vmatpush1.bf16.msra.mxu0 %v9851_v17  ;;  %v386_v17 = vld [vmem:[%s20884_s26 + $0xa30] sm:$0xff]  ;;  %v14612_v11 = vld [vmem:[%s20884_s26 + $0xbd8] sm:$0xff] }
 0x14b   :  { %2886 = vmatpush1.bf16.msra.mxu1 %v9853_v18  ;;  %2773 = vmatprep.subr.bf16.mxu0 %v9860_v19  ;;  %v383_v18 = vld [vmem:[%s20884_s26 + $0xa18] sm:$0xff]  ;;  %v9924_v22 = vcombine.high %v382_v15, %v386_v17 }
 0x14c   :  { %2896 = vmatprep.subr.bf16.mxu1 %v9862_v20  ;;  %v387_v19 = vld [vmem:[%s20884_s26 + $0xa38] sm:$0xff]  ;;  %v9915_v20 = vcombine.low %v374_v7, %v378_v8  ;;  %v14738_v8 = vadd.s32 288, %v13380_v44 }
 0x14d   :  { %2765 = vmatmul.mubr.bf16.vlgmr.msra.gmra.mrb[4].mxu0 %v13768_v43  ;;  %v9926_v9 = vcombine.high %v383_v18, %v387_v19  ;;  %v9925_v29 = vcombine.low %v383_v18, %v387_v19  ;;  %v14633_v19 = vadd.s32 136, %v13380_v44  ;;  %v14699_v18 = vadd.s32 416, %v13380_v44 }
 0x14e   :  { %2774 = vmatpush1.bf16.msra.mxu0 %v9859_v23  ;;  %2888 = vmatmul.mubr.bf16.vlgmr.msra.gmra.mrb[4].mxu1 %v13768_v43  ;;  %v343_v43 = vld [vmem:[%s20884_s26 + $0x8d8] sm:$0xff]  ;;  %v394_v23 = vld [vmem:[%s20884_s26 + $0xa70] sm:$0xff]  ;;  %20914 = vst [vmem:[#allocation25_spill] sm:$0xff] %v14738_v8 }
 0x14f   :  { %2897 = vmatpush1.bf16.msra.mxu1 %v9861_v24  ;;  %2775 = vmatprep.subr.bf16.mxu0 %v9868_v26  ;;  %v9886_v42 = vcombine.high %v343_v43, %v347_v38  ;;  %v9885_v49 = vcombine.low %v343_v43, %v347_v38  ;;  %v391_v24 = vld [vmem:[%s20884_s26 + $0xa58] sm:$0xff]  ;;  %v9932_v30 = vcombine.high %v390_v53, %v394_v23  ;;  %v14507_v38 = vld [vmem:[%s20884_s26 + $0xb10] sm:$0xff] }
 0x150   :  { %2898 = vmatprep.subr.bf16.mxu1 %v9870_v27  ;;  %2805 = vmatprep.mubr.bf16.mxu0 %v13782_v52  ;;  %v395_v26 = vld [vmem:[%s20884_s26 + $0xa78] sm:$0xff]  ;;  %v9923_v27 = vcombine.low %v382_v15, %v386_v17  ;;  %v14626_v15 = vadd.s32 128, %v13380_v44  ;;  %20887 = vst [vmem:[#allocation6_spill] sm:$0xff] %v14633_v19  ;;  %20902 = vst [vmem:[#allocation21_spill] sm:$0xff] %v14699_v18 }
 0x151   :  { %2928 = vmatprep.mubr.bf16.mxu1 %v13782_v52  ;;  %v351_v52 = vld [vmem:[%s20884_s26 + $0x918] sm:$0xff] }
 0x152   :  { %2776 = vmatpush1.bf16.msra.mxu0 %v9867_v31  ;;  %v9894_v16 = vcombine.high %v351_v52, %v355_v47  ;;  %v9893_v58 = vcombine.low %v351_v52, %v355_v47  ;;  %v14477_v31 = vld [vmem:[%s20884_s26 + $0xa98] sm:$0xff]  ;;  %v14529_v52 = vld [vmem:[%s20884_s26 + $0xb50] sm:$0xff]  ;;  %20886 = vst [vmem:[#allocation5_spill] sm:$0xff] %v14626_v15 }
 0x153   :  { %2899 = vmatpush1.bf16.msra.mxu1 %v9869_v32  ;;  %2777 = vmatprep.subr.bf16.mxu0 %v9876_v33  ;;  %v14482_v32 = vld [vmem:[%s20884_s26 + $0xab8] sm:$0xff]  ;;  %v14487_v33 = vld [vmem:[%s20884_s26 + $0xad0] sm:$0xff] }
 0x154   :  { %2900 = vmatprep.subr.bf16.mxu1 %v9878_v35  ;;  %v9934_v35 = vcombine.high %v391_v24, %v395_v26  ;;  %v14502_v43 = vld [vmem:[%s20884_s26 + $0xaf8] sm:$0xff]  ;;  %v14534_v47 = vld [vmem:[%s20884_s26 + $0xb70] sm:$0xff]  ;;  %v9947_v55 = vcombine.low %v14487_v33, %v14492_v36  ;;  %v9948_v56 = vcombine.high %v14487_v33, %v14492_v36  ;;  %v14670_v33 = vadd.s32 408, %v13380_v44 }
 0x155   :  { %v9964_v7 = vcombine.high %v14529_v52, %v14534_v47 }
 0x156   :  { %2778 = vmatpush1.bf16.msra.mxu0 %v9875_v39  ;;  %v14512_v39 = vld [vmem:[%s20884_s26 + $0xb30] sm:$0xff]  ;;  %20895 = vst [vmem:[#allocation14_spill] sm:$0xff] %v14670_v33 }
 0x157   :  { %2901 = vmatpush1.bf16.msra.mxu1 %v9877_v40  ;;  %2779 = vmatprep.subr.bf16.mxu0 %v9884_v41  ;;  %v14517_v40 = vld [vmem:[%s20884_s26 + $0xb18] sm:$0xff]  ;;  %v9931_v41 = vcombine.low %v390_v53, %v394_v23  ;;  %v9955_v1 = vcombine.low %v14507_v38, %v14512_v39  ;;  %v9956_v2 = vcombine.high %v14507_v38, %v14512_v39  ;;  %v14646_v53 = vadd.s32 8, %v13380_v44 }
 0x158   :  { %2902 = vmatprep.subr.bf16.mxu1 %v9886_v42  ;;  %v9933_v42 = vcombine.low %v391_v24, %v395_v26  ;;  %v9957_v3 = vcombine.low %v14517_v40, %v14524_v46  ;;  %v14651_v24 = vadd.s32 256, %v13380_v44  ;;  %v14654_v26 = vadd.s32 264, %v13380_v44 }
 0x159   :  { %v3075_v36 = vand.u32 15, %v14646_v53  ;;  %v20906_v23 = vmov 0  ;;  %v14741_v38 = vadd.s32 296, %v13380_v44  ;;  %v20916_v39 = vmov 0 }
 0x15a   :  { %2780 = vmatpush1.bf16.msra.mxu0 %v9883_v48  ;;  %v14537_v48 = vand.u32 127, %v450_v34  ;;  %v14553_v34 = vld [vmem:[%s20884_s26 + $0xb78] sm:$0xff]  ;;  %20890 = vst [vmem:[#allocation9_spill] sm:$0xff] %v14651_v24  ;;  %20891 = vst [vmem:[#allocation10_spill] sm:$0xff] %v14654_v26 }
 0x15b   :  { %2903 = vmatpush1.bf16.msra.mxu1 %v9885_v49  ;;  %2781 = vmatprep.subr.bf16.mxu0 %v9892_v50  ;;  %v9940_v49 = vcombine.high %v14467_v25, %v14472_v28  ;;  %v9941_v50 = vcombine.low %v14477_v31, %v14482_v32  ;;  %v9966_v10 = vcombine.high %v14548_v51, %v14553_v34  ;;  %v3074_v25 = vand.u32 15, %v13380_v44 }
 0x15c   :  { %2904 = vmatprep.subr.bf16.mxu1 %v9894_v16  ;;  %v9942_v16 = vcombine.high %v14477_v31, %v14482_v32  ;;  %v14659_v28 = vadd.s32 144, %v13380_v44  ;;  %v14667_v32 = vadd.s32 400, %v13380_v44  ;;  %20915 = vst [vmem:[#allocation26_spill] sm:$0xff] %v14741_v38  ;;  %vm14755_vm5 = vcmp.eq.s32.totalorder %v3075_v36, %v14537_v48 }
 0x15d   :  { %vm14750_vm4 = vcmp.eq.s32.totalorder %v3074_v25, %v14537_v48  ;;  %v3126_v25 = vand.u32 15, %v14699_v18  ;;  %v20931_v18 = vmov 0 }
 0x15e   :  { %2782 = vmatpush1.bf16.msra.mxu0 %v9891_v57  ;;  %v9949_v57 = vcombine.low %v14497_v37, %v14502_v43  ;;  %20892 = vst [vmem:[#allocation11_spill] sm:$0xff] %v14659_v28  ;;  %20894 = vst [vmem:[#allocation13_spill] sm:$0xff] %v14667_v32  ;;  %v20917_v39 = vsel %vm14750_vm4, 4294967295, %v20916_v39 }
 0x15f   :  { %2905 = vmatpush1.bf16.msra.mxu1 %v9893_v58  ;;  %2783 = vmatprep.subr.bf16.mxu0 %v9900_v60  ;;  %v9950_v58 = vcombine.high %v14497_v37, %v14502_v43  ;;  %v14571_v60 = vld [vmem:[%s20884_s26 + $0xbb0] sm:$0xff]  ;;  %v14675_v37 = vadd.s32 16, %v13380_v44  ;;  %v14678_v43 = vadd.s32 24, %v13380_v44  ;;  %20918 = vst [vmem:[#allocation27_spill] sm:$0xff] %v20917_v39  ;;  %v15125_v39 = vadd.s32 488, %v13380_v44 }
 0x160   :  { %2906 = vmatprep.subr.bf16.mxu1 %v9902_v61  ;;  %v14576_v61 = vld [vmem:[%s20884_s26 + $0xb98] sm:$0xff] }
 0x161   :  { %20896 = vst [vmem:[#allocation15_spill] sm:$0xff] %v14675_v37  ;;  %20897 = vst [vmem:[#allocation16_spill] sm:$0xff] %v14678_v43 }
 0x162   :  { %2784 = vmatpush1.bf16.msra.mxu0 %v9899_v4  ;;  %v9958_v4 = vcombine.high %v14517_v40, %v14524_v46  ;;  %v14762_v40 = vsub.s32 0, %v13380_v44  ;;  %v14765_v46 = vsub.s32 2, %v13380_v44  ;;  %21049 = vst [vmem:[#allocation80_spill] sm:$0xff] %v15125_v39 }
 0x163   :  { %2907 = vmatpush1.bf16.msra.mxu1 %v9901_v5  ;;  %2785 = vmatprep.subr.bf16.mxu0 %v9908_v6  ;;  %v14594_v5 = vld [vmem:[%s20884_s26 + $0xbd0] sm:$0xff] }
 0x164   :  { %2908 = vmatprep.subr.bf16.mxu1 %v9910_v63  ;;  %v14599_v6 = vld [vmem:[%s20884_s26 + $0xbf0] sm:$0xff]  ;;  %20921 = vst [vmem:[#allocation28_spill] sm:$0xff] %v14762_v40  ;;  %20922 = vst [vmem:[#allocation29_spill] sm:$0xff] %v14765_v46  ;;  %v14785_v63 = vld [vmem:[%s20214_s2] sm:$0xff] }
 0x166   :  { %2786 = vmatpush1.bf16.msra.mxu0 %v9907_v12  ;;  %v14617_v12 = vld [vmem:[%s20884_s26 + $0xbf8] sm:$0xff] }
 0x167   :  { %2909 = vmatpush1.bf16.msra.mxu1 %v9909_v13  ;;  %2787 = vmatprep.subr.bf16.mxu0 %v9916_v14  ;;  %v14720_v13 = vadd.s32 40, %v13380_v44 }
 0x168   :  { %2910 = vmatprep.subr.bf16.mxu1 %v9918_v59  ;;  %v14717_v59 = vadd.s32 32, %v13380_v44 }
 0x169   :  { %20909 = vst [vmem:[#allocation24_spill] sm:$0xff] %v14720_v13 }
 0x16a   :  { %2788 = vmatpush1.bf16.msra.mxu0 %v9915_v20  ;;  %v14636_v20 = vadd.s32 384, %v13380_v44  ;;  %20908 = vst [vmem:[#allocation23_spill] sm:$0xff] %v14717_v59 }
 0x16b   :  { %2911 = vmatpush1.bf16.msra.mxu1 %v9917_v21  ;;  %2789 = vmatprep.subr.bf16.mxu0 %v9924_v22  ;;  %v3125_v22 = vand.u32 15, %v14670_v33  ;;  %v3077_v21 = vand.u32 15, %v14678_v43  ;;  %v14827_v43 = vsub.s32 1, %v13380_v44  ;;  %v14895_v33 = vadd.s32 200, %v13380_v44 }
 0x16c   :  { %2912 = vmatprep.subr.bf16.mxu1 %v9926_v9  ;;  %20888 = vst [vmem:[#allocation7_spill] sm:$0xff] %v14636_v20  ;;  %v14643_v9 = vadd.s32 392, %v13380_v44  ;;  %v3122_v31 = vand.u32 15, %v14636_v20  ;;  %v15073_v20 = vadd.s32 344, %v13380_v44 }
 0x16d   :  { %vm14820_vm11 = vcmp.eq.s32.totalorder %v3125_v22, %v14537_v48  ;;  %20941 = vst [vmem:[#allocation35_spill] sm:$0xff] %v14827_v43  ;;  %v20944_v22 = vcombine.high %v14558_v54, %v14571_v60  ;;  %vm14844_vm13 = vcmp.eq.s32.totalorder %v3077_v21, %v14537_v48  ;;  %v20954_v21 = vmov 0  ;;  %20969 = vst [vmem:[#allocation48_spill] sm:$0xff] %v14895_v33 }
 0x16e   :  { %2790 = vmatpush1.bf16.msra.mxu0 %v9923_v27  ;;  %20889 = vst [vmem:[#allocation8_spill] sm:$0xff] %v14643_v9  ;;  %v3090_v27 = vand.u32 15, %v14626_v15  ;;  %vm14726_vm2 = vcmp.eq.s32.totalorder %v3122_v31, %v14537_v48  ;;  %21030 = vst [vmem:[#allocation72_spill] sm:$0xff] %v15073_v20  ;;  %v15096_v15 = vadd.s32 232, %v13380_v44 }
 0x16f   :  { %2913 = vmatpush1.bf16.msra.mxu1 %v9925_v29  ;;  %2791 = vmatprep.subr.bf16.mxu0 %v9932_v30  ;;  %v14662_v29 = vadd.s32 152, %v13380_v44  ;;  %v3091_v30 = vand.u32 15, %v14633_v19  ;;  %v15093_v19 = vadd.s32 224, %v13380_v44 }
 0x170   :  { %2914 = vmatprep.subr.bf16.mxu1 %v9934_v35  ;;  %v3123_v35 = vand.u32 15, %v14643_v9  ;;  %vm14705_vm0 = vcmp.eq.s32.totalorder %v3090_v27, %v14537_v48  ;;  %v20910_v27 = vmov 0  ;;  %v15070_v9 = vadd.s32 336, %v13380_v44  ;;  %21038 = vst [vmem:[#allocation76_spill] sm:$0xff] %v15096_v15 }
 0x171   :  { %20893 = vst [vmem:[#allocation12_spill] sm:$0xff] %v14662_v29  ;;  %vm14710_vm1 = vcmp.eq.s32.totalorder %v3091_v30, %v14537_v48  ;;  %v20911_v27 = vsel %vm14726_vm2, 4294967295, %v20910_v27  ;;  %v20912_v30 = vmov 0  ;;  %21037 = vst [vmem:[#allocation75_spill] sm:$0xff] %v15093_v19 }
 0x172   :  { %2792 = vmatpush1.bf16.msra.mxu0 %v9931_v41  ;;  %v3106_v41 = vand.u32 15, %v14651_v24  ;;  %v20907_v23 = vsel %vm14710_vm1, 4294967295, %v20906_v23  ;;  %vm14731_vm3 = vcmp.eq.s32.totalorder %v3123_v35, %v14537_v48  ;;  %v20290_v24 = vmov 1.0|1.0   ;;  %21029 = vst [vmem:[#allocation71_spill] sm:$0xff] %v15070_v9 }
 0x173   :  { %2915 = vmatpush1.bf16.msra.mxu1 %v9933_v42  ;;  %2793 = vmatprep.subr.bf16.mxu0 %v9940_v49  ;;  %v3107_v42 = vand.u32 15, %v14654_v26  ;;  %v14686_v49 = vadd.s32 280, %v13380_v44  ;;  %v20913_v30 = vsel %vm14731_vm3, 4294967295, %v20912_v30  ;;  %v14989_v26 = vadd.s32 216, %v13380_v44 }
 0x174   :  { %2916 = vmatprep.subr.bf16.mxu1 %v9942_v16  ;;  %v3093_v16 = vand.u32 15, %v14662_v29  ;;  %vm14771_vm6 = vcmp.eq.s32.totalorder %v3106_v41, %v14537_v48  ;;  %v14791_v41 = vadd.s32 184, %v13380_v44  ;;  %v14915_v29 = vadd.s32 448, %v13380_v44 }
 0x175   :  { %20899 = vst [vmem:[#allocation18_spill] sm:$0xff] %v14686_v49  ;;  %v3109_v14 = vand.u32 15, %v14686_v49  ;;  %vm14776_vm7 = vcmp.eq.s32.totalorder %v3107_v42, %v14537_v48  ;;  %v20929_v42 = vmov 0  ;;  %v14809_v49 = vadd.s32 440, %v13380_v44  ;;  %21005 = vst [vmem:[#allocation64_spill] sm:$0xff] %v14989_v26 }
 0x176   :  { %2794 = vmatpush1.bf16.msra.mxu0 %v9939_v45  ;;  %v14683_v45 = vadd.s32 272, %v13380_v44  ;;  %20928 = vst [vmem:[#allocation31_spill] sm:$0xff] %v14791_v41  ;;  %vm14799_vm9 = vcmp.eq.s32.totalorder %v3093_v16, %v14537_v48  ;;  %v20936_v16 = vmov 0  ;;  %20977 = vst [vmem:[#allocation51_spill] sm:$0xff] %v14915_v29 }
 0x177   :  { %2917 = vmatpush1.bf16.msra.mxu1 %v9941_v50  ;;  %2795 = vmatprep.subr.bf16.mxu0 %v9948_v56  ;;  %v3092_v50 = vand.u32 15, %v14659_v28  ;;  %v14691_v56 = vadd.s32 160, %v13380_v44  ;;  %v20932_v18 = vsel %vm14799_vm9, 4294967295, %v20931_v18  ;;  %20934 = vst [vmem:[#allocation33_spill] sm:$0xff] %v14809_v49  ;;  %vm14867_vm15 = vcmp.eq.s32.totalorder %v3109_v14, %v14537_v48 }
 0x178   :  { %2918 = vmatprep.subr.bf16.mxu1 %v9950_v58  ;;  %20898 = vst [vmem:[#allocation17_spill] sm:$0xff] %v14683_v45  ;;  %v3124_v58 = vand.u32 15, %v14667_v32  ;;  %v3108_v17 = vand.u32 15, %v14683_v45  ;;  %v3111_v45 = vand.u32 15, %v14741_v38  ;;  %v3097_v38 = vand.u32 15, %v14791_v41 }
 0x179   :  { %20900 = vst [vmem:[#allocation19_spill] sm:$0xff] %v14691_v56  ;;  %v3094_v31 = vand.u32 15, %v14691_v56  ;;  %vm14794_vm8 = vcmp.eq.s32.totalorder %v3092_v50, %v14537_v48  ;;  %v14806_v56 = vadd.s32 432, %v13380_v44  ;;  %v20935_v50 = vcombine.low %v14529_v52, %v14534_v47 }
 0x17a   :  { %2796 = vmatpush1.bf16.msra.mxu0 %v9947_v55  ;;  %v14694_v55 = vadd.s32 168, %v13380_v44  ;;  %v20930_v42 = vsel %vm14794_vm8, 4294967295, %v20929_v42  ;;  %vm14815_vm10 = vcmp.eq.s32.totalorder %v3124_v58, %v14537_v48  ;;  %v14830_v52 = vsub.s32 3, %v13380_v44 }
 0x17b   :  { %2919 = vmatpush1.bf16.msra.mxu1 %v9949_v57  ;;  %2797 = vmatprep.subr.bf16.mxu0 %v9956_v2  ;;  %v14702_v57 = vadd.s32 424, %v13380_v44  ;;  %v20904_v2 = vmov 0  ;;  %20933 = vst [vmem:[#allocation32_spill] sm:$0xff] %v14806_v56  ;;  %v20937_v16 = vsel %vm14815_vm10, 4294967295, %v20936_v16  ;;  %v20943_v47 = vcombine.low %v14548_v51, %v14553_v34 }
 0x17c   :  { %20901 = vst [vmem:[#allocation20_spill] sm:$0xff] %v14694_v55  ;;  %2920 = vmatprep.subr.bf16.mxu1 %v9958_v4  ;;  %v20905_v2 = vsel %vm14705_vm0, 4294967295, %v20904_v2  ;;  %v3076_v4 = vand.u32 15, %v14675_v37  ;;  %v3095_v35 = vand.u32 15, %v14694_v55  ;;  %v3079_v55 = vand.u32 15, %v14720_v13  ;;  %20938 = vst [vmem:[#allocation34_spill] sm:$0xff] %v20937_v16 }
 0x17d   :  { %20903 = vst [vmem:[#allocation22_spill] sm:$0xff] %v14702_v57  ;;  %v3127_v36 = vand.u32 15, %v14702_v57  ;;  %v3078_v57 = vand.u32 15, %v14717_v59  ;;  %v20939_v59 = vmov 0  ;;  %v3110_v13 = vand.u32 15, %v14738_v8  ;;  %20942 = vst [vmem:[#allocation36_spill] sm:$0xff] %v14830_v52 }
 0x17e   :  { %2798 = vmatpush1.bf16.msra.mxu0 %v9955_v1  ;;  %v20919_v1 = vmov 0  ;;  %v20940_v59 = vsel %vm14820_vm11, 4294967295, %v20939_v59  ;;  %vm14839_vm12 = vcmp.eq.s32.totalorder %v3076_v4, %v14537_v48  ;;  %v20945_v58 = vmov 0 }
 0x17f   :  { %2921 = vmatpush1.bf16.msra.mxu1 %v9957_v3  ;;  %2799 = vmatprep.subr.bf16.mxu0 %v9964_v7  ;;  %v20920_v1 = vsel %vm14755_vm5, 4294967295, %v20919_v1  ;;  %v20923_v3 = vmov 0  ;;  %v20925_v7 = vmov 0  ;;  %v20946_v58 = vsel %vm14839_vm12, 4294967295, %v20945_v58 }
 0x180   :  { %2922 = vmatprep.subr.bf16.mxu1 %v9966_v10  ;;  %v20924_v3 = vsel %vm14771_vm6, 4294967295, %v20923_v3  ;;  %v20926_v7 = vsel %vm14776_vm7, 4294967295, %v20925_v7  ;;  %v14788_v10 = vadd.s32 176, %v13380_v44  ;;  %20947 = vst [vmem:[#allocation37_spill] sm:$0xff] %v20946_v58  ;;  %v14853_v34 = vadd.s32 48, %v13380_v44 }
 0x181   :  { %v20953_v4 = vcombine.high %v14576_v61, %v14581_v62  ;;  %vm14862_vm14 = vcmp.eq.s32.totalorder %v3108_v17, %v14537_v48  ;;  %v14874_v8 = vadd.s32 304, %v13380_v44  ;;  %v14877_v37 = vadd.s32 312, %v13380_v44 }
 0x182   :  { %20927 = vst [vmem:[#allocation30_spill] sm:$0xff] %v14788_v10  ;;  %2800 = vmatpush1.bf16.msra.mxu0 %v20935_v50  ;;  %v20948_v50 = vmov 0  ;;  %20951 = vst [vmem:[#allocation39_spill] sm:$0xff] %v14853_v34  ;;  %v20955_v21 = vsel %vm14862_vm14, 4294967295, %v20954_v21  ;;  %v3096_v51 = vand.u32 15, %v14788_v10  ;;  %v20962_v17 = vmov 0 }
 0x183   :  { %2923 = vmatpush1.bf16.msra.mxu1 %v20943_v47  ;;  %2801 = vmatprep.subr.bf16.mxu0 %v20944_v22  ;;  %v20949_v50 = vsel %vm14844_vm13, 4294967295, %v20948_v50  ;;  %v14856_v47 = vadd.s32 56, %v13380_v44  ;;  %20956 = vst [vmem:[#allocation41_spill] sm:$0xff] %v20955_v21  ;;  %v20957_v22 = vmov 0  ;;  %20960 = vst [vmem:[#allocation43_spill] sm:$0xff] %v14874_v8  ;;  %vm14880_vm13 = vcmp.eq.s32.totalorder %v3094_v31, %v14537_v48 }
 0x184   :  { %20950 = vst [vmem:[#allocation38_spill] sm:$0xff] %v20949_v50  ;;  %2924 = vmatprep.subr.bf16.mxu1 %v20953_v4  ;;  %v20958_v22 = vsel %vm14867_vm15, 4294967295, %v20957_v22  ;;  %20961 = vst [vmem:[#allocation44_spill] sm:$0xff] %v14877_v37  ;;  %v20963_v17 = vsel %vm14880_vm13, 4294967295, %v20962_v17  ;;  %vm14885_vm14 = vcmp.eq.s32.totalorder %v3095_v35, %v14537_v48  ;;  %v20965_v14 = vmov 0 }
 0x185   :  { %20952 = vst [vmem:[#allocation40_spill] sm:$0xff] %v14856_v47  ;;  %20959 = vst [vmem:[#allocation42_spill] sm:$0xff] %v20958_v22  ;;  %v20966_v14 = vsel %vm14885_vm14, 4294967295, %v20965_v14  ;;  %v3128_v4 = vand.u32 15, %v14806_v56  ;;  %v3129_v41 = vand.u32 15, %v14809_v49  ;;  %v14892_v10 = vadd.s32 192, %v13380_v44 }
 0x186   :  { %20964 = vst [vmem:[#allocation45_spill] sm:$0xff] %v20963_v17  ;;  %20967 = vst [vmem:[#allocation46_spill] sm:$0xff] %v20966_v14  ;;  %v20970_v31 = vcombine.low %v14558_v54, %v14571_v60  ;;  %vm14901_vm13 = vcmp.eq.s32.totalorder %v3126_v25, %v14537_v48  ;;  %v20971_v35 = vmov 0  ;;  %vm14906_vm14 = vcmp.eq.s32.totalorder %v3127_v36, %v14537_v48 }
 0x187   :  { %20968 = vst [vmem:[#allocation47_spill] sm:$0xff] %v14892_v10  ;;  %v20972_v35 = vsel %vm14901_vm13, 4294967295, %v20971_v35  ;;  %v20974_v56 = vmov 0  ;;  %v14918_v54 = vadd.s32 456, %v13380_v44  ;;  %v20979_v60 = vcombine.low %v14576_v61, %v14581_v62 }
 0x188   :  { %2802 = vmatpush1.bf16.msra.mxu0 %v20970_v31  ;;  %20973 = vst [vmem:[#allocation49_spill] sm:$0xff] %v20972_v35  ;;  %v20975_v56 = vsel %vm14906_vm14, 4294967295, %v20974_v56  ;;  %v20980_v25 = vcombine.high %v14594_v5, %v14599_v6  ;;  %vm14927_vm14 = vcmp.eq.s32.totalorder %v3078_v57, %v14537_v48  ;;  %v20981_v36 = vmov 0 }
 0x189   :  { %20976 = vst [vmem:[#allocation50_spill] sm:$0xff] %v20975_v56  ;;  %20978 = vst [vmem:[#allocation52_spill] sm:$0xff] %v14918_v54  ;;  %2925 = vmatpush1.bf16.msra.mxu1 %v20979_v60  ;;  %v20982_v36 = vsel %vm14927_vm14, 4294967295, %v20981_v36  ;;  %vm14932_vm13 = vcmp.eq.s32.totalorder %v3079_v55, %v14537_v48  ;;  %v20984_v31 = vmov 0  ;;  %v3080_v32 = vand.u32 15, %v14853_v34 }
 0x18a   :  { %2803 = vmatprep.subr.bf16.mxu0 %v20980_v25  ;;  %20983 = vst [vmem:[#allocation53_spill] sm:$0xff] %v20982_v36  ;;  %v20985_v31 = vsel %vm14932_vm13, 4294967295, %v20984_v31  ;;  %v3081_v49 = vand.u32 15, %v14856_v47  ;;  %v14939_v61 = vadd.s32 64, %v13380_v44  ;;  %v14942_v62 = vadd.s32 72, %v13380_v44  ;;  %vm21016_vm14 = vmpackc.low %vm14710_vm1, %vm14705_vm0 }
 0x18b   :  { %20986 = vst [vmem:[#allocation54_spill] sm:$0xff] %v20985_v31  ;;  %v20989_v57 = vcombine.high %v14612_v11, %v14617_v12  ;;  %vm14952_vm13 = vcmp.eq.s32.totalorder %v3110_v13, %v14537_v48  ;;  %v20990_v55 = vmov 0  ;;  %vm14957_vm15 = vcmp.eq.s32.totalorder %v3111_v45, %v14537_v48 }
 0x18c   :  { %20987 = vst [vmem:[#allocation55_spill] sm:$0xff] %v14939_v61  ;;  %20988 = vst [vmem:[#allocation56_spill] sm:$0xff] %v14942_v62  ;;  %v20991_v55 = vsel %vm14952_vm13, 4294967295, %v20990_v55  ;;  %v20993_v60 = vmov 0  ;;  %v3112_v25 = vand.u32 15, %v14874_v8  ;;  %v3113_v47 = vand.u32 15, %v14877_v37 }
 0x18d   :  { %2926 = vmatprep.subr.bf16.mxu1 %v20989_v57  ;;  %20992 = vst [vmem:[#allocation57_spill] sm:$0xff] %v20991_v55  ;;  %v20994_v60 = vsel %vm14957_vm15, 4294967295, %v20993_v60  ;;  %v14964_v57 = vadd.s32 320, %v13380_v44  ;;  %v14967_v34 = vadd.s32 328, %v13380_v44  ;;  %vm14974_vm13 = vcmp.eq.s32.totalorder %v3096_v51, %v14537_v48 }
 0x18e   :  { %20995 = vst [vmem:[#allocation58_spill] sm:$0xff] %v20994_v60  ;;  %v20998_v13 = vmov 0  ;;  %vm14979_vm15 = vcmp.eq.s32.totalorder %v3097_v38, %v14537_v48  ;;  %v21001_v45 = vmov 0  ;;  %v3098_v37 = vand.u32 15, %v14892_v10 }
 0x18f   :  { %20996 = vst [vmem:[#allocation59_spill] sm:$0xff] %v14964_v57  ;;  %20997 = vst [vmem:[#allocation60_spill] sm:$0xff] %v14967_v34  ;;  %v20999_v13 = vsel %vm14974_vm13, 4294967295, %v20998_v13  ;;  %v21002_v45 = vsel %vm14979_vm15, 4294967295, %v21001_v45  ;;  %v3099_v8 = vand.u32 15, %v14895_v33  ;;  %v14986_v28 = vadd.s32 208, %v13380_v44 }
 0x190   :  { %21000 = vst [vmem:[#allocation61_spill] sm:$0xff] %v20999_v13  ;;  %21003 = vst [vmem:[#allocation62_spill] sm:$0xff] %v21002_v45  ;;  %v21006_v51 = vcombine.low %v14594_v5, %v14599_v6  ;;  %vm14999_vm15 = vcmp.eq.s32.totalorder %v3128_v4, %v14537_v48  ;;  %v21007_v38 = vmov 0  ;;  %vm15004_vm13 = vcmp.eq.s32.totalorder %v3129_v41, %v14537_v48 }
 0x191   :  { %21004 = vst [vmem:[#allocation63_spill] sm:$0xff] %v14986_v28  ;;  %v21008_v38 = vsel %vm14999_vm15, 4294967295, %v21007_v38  ;;  %v21010_v33 = vmov 0  ;;  %v3130_v10 = vand.u32 15, %v14915_v29  ;;  %v3131_v5 = vand.u32 15, %v14918_v54 }
 0x192   :  { %2804 = vmatpush1.bf16.msra.mxu0 %v21006_v51  ;;  %21009 = vst [vmem:[#allocation65_spill] sm:$0xff] %v21008_v38  ;;  %v21011_v33 = vsel %vm15004_vm13, 4294967295, %v21010_v33  ;;  %v15011_v6 = vadd.s32 464, %v13380_v44  ;;  %v15014_v51 = vadd.s32 472, %v13380_v44  ;;  %v21015_v4 = vcombine.low %v14612_v11, %v14617_v12 }
 0x193   :  { %21012 = vst [vmem:[#allocation66_spill] sm:$0xff] %v21011_v33  ;;  %11968 = vmatprep.subr.msk.bf16.mxu0 %vm21016_vm14, %v20290_v24  ;;  %vm15030_vm15 = vcmp.eq.s32.totalorder %v3080_v32, %v14537_v48  ;;  %v21017_v41 = vmov 0  ;;  %vm15035_vm12 = vcmp.eq.s32.totalorder %v3081_v49, %v14537_v48  ;;  %v21019_v11 = vmov 0  ;;  %vm21024_vm14 = vmpackc.low %vm14731_vm3, %vm14726_vm2 }
 0x194   :  { %21013 = vst [vmem:[#allocation67_spill] sm:$0xff] %v15011_v6  ;;  %21014 = vst [vmem:[#allocation68_spill] sm:$0xff] %v15014_v51  ;;  %2927 = vmatpush1.bf16.msra.mxu1 %v21015_v4  ;;  %v21018_v41 = vsel %vm15030_vm15, 4294967295, %v21017_v41  ;;  %v21020_v11 = vsel %vm15035_vm12, 4294967295, %v21019_v11  ;;  %v3082_v12 = vand.u32 15, %v14939_v61  ;;  %v3083_v4 = vand.u32 15, %v14942_v62 }
 0x195   :  { %v15042_v24 = vadd.s32 80, %v13380_v44  ;;  %v15045_v54 = vadd.s32 88, %v13380_v44  ;;  %v21023_v29 = vmov 1.0|1.0   ;;  %vm15058_vm0 = vcmp.eq.s32.totalorder %v3112_v25, %v14537_v48  ;;  %2806 = vmatmul.mubr.bf16.vlgmr.msra.gmra.mrb[4].mxu0 %v13970_v0 }
 0x196   :  { %12000 = vmatprep.subr.msk.bf16.mxu1 %vm21024_vm14, %v21023_v29  ;;  %v21025_v32 = vmov 0  ;;  %vm15063_vm1 = vcmp.eq.s32.totalorder %v3113_v47, %v14537_v48  ;;  %v21027_v49 = vmov 0  ;;  %v3114_v62 = vand.u32 15, %v14964_v57  ;;  %vm21039_vm14 = vmpackc.low %vm14755_vm5, %vm14750_vm4 }
 0x197   :  { %21021 = vst [vmem:[#allocation69_spill] sm:$0xff] %v15042_v24  ;;  %21022 = vst [vmem:[#allocation70_spill] sm:$0xff] %v15045_v54  ;;  %v21026_v32 = vsel %vm15058_vm0, 4294967295, %v21025_v32  ;;  %v21028_v49 = vsel %vm15063_vm1, 4294967295, %v21027_v49  ;;  %v3115_v61 = vand.u32 15, %v14967_v34  ;;  %vm15081_vm13 = vcmp.eq.s32.totalorder %v3098_v37, %v14537_v48  ;;  %2929 = vmatmul.mubr.bf16.vlgmr.msra.gmra.mrb[4].mxu1 %v13970_v0  ;;  %11970 = vmatpush3.bf16.msk.msra.mxu0 %vm21039_vm14, %v21023_v29 }
 0x198   :  { %v21031_v47 = vmov 0  ;;  %vm15086_vm2 = vcmp.eq.s32.totalorder %v3099_v8, %v14537_v48  ;;  %v21034_v25 = vmov 0  ;;  %v3100_v34 = vand.u32 15, %v14986_v28  ;;  %vm21050_vm14 = vmpackc.low %vm14776_vm7, %vm14771_vm6 }
 0x199   :  { %v21032_v47 = vsel %vm15081_vm13, 4294967295, %v21031_v47  ;;  %v21035_v25 = vsel %vm15086_vm2, 4294967295, %v21034_v25  ;;  %v3101_v57 = vand.u32 15, %v14989_v26  ;;  %vm21040_vm3 = vnez %v20946_v58  ;;  %12002 = vmatpush3.bf16.msk.msra.mxu1 %vm21050_vm14, %v21023_v29  ;;  %vm21051_vm13 = vmpackc.low %vm14799_vm9, %vm14794_vm8 }
 0x19a   :  { %21033 = vst [vmem:[#allocation73_spill] sm:$0xff] %v21032_v47  ;;  %21036 = vst [vmem:[#allocation74_spill] sm:$0xff] %v21035_v25  ;;  %vm21041_vm2 = vnez %v20949_v50  ;;  %vm15110_vm1 = vcmp.eq.s32.totalorder %v3130_v10, %v14537_v48  ;;  %v21042_v8 = vmov 0  ;;  %vm15115_vm0 = vcmp.eq.s32.totalorder %v3131_v5, %v14537_v48  ;;  %11972 = vmatprep.subr.msk.bf16.mxu0 %vm21051_vm13, %v21023_v29 }
 0x19b   :  { %v21043_v8 = vsel %vm15110_vm1, 4294967295, %v21042_v8  ;;  %v21045_v0 = vmov 0  ;;  %v3132_v37 = vand.u32 15, %v15011_v6  ;;  %v3133_v26 = vand.u32 15, %v15014_v51  ;;  %vm21060_vm13 = vmpackc.low %vm14820_vm11, %vm14815_vm10 }
 0x19c   :  { %21044 = vst [vmem:[#allocation77_spill] sm:$0xff] %v21043_v8  ;;  %v21046_v0 = vsel %vm15115_vm0, 4294967295, %v21045_v0  ;;  %v15122_v28 = vadd.s32 480, %v13380_v44  ;;  %vm21052_vm4 = vnez %v20955_v21  ;;  %vm21053_vm5 = vnez %v20958_v22  ;;  %12004 = vmatprep.subr.msk.bf16.mxu1 %vm21060_vm13, %v21023_v29  ;;  %vm21077_vm11 = vmpackc.low %vm21041_vm2, %vm21040_vm3 }
 0x19d   :  { %21047 = vst [vmem:[#allocation78_spill] sm:$0xff] %v21046_v0  ;;  %vm15144_vm1 = vcmp.eq.s32.totalorder %v3082_v12, %v14537_v48  ;;  %v21054_v10 = vmov 0  ;;  %vm15149_vm6 = vcmp.eq.s32.totalorder %v3083_v4, %v14537_v48  ;;  %v21057_v5 = vmov 0  ;;  %11974 = vmatpush3.bf16.msk.msra.mxu0 %vm21077_vm11, %v21023_v29  ;;  %vm21088_vm11 = vmpackc.low %vm21053_vm5, %vm21052_vm4 }
 0x19e   :  { %21048 = vst [vmem:[#allocation79_spill] sm:$0xff] %v15122_v28  ;;  %v21055_v10 = vsel %vm15144_vm1, 4294967295, %v21054_v10  ;;  %v21058_v5 = vsel %vm15149_vm6, 4294967295, %v21057_v5  ;;  %v3084_v51 = vand.u32 15, %v15042_v24  ;;  %v3085_v6 = vand.u32 15, %v15045_v54  ;;  %12006 = vmatpush3.bf16.msk.msra.mxu1 %vm21088_vm11, %v21023_v29 }
 0x19f   :  { %21056 = vst [vmem:[#allocation81_spill] sm:$0xff] %v21055_v10  ;;  %21059 = vst [vmem:[#allocation82_spill] sm:$0xff] %v21058_v5  ;;  %vm21061_vm14 = vnez %v20963_v17  ;;  %vm21062_vm0 = vnez %v20966_v14  ;;  %vm15166_vm9 = vcmp.eq.s32.totalorder %v3114_v62, %v14537_v48  ;;  %v21063_v12 = vmov 0 }
 0x1a0   :  { %v21064_v12 = vsel %vm15166_vm9, 4294967295, %v21063_v12  ;;  %vm15171_vm7 = vcmp.eq.s32.totalorder %v3115_v61, %v14537_v48  ;;  %v21066_v4 = vmov 0  ;;  %v3116_v54 = vand.u32 15, %v15070_v9  ;;  %vm21089_vm6 = vmpackc.low %vm21062_vm0, %vm21061_vm14 }
 0x1a1   :  { %21065 = vst [vmem:[#allocation83_spill] sm:$0xff] %v21064_v12  ;;  %v21067_v4 = vsel %vm15171_vm7, 4294967295, %v21066_v4  ;;  %v3117_v24 = vand.u32 15, %v15073_v20  ;;  %vm21069_vm13 = vnez %v20972_v35  ;;  %vm21070_vm10 = vnez %v20975_v56  ;;  %11976 = vmatprep.subr.msk.bf16.mxu0 %vm21089_vm6, %v21023_v29 }
 0x1a2   :  { %21068 = vst [vmem:[#allocation84_spill] sm:$0xff] %v21067_v4  ;;  %vm15182_vm8 = vcmp.eq.s32.totalorder %v3100_v34, %v14537_v48  ;;  %v21071_v62 = vmov 0  ;;  %vm15187_vm9 = vcmp.eq.s32.totalorder %v3101_v57, %v14537_v48  ;;  %v21074_v61 = vmov 0  ;;  %vm21098_vm6 = vmpackc.low %vm21070_vm10, %vm21069_vm13 }
 0x1a3   :  { %v21072_v62 = vsel %vm15182_vm8, 4294967295, %v21071_v62  ;;  %v21075_v61 = vsel %vm15187_vm9, 4294967295, %v21074_v61  ;;  %v3102_v16 = vand.u32 15, %v15093_v19  ;;  %v3103_v9 = vand.u32 15, %v15096_v15  ;;  %12008 = vmatprep.subr.msk.bf16.mxu1 %vm21098_vm6, %v21023_v29 }
 0x1a4   :  { %21073 = vst [vmem:[#allocation85_spill] sm:$0xff] %v21072_v62  ;;  %21076 = vst [vmem:[#allocation86_spill] sm:$0xff] %v21075_v61  ;;  %vm21078_vm7 = vnez %v20982_v36  ;;  %vm21079_vm8 = vnez %v20985_v31  ;;  %vm15204_vm1 = vcmp.eq.s32.totalorder %v3132_v37, %v14537_v48  ;;  %v21080_v34 = vmov 0 }
 0x1a5   :  { %v21081_v34 = vsel %vm15204_vm1, 4294967295, %v21080_v34  ;;  %vm15209_vm9 = vcmp.eq.s32.totalorder %v3133_v26, %v14537_v48  ;;  %v21083_v57 = vmov 0  ;;  %v3134_v15 = vand.u32 15, %v15122_v28  ;;  %vm21116_vm13 = vmpackc.low %vm21079_vm8, %vm21078_vm7 }
 0x1a6   :  { %21082 = vst [vmem:[#allocation87_spill] sm:$0xff] %v21081_v34  ;;  %v21084_v57 = vsel %vm15209_vm9, 4294967295, %v21083_v57  ;;  %v3135_v19 = vand.u32 15, %v15125_v39  ;;  %v15216_v20 = vadd.s32 96, %v13380_v44  ;;  %v15219_v58 = vadd.s32 104, %v13380_v44  ;;  %11978 = vmatpush3.bf16.msk.msra.mxu0 %vm21116_vm13, %v21023_v29 }
 0x1a7   :  { %21085 = vst [vmem:[#allocation88_spill] sm:$0xff] %v21084_v57  ;;  %vm21090_vm3 = vnez %v20991_v55  ;;  %vm21091_vm2 = vnez %v20994_v60  ;;  %vm15238_vm1 = vcmp.eq.s32.totalorder %v3084_v51, %v14537_v48  ;;  %v21092_v26 = vmov 0 }
 0x1a8   :  { %21086 = vst [vmem:[#allocation89_spill] sm:$0xff] %v15216_v20  ;;  %21087 = vst [vmem:[#allocation90_spill] sm:$0xff] %v15219_v58  ;;  %v21093_v26 = vsel %vm15238_vm1, 4294967295, %v21092_v26  ;;  %vm15243_vm4 = vcmp.eq.s32.totalorder %v3085_v6, %v14537_v48  ;;  %v21094_v37 = vmov 0  ;;  %v15248_v39 = vadd.s32 352, %v13380_v44 }
 0x1a9   :  { %v21095_v37 = vsel %vm15243_vm4, 4294967295, %v21094_v37  ;;  %v15251_v28 = vadd.s32 360, %v13380_v44  ;;  %vm21099_vm11 = vnez %v20999_v13  ;;  %vm21100_vm9 = vnez %v21002_v45  ;;  %vm21123_vm13 = vmpackc.low %vm21091_vm2, %vm21090_vm3 }
 0x1aa   :  { %21096 = vst [vmem:[#allocation91_spill] sm:$0xff] %v15248_v39  ;;  %vm15264_vm0 = vcmp.eq.s32.totalorder %v3116_v54, %v14537_v48  ;;  %v21101_v6 = vmov 0  ;;  %vm15269_vm5 = vcmp.eq.s32.totalorder %v3117_v24, %v14537_v48  ;;  %v21103_v51 = vmov 0  ;;  %12010 = vmatpush3.bf16.msk.msra.mxu1 %vm21123_vm13, %v21023_v29 }
 0x1ab   :  { %21097 = vst [vmem:[#allocation92_spill] sm:$0xff] %v15251_v28  ;;  %v21102_v6 = vsel %vm15264_vm0, 4294967295, %v21101_v6  ;;  %v21104_v51 = vsel %vm15269_vm5, 4294967295, %v21103_v51  ;;  %v15274_v56 = vadd.s32 240, %v13380_v44  ;;  %v15277_v35 = vadd.s32 248, %v13380_v44 }
 0x1ac   :  { %vm21107_vm6 = vnez %v21008_v38  ;;  %vm21108_vm14 = vnez %v21011_v33  ;;  %vm15284_vm10 = vcmp.eq.s32.totalorder %v3102_v16, %v14537_v48  ;;  %v21109_v54 = vmov 0 }
 0x1ad   :  { %21105 = vst [vmem:[#allocation93_spill] sm:$0xff] %v15274_v56  ;;  %21106 = vst [vmem:[#allocation94_spill] sm:$0xff] %v15277_v35  ;;  %v21110_v54 = vsel %vm15284_vm10, 4294967295, %v21109_v54  ;;  %vm15289_vm0 = vcmp.eq.s32.totalorder %v3103_v9, %v14537_v48  ;;  %v21111_v24 = vmov 0  ;;  %v15294_v17 = vadd.s32 496, %v13380_v44 }
 0x1ae   :  { %v21112_v24 = vsel %vm15289_vm0, 4294967295, %v21111_v24  ;;  %v15297_v14 = vadd.s32 504, %v13380_v44  ;;  %v15300_v21 = vadd.s32 112, %v13380_v44  ;;  %vm15313_vm10 = vcmp.eq.s32.totalorder %v3134_v15, %v14537_v48  ;;  %vm21124_vm0 = vmpackc.low %vm21100_vm9, %vm21099_vm11 }
 0x1af   :  { %21113 = vst [vmem:[#allocation95_spill] sm:$0xff] %v15294_v17  ;;  %v21117_v9 = vmov 0  ;;  %vm15318_vm5 = vcmp.eq.s32.totalorder %v3135_v19, %v14537_v48  ;;  %v21119_v16 = vmov 0  ;;  %v3086_v31 = vand.u32 15, %v15216_v20  ;;  %11980 = vmatprep.subr.msk.bf16.mxu0 %vm21124_vm0, %v21023_v29  ;;  %vm21128_vm0 = vmpackc.low %vm21108_vm14, %vm21107_vm6 }
 0x1b0   :  { %21114 = vst [vmem:[#allocation96_spill] sm:$0xff] %v15297_v14  ;;  %21115 = vst [vmem:[#allocation97_spill] sm:$0xff] %v15300_v21  ;;  %v21118_v9 = vsel %vm15313_vm10, 4294967295, %v21117_v9  ;;  %v21120_v16 = vsel %vm15318_vm5, 4294967295, %v21119_v16  ;;  %v3087_v36 = vand.u32 15, %v15219_v58  ;;  %v15325_v22 = vadd.s32 120, %v13380_v44  ;;  %12012 = vmatprep.subr.msk.bf16.mxu1 %vm21128_vm0, %v21023_v29 }
 0x1b1   :  { %v15328_v50 = vadd.s32 368, %v13380_v44  ;;  %vm21125_vm7 = vnez %v21026_v32  ;;  %vm21126_vm8 = vnez %v21028_v49  ;;  %v3118_v15 = vand.u32 15, %v15248_v39  ;;  %vm21133_vm11 = vmpackc.low %vm15035_vm12, %vm15030_vm15 }
 0x1b2   :  { %21121 = vst [vmem:[#allocation98_spill] sm:$0xff] %v15325_v22  ;;  %v3119_v19 = vand.u32 15, %v15251_v28  ;;  %v15349_v58 = vadd.s32 376, %v13380_v44  ;;  %v3026_v20 = vadd.s32 640, %v13380_v44  ;;  %vm21129_vm13 = vnez %v21032_v47  ;;  %11982 = vmatpush3.bf16.msk.msra.mxu0 %vm21133_vm11, %v21023_v29  ;;  %vm21141_vm11 = vmpackc.low %vm21126_vm8, %vm21125_vm7 }
 0x1b3   :  { %21122 = vst [vmem:[#allocation99_spill] sm:$0xff] %v15328_v50  ;;  %vm21130_vm5 = vnez %v21035_v25  ;;  %v3104_v39 = vand.u32 15, %v15274_v56  ;;  %v3105_v28 = vand.u32 15, %v15277_v35  ;;  %v3027_v13 = vadd.s32 648, %v13380_v44  ;;  %12014 = vmatpush3.bf16.msk.msra.mxu1 %vm21141_vm11, %v21023_v29 }
 0x1b4   :  { %21127 = vst [vmem:[#allocation100_spill] sm:$0xff] %v15349_v58  ;;  %v3058_v45 = vadd.s32 896, %v13380_v44  ;;  %vm21131_vm9 = vnez %v21043_v8  ;;  %vm21132_vm3 = vnez %v21046_v0  ;;  %v3136_v38 = vand.u32 15, %v15294_v17  ;;  %vm21142_vm0 = vmpackc.low %vm21130_vm5, %vm21129_vm13 }
 0x1b5   :  { %v3137_v33 = vand.u32 15, %v15297_v14  ;;  %v3088_v55 = vand.u32 15, %v15300_v21  ;;  %v3059_v60 = vadd.s32 904, %v13380_v44  ;;  %vm21134_vm6 = vnez %v21055_v10  ;;  %11984 = vmatprep.subr.msk.bf16.mxu0 %vm21142_vm0, %v21023_v29  ;;  %vm21151_vm0 = vmpackc.low %vm21132_vm3, %vm21131_vm9  ;;  %v2684_v10 = vpop.f32.mrb[0].mxu1 }
 0x1b6   :  { %vm21135_vm2 = vnez %v21058_v5  ;;  %vm15385_vm10 = vcmp.eq.s32.totalorder %v3086_v31, %v14537_v48  ;;  %v21136_v14 = vmov 0  ;;  %vm15390_vm4 = vcmp.eq.s32.totalorder %v3087_v36, %v14537_v48  ;;  %12016 = vmatprep.subr.msk.bf16.mxu1 %vm21151_vm0, %v21023_v29  ;;  %v2686_v47 = vpop.f32.mrb[1].mxu1 }
 0x1b7   :  { %v21137_v14 = vsel %vm15385_vm10, 4294967295, %v21136_v14  ;;  %v21139_v21 = vmov 0  ;;  %v3089_v17 = vand.u32 15, %v15325_v22  ;;  %v3120_v35 = vand.u32 15, %v15328_v50  ;;  %vm21171_vm3 = vmpackc.low %vm21135_vm2, %vm21134_vm6 }
 0x1b8   :  { %21138 = vst [vmem:[#allocation101_spill] sm:$0xff] %v21137_v14  ;;  %v21140_v21 = vsel %vm15390_vm4, 4294967295, %v21139_v21  ;;  %vm21143_vm14 = vnez %v21064_v12  ;;  %vm21144_vm15 = vnez %v21067_v4  ;;  %vm15413_vm4 = vcmp.eq.s32.totalorder %v3118_v15, %v14537_v48  ;;  %11986 = vmatpush3.bf16.msk.msra.mxu0 %vm21171_vm3, %v21023_v29 }
 0x1b9   :  { %v21145_v36 = vmov 0  ;;  %vm15418_vm7 = vcmp.eq.s32.totalorder %v3119_v19, %v14537_v48  ;;  %v21148_v31 = vmov 0  ;;  %v3121_v50 = vand.u32 15, %v15349_v58  ;;  %vm21179_vm3 = vmpackc.low %vm21144_vm15, %vm21143_vm14 }
 0x1ba   :  { %v21146_v36 = vsel %vm15413_vm4, 4294967295, %v21145_v36  ;;  %v21149_v31 = vsel %vm15418_vm7, 4294967295, %v21148_v31  ;;  %v3154_v22 = vand.u32 15, %v3026_v20  ;;  %vm21152_vm11 = vnez %v21072_v62  ;;  %12018 = vmatpush3.bf16.msk.msra.mxu1 %vm21179_vm3, %v21023_v29 }
 0x1bb   :  { %21147 = vst [vmem:[#allocation102_spill] sm:$0xff] %v21146_v36  ;;  %21150 = vst [vmem:[#allocation103_spill] sm:$0xff] %v21149_v31  ;;  %vm21153_vm12 = vnez %v21075_v61  ;;  %vm15434_vm5 = vcmp.eq.s32.totalorder %v3104_v39, %v14537_v48  ;;  %v21154_v15 = vmov 0  ;;  %vm15439_vm8 = vcmp.eq.s32.totalorder %v3105_v28, %v14537_v48  ;;  %v2561_v61 = vpop.f32.mrb[0].mxu0 }
 0x1bc   :  { %v21155_v15 = vsel %vm15434_vm5, 4294967295, %v21154_v15  ;;  %v21157_v20 = vmov 0  ;;  %v3155_v19 = vand.u32 15, %v3027_v13  ;;  %v3186_v58 = vand.u32 15, %v3058_v45  ;;  %v2563_v5 = vpop.f32.mrb[1].mxu0 }
 0x1bd   :  { %21156 = vst [vmem:[#allocation104_spill] sm:$0xff] %v21155_v15  ;;  %v21158_v20 = vsel %vm15439_vm8, 4294967295, %v21157_v20  ;;  %vm21160_vm9 = vnez %v21081_v34  ;;  %vm21161_vm0 = vnez %v21084_v57  ;;  %vm15448_vm7 = vcmp.eq.s32.totalorder %v3136_v38, %v14537_v48  ;;  %vm21180_vm8 = vmpackc.low %vm21153_vm12, %vm21152_vm11  ;;  %v2565_v25 = vpop.f32.mrb[2].mxu0 }
 0x1be   :  { %21159 = vst [vmem:[#allocation105_spill] sm:$0xff] %v21158_v20  ;;  %v21162_v56 = vmov 0  ;;  %vm15453_vm13 = vcmp.eq.s32.totalorder %v3137_v33, %v14537_v48  ;;  %v21165_v39 = vmov 0  ;;  %vm15458_vm5 = vcmp.eq.s32.totalorder %v3088_v55, %v14537_v48  ;;  %11988 = vmatprep.subr.msk.bf16.mxu0 %vm21180_vm8, %v21023_v29  ;;  %vm21189_vm8 = vmpackc.low %vm21161_vm0, %vm21160_vm9 }
 0x1bf   :  { %v21163_v56 = vsel %vm15448_vm7, 4294967295, %v21162_v56  ;;  %v21166_v39 = vsel %vm15453_vm13, 4294967295, %v21165_v39  ;;  %v21168_v28 = vmov 0  ;;  %v3187_v13 = vand.u32 15, %v3059_v60  ;;  %12020 = vmatprep.subr.msk.bf16.mxu1 %vm21189_vm8, %v21023_v29 }
 0x1c0   :  { %21164 = vst [vmem:[#allocation106_spill] sm:$0xff] %v21163_v56  ;;  %21167 = vst [vmem:[#allocation107_spill] sm:$0xff] %v21166_v39  ;;  %v21169_v28 = vsel %vm15458_vm5, 4294967295, %v21168_v28  ;;  %vm21172_vm7 = vnez %v21095_v37  ;;  %vm15473_vm13 = vcmp.eq.s32.totalorder %v3089_v17, %v14537_v48  ;;  %v21173_v33 = vmov 0 }
 0x1c1   :  { %21170 = vst [vmem:[#allocation108_spill] sm:$0xff] %v21169_v28  ;;  %v21174_v33 = vsel %vm15473_vm13, 4294967295, %v21173_v33  ;;  %vm15478_vm5 = vcmp.eq.s32.totalorder %v3120_v35, %v14537_v48  ;;  %v21176_v55 = vmov 0  ;;  %v3010_v60 = vadd.s32 512, %v13380_v44  ;;  %vm21209_vm9 = vmpackc.low %vm21172_vm7, %vm15238_vm1 }
 0x1c2   :  { %21175 = vst [vmem:[#allocation109_spill] sm:$0xff] %v21174_v33  ;;  %v21177_v55 = vsel %vm15478_vm5, 4294967295, %v21176_v55  ;;  %v3011_v45 = vadd.s32 520, %v13380_v44  ;;  %vm21181_vm6 = vnez %v21102_v6  ;;  %vm21182_vm2 = vnez %v21104_v51  ;;  %11990 = vmatpush3.bf16.msk.msra.mxu0 %vm21209_vm9, %v21023_v29 }
 0x1c3   :  { %21178 = vst [vmem:[#allocation110_spill] sm:$0xff] %v21177_v55  ;;  %vm15501_vm13 = vcmp.eq.s32.totalorder %v3121_v50, %v14537_v48  ;;  %v21183_v17 = vmov 0  ;;  %vm15506_vm14 = vcmp.eq.s32.totalorder %v3154_v22, %v14537_v48  ;;  %v21186_v35 = vmov 0  ;;  %vm21213_vm9 = vmpackc.low %vm21182_vm2, %vm21181_vm6 }
 0x1c4   :  { %v21184_v17 = vsel %vm15501_vm13, 4294967295, %v21183_v17  ;;  %v21187_v35 = vsel %vm15506_vm14, 4294967295, %v21186_v35  ;;  %v3042_v38 = vadd.s32 768, %v13380_v44  ;;  %v3043_v62 = vadd.s32 776, %v13380_v44  ;;  %12022 = vmatpush3.bf16.msk.msra.mxu1 %vm21213_vm9, %v21023_v29 }
 0x1c5   :  { %21185 = vst [vmem:[#allocation111_spill] sm:$0xff] %v21184_v17  ;;  %21188 = vst [vmem:[#allocation112_spill] sm:$0xff] %v21187_v35  ;;  %vm21190_vm3 = vnez %v21110_v54  ;;  %vm21191_vm5 = vnez %v21112_v24  ;;  %vm15523_vm12 = vcmp.eq.s32.totalorder %v3155_v19, %v14537_v48  ;;  %v21192_v50 = vmov 0 }
 0x1c6   :  { %v21193_v50 = vsel %vm15523_vm12, 4294967295, %v21192_v50  ;;  %vm15528_vm15 = vcmp.eq.s32.totalorder %v3186_v58, %v14537_v48  ;;  %v21195_v22 = vmov 0  ;;  %v3028_v57 = vadd.s32 656, %v13380_v44 }
 0x1c7   :  { %21194 = vst [vmem:[#allocation113_spill] sm:$0xff] %v21193_v50  ;;  %v21196_v22 = vsel %vm15528_vm15, 4294967295, %v21195_v22  ;;  %v3029_v34 = vadd.s32 664, %v13380_v44  ;;  %v21198_v12 = vrot.slane %v14785_v63, %v14762_v40  ;;  %vm21200_vm8 = vnez %v21118_v9  ;;  %vm21214_vm15 = vmpackc.low %vm21191_vm5, %vm21190_vm3 }
 0x1c8   :  { %21197 = vst [vmem:[#allocation114_spill] sm:$0xff] %v21196_v22  ;;  %vm21201_vm11 = vnez %v21120_v16  ;;  %vm15544_vm0 = vcmp.eq.s32.totalorder %v3187_v13, %v14537_v48  ;;  %v21202_v58 = vmov 0  ;;  %v3060_v19 = vadd.s32 912, %v13380_v44  ;;  %11992 = vmatprep.subr.msk.bf16.mxu0 %vm21214_vm15, %v21023_v29 }
 0x1c9   :  { %v15537_v4 = vadd.f32 %v2561_v61, %v21198_v12  ;;  %v21203_v58 = vsel %vm15544_vm0, 4294967295, %v21202_v58  ;;  %v3061_v8 = vadd.s32 920, %v13380_v44  ;;  %v21205_v12 = vrot.slane %v14785_v63, %v14765_v46  ;;  %vm21216_vm9 = vmpackc.low %vm21201_vm11, %vm21200_vm8 }
 0x1ca   :  { %21204 = vst [vmem:[#allocation116_spill] sm:$0xff] %v21203_v58  ;;  %v21207_v40 = vrot.slane %v14785_v63, %v14827_v43  ;;  %vm21210_vm0 = vnez %v21140_v21  ;;  %v3139_v13 = vand.u32 15, %v3011_v45  ;;  %v2566_v43 = vpop.f32.mrb[3].mxu0  ;;  %vm21215_vm1 = vnez %v21149_v31  ;;  %12024 = vmatprep.subr.msk.bf16.mxu1 %vm21216_vm9, %v21023_v29 }
 0x1cb   :  { %21199 = vst [vmem:[#allocation115_spill] sm:$0xff] %v15537_v4  ;;  %v15553_v61 = vadd.f32 %v2684_v10, %v21205_v12  ;;  %v3138_v10 = vand.u32 15, %v3010_v60  ;;  %v20466_v12 = vmax.f32 %v15537_v4, 0.0  ;;  %v3171_v43 = vand.u32 15, %v3043_v62 }
 0x1cc   :  { %v15558_v0 = vadd.f32 %v2563_v5, %v21207_v40  ;;  %v21211_v40 = vrot.slane %v14785_v63, %v14830_v52  ;;  %v2688_v5 = vpop.f32.mrb[2].mxu1  ;;  %v3170_v63 = vand.u32 15, %v3042_v38  ;;  %vm21217_vm15 = vnez %v21155_v15 }
 0x1cd   :  { %21206 = vst [vmem:[#allocation117_spill] sm:$0xff] %v15553_v61  ;;  %v2689_v45 = vpop.f32.mrb[3].mxu1  ;;  %vm21218_vm3 = vnez %v21158_v20  ;;  %v3157_v38 = vand.u32 15, %v3029_v34  ;;  %vm21219_vm7 = vcmask 1041408   ;;  %vm21220_vm6 = vnez %v21163_v56 }
 0x1ce   :  { %21208 = vst [vmem:[#allocation118_spill] sm:$0xff] %v15558_v0  ;;  %v15574_v25 = vadd.f32 %v2686_v47, %v21211_v40  ;;  %v3156_v40 = vand.u32 15, %v3028_v57  ;;  %v3652_v62 = vsel %vm21219_vm7, %v20466_v12, 0.0  ;;  %vm21221_vm2 = vnez %v21166_v39  ;;  %vm21223_vm9 = vmmov %vm21219_vm7 }
 0x1cf   :  { %v3188_v45 = vand.u32 15, %v3060_v19  ;;  %v3189_v60 = vand.u32 15, %v3061_v8  ;;  %v3653_v47 = vrot.slane %v3652_v62, 4  ;;  %v21222_v52 = vmax.f32 %v15553_v61, 0.0  ;;  %vm21225_vm5 = vmmov %vm21219_vm7 }
 0x1d0   :  { %21212 = vst [vmem:[#allocation119_spill] sm:$0xff] %v15574_v25  ;;  %v20470_v5 = vmax.f32 %v15574_v25, 0.0  ;;  %v21224_v34 = vmax.f32 %v15558_v0, 0.0  ;;  %vm21226_vm7 = vmpackc.low %vm21210_vm0, %vm15385_vm10  ;;  %vm21227_vm12 = vnez %v21169_v28  ;;  %vm21228_vm8 = vnez %v21174_v33 }
 0x1d1   :  { %v3666_v46 = vsel %vm21223_vm9, %v21222_v52, 0.0  ;;  %11994 = vmatpush3.bf16.msk.msra.mxu0 %vm21226_vm7, %v21023_v29  ;;  %vm15629_vm14 = vcmp.eq.s32.totalorder %v3138_v10, %v14537_v48  ;;  %v21229_v8 = vmov 0  ;;  %vm15634_vm9 = vcmp.eq.s32.totalorder %v3139_v13, %v14537_v48  ;;  %vm21233_vm7 = vmpackc.low %vm21215_vm1, %vm15413_vm4 }
 0x1d2   :  { %v3659_v57 = vsel %vm21225_vm5, %v21224_v34, 0.0  ;;  %v21230_v8 = vsel %vm15629_vm14, 4294967295, %v21229_v8  ;;  %v21231_v52 = vmov 0  ;;  %v3667_v19 = vrot.slane %v3666_v46, 4  ;;  %12026 = vmatpush3.bf16.msk.msra.mxu1 %vm21233_vm7, %v21023_v29  ;;  %vm21234_vm11 = vmpackc.low %vm21218_vm3, %vm21217_vm15 }
 0x1d3   :  { %v21232_v52 = vsel %vm15634_vm9, 4294967295, %v21231_v52  ;;  %v3660_v34 = vrot.slane %v3659_v57, 4  ;;  %v3673_v12 = vsel %vm21225_vm5, %v20470_v5, 0.0  ;;  %11996 = vmatprep.subr.msk.bf16.mxu0 %vm21234_vm11, %v21023_v29  ;;  %vm21235_vm10 = vnez %v21177_v55  ;;  %vm21240_vm11 = vmpackc.low %vm21221_vm2, %vm21220_vm6 }
 0x1d4   :  { %vm15658_vm5 = vcmp.eq.s32.totalorder %v3170_v63, %v14537_v48  ;;  %v21236_v10 = vmov 0  ;;  %vm15663_vm4 = vcmp.eq.s32.totalorder %v3171_v43, %v14537_v48  ;;  %v21238_v13 = vmov 0  ;;  %12028 = vmatprep.subr.msk.bf16.mxu1 %vm21240_vm11, %v21023_v29  ;;  %vm21256_vm6 = vmpackc.low %vm15501_vm13, %vm21235_vm10 }
 0x1d5   :  { %v21237_v10 = vsel %vm15658_vm5, 4294967295, %v21236_v10  ;;  %v21239_v13 = vsel %vm15663_vm4, 4294967295, %v21238_v13  ;;  %v3012_v5 = vadd.s32 528, %v13380_v44  ;;  %v3654_v25 = vadd.f32 %v3653_v47, %v3652_v62 }
 0x1d6   :  { %v3674_v0 = vrot.slane %v3673_v12, 4  ;;  %vm21241_vm7 = vnez %v21187_v35  ;;  %vm21242_vm0 = vnez %v21193_v50  ;;  %vm15679_vm3 = vcmp.eq.s32.totalorder %v3156_v40, %v14537_v48  ;;  %12030 = vmatpush3.bf16.msk.msra.mxu1 %vm21256_vm6, %v21023_v29 }
 0x1d7   :  { %v21243_v63 = vmov 0  ;;  %vm15684_vm1 = vcmp.eq.s32.totalorder %v3157_v38, %v14537_v48  ;;  %v21245_v43 = vmov 0  ;;  %v3013_v47 = vadd.s32 536, %v13380_v44 }
 0x1d8   :  { %v21244_v63 = vsel %vm15679_vm3, 4294967295, %v21243_v63  ;;  %v21246_v43 = vsel %vm15684_vm1, 4294967295, %v21245_v43  ;;  %v3044_v62 = vadd.s32 784, %v13380_v44  ;;  %v3668_v61 = vadd.f32 %v3667_v19, %v3666_v46  ;;  %vm21255_vm1 = vmpackc.low %vm21228_vm8, %vm21227_vm12 }
 0x1d9   :  { %v3661_v4 = vadd.f32 %v3660_v34, %v3659_v57  ;;  %vm21247_vm11 = vnez %v21196_v22  ;;  %vm21248_vm15 = vnez %v21203_v58  ;;  %vm15695_vm2 = vcmp.eq.s32.totalorder %v3188_v45, %v14537_v48  ;;  %11998 = vmatpush3.bf16.msk.msra.mxu0 %vm21255_vm1, %v21023_v29  ;;  %vm21257_vm12 = vmpackc.low %vm21242_vm0, %vm21241_vm7 }
 0x1da   :  { %v21249_v40 = vmov 0  ;;  %vm15700_vm3 = vcmp.eq.s32.totalorder %v3189_v60, %v14537_v48  ;;  %v21252_v38 = vmov 0  ;;  %v3655_v56 = vrot.slane %v3654_v25, 2  ;;  %12032 = vmatprep.subr.msk.bf16.mxu0 %vm21257_vm12, %v21023_v29  ;;  %vm21258_vm1 = vmpackc.low %vm21248_vm15, %vm21247_vm11 }
 0x1db   :  { %v21250_v40 = vsel %vm15695_vm2, 4294967295, %v21249_v40  ;;  %v21253_v38 = vsel %vm15700_vm3, 4294967295, %v21252_v38  ;;  %v3675_v39 = vadd.f32 %v3674_v0, %v3673_v12  ;;  %v3045_v46 = vadd.s32 792, %v13380_v44  ;;  %12064 = vmatprep.subr.msk.bf16.mxu1 %vm21258_vm1, %v21023_v29  ;;  %vm21279_vm8 = vmpackc.low %vm15634_vm9, %vm15629_vm14 }
 0x1dc   :  { %21251 = vst [vmem:[#allocation120_spill] sm:$0xff] %v21250_v40  ;;  %21254 = vst [vmem:[#allocation121_spill] sm:$0xff] %v21253_v38  ;;  %v3030_v45 = vadd.s32 672, %v13380_v44  ;;  %v3669_v57 = vrot.slane %v3668_v61, 2  ;;  %v3662_v19 = vrot.slane %v3661_v4, 2  ;;  %v3140_v0 = vand.u32 15, %v3012_v5 }
 0x1dd   :  { %v3031_v12 = vadd.s32 680, %v13380_v44  ;;  %v3656_v60 = vadd.f32 %v3655_v56, %v3654_v25  ;;  %v3676_v34 = vrot.slane %v3675_v39, 2  ;;  %v3141_v55 = vand.u32 15, %v3013_v47  ;;  %vm21288_vm9 = vmpackc.low %vm15700_vm3, %vm15695_vm2 }
 0x1de   :  { %v3172_v17 = vand.u32 15, %v3044_v62  ;;  %v3670_v28 = vadd.f32 %v3669_v57, %v3668_v61  ;;  %v3663_v50 = vadd.f32 %v3662_v19, %v3661_v4  ;;  %v3062_v35 = vadd.s32 928, %v13380_v44 }
 0x1df   :  { %v3063_v33 = vadd.s32 936, %v13380_v44  ;;  %v3657_v5 = vrot.slane %v3656_v60, 1  ;;  %v3677_v15 = vadd.f32 %v3676_v34, %v3675_v39  ;;  %v3173_v20 = vand.u32 15, %v3045_v46 }
 0x1e0   :  { %v3158_v56 = vand.u32 15, %v3030_v45  ;;  %v3671_v25 = vrot.slane %v3670_v28, 1  ;;  %v3664_v36 = vrot.slane %v3663_v50, 1  ;;  %v3014_v58 = vadd.s32 544, %v13380_v44 }
 0x1e1   :  { %v3015_v22 = vadd.s32 552, %v13380_v44  ;;  %v3678_v31 = vrot.slane %v3677_v15, 1  ;;  %v3159_v14 = vand.u32 15, %v3031_v12  ;;  %v3046_v47 = vadd.s32 800, %v13380_v44 }
 0x1e2   :  { %v3047_v4 = vadd.s32 808, %v13380_v44  ;;  %v3665_v61 = vadd.f32 %v3664_v36, %v3663_v50  ;;  %vm15742_vm6 = vcmp.eq.s32.totalorder %v3140_v0, %v14537_v48  ;;  %v21259_v39 = vmov 0 }
 0x1e3   :  { %v21260_v39 = vsel %vm15742_vm6, 4294967295, %v21259_v39  ;;  %v3190_v62 = vand.u32 15, %v3062_v35  ;;  %v3191_v46 = vand.u32 15, %v3063_v33  ;;  %v3679_v45 = vadd.f32 %v3678_v31, %v3677_v15 }
 0x1e4   :  { %21261 = vst [vmem:[#allocation122_spill] sm:$0xff] %v21260_v39  ;;  %v3658_v57 = vadd.f32 %v3657_v5, %v3656_v60  ;;  %vm15751_vm11 = vcmp.eq.s32.totalorder %v3141_v55, %v14537_v48  ;;  %v21262_v36 = vmov 0  ;;  %vm15756_vm12 = vcmp.eq.s32.totalorder %v3172_v17, %v14537_v48  ;;  %3772 = vmatprep.mubr.f32.mxu0 %v3665_v61 }
 0x1e5   :  { %v21263_v36 = vsel %vm15751_vm11, 4294967295, %v21262_v36  ;;  %v21265_v50 = vmov 0  ;;  %v3672_v35 = vadd.f32 %v3671_v25, %v3670_v28  ;;  %vm21268_vm15 = vnez %v21244_v63  ;;  %3842 = vmatprep.mubr.f32.mxu1 %v3679_v45  ;;  %vm21303_vm2 = vmpackc.low %vm15751_vm11, %vm15742_vm6 }
 0x1e6   :  { %21264 = vst [vmem:[#allocation123_spill] sm:$0xff] %v21263_v36  ;;  %v21266_v50 = vsel %vm15756_vm12, 4294967295, %v21265_v50  ;;  %vm21269_vm7 = vnez %v21246_v43  ;;  %vm15765_vm10 = vcmp.eq.s32.totalorder %v3173_v20, %v14537_v48  ;;  %v21270_v31 = vmov 0  ;;  %3773 = vmatmul.mubr.f32.vlgmr.msra.gmra.mrb[8].mxu0 %v3658_v57 }
 0x1e7   :  { %21267 = vst [vmem:[#allocation124_spill] sm:$0xff] %v21266_v50  ;;  %v21271_v31 = vsel %vm15765_vm10, 4294967295, %v21270_v31  ;;  %v3142_v15 = vand.u32 15, %v3014_v58  ;;  %v3143_v33 = vand.u32 15, %v3015_v22  ;;  %vm15774_vm13 = vcmp.eq.s32.totalorder %v3158_v56, %v14537_v48  ;;  %3843 = vmatmul.mubr.f32.vlgmr.msra.gmra.mrb[8].mxu1 %v3672_v35  ;;  %12034 = vmatpush3.bf16.msk.msra.mxu0 %vm21279_vm8, %v21023_v29  ;;  %vm21286_vm8 = vmpackc.low %vm15663_vm4, %vm15658_vm5 }
 0x1e8   :  { %21272 = vst [vmem:[#allocation125_spill] sm:$0xff] %v21271_v31  ;;  %v21273_v28 = vmov 0  ;;  %vm15779_vm0 = vcmp.eq.s32.totalorder %v3159_v14, %v14537_v48  ;;  %v21276_v20 = vmov 0  ;;  %v3174_v55 = vand.u32 15, %v3046_v47  ;;  %12066 = vmatpush3.bf16.msk.msra.mxu1 %vm21286_vm8, %v21023_v29  ;;  %vm21287_vm1 = vmpackc.low %vm21269_vm7, %vm21268_vm15 }
 0x1e9   :  { %v21274_v28 = vsel %vm15774_vm13, 4294967295, %v21273_v28  ;;  %v21277_v20 = vsel %vm15779_vm0, 4294967295, %v21276_v20  ;;  %v3175_v17 = vand.u32 15, %v3047_v4  ;;  %vm15794_vm13 = vcmp.eq.s32.totalorder %v3190_v62, %v14537_v48  ;;  %12036 = vmatprep.subr.msk.bf16.mxu0 %vm21287_vm1, %v21023_v29  ;;  %12068 = vmatprep.subr.msk.bf16.mxu1 %vm21288_vm9, %v21023_v29  ;;  %vm21304_vm9 = vmpackc.low %vm15765_vm10, %vm15756_vm12 }
 0x1ea   :  { %21275 = vst [vmem:[#allocation126_spill] sm:$0xff] %v21274_v28  ;;  %21278 = vst [vmem:[#allocation127_spill] sm:$0xff] %v21277_v20  ;;  %v21280_v14 = vmov 0  ;;  %vm15799_vm0 = vcmp.eq.s32.totalorder %v3191_v46, %v14537_v48  ;;  %v21283_v22 = vmov 0  ;;  %vm21289_vm8 = vnez %v21274_v28 }
 0x1eb   :  { %v21281_v14 = vsel %vm15794_vm13, 4294967295, %v21280_v14  ;;  %v21284_v22 = vsel %vm15799_vm0, 4294967295, %v21283_v22  ;;  %vm21290_vm5 = vnez %v21277_v20  ;;  %vm15830_vm15 = vcmp.eq.s32.totalorder %v3142_v15, %v14537_v48  ;;  %12038 = vmatpush3.bf16.msk.msra.mxu0 %vm21303_vm2, %v21023_v29  ;;  %vm21306_vm2 = vmpackc.low %vm15799_vm0, %vm15794_vm13 }
 0x1ec   :  { %21282 = vst [vmem:[#allocation128_spill] sm:$0xff] %v21281_v14  ;;  %21285 = vst [vmem:[#allocation129_spill] sm:$0xff] %v21284_v22  ;;  %v21291_v58 = vmov 0  ;;  %vm15835_vm1 = vcmp.eq.s32.totalorder %v3143_v33, %v14537_v48  ;;  %v21294_v19 = vmov 0  ;;  %vm15844_vm14 = vcmp.eq.s32.totalorder %v3174_v55, %v14537_v48  ;;  %12070 = vmatpush3.bf16.msk.msra.mxu1 %vm21304_vm9, %v21023_v29 }
 0x1ed   :  { %v21292_v58 = vsel %vm15830_vm15, 4294967295, %v21291_v58  ;;  %v21295_v19 = vsel %vm15835_vm1, 4294967295, %v21294_v19  ;;  %v21297_v0 = vmov 0  ;;  %vm15849_vm4 = vcmp.eq.s32.totalorder %v3175_v17, %v14537_v48  ;;  %vm21305_vm3 = vmpackc.low %vm21290_vm5, %vm21289_vm8  ;;  %12072 = vmatprep.subr.msk.bf16.mxu1 %vm21306_vm2, %v21023_v29 }
 0x1ee   :  { %21293 = vst [vmem:[#allocation130_spill] sm:$0xff] %v21292_v58  ;;  %21296 = vst [vmem:[#allocation131_spill] sm:$0xff] %v21295_v19  ;;  %v21298_v0 = vsel %vm15844_vm14, 4294967295, %v21297_v0  ;;  %v21300_v12 = vmov 0  ;;  %12040 = vmatprep.subr.msk.bf16.mxu0 %vm21305_vm3, %v21023_v29  ;;  %v3032_v60 = vadd.s32 688, %v13380_v44  ;;  %v3033_v34 = vadd.s32 696, %v13380_v44 }
 0x1ef   :  { %21299 = vst [vmem:[#allocation132_spill] sm:$0xff] %v21298_v0  ;;  %v21301_v12 = vsel %vm15849_vm4, 4294967295, %v21300_v12  ;;  %vm20517_vm6 = vmpackc.low %vm15835_vm1, %vm15830_vm15  ;;  %v3064_v5 = vadd.s32 944, %v13380_v44  ;;  %v3065_v56 = vadd.s32 952, %v13380_v44  ;;  %v3016_v25 = vadd.s32 560, %v13380_v44 }
 0x1f0   :  { %21302 = vst [vmem:[#allocation133_spill] sm:$0xff] %v21301_v12  ;;  %vm20515_vm9 = vmpackc.low %vm15849_vm4, %vm15844_vm14  ;;  %12042 = vmatpush3.bf16.msk.msra.mxu0 %vm20517_vm6, %v21023_v29  ;;  %v3017_v47 = vadd.s32 568, %v13380_v44  ;;  %v3048_v4 = vadd.s32 816, %v13380_v44  ;;  %v3049_v61 = vadd.s32 824, %v13380_v44  ;;  %v3160_v62 = vand.u32 15, %v3032_v60 }
 0x1f1   :  { %12074 = vmatpush3.bf16.msk.msra.mxu1 %vm20515_vm9, %v21023_v29  ;;  %v3161_v46 = vand.u32 15, %v3033_v34  ;;  %v3192_v45 = vand.u32 15, %v3064_v5  ;;  %v3193_v57 = vand.u32 15, %v3065_v56  ;;  %v3144_v35 = vand.u32 15, %v3016_v25 }
 0x1f2   :  { %v3145_v15 = vand.u32 15, %v3017_v47  ;;  %v3176_v33 = vand.u32 15, %v3048_v4  ;;  %vm15906_vm3 = vcmp.eq.s32.totalorder %v3160_v62, %v14537_v48  ;;  %v21307_v55 = vmov 0 }
 0x1f3   :  { %v21308_v55 = vsel %vm15906_vm3, 4294967295, %v21307_v55  ;;  %vm15911_vm2 = vcmp.eq.s32.totalorder %v3161_v46, %v14537_v48  ;;  %v21310_v17 = vmov 0  ;;  %vm15916_vm9 = vcmp.eq.s32.totalorder %v3192_v45, %v14537_v48 }
 0x1f4   :  { %21309 = vst [vmem:[#allocation134_spill] sm:$0xff] %v21308_v55  ;;  %v21311_v17 = vsel %vm15911_vm2, 4294967295, %v21310_v17  ;;  %v21313_v0 = vmov 0  ;;  %vm15921_vm6 = vcmp.eq.s32.totalorder %v3193_v57, %v14537_v48  ;;  %v21316_v60 = vmov 0  ;;  %vm20523_vm14 = vmpackc.low %vm15911_vm2, %vm15906_vm3 }
 0x1f5   :  { %21312 = vst [vmem:[#allocation135_spill] sm:$0xff] %v21311_v17  ;;  %v21314_v0 = vsel %vm15916_vm9, 4294967295, %v21313_v0  ;;  %v21317_v60 = vsel %vm15921_vm6, 4294967295, %v21316_v60  ;;  %vm15930_vm4 = vcmp.eq.s32.totalorder %v3144_v35, %v14537_v48  ;;  %v21319_v34 = vmov 0  ;;  %12044 = vmatprep.subr.msk.bf16.mxu0 %vm20523_vm14, %v21023_v29  ;;  %vm20525_vm15 = vmpackc.low %vm15921_vm6, %vm15916_vm9 }
 0x1f6   :  { %21315 = vst [vmem:[#allocation136_spill] sm:$0xff] %v21314_v0  ;;  %21318 = vst [vmem:[#allocation137_spill] sm:$0xff] %v21317_v60  ;;  %v21320_v34 = vsel %vm15930_vm4, 4294967295, %v21319_v34  ;;  %vm15945_vm1 = vcmp.eq.s32.totalorder %v3145_v15, %v14537_v48  ;;  %v21322_v5 = vmov 0  ;;  %v3177_v56 = vand.u32 15, %v3049_v61  ;;  %12076 = vmatprep.subr.msk.bf16.mxu1 %vm20525_vm15, %v21023_v29 }
 0x1f7   :  { %21321 = vst [vmem:[#allocation138_spill] sm:$0xff] %v21320_v34  ;;  %v21323_v5 = vsel %vm15945_vm1, 4294967295, %v21322_v5  ;;  %vm15950_vm13 = vcmp.eq.s32.totalorder %v3176_v33, %v14537_v48  ;;  %v21325_v25 = vmov 0  ;;  %v3034_v47 = vadd.s32 704, %v13380_v44  ;;  %vm20527_vm14 = vmpackc.low %vm15945_vm1, %vm15930_vm4 }
 0x1f8   :  { %21324 = vst [vmem:[#allocation139_spill] sm:$0xff] %v21323_v5  ;;  %v21326_v25 = vsel %vm15950_vm13, 4294967295, %v21325_v25  ;;  %v3035_v4 = vadd.s32 712, %v13380_v44  ;;  %v3066_v61 = vadd.s32 960, %v13380_v44  ;;  %12046 = vmatpush3.bf16.msk.msra.mxu0 %vm20527_vm14, %v21023_v29  ;;  %vm15974_vm3 = vcmp.eq.s32.totalorder %v3177_v56, %v14537_v48 }
 0x1f9   :  { %21327 = vst [vmem:[#allocation140_spill] sm:$0xff] %v21326_v25  ;;  %v21328_v62 = vmov 0  ;;  %v3162_v46 = vand.u32 15, %v3034_v47  ;;  %v3067_v45 = vadd.s32 968, %v13380_v44  ;;  %v3018_v57 = vadd.s32 576, %v13380_v44  ;;  %vm20534_vm15 = vmpackc.low %vm15974_vm3, %vm15950_vm13 }
 0x1fa   :  { %v21329_v62 = vsel %vm15974_vm3, 4294967295, %v21328_v62  ;;  %v3163_v35 = vand.u32 15, %v3035_v4  ;;  %v3194_v15 = vand.u32 15, %v3066_v61  ;;  %v3019_v33 = vadd.s32 584, %v13380_v44  ;;  %12078 = vmatpush3.bf16.msk.msra.mxu1 %vm20534_vm15, %v21023_v29 }
 0x1fb   :  { %21330 = vst [vmem:[#allocation141_spill] sm:$0xff] %v21329_v62  ;;  %v3050_v34 = vadd.s32 832, %v13380_v44  ;;  %vm15993_vm14 = vcmp.eq.s32.totalorder %v3162_v46, %v14537_v48  ;;  %v21331_v56 = vmov 0  ;;  %v3195_v47 = vand.u32 15, %v3067_v45 }
 0x1fc   :  { %v21332_v56 = vsel %vm15993_vm14, 4294967295, %v21331_v56  ;;  %v3146_v5 = vand.u32 15, %v3018_v57  ;;  %v3051_v4 = vadd.s32 840, %v13380_v44  ;;  %vm15999_vm4 = vcmp.eq.s32.totalorder %v3163_v35, %v14537_v48 }
 0x1fd   :  { %21333 = vst [vmem:[#allocation142_spill] sm:$0xff] %v21332_v56  ;;  %v21334_v61 = vmov 0  ;;  %vm16004_vm1 = vcmp.eq.s32.totalorder %v3194_v15, %v14537_v48  ;;  %v21337_v62 = vmov 0  ;;  %v3147_v25 = vand.u32 15, %v3019_v33  ;;  %vm20540_vm15 = vmpackc.low %vm15999_vm4, %vm15993_vm14 }
 0x1fe   :  { %v21335_v61 = vsel %vm15999_vm4, 4294967295, %v21334_v61  ;;  %v21338_v62 = vsel %vm16004_vm1, 4294967295, %v21337_v62  ;;  %v3178_v0 = vand.u32 15, %v3050_v34  ;;  %vm16013_vm13 = vcmp.eq.s32.totalorder %v3195_v47, %v14537_v48  ;;  %12048 = vmatprep.subr.msk.bf16.mxu0 %vm20540_vm15, %v21023_v29 }
 0x1ff   :  { %21336 = vst [vmem:[#allocation143_spill] sm:$0xff] %v21335_v61  ;;  %21339 = vst [vmem:[#allocation144_spill] sm:$0xff] %v21338_v62  ;;  %v21340_v46 = vmov 0  ;;  %vm16018_vm3 = vcmp.eq.s32.totalorder %v3146_v5, %v14537_v48  ;;  %v21343_v45 = vmov 0  ;;  %v3179_v57 = vand.u32 15, %v3051_v4 }
 0x200   :  { %v21341_v46 = vsel %vm16013_vm13, 4294967295, %v21340_v46  ;;  %v21344_v45 = vsel %vm16018_vm3, 4294967295, %v21343_v45  ;;  %v3036_v35 = vadd.s32 720, %v13380_v44  ;;  %vm20542_vm9 = vmpackc.low %vm16013_vm13, %vm16004_vm1  ;;  %vm16034_vm6 = vcmp.eq.s32.totalorder %v3147_v25, %v14537_v48 }
 0x201   :  { %21342 = vst [vmem:[#allocation145_spill] sm:$0xff] %v21341_v46  ;;  %21345 = vst [vmem:[#allocation146_spill] sm:$0xff] %v21344_v45  ;;  %v21346_v34 = vmov 0  ;;  %vm16039_vm2 = vcmp.eq.s32.totalorder %v3178_v0, %v14537_v48  ;;  %v21349_v5 = vmov 0  ;;  %v3037_v15 = vadd.s32 728, %v13380_v44  ;;  %12080 = vmatprep.subr.msk.bf16.mxu1 %vm20542_vm9, %v21023_v29 }
 0x202   :  { %v21347_v34 = vsel %vm16034_vm6, 4294967295, %v21346_v34  ;;  %v21350_v5 = vsel %vm16039_vm2, 4294967295, %v21349_v5  ;;  %v3068_v33 = vadd.s32 976, %v13380_v44  ;;  %vm20545_vm15 = vmpackc.low %vm16034_vm6, %vm16018_vm3  ;;  %vm16056_vm14 = vcmp.eq.s32.totalorder %v3179_v57, %v14537_v48 }
 0x203   :  { %21348 = vst [vmem:[#allocation147_spill] sm:$0xff] %v21347_v34  ;;  %21351 = vst [vmem:[#allocation148_spill] sm:$0xff] %v21350_v5  ;;  %v21352_v0 = vmov 0  ;;  %v3164_v25 = vand.u32 15, %v3036_v35  ;;  %v3069_v47 = vadd.s32 984, %v13380_v44  ;;  %v3020_v4 = vadd.s32 592, %v13380_v44  ;;  %12050 = vmatpush3.bf16.msk.msra.mxu0 %vm20545_vm15, %v21023_v29 }
 0x204   :  { %v21353_v0 = vsel %vm16056_vm14, 4294967295, %v21352_v0  ;;  %vm20554_vm9 = vmpackc.low %vm16056_vm14, %vm16039_vm2  ;;  %v3165_v57 = vand.u32 15, %v3037_v15  ;;  %v3196_v62 = vand.u32 15, %v3068_v33  ;;  %v3021_v35 = vadd.s32 600, %v13380_v44 }
 0x205   :  { %21354 = vst [vmem:[#allocation149_spill] sm:$0xff] %v21353_v0  ;;  %v3052_v46 = vadd.s32 848, %v13380_v44  ;;  %12082 = vmatpush3.bf16.msk.msra.mxu1 %vm20554_vm9, %v21023_v29  ;;  %vm16081_vm15 = vcmp.eq.s32.totalorder %v3164_v25, %v14537_v48  ;;  %v21355_v45 = vmov 0  ;;  %v3197_v34 = vand.u32 15, %v3069_v47 }
 0x206   :  { %v21356_v45 = vsel %vm16081_vm15, 4294967295, %v21355_v45  ;;  %v3148_v56 = vand.u32 15, %v3020_v4  ;;  %v3053_v15 = vadd.s32 856, %v13380_v44  ;;  %vm16087_vm3 = vcmp.eq.s32.totalorder %v3165_v57, %v14537_v48 }
 0x207   :  { %21357 = vst [vmem:[#allocation150_spill] sm:$0xff] %v21356_v45  ;;  %v21358_v33 = vmov 0  ;;  %vm16092_vm6 = vcmp.eq.s32.totalorder %v3196_v62, %v14537_v48  ;;  %v21361_v0 = vmov 0  ;;  %v3149_v5 = vand.u32 15, %v3021_v35  ;;  %vm20560_vm9 = vmpackc.low %vm16087_vm3, %vm16081_vm15 }
 0x208   :  { %v21359_v33 = vsel %vm16087_vm3, 4294967295, %v21358_v33  ;;  %v21362_v0 = vsel %vm16092_vm6, 4294967295, %v21361_v0  ;;  %v3180_v61 = vand.u32 15, %v3052_v46  ;;  %vm16101_vm2 = vcmp.eq.s32.totalorder %v3197_v34, %v14537_v48  ;;  %12052 = vmatprep.subr.msk.bf16.mxu0 %vm20560_vm9, %v21023_v29 }
 0x209   :  { %21360 = vst [vmem:[#allocation151_spill] sm:$0xff] %v21359_v33  ;;  %21363 = vst [vmem:[#allocation152_spill] sm:$0xff] %v21362_v0  ;;  %v21364_v25 = vmov 0  ;;  %vm16106_vm14 = vcmp.eq.s32.totalorder %v3148_v56, %v14537_v48  ;;  %v21367_v47 = vmov 0  ;;  %v3181_v62 = vand.u32 15, %v3053_v15 }
 0x20a   :  { %v21365_v25 = vsel %vm16101_vm2, 4294967295, %v21364_v25  ;;  %v21368_v47 = vsel %vm16106_vm14, 4294967295, %v21367_v47  ;;  %v3038_v4 = vadd.s32 736, %v13380_v44  ;;  %vm20562_vm1 = vmpackc.low %vm16101_vm2, %vm16092_vm6  ;;  %vm16122_vm13 = vcmp.eq.s32.totalorder %v3149_v5, %v14537_v48 }
 0x20b   :  { %21366 = vst [vmem:[#allocation153_spill] sm:$0xff] %v21365_v25  ;;  %21369 = vst [vmem:[#allocation154_spill] sm:$0xff] %v21368_v47  ;;  %v21370_v56 = vmov 0  ;;  %vm16127_vm4 = vcmp.eq.s32.totalorder %v3180_v61, %v14537_v48  ;;  %v21373_v46 = vmov 0  ;;  %v3039_v34 = vadd.s32 744, %v13380_v44  ;;  %12084 = vmatprep.subr.msk.bf16.mxu1 %vm20562_vm1, %v21023_v29 }
 0x20c   :  { %v21371_v56 = vsel %vm16122_vm13, 4294967295, %v21370_v56  ;;  %v21374_v46 = vsel %vm16127_vm4, 4294967295, %v21373_v46  ;;  %v3070_v57 = vadd.s32 992, %v13380_v44  ;;  %vm20565_vm9 = vmpackc.low %vm16122_vm13, %vm16106_vm14  ;;  %vm16144_vm15 = vcmp.eq.s32.totalorder %v3181_v62, %v14537_v48 }
 0x20d   :  { %21372 = vst [vmem:[#allocation155_spill] sm:$0xff] %v21371_v56  ;;  %21375 = vst [vmem:[#allocation156_spill] sm:$0xff] %v21374_v46  ;;  %v21376_v61 = vmov 0  ;;  %v3166_v5 = vand.u32 15, %v3038_v4  ;;  %v3071_v35 = vadd.s32 1000, %v13380_v44  ;;  %v3022_v15 = vadd.s32 608, %v13380_v44  ;;  %12054 = vmatpush3.bf16.msk.msra.mxu0 %vm20565_vm9, %v21023_v29 }
 0x20e   :  { %v21377_v61 = vsel %vm16144_vm15, 4294967295, %v21376_v61  ;;  %vm20574_vm1 = vmpackc.low %vm16144_vm15, %vm16127_vm4  ;;  %v3167_v62 = vand.u32 15, %v3039_v34  ;;  %v3198_v0 = vand.u32 15, %v3070_v57  ;;  %v3023_v4 = vadd.s32 616, %v13380_v44 }
 0x20f   :  { %21378 = vst [vmem:[#allocation157_spill] sm:$0xff] %v21377_v61  ;;  %v3054_v25 = vadd.s32 864, %v13380_v44  ;;  %12086 = vmatpush3.bf16.msk.msra.mxu1 %vm20574_vm1, %v21023_v29  ;;  %vm16169_vm9 = vcmp.eq.s32.totalorder %v3166_v5, %v14537_v48  ;;  %v21379_v47 = vmov 0  ;;  %v3199_v56 = vand.u32 15, %v3071_v35 }
 0x210   :  { %v21380_v47 = vsel %vm16169_vm9, 4294967295, %v21379_v47  ;;  %v3150_v45 = vand.u32 15, %v3022_v15  ;;  %v3055_v34 = vadd.s32 872, %v13380_v44  ;;  %vm16175_vm14 = vcmp.eq.s32.totalorder %v3167_v62, %v14537_v48 }
 0x211   :  { %21381 = vst [vmem:[#allocation158_spill] sm:$0xff] %v21380_v47  ;;  %v21382_v57 = vmov 0  ;;  %vm16180_vm13 = vcmp.eq.s32.totalorder %v3198_v0, %v14537_v48  ;;  %v21385_v61 = vmov 0  ;;  %v3151_v46 = vand.u32 15, %v3023_v4  ;;  %vm20580_vm1 = vmpackc.low %vm16175_vm14, %vm16169_vm9 }
 0x212   :  { %v21383_v57 = vsel %vm16175_vm14, 4294967295, %v21382_v57  ;;  %v21386_v61 = vsel %vm16180_vm13, 4294967295, %v21385_v61  ;;  %v3182_v33 = vand.u32 15, %v3054_v25  ;;  %vm16189_vm4 = vcmp.eq.s32.totalorder %v3199_v56, %v14537_v48  ;;  %12056 = vmatprep.subr.msk.bf16.mxu0 %vm20580_vm1, %v21023_v29 }
 0x213   :  { %21384 = vst [vmem:[#allocation159_spill] sm:$0xff] %v21383_v57  ;;  %21387 = vst [vmem:[#allocation160_spill] sm:$0xff] %v21386_v61  ;;  %v21388_v5 = vmov 0  ;;  %vm16194_vm15 = vcmp.eq.s32.totalorder %v3150_v45, %v14537_v48  ;;  %v21391_v35 = vmov 0  ;;  %v3183_v0 = vand.u32 15, %v3055_v34 }
 0x214   :  { %v21389_v5 = vsel %vm16189_vm4, 4294967295, %v21388_v5  ;;  %v21392_v35 = vsel %vm16194_vm15, 4294967295, %v21391_v35  ;;  %v3040_v15 = vadd.s32 752, %v13380_v44  ;;  %vm20582_vm6 = vmpackc.low %vm16189_vm4, %vm16180_vm13  ;;  %vm16210_vm2 = vcmp.eq.s32.totalorder %v3151_v46, %v14537_v48 }
 0x215   :  { %21390 = vst [vmem:[#allocation161_spill] sm:$0xff] %v21389_v5  ;;  %21393 = vst [vmem:[#allocation162_spill] sm:$0xff] %v21392_v35  ;;  %v21394_v45 = vmov 0  ;;  %vm16215_vm3 = vcmp.eq.s32.totalorder %v3182_v33, %v14537_v48  ;;  %v21397_v25 = vmov 0  ;;  %v3041_v56 = vadd.s32 760, %v13380_v44  ;;  %12088 = vmatprep.subr.msk.bf16.mxu1 %vm20582_vm6, %v21023_v29 }
 0x216   :  { %v21395_v45 = vsel %vm16210_vm2, 4294967295, %v21394_v45  ;;  %v21398_v25 = vsel %vm16215_vm3, 4294967295, %v21397_v25  ;;  %v3072_v62 = vadd.s32 1008, %v13380_v44  ;;  %vm20585_vm1 = vmpackc.low %vm16210_vm2, %vm16194_vm15  ;;  %vm16232_vm9 = vcmp.eq.s32.totalorder %v3183_v0, %v14537_v48 }
 0x217   :  { %21396 = vst [vmem:[#allocation163_spill] sm:$0xff] %v21395_v45  ;;  %21399 = vst [vmem:[#allocation164_spill] sm:$0xff] %v21398_v25  ;;  %v21400_v33 = vmov 0  ;;  %v3168_v46 = vand.u32 15, %v3040_v15  ;;  %v3073_v4 = vadd.s32 1016, %v13380_v44  ;;  %v3024_v34 = vadd.s32 624, %v13380_v44  ;;  %12058 = vmatpush3.bf16.msk.msra.mxu0 %vm20585_vm1, %v21023_v29 }
 0x218   :  { %v21401_v33 = vsel %vm16232_vm9, 4294967295, %v21400_v33  ;;  %vm20594_vm6 = vmpackc.low %vm16232_vm9, %vm16215_vm3  ;;  %v3169_v0 = vand.u32 15, %v3041_v56  ;;  %v3200_v61 = vand.u32 15, %v3072_v62  ;;  %v3025_v15 = vadd.s32 632, %v13380_v44 }
 0x219   :  { %21402 = vst [vmem:[#allocation165_spill] sm:$0xff] %v21401_v33  ;;  %v3056_v5 = vadd.s32 880, %v13380_v44  ;;  %12090 = vmatpush3.bf16.msk.msra.mxu1 %vm20594_vm6, %v21023_v29  ;;  %vm16257_vm1 = vcmp.eq.s32.totalorder %v3168_v46, %v14537_v48  ;;  %v21403_v35 = vmov 0  ;;  %v3201_v45 = vand.u32 15, %v3073_v4 }
 0x21a   :  { %v21404_v35 = vsel %vm16257_vm1, 4294967295, %v21403_v35  ;;  %v3152_v47 = vand.u32 15, %v3024_v34  ;;  %v3057_v56 = vadd.s32 888, %v13380_v44  ;;  %vm16263_vm15 = vcmp.eq.s32.totalorder %v3169_v0, %v14537_v48 }
 0x21b   :  { %21405 = vst [vmem:[#allocation166_spill] sm:$0xff] %v21404_v35  ;;  %v21406_v62 = vmov 0  ;;  %vm16268_vm2 = vcmp.eq.s32.totalorder %v3200_v61, %v14537_v48  ;;  %v21409_v33 = vmov 0  ;;  %v3153_v25 = vand.u32 15, %v3025_v15  ;;  %vm20600_vm6 = vmpackc.low %vm16263_vm15, %vm16257_vm1  ;;  %v13192_v15 = vld [vmem:[%s20214_s2] sm:$0xff] }
 0x21c   :  { %v21407_v62 = vsel %vm16263_vm15, 4294967295, %v21406_v62  ;;  %v21410_v33 = vsel %vm16268_vm2, 4294967295, %v21409_v33  ;;  %v3184_v57 = vand.u32 15, %v3056_v5  ;;  %vm16277_vm3 = vcmp.eq.s32.totalorder %v3201_v45, %v14537_v48  ;;  %12060 = vmatprep.subr.msk.bf16.mxu0 %vm20600_vm6, %v21023_v29 }
 0x21d   :  { %21408 = vst [vmem:[#allocation167_spill] sm:$0xff] %v21407_v62  ;;  %21411 = vst [vmem:[#allocation168_spill] sm:$0xff] %v21410_v33  ;;  %v21412_v46 = vmov 0  ;;  %vm16282_vm9 = vcmp.eq.s32.totalorder %v3152_v47, %v14537_v48  ;;  %v21415_v4 = vmov 0  ;;  %v3185_v61 = vand.u32 15, %v3057_v56 }
 0x21e   :  { %v21413_v46 = vsel %vm16277_vm3, 4294967295, %v21412_v46  ;;  %v21416_v4 = vsel %vm16282_vm9, 4294967295, %v21415_v4  ;;  %vm20602_vm13 = vmpackc.low %vm16277_vm3, %vm16268_vm2  ;;  %vm16297_vm4 = vcmp.eq.s32.totalorder %v3153_v25, %v14537_v48  ;;  %v21418_v5 = vmov 0 }
 0x21f   :  { %21414 = vst [vmem:[#allocation169_spill] sm:$0xff] %v21413_v46  ;;  %21417 = vst [vmem:[#allocation170_spill] sm:$0xff] %v21416_v4  ;;  %v21419_v5 = vsel %vm16297_vm4, 4294967295, %v21418_v5  ;;  %vm16302_vm14 = vcmp.eq.s32.totalorder %v3184_v57, %v14537_v48  ;;  %v21421_v47 = vmov 0  ;;  %12092 = vmatprep.subr.msk.bf16.mxu1 %vm20602_vm13, %v21023_v29  ;;  %vm16317_vm1 = vcmp.eq.s32.totalorder %v3185_v61, %v14537_v48 }
 0x220   :  { %21420 = vst [vmem:[#allocation171_spill] sm:$0xff] %v21419_v5  ;;  %v21422_v47 = vsel %vm16302_vm14, 4294967295, %v21421_v47  ;;  %vm20619_vm6 = vmpackc.low %vm16297_vm4, %vm16282_vm9  ;;  %v21424_v45 = vmov 0  ;;  %v20612_v57 = vsub.s32 4, %v13380_v44  ;;  %v20614_v25 = vsub.s32 6, %v13380_v44 }
 0x221   :  { %21423 = vst [vmem:[#allocation172_spill] sm:$0xff] %v21422_v47  ;;  %v21425_v45 = vsel %vm16317_vm1, 4294967295, %v21424_v45  ;;  %12062 = vmatpush3.bf16.msk.msra.mxu0 %vm20619_vm6, %v21023_v29  ;;  %vm20618_vm13 = vmpackc.low %vm16317_vm1, %vm16302_vm14  ;;  %v20616_v34 = vsub.s32 5, %v13380_v44  ;;  %v20622_v0 = vsub.s32 7, %v13380_v44 }
 0x222   :  { %21426 = vst [vmem:[#allocation173_spill] sm:$0xff] %v21425_v45  ;;  %12094 = vmatpush3.bf16.msk.msra.mxu1 %vm20618_vm13, %v21023_v29  ;;  %v504_v56 = vrot.slane %v13192_v15, %v20612_v57  ;;  %v512_v61 = vrot.slane %v13192_v15, %v20614_v25  ;;  %vm21427_vm13 = vcmask 1041408  }
 0x223   :  { %v508_v47 = vrot.slane %v13192_v15, %v20616_v34  ;;  %v516_v45 = vrot.slane %v13192_v15, %v20622_v0  ;;  %vm21428_vm6 = vmmov %vm21427_vm13 }
 0x224   :  { %vm21429_vm14 = vmmov %vm21428_vm6 }
 0x225   :  { %vm21430_vm1 = vmmov %vm21428_vm6 }
 0x268   :  { %v2807_v4 = vpop.f32.mrb[4].mxu0 }
 0x269   :  { %v16352_v5 = vadd.f32 %v2807_v4, %v504_v56  ;;  %v2809_v46 = vpop.f32.mrb[5].mxu0 }
 0x26a   :  { %v2930_v33 = vpop.f32.mrb[4].mxu1  ;;  %v16356_v62 = vadd.f32 %v2809_v46, %v508_v47  ;;  %v2811_v57 = vpop.f32.mrb[6].mxu0 }
 0x26b   :  { %v16354_v35 = vadd.f32 %v2930_v33, %v512_v61  ;;  %v2932_v60 = vpop.f32.mrb[5].mxu1  ;;  %v20623_v55 = vmax.f32 %v16352_v5, 0.0  ;;  %v2812_v34 = vpop.f32.mrb[7].mxu0 }
 0x26c   :  { %v16359_v25 = vadd.f32 %v2932_v60, %v516_v45  ;;  %v2934_v17 = vpop.f32.mrb[6].mxu1  ;;  %v20632_v15 = vmax.f32 %v16356_v62, 0.0 }
 0x26d   :  { %v20628_v12 = vmax.f32 %v16354_v35, 0.0  ;;  %v2935_v4 = vpop.f32.mrb[7].mxu1  ;;  %v3680_v33 = vsel %vm21427_vm13, %v20623_v55, 0.0 }
 0x26e   :  { %v20638_v46 = vmax.f32 %v16359_v25, 0.0  ;;  %v3681_v47 = vrot.slane %v3680_v33, 4  ;;  %v3687_v17 = vsel %vm21429_vm14, %v20632_v15, 0.0 }
 0x26f   :  { %v3694_v57 = vsel %vm21428_vm6, %v20628_v12, 0.0  ;;  %v3688_v45 = vrot.slane %v3687_v17, 4 }
 0x270   :  { %v3695_v60 = vrot.slane %v3694_v57, 4  ;;  %v3701_v34 = vsel %vm21430_vm1, %v20638_v46, 0.0  ;;  %v3682_v56 = vadd.f32 %v3681_v47, %v3680_v33 }
 0x271   :  { %v3702_v61 = vrot.slane %v3701_v34, 4  ;;  %v3689_v0 = vadd.f32 %v3688_v45, %v3687_v17  ;;  %v21448_v45 = vmov 0 }
 0x272   :  { %v3696_v4 = vadd.f32 %v3695_v60, %v3694_v57  ;;  %v3683_v55 = vrot.slane %v3682_v56, 2 }
 0x273   :  { %v3703_v58 = vadd.f32 %v3702_v61, %v3701_v34  ;;  %v3690_v14 = vrot.slane %v3689_v0, 2  ;;  %v3592_v34 = vadd.s32 640, %v14537_v48  ;;  %v20653_v61 = vmov 0.0  }
 0x274   :  { %v3697_v19 = vrot.slane %v3696_v4, 2  ;;  %v3684_v22 = vadd.f32 %v3683_v55, %v3682_v56  ;;  %v3594_v56 = vadd.s32 896, %v14537_v48 }
 0x275   :  { %v3704_v12 = vrot.slane %v3703_v58, 2  ;;  %v3691_v20 = vadd.f32 %v3690_v14, %v3689_v0  ;;  %v21442_v0 = vmov 0 }
 0x276   :  { %v3698_v28 = vadd.f32 %v3697_v19, %v3696_v4  ;;  %v3685_v50 = vrot.slane %v3684_v22, 1  ;;  %v3600_v4 = vand.u32 15, %v3592_v34 }
 0x277   :  { %v3705_v15 = vadd.f32 %v3704_v12, %v3703_v58  ;;  %v3692_v39 = vrot.slane %v3691_v20, 1  ;;  %v16377_v58 = vadd.s32 128, %v14537_v48  ;;  %v16380_v12 = vadd.s32 384, %v14537_v48 }
 0x278   :  { %v3699_v31 = vrot.slane %v3698_v28, 1  ;;  %v3686_v46 = vadd.f32 %v3685_v50, %v3684_v22  ;;  %v21440_v22 = vmov 0 }
 0x279   :  { %v3706_v36 = vrot.slane %v3705_v15, 1  ;;  %v3693_v40 = vadd.f32 %v3692_v39, %v3691_v20  ;;  %21431 = vst [vmem:[#allocation174_spill] sm:$0xff] %v16377_v58  ;;  %21432 = vst [vmem:[#allocation175_spill] sm:$0xff] %v16380_v12  ;;  %v16383_v39 = vadd.s32 256, %v14537_v48  ;;  %v21438_v20 = vmov 0 }
 0x27a   :  { %v3700_v33 = vadd.f32 %v3699_v31, %v3698_v28  ;;  %v21434_v31 = vmov 0  ;;  %v21436_v28 = vmov 0 }
 0x27b   :  { %v3707_v38 = vadd.f32 %v3706_v36, %v3705_v15  ;;  %3912 = vmatprep.mubr.f32.mxu0 %v3693_v40  ;;  %21433 = vst [vmem:[#allocation176_spill] sm:$0xff] %v16383_v39  ;;  %v3596_v40 = vand.u32 15, %v16377_v58  ;;  %v3595_v36 = vand.u32 15, %v14537_v48  ;;  %v3597_v50 = vand.u32 15, %v16383_v39 }
 0x27c   :  { %3913 = vmatmul.mubr.f32.vlgmr.msra.gmra.mrb[10].mxu0 %v3686_v46  ;;  %v21444_v15 = vmov 0  ;;  %v21446_v46 = vmov 0  ;;  %v21458_v58 = vmov 0  ;;  %v21460_v39 = vmov 0 }
 0x27d   :  { %3982 = vmatprep.mubr.f32.mxu1 %v3707_v38  ;;  %v3598_v38 = vand.u32 15, %v16380_v12  ;;  %vm16390_vm14 = vcmp.eq.s32.totalorder %v3596_v40, %v13380_v44  ;;  %vm16395_vm13 = vcmp.eq.s32.totalorder %v3596_v40, %v14646_v53  ;;  %vm16414_vm4 = vcmp.eq.s32.totalorder %v3595_v36, %v13380_v44  ;;  %4057 = vmatprep.mubr.f32.mxu0 %v20653_v61 }
 0x27e   :  { %3983 = vmatmul.mubr.f32.vlgmr.msra.gmra.mrb[10].mxu1 %v3700_v33  ;;  %v21435_v31 = vsel %vm16390_vm14, 4294967295, %v21434_v31  ;;  %v21437_v28 = vsel %vm16395_vm13, 4294967295, %v21436_v28  ;;  %vm20645_vm9 = vmpackc.low %vm16395_vm13, %vm16390_vm14  ;;  %v21443_v0 = vsel %vm16414_vm4, 4294967295, %v21442_v0  ;;  %vm16419_vm2 = vcmp.eq.s32.totalorder %v3595_v36, %v14646_v53 }
 0x27f   :  { %vm16400_vm6 = vcmp.eq.s32.totalorder %v3598_v38, %v13380_v44  ;;  %vm16405_vm1 = vcmp.eq.s32.totalorder %v3598_v38, %v14646_v53  ;;  %v21445_v15 = vsel %vm16419_vm2, 4294967295, %v21444_v15  ;;  %vm16424_vm3 = vcmp.eq.s32.totalorder %v3597_v50, %v13380_v44  ;;  %12096 = vmatprep.subr.msk.bf16.mxu0 %vm20645_vm9, %v21023_v29  ;;  %vm20647_vm0 = vmpackc.low %vm16419_vm2, %vm16414_vm4  ;;  %4128 = vmatprep.mubr.f32.mxu1 %v20653_v61 }
 0x280   :  { %v21439_v20 = vsel %vm16400_vm6, 4294967295, %v21438_v20  ;;  %v21441_v22 = vsel %vm16405_vm1, 4294967295, %v21440_v22  ;;  %v21447_v46 = vsel %vm16424_vm3, 4294967295, %v21446_v46  ;;  %vm16429_vm15 = vcmp.eq.s32.totalorder %v3597_v50, %v14646_v53  ;;  %12098 = vmatpush1.bf16.msk.msra.mxu0 %vm20647_vm0, %v21023_v29  ;;  %vm20648_vm9 = vmpackc.low %vm16405_vm1, %vm16400_vm6 }
 0x281   :  { %v21449_v45 = vsel %vm16429_vm15, 4294967295, %v21448_v45  ;;  %12100 = vmatprep.subr.msk.bf16.mxu1 %vm20648_vm9, %v21023_v29  ;;  %vm20651_vm14 = vmpackc.low %vm16429_vm15, %vm16424_vm3  ;;  %v3602_v33 = vand.u32 15, %v3594_v56  ;;  %vm16474_vm0 = vcmp.eq.s32.totalorder %v3600_v4, %v13380_v44  ;;  %vm16479_vm9 = vcmp.eq.s32.totalorder %v3600_v4, %v14646_v53 }
 0x282   :  { %12102 = vmatpush1.bf16.msk.msra.mxu1 %vm20651_vm14, %v21023_v29  ;;  %vm20655_vm14 = vmpackc.low %vm16479_vm9, %vm16474_vm0  ;;  %vm21468_vm6 = vnez %v20905_v2  ;;  %v21489_v2 = vld [vmem:[#allocation38_spill] sm:$0xff] }
 0x283   :  { %vm16484_vm4 = vcmp.eq.s32.totalorder %v3602_v33, %v13380_v44  ;;  %vm16489_vm3 = vcmp.eq.s32.totalorder %v3602_v33, %v14646_v53  ;;  %12104 = vmatprep.subr.msk.bf16.mxu0 %vm20655_vm14, %v21023_v29 }
 0x284   :  { %vm20658_vm15 = vmpackc.low %vm16489_vm3, %vm16484_vm4 }
 0x285   :  { %12108 = vmatprep.subr.msk.bf16.mxu1 %vm20658_vm15, %v21023_v29 }
 0x2b9   :  { %v11279_v47 = vpop.f32.mrb[8].mxu0 }
 0x2ba   :  { %v11314_v57 = vpop.f32.mrb[8].mxu1  ;;  %v11280_v17 = vpop.f32.mrb[9].mxu0 }
 0x2bb   :  { %v11281_v55 = vadd.f32 %v11280_v17, %v11279_v47  ;;  %v11315_v60 = vpop.f32.mrb[9].mxu1  ;;  %v21450_v47 = vmov 0  ;;  %v21454_v17 = vmov 0 }
 0x2bc   :  { %v11316_v19 = vadd.f32 %v11315_v60, %v11314_v57  ;;  %v21451_v47 = vsel %vm16474_vm0, 4294967295, %v21450_v47  ;;  %v21452_v57 = vmov 0  ;;  %v21455_v17 = vsel %vm16484_vm4, 4294967295, %v21454_v17 }
 0x2bd   :  { %v21453_v57 = vsel %vm16479_vm9, 4294967295, %v21452_v57  ;;  %v3591_v60 = vadd.s32 512, %v14537_v48  ;;  %vm20665_vm0 = vcmask 130048  }
 0x2be   :  { %v3845_v14 = vadd.f32 %v11316_v19, %v11281_v55  ;;  %v21456_v55 = vmov 0  ;;  %v3593_v19 = vadd.s32 768, %v14537_v48 }
 0x2bf   :  { %v21457_v55 = vsel %vm16489_vm3, 4294967295, %v21456_v55  ;;  %v3599_v38 = vand.u32 15, %v3591_v60  ;;  %v21462_v60 = vmov 0 }
 0x2c0   :  { %v3601_v34 = vand.u32 15, %v3593_v19  ;;  %v21464_v19 = vmov 0 }
 0x2c1   :  { %vm16516_vm14 = vcmp.eq.s32.totalorder %v3599_v38, %v13380_v44  ;;  %vm16521_vm15 = vcmp.eq.s32.totalorder %v3599_v38, %v14646_v53  ;;  %v21476_v38 = vld [vmem:[#allocation27_spill] sm:$0xff] }
 0x2c2   :  { %v21459_v58 = vsel %vm16516_vm14, 4294967295, %v21458_v58  ;;  %v21461_v39 = vsel %vm16521_vm15, 4294967295, %v21460_v39  ;;  %vm16526_vm4 = vcmp.eq.s32.totalorder %v3601_v34, %v13380_v44  ;;  %vm16531_vm3 = vcmp.eq.s32.totalorder %v3601_v34, %v14646_v53  ;;  %vm20668_vm9 = vmpackc.low %vm16521_vm15, %vm16516_vm14  ;;  %v21516_v34 = vld [vmem:[#allocation57_spill] sm:$0xff] }
 0x2c3   :  { %v21463_v60 = vsel %vm16526_vm4, 4294967295, %v21462_v60  ;;  %v21465_v19 = vsel %vm16531_vm3, 4294967295, %v21464_v19  ;;  %vm20672_vm2 = vmpackc.low %vm16531_vm3, %vm16526_vm4  ;;  %vm21471_vm14 = vnez %v20911_v27  ;;  %vm21473_vm4 = vcmask 130048   ;;  %v21491_v27 = vld [vmem:[#allocation37_spill] sm:$0xff] }
 0x2c4   :  { %vm21475_vm3 = vnez %v20920_v1  ;;  %vm21477_vm13 = vnez %v21476_v38  ;;  %v21501_v1 = vld [vmem:[#allocation45_spill] sm:$0xff] }
 0x2c5   :  { %vm21478_vm8 = vmpackc.low %vm21475_vm3, %vm21477_vm13  ;;  %vm21492_vm13 = vnez %v21491_v27  ;;  %v21537_v38 = vld [vmem:[#allocation73_spill] sm:$0xff]  ;;  %v21555_v27 = vld [vmem:[#allocation86_spill] sm:$0xff] }
 0x34f   :  { %v11349_v40 = vpop.f32.mrb[10].mxu0 }
 0x350   :  { %v11350_v50 = vpop.f32.mrb[11].mxu0 }
 0x351   :  { %v11384_v36 = vpop.f32.mrb[10].mxu1  ;;  %v11351_v56 = vadd.f32 %v11350_v50, %v11349_v40  ;;  %v21514_v50 = vld [vmem:[#allocation58_spill] sm:$0xff] }
 0x352   :  { %v11385_v4 = vpop.f32.mrb[11].mxu1 }
 0x353   :  { %v11386_v33 = vadd.f32 %v11385_v4, %v11384_v36  ;;  %v3915_v61 = vadd.f32 %v11351_v56, %v3845_v14  ;;  %v21511_v36 = vld [vmem:[#allocation53_spill] sm:$0xff]  ;;  %v21519_v56 = vld [vmem:[#allocation62_spill] sm:$0xff] }
 0x354   :  { %v21521_v4 = vld [vmem:[#allocation61_spill] sm:$0xff] }
 0x355   :  { %v3985_v14 = vadd.f32 %v11386_v33, %v3915_v61  ;;  %v21466_v61 = vmov 0.0   ;;  %v21524_v33 = vld [vmem:[#allocation66_spill] sm:$0xff] }
 0x357   :  { %v3988_v40 = vmul.f32 0.0078125, %v3985_v14  ;;  %v21526_v14 = vld [vmem:[#allocation65_spill] sm:$0xff] }
 0x359   :  { %10259 = vmatmul.mubr.msk.f32.vlgmr.msra.gmra.mrb[12].mxu0 %vm20665_vm0, %v3988_v40  ;;  %10264 = vmatmul.mubr.msk.f32.vlgmr.msra.gmra.mrb[12].mxu1 %vm20665_vm0, %v3988_v40  ;;  %vm21467_vm0 = vnez %v20907_v23  ;;  %v21486_v23 = vld [vmem:[#allocation34_spill] sm:$0xff] }
 0x35a   :  { %12106 = vmatpush1.bf16.msk.msra.mxu0 %vm20668_vm9, %v21023_v29  ;;  %12110 = vmatpush1.bf16.msk.msra.mxu1 %vm20672_vm2, %v21023_v29  ;;  %vm21469_vm1 = vmpackc.low %vm21467_vm0, %vm21468_vm6  ;;  %vm21470_vm9 = vnez %v20913_v30  ;;  %vm21479_vm0 = vnez %v20926_v7  ;;  %vm21480_vm6 = vnez %v20924_v3  ;;  %vm21487_vm3 = vnez %v21486_v23  ;;  %v21496_v30 = vld [vmem:[#allocation41_spill] sm:$0xff]  ;;  %v21504_v3 = vld [vmem:[#allocation50_spill] sm:$0xff] }
 0x35b   :  { %4199 = vmatprep.mubr.f32.mxu0 %v21466_v61  ;;  %4270 = vmatprep.mubr.f32.mxu1 %v21466_v61  ;;  %vm21472_vm15 = vmpackc.low %vm21470_vm9, %vm21471_vm14  ;;  %vm21490_vm14 = vnez %v21489_v2  ;;  %v21506_v7 = vld [vmem:[#allocation49_spill] sm:$0xff]  ;;  %v21550_v23 = vld [vmem:[#allocation84_spill] sm:$0xff] }
 0x35c   :  { %12112 = vmatprep.subr.msk.bf16.mxu0 %vm21469_vm1, %v21023_v29  ;;  %12144 = vmatprep.subr.msk.bf16.mxu1 %vm21472_vm15, %v21023_v29  ;;  %vm21474_vm2 = vmmov %vm21473_vm4  ;;  %vm21482_vm15 = vnez %v20932_v18  ;;  %v21494_v18 = vld [vmem:[#allocation42_spill] sm:$0xff]  ;;  %v21552_v2 = vld [vmem:[#allocation83_spill] sm:$0xff] }
 0x35d   :  { %10269 = vmatmul.mubr.msk.f32.vlgmr.msra.gmra.mrb[14].mxu0 %vm21473_vm4, %v3988_v40  ;;  %10274 = vmatmul.mubr.msk.f32.vlgmr.msra.gmra.mrb[14].mxu1 %vm21474_vm2, %v3988_v40  ;;  %vm21481_vm1 = vmpackc.low %vm21479_vm0, %vm21480_vm6  ;;  %vm21483_vm4 = vnez %v20930_v42  ;;  %vm21485_vm2 = vnez %v20940_v59  ;;  %vm21495_vm6 = vnez %v21494_v18  ;;  %v21499_v59 = vld [vmem:[#allocation46_spill] sm:$0xff]  ;;  %v21557_v18 = vld [vmem:[#allocation85_spill] sm:$0xff] }
 0x35e   :  { %12114 = vmatpush3.bf16.msk.msra.mxu0 %vm21478_vm8, %v21023_v29  ;;  %12146 = vmatpush3.bf16.msk.msra.mxu1 %vm21481_vm1, %v21023_v29  ;;  %vm21484_vm9 = vmpackc.low %vm21482_vm15, %vm21483_vm4  ;;  %vm21497_vm1 = vnez %v21496_v30  ;;  %vm21500_vm4 = vnez %v21499_v59  ;;  %v21509_v42 = vld [vmem:[#allocation54_spill] sm:$0xff]  ;;  %v21560_v30 = vld [vmem:[#allocation88_spill] sm:$0xff] }
 0x35f   :  { %12116 = vmatprep.subr.msk.bf16.mxu0 %vm21484_vm9, %v21023_v29  ;;  %vm21488_vm8 = vmpackc.low %vm21485_vm2, %vm21487_vm3  ;;  %vm21502_vm9 = vnez %v21501_v1  ;;  %vm21505_vm3 = vnez %v21504_v3  ;;  %v21535_v40 = vld [vmem:[#allocation74_spill] sm:$0xff]  ;;  %v21562_v59 = vld [vmem:[#allocation87_spill] sm:$0xff] }
 0x360   :  { %12148 = vmatprep.subr.msk.bf16.mxu1 %vm21488_vm8, %v21023_v29  ;;  %vm21493_vm0 = vmpackc.low %vm21490_vm14, %vm21492_vm13  ;;  %vm21507_vm8 = vnez %v21506_v7  ;;  %vm21510_vm13 = vnez %v21509_v42  ;;  %v21601_v1 = vld [vmem:[#allocation111_spill] sm:$0xff]  ;;  %v21603_v3 = vld [vmem:[#allocation110_spill] sm:$0xff] }
 0x361   :  { %vm21498_vm15 = vmpackc.low %vm21495_vm6, %vm21497_vm1  ;;  %vm21515_vm1 = vnez %v21514_v50  ;;  %v21606_v7 = vld [vmem:[#allocation113_spill] sm:$0xff]  ;;  %v21608_v42 = vld [vmem:[#allocation112_spill] sm:$0xff] }
 0x362   :  { %12118 = vmatpush3.bf16.msk.msra.mxu0 %vm21493_vm0, %v21023_v29  ;;  %12150 = vmatpush3.bf16.msk.msra.mxu1 %vm21498_vm15, %v21023_v29  ;;  %vm21503_vm2 = vmpackc.low %vm21500_vm4, %vm21502_vm9  ;;  %vm21512_vm0 = vnez %v21511_v36  ;;  %vm21517_vm15 = vnez %v21516_v34  ;;  %vm21520_vm9 = vnez %v21519_v56  ;;  %v21611_v36 = vld [vmem:[#allocation116_spill] sm:$0xff]  ;;  %v21613_v50 = vld [vmem:[#allocation114_spill] sm:$0xff] }
 0x363   :  { %12120 = vmatprep.subr.msk.bf16.mxu0 %vm21503_vm2, %v21023_v29  ;;  %vm21508_vm14 = vmpackc.low %vm21505_vm3, %vm21507_vm8  ;;  %vm21522_vm2 = vnez %v21521_v4  ;;  %vm21525_vm8 = vnez %v21524_v33  ;;  %v21616_v4 = vld [vmem:[#allocation28_spill] sm:$0xff] }
 0x364   :  { %12152 = vmatprep.subr.msk.bf16.mxu1 %vm21508_vm14, %v21023_v29  ;;  %vm21513_vm6 = vmpackc.low %vm21510_vm13, %vm21512_vm0  ;;  %vm21527_vm14 = vnez %v21526_v14  ;;  %vm21529_vm0 = vnez %v21020_v11  ;;  %v21540_v11 = vld [vmem:[#allocation78_spill] sm:$0xff] }
 0x365   :  { %vm21518_vm4 = vmpackc.low %vm21515_vm1, %vm21517_vm15  ;;  %vm21532_vm15 = vnez %v21028_v49  ;;  %v21545_v49 = vld [vmem:[#allocation82_spill] sm:$0xff] }
 0x366   :  { %12122 = vmatpush3.bf16.msk.msra.mxu0 %vm21513_vm6, %v21023_v29  ;;  %12154 = vmatpush3.bf16.msk.msra.mxu1 %vm21518_vm4, %v21023_v29  ;;  %vm21523_vm3 = vmpackc.low %vm21520_vm9, %vm21522_vm2  ;;  %vm21530_vm6 = vnez %v21018_v41  ;;  %vm21533_vm4 = vnez %v21026_v32  ;;  %vm21536_vm2 = vnez %v21535_v40  ;;  %v21542_v41 = vld [vmem:[#allocation77_spill] sm:$0xff] }
 0x367   :  { %12124 = vmatprep.subr.msk.bf16.mxu0 %vm21523_vm3, %v21023_v29  ;;  %vm21528_vm13 = vmpackc.low %vm21525_vm8, %vm21527_vm14  ;;  %vm21538_vm3 = vnez %v21537_v38  ;;  %vm21541_vm14 = vnez %v21540_v11  ;;  %v21547_v32 = vld [vmem:[#allocation81_spill] sm:$0xff] }
 0x368   :  { %12156 = vmatprep.subr.msk.bf16.mxu1 %vm21528_vm13, %v21023_v29  ;;  %vm21531_vm1 = vmpackc.low %vm21529_vm0, %vm21530_vm6  ;;  %vm21543_vm13 = vnez %v21542_v41  ;;  %vm21546_vm6 = vnez %v21545_v49  ;;  %v21617_v49 = vld [vmem:[#allocation115_spill] sm:$0xff] }
 0x369   :  { %vm21534_vm9 = vmpackc.low %vm21532_vm15, %vm21533_vm4  ;;  %vm21551_vm4 = vnez %v21550_v23 }
 0x36a   :  { %12126 = vmatpush3.bf16.msk.msra.mxu0 %vm21531_vm1, %v21023_v29  ;;  %12158 = vmatpush3.bf16.msk.msra.mxu1 %vm21534_vm9, %v21023_v29  ;;  %vm21539_vm8 = vmpackc.low %vm21536_vm2, %vm21538_vm3  ;;  %vm21548_vm1 = vnez %v21547_v32  ;;  %vm21553_vm9 = vnez %v21552_v2  ;;  %vm21556_vm3 = vnez %v21555_v27  ;;  %v21618_v32 = vmax.f32 %v21617_v49, 0.0  ;;  %v21619_v2 = vld [vmem:[#allocation117_spill] sm:$0xff] }
 0x36b   :  { %12128 = vmatprep.subr.msk.bf16.mxu0 %vm21539_vm8, %v21023_v29  ;;  %vm21544_vm0 = vmpackc.low %vm21541_vm14, %vm21543_vm13  ;;  %vm21558_vm8 = vnez %v21557_v18  ;;  %vm21561_vm13 = vnez %v21560_v30  ;;  %v21620_v27 = vmax.f32 %v21619_v2, 0.0  ;;  %v21621_v30 = vld [vmem:[#allocation118_spill] sm:$0xff] }
 0x36c   :  { %12160 = vmatprep.subr.msk.bf16.mxu1 %vm21544_vm0, %v21023_v29  ;;  %vm21549_vm15 = vmpackc.low %vm21546_vm6, %vm21548_vm1  ;;  %vm21563_vm0 = vnez %v21562_v59  ;;  %vm21565_vm1 = vnez %v21095_v37  ;;  %v21581_v37 = vld [vmem:[#allocation103_spill] sm:$0xff]  ;;  %v21622_v59 = vmax.f32 %v21621_v30, 0.0 }
 0x36d   :  { %vm21554_vm2 = vmpackc.low %vm21551_vm4, %vm21553_vm9  ;;  %vm21568_vm9 = vnez %v21104_v51  ;;  %v21586_v51 = vld [vmem:[#allocation105_spill] sm:$0xff] }
 0x36e   :  { %12130 = vmatpush3.bf16.msk.msra.mxu0 %vm21549_vm15, %v21023_v29  ;;  %12162 = vmatpush3.bf16.msk.msra.mxu1 %vm21554_vm2, %v21023_v29  ;;  %vm21559_vm14 = vmpackc.low %vm21556_vm3, %vm21558_vm8  ;;  %vm21566_vm15 = vnez %v21093_v26  ;;  %vm21569_vm2 = vnez %v21102_v6  ;;  %vm21571_vm8 = vnez %v21112_v24  ;;  %v21578_v26 = vld [vmem:[#allocation101_spill] sm:$0xff]  ;;  %v21583_v6 = vld [vmem:[#allocation102_spill] sm:$0xff] }
 0x36f   :  { %12132 = vmatprep.subr.msk.bf16.mxu0 %vm21559_vm14, %v21023_v29  ;;  %vm21564_vm6 = vmpackc.low %vm21561_vm13, %vm21563_vm0  ;;  %vm21572_vm14 = vnez %v21110_v54  ;;  %vm21574_vm0 = vnez %v21120_v16  ;;  %v21588_v54 = vld [vmem:[#allocation104_spill] sm:$0xff]  ;;  %v21593_v24 = vld [vmem:[#allocation106_spill] sm:$0xff] }
 0x370   :  { %12164 = vmatprep.subr.msk.bf16.mxu1 %vm21564_vm6, %v21023_v29  ;;  %vm21567_vm4 = vmpackc.low %vm21565_vm1, %vm21566_vm15  ;;  %vm21575_vm6 = vnez %v21118_v9  ;;  %vm21577_vm15 = vnez %v21140_v21  ;;  %v21591_v21 = vld [vmem:[#allocation107_spill] sm:$0xff]  ;;  %v21596_v9 = vld [vmem:[#allocation109_spill] sm:$0xff] }
 0x371   :  { %vm21570_vm3 = vmpackc.low %vm21568_vm9, %vm21569_vm2  ;;  %vm21582_vm2 = vnez %v21581_v37  ;;  %v21598_v16 = vld [vmem:[#allocation108_spill] sm:$0xff]  ;;  %v21623_v37 = vld [vmem:[#allocation119_spill] sm:$0xff] }
 0x372   :  { %12134 = vmatpush3.bf16.msk.msra.mxu0 %vm21567_vm4, %v21023_v29  ;;  %12166 = vmatpush3.bf16.msk.msra.mxu1 %vm21570_vm3, %v21023_v29  ;;  %vm21573_vm13 = vmpackc.low %vm21571_vm8, %vm21572_vm14  ;;  %vm21579_vm4 = vnez %v21578_v26  ;;  %vm21584_vm3 = vnez %v21583_v6  ;;  %vm21587_vm14 = vnez %v21586_v51  ;;  %v21624_v6 = vmax.f32 %v21623_v37, 0.0 }
 0x373   :  { %12136 = vmatprep.subr.msk.bf16.mxu0 %vm21573_vm13, %v21023_v29  ;;  %vm21576_vm1 = vmpackc.low %vm21574_vm0, %vm21575_vm6  ;;  %vm21589_vm13 = vnez %v21588_v54  ;;  %vm21592_vm6 = vnez %v21591_v21 }
 0x374   :  { %12168 = vmatprep.subr.msk.bf16.mxu1 %vm21576_vm1, %v21023_v29  ;;  %vm21580_vm9 = vmpackc.low %vm21577_vm15, %vm21579_vm4  ;;  %vm21594_vm1 = vnez %v21593_v24  ;;  %vm21597_vm4 = vnez %v21596_v9 }
 0x375   :  { %vm21585_vm8 = vmpackc.low %vm21582_vm2, %vm21584_vm3  ;;  %vm21602_vm3 = vnez %v21601_v1 }
 0x376   :  { %12138 = vmatpush3.bf16.msk.msra.mxu0 %vm21580_vm9, %v21023_v29  ;;  %12170 = vmatpush3.bf16.msk.msra.mxu1 %vm21585_vm8, %v21023_v29  ;;  %vm21590_vm0 = vmpackc.low %vm21587_vm14, %vm21589_vm13  ;;  %vm21599_vm9 = vnez %v21598_v16  ;;  %vm21604_vm8 = vnez %v21603_v3  ;;  %vm21607_vm13 = vnez %v21606_v7 }
 0x377   :  { %12140 = vmatprep.subr.msk.bf16.mxu0 %vm21590_vm0, %v21023_v29  ;;  %vm21595_vm15 = vmpackc.low %vm21592_vm6, %vm21594_vm1  ;;  %vm21609_vm0 = vnez %v21608_v42  ;;  %vm21612_vm1 = vnez %v21611_v36 }
 0x378   :  { %12172 = vmatprep.subr.msk.bf16.mxu1 %vm21595_vm15, %v21023_v29  ;;  %vm21600_vm2 = vmpackc.low %vm21597_vm4, %vm21599_vm9  ;;  %vm21614_vm15 = vnez %v21613_v50  ;;  %vm21625_vm9 = vcmask 1041408  }
 0x379   :  { %vm21605_vm14 = vmpackc.low %vm21602_vm3, %vm21604_vm8 }
 0x37a   :  { %12142 = vmatpush3.bf16.msk.msra.mxu0 %vm21600_vm2, %v21023_v29  ;;  %12174 = vmatpush3.bf16.msk.msra.mxu1 %vm21605_vm14, %v21023_v29  ;;  %vm21610_vm6 = vmpackc.low %vm21607_vm13, %vm21609_vm0  ;;  %vm21635_vm0 = vnez %v21232_v52  ;;  %v21643_v52 = vld [vmem:[#allocation121_spill] sm:$0xff] }
 0x37b   :  { %12176 = vmatprep.subr.msk.bf16.mxu0 %vm21610_vm6, %v21023_v29  ;;  %vm21615_vm4 = vmpackc.low %vm21612_vm1, %vm21614_vm15  ;;  %vm21636_vm6 = vnez %v21230_v8  ;;  %vm21638_vm15 = vnez %v21239_v13  ;;  %v21645_v8 = vld [vmem:[#allocation120_spill] sm:$0xff] }
 0x37c   :  { %12208 = vmatprep.subr.msk.bf16.mxu1 %vm21615_vm4, %v21023_v29  ;;  %vm21626_vm2 = vmmov %vm21625_vm9  ;;  %vm21639_vm4 = vnez %v21237_v10 }
 0x37d   :  { %vm21627_vm3 = vmmov %vm21626_vm2 }
 0x37e   :  { %vm21628_vm8 = vmmov %vm21626_vm2 }
 0x37f   :  { %vm21631_vm14 = vmmov %vm21626_vm2 }
 0x380   :  { %vm21632_vm13 = vmmov %vm21626_vm2 }
 0x381   :  { %vm21637_vm1 = vmpackc.low %vm21635_vm0, %vm21636_vm6 }
 0x382   :  { %vm21654_vm6 = vmpackc.low %vm15765_vm10, %vm15756_vm12 }
 0x42c   :  { %v4059_v34 = vpop.f32.mrb[12].mxu0  ;;  %v4130_v56 = vpop.f32.mrb[12].mxu1 }
 0x42d   :  { %v4280_v33 = vrot.slane %v4059_v34, %v21616_v4  ;;  %v4288_v14 = vrot.slane %v4130_v56, %v21616_v4  ;;  %v4061_v40 = vpop.f32.mrb[13].mxu0  ;;  %v4132_v38 = vpop.f32.mrb[13].mxu1 }
 0x42e   :  { %v4284_v11 = vrot.slane %v4061_v40, %v21616_v4  ;;  %v4292_v41 = vrot.slane %v4132_v38, %v21616_v4 }
 0x42f   :  { %v16771_v23 = vsub.f32 %v21618_v32, %v4280_v33  ;;  %v16775_v18 = vsub.f32 %v21620_v27, %v4288_v14  ;;  %v21629_v32 = vmax.f32 %v16356_v62, 0.0  ;;  %v21630_v27 = vmax.f32 %v16359_v25, 0.0 }
 0x430   :  { %v16779_v26 = vsub.f32 %v21622_v59, %v4284_v11  ;;  %v16783_v51 = vsub.f32 %v21624_v6, %v4292_v41  ;;  %v4201_v54 = vpop.f32.mrb[14].mxu0  ;;  %v4272_v21 = vpop.f32.mrb[14].mxu1 }
 0x431   :  { %v4317_v24 = vmul.f32 %v16771_v23, %v16771_v23  ;;  %v4319_v9 = vmul.f32 %v16775_v18, %v16775_v18  ;;  %v4203_v16 = vpop.f32.mrb[15].mxu0  ;;  %v4274_v1 = vpop.f32.mrb[15].mxu1 }
 0x432   :  { %v4318_v3 = vmul.f32 %v16779_v26, %v16779_v26  ;;  %v4320_v7 = vmul.f32 %v16783_v51, %v16783_v51  ;;  %v4300_v42 = vrot.slane %v4203_v16, %v21616_v4  ;;  %v4308_v36 = vrot.slane %v4274_v1, %v21616_v4 }
 0x433   :  { %v4325_v50 = vsel %vm21625_vm9, %v4317_v24, 0.0  ;;  %v4339_v34 = vsel %vm21626_vm2, %v4319_v9, 0.0  ;;  %vm21640_vm9 = vmpackc.low %vm21638_vm15, %vm21639_vm4  ;;  %vm21641_vm2 = vnez %v21244_v63 }
 0x434   :  { %v4326_v56 = vrot.slane %v4325_v50, 4  ;;  %v4340_v33 = vrot.slane %v4339_v34, 4  ;;  %v4332_v14 = vsel %vm21627_vm3, %v4318_v3, 0.0  ;;  %v4346_v40 = vsel %vm21628_vm8, %v4320_v7, 0.0  ;;  %vm21642_vm3 = vmpackc.low %vm21269_vm7, %vm21641_vm2 }
 0x435   :  { %v4333_v38 = vrot.slane %v4332_v14, 4  ;;  %v4347_v11 = vrot.slane %v4346_v40, 4  ;;  %v16801_v2 = vsub.f32 %v21629_v32, %v4300_v42  ;;  %v16805_v30 = vsub.f32 %v21630_v27, %v4308_v36 }
 0x436   :  { %v4327_v41 = vadd.f32 %v4326_v56, %v4325_v50  ;;  %v4341_v49 = vadd.f32 %v4340_v33, %v4339_v34  ;;  %v4296_v34 = vrot.slane %v4201_v54, %v21616_v4  ;;  %v4304_v56 = vrot.slane %v4272_v21, %v21616_v4 }
 0x437   :  { %v4334_v59 = vadd.f32 %v4333_v38, %v4332_v14  ;;  %v4348_v37 = vadd.f32 %v4347_v11, %v4346_v40  ;;  %v4322_v9 = vmul.f32 %v16801_v2, %v16801_v2  ;;  %v4324_v16 = vmul.f32 %v16805_v30, %v16805_v30 }
 0x438   :  { %v4328_v6 = vrot.slane %v4327_v41, 2  ;;  %v4342_v24 = vrot.slane %v4341_v49, 2  ;;  %v21634_v54 = vmax.f32 %v16354_v35, 0.0  ;;  %vm21644_vm8 = vnez %v21643_v52  ;;  %v21698_v52 = vld [vmem:[#allocation142_spill] sm:$0xff] }
 0x439   :  { %v4335_v1 = vrot.slane %v4334_v59, 2  ;;  %v4349_v3 = vrot.slane %v4348_v37, 2  ;;  %v4360_v42 = vsel %vm21631_vm14, %v4322_v9, 0.0  ;;  %v4374_v25 = vsel %vm21632_vm13, %v4324_v16, 0.0 }
 0x43a   :  { %v4329_v7 = vadd.f32 %v4328_v6, %v4327_v41  ;;  %v4343_v62 = vadd.f32 %v4342_v24, %v4341_v49  ;;  %v4361_v33 = vrot.slane %v4360_v42, 4  ;;  %v4375_v14 = vrot.slane %v4374_v25, 4 }
 0x43b   :  { %v4336_v36 = vadd.f32 %v4335_v1, %v4334_v59  ;;  %v4350_v50 = vadd.f32 %v4349_v3, %v4348_v37  ;;  %v21633_v59 = vmax.f32 %v16352_v5, 0.0  ;;  %v16821_v21 = vsub.f32 %v21634_v54, %v4304_v56  ;;  %v21661_v56 = vld [vmem:[#allocation129_spill] sm:$0xff]  ;;  %v21693_v54 = vld [vmem:[#allocation140_spill] sm:$0xff] }
 0x43c   :  { %v4330_v11 = vrot.slane %v4329_v7, 1  ;;  %v4344_v32 = vrot.slane %v4343_v62, 1  ;;  %v4362_v27 = vadd.f32 %v4361_v33, %v4360_v42  ;;  %v4376_v12 = vadd.f32 %v4375_v14, %v4374_v25  ;;  %v21663_v33 = vld [vmem:[#allocation128_spill] sm:$0xff]  ;;  %v21666_v14 = vld [vmem:[#allocation131_spill] sm:$0xff]  ;;  %v21718_v42 = vld [vmem:[#allocation150_spill] sm:$0xff] }
 0x43d   :  { %v4337_v40 = vrot.slane %v4336_v36, 1  ;;  %v4351_v38 = vrot.slane %v4350_v50, 1  ;;  %v16817_v37 = vsub.f32 %v21633_v59, %v4296_v34  ;;  %vm21646_vm14 = vnez %v21645_v8  ;;  %v21658_v34 = vld [vmem:[#allocation126_spill] sm:$0xff]  ;;  %v21691_v59 = vld [vmem:[#allocation141_spill] sm:$0xff] }
 0x43e   :  { %v4331_v6 = vadd.f32 %v4330_v11, %v4329_v7  ;;  %v4345_v24 = vadd.f32 %v4344_v32, %v4343_v62  ;;  %v4363_v9 = vrot.slane %v4362_v27, 2  ;;  %v4377_v16 = vrot.slane %v4376_v12, 2  ;;  %vm21647_vm13 = vmpackc.low %vm21644_vm8, %vm21646_vm14  ;;  %v21649_v7 = vld [vmem:[#allocation122_spill] sm:$0xff]  ;;  %v21673_v11 = vld [vmem:[#allocation132_spill] sm:$0xff] }
 0x43f   :  { %v4338_v41 = vadd.f32 %v4337_v40, %v4336_v36  ;;  %v4352_v49 = vadd.f32 %v4351_v38, %v4350_v50  ;;  %v4321_v10 = vmul.f32 %v16817_v37, %v16817_v37  ;;  %v4323_v5 = vmul.f32 %v16821_v21, %v16821_v21  ;;  %v21668_v40 = vld [vmem:[#allocation130_spill] sm:$0xff]  ;;  %v21671_v38 = vld [vmem:[#allocation133_spill] sm:$0xff]  ;;  %v21716_v62 = vld [vmem:[#allocation151_spill] sm:$0xff] }
 0x440   :  { %v4364_v1 = vadd.f32 %v4363_v9, %v4362_v27  ;;  %v4378_v3 = vadd.f32 %v4377_v16, %v4376_v12  ;;  %vm21650_vm7 = vnez %v21649_v7  ;;  %vm21659_vm4 = vnez %v21658_v34  ;;  %v21686_v9 = vld [vmem:[#allocation139_spill] sm:$0xff]  ;;  %v21688_v16 = vld [vmem:[#allocation138_spill] sm:$0xff]  ;;  %v21701_v8 = vld [vmem:[#allocation145_spill] sm:$0xff] }
 0x441   :  { %4445 = vmatprep.mubr.f32.mxu0 %v4338_v41  ;;  %4515 = vmatprep.mubr.f32.mxu1 %v4352_v49  ;;  %vm21651_vm0 = vmpackc.low %vm15751_vm11, %vm21650_vm7  ;;  %vm21664_vm2 = vnez %v21663_v33  ;;  %vm21667_vm12 = vnez %v21666_v14  ;;  %vm21672_vm14 = vnez %v21671_v38  ;;  %v21676_v41 = vld [vmem:[#allocation135_spill] sm:$0xff]  ;;  %v21678_v49 = vld [vmem:[#allocation134_spill] sm:$0xff] }
 0x442   :  { %4446 = vmatmul.mubr.f32.vlgmr.msra.gmra.mrb[16].mxu0 %v4331_v6  ;;  %4516 = vmatmul.mubr.f32.vlgmr.msra.gmra.mrb[16].mxu1 %v4345_v24  ;;  %v4365_v35 = vrot.slane %v4364_v1, 1  ;;  %v4379_v13 = vrot.slane %v4378_v3, 1  ;;  %vm21660_vm11 = vmpackc.low %vm21290_vm5, %vm21659_vm4  ;;  %vm21674_vm5 = vnez %v21673_v11  ;;  %vm21677_vm7 = vnez %v21676_v41  ;;  %v21681_v6 = vld [vmem:[#allocation137_spill] sm:$0xff]  ;;  %v21683_v24 = vld [vmem:[#allocation136_spill] sm:$0xff] }
 0x443   :  { %12178 = vmatpush3.bf16.msk.msra.mxu0 %vm21637_vm1, %v21023_v29  ;;  %12210 = vmatpush3.bf16.msk.msra.mxu1 %vm21640_vm9, %v21023_v29  ;;  %vm21655_vm1 = vcmask 1041408   ;;  %vm21662_vm9 = vnez %v21661_v56  ;;  %v21726_v50 = vld [vmem:[#allocation155_spill] sm:$0xff]  ;;  %v21728_v34 = vld [vmem:[#allocation154_spill] sm:$0xff]  ;;  %v21731_v56 = vld [vmem:[#allocation157_spill] sm:$0xff] }
 0x444   :  { %12180 = vmatprep.subr.msk.bf16.mxu0 %vm21642_vm3, %v21023_v29  ;;  %12212 = vmatprep.subr.msk.bf16.mxu1 %vm21647_vm13, %v21023_v29  ;;  %v4366_v43 = vadd.f32 %v4365_v35, %v4364_v1  ;;  %v4380_v12 = vadd.f32 %v4379_v13, %v4378_v3  ;;  %v4353_v25 = vsel %vm21655_vm1, %v4321_v10, 0.0  ;;  %vm21656_vm15 = vmmov %vm21655_vm1  ;;  %vm21669_vm3 = vnez %v21668_v40  ;;  %v21696_v35 = vld [vmem:[#allocation143_spill] sm:$0xff]  ;;  %v21703_v13 = vld [vmem:[#allocation144_spill] sm:$0xff] }
 0x445   :  { %v4367_v36 = vsel %vm21656_vm15, %v4323_v5, 0.0  ;;  %vm21665_vm10 = vmpackc.low %vm21662_vm9, %vm21664_vm2  ;;  %v4354_v32 = vrot.slane %v4353_v25, 4  ;;  %vm21682_vm1 = vnez %v21681_v6  ;;  %vm21684_vm15 = vnez %v21683_v24  ;;  %v21706_v10 = vld [vmem:[#allocation147_spill] sm:$0xff]  ;;  %v21708_v5 = vld [vmem:[#allocation146_spill] sm:$0xff] }
 0x446   :  { %4585 = vmatprep.mubr.f32.mxu0 %v4366_v43  ;;  %4655 = vmatprep.mubr.f32.mxu1 %v4380_v12  ;;  %vm21670_vm8 = vmpackc.low %vm21667_vm12, %vm21669_vm3  ;;  %v4368_v27 = vrot.slane %v4367_v36, 4  ;;  %vm21689_vm9 = vnez %v21688_v16  ;;  %vm21694_vm12 = vnez %v21693_v54  ;;  %v21711_v43 = vld [vmem:[#allocation149_spill] sm:$0xff]  ;;  %v21713_v12 = vld [vmem:[#allocation148_spill] sm:$0xff] }
 0x447   :  { %12182 = vmatpush3.bf16.msk.msra.mxu0 %vm21651_vm0, %v21023_v29  ;;  %12214 = vmatpush3.bf16.msk.msra.mxu1 %vm21654_vm6, %v21023_v29  ;;  %vm21675_vm13 = vmpackc.low %vm21672_vm14, %vm21674_vm5  ;;  %vm21679_vm0 = vnez %v21678_v49  ;;  %v4355_v1 = vadd.f32 %v4354_v32, %v4353_v25  ;;  %vm21699_vm14 = vnez %v21698_v52  ;;  %v21721_v25 = vld [vmem:[#allocation153_spill] sm:$0xff]  ;;  %v21733_v33 = vld [vmem:[#allocation156_spill] sm:$0xff] }
 0x448   :  { %12184 = vmatprep.subr.msk.bf16.mxu0 %vm21660_vm11, %v21023_v29  ;;  %12216 = vmatprep.subr.msk.bf16.mxu1 %vm21665_vm10, %v21023_v29  ;;  %vm21680_vm6 = vmpackc.low %vm21677_vm7, %vm21679_vm0  ;;  %vm21687_vm11 = vnez %v21686_v9  ;;  %vm21692_vm10 = vnez %v21691_v59  ;;  %v4369_v3 = vadd.f32 %v4368_v27, %v4367_v36  ;;  %vm21704_vm7 = vnez %v21703_v13  ;;  %v21723_v36 = vld [vmem:[#allocation152_spill] sm:$0xff]  ;;  %v21736_v14 = vld [vmem:[#allocation159_spill] sm:$0xff] }
 0x449   :  { %vm21685_vm4 = vmpackc.low %vm21682_vm1, %vm21684_vm15  ;;  %vm21709_vm1 = vnez %v21708_v5  ;;  %v4356_v63 = vrot.slane %v4355_v1, 2  ;;  %v21738_v40 = vld [vmem:[#allocation158_spill] sm:$0xff]  ;;  %v21741_v38 = vld [vmem:[#allocation161_spill] sm:$0xff] }
 0x44a   :  { %vm21690_vm2 = vmpackc.low %vm21687_vm11, %vm21689_vm9  ;;  %vm21714_vm11 = vnez %v21713_v12  ;;  %v4370_v7 = vrot.slane %v4369_v3, 2  ;;  %v21743_v11 = vld [vmem:[#allocation160_spill] sm:$0xff]  ;;  %v21746_v41 = vld [vmem:[#allocation163_spill] sm:$0xff] }
 0x44b   :  { %12186 = vmatpush3.bf16.msk.msra.mxu0 %vm21670_vm8, %v21023_v29  ;;  %12218 = vmatpush3.bf16.msk.msra.mxu1 %vm21675_vm13, %v21023_v29  ;;  %vm21695_vm3 = vmpackc.low %vm21692_vm10, %vm21694_vm12  ;;  %vm21697_vm8 = vnez %v21696_v35  ;;  %vm21702_vm13 = vnez %v21701_v8  ;;  %vm21719_vm10 = vnez %v21718_v42  ;;  %v4357_v32 = vadd.f32 %v4356_v63, %v4355_v1  ;;  %v21748_v49 = vld [vmem:[#allocation162_spill] sm:$0xff]  ;;  %v21751_v6 = vld [vmem:[#allocation165_spill] sm:$0xff] }
 0x44c   :  { %12188 = vmatprep.subr.msk.bf16.mxu0 %vm21680_vm6, %v21023_v29  ;;  %12220 = vmatprep.subr.msk.bf16.mxu1 %vm21685_vm4, %v21023_v29  ;;  %vm21700_vm5 = vmpackc.low %vm21697_vm8, %vm21699_vm14  ;;  %vm21707_vm6 = vnez %v21706_v10  ;;  %vm21712_vm4 = vnez %v21711_v43  ;;  %vm21724_vm8 = vnez %v21723_v36  ;;  %v4371_v27 = vadd.f32 %v4370_v7, %v4369_v3  ;;  %v21753_v24 = vld [vmem:[#allocation164_spill] sm:$0xff]  ;;  %v21756_v9 = vld [vmem:[#allocation167_spill] sm:$0xff] }
 0x44d   :  { %vm21705_vm0 = vmpackc.low %vm21702_vm13, %vm21704_vm7  ;;  %vm21729_vm13 = vnez %v21728_v34  ;;  %v21758_v16 = vld [vmem:[#allocation166_spill] sm:$0xff]  ;;  %v21761_v59 = vld [vmem:[#allocation169_spill] sm:$0xff]  ;;  %v4358_v1 = vrot.slane %v4357_v32, 1 }
 0x44e   :  { %vm21710_vm15 = vmpackc.low %vm21707_vm6, %vm21709_vm1  ;;  %vm21734_vm6 = vnez %v21733_v33  ;;  %v21763_v54 = vld [vmem:[#allocation168_spill] sm:$0xff]  ;;  %v4372_v3 = vrot.slane %v4371_v27, 1  ;;  %v21766_v35 = vld [vmem:[#allocation171_spill] sm:$0xff] }
 0x44f   :  { %12190 = vmatpush3.bf16.msk.msra.mxu0 %vm21690_vm2, %v21023_v29  ;;  %12222 = vmatpush3.bf16.msk.msra.mxu1 %vm21695_vm3, %v21023_v29  ;;  %vm21715_vm9 = vmpackc.low %vm21712_vm4, %vm21714_vm11  ;;  %vm21717_vm2 = vnez %v21716_v62  ;;  %vm21722_vm3 = vnez %v21721_v25  ;;  %vm21739_vm4 = vnez %v21738_v40  ;;  %v21768_v52 = vld [vmem:[#allocation170_spill] sm:$0xff]  ;;  %v21771_v8 = vld [vmem:[#allocation173_spill] sm:$0xff]  ;;  %v4359_v10 = vadd.f32 %v4358_v1, %v4357_v32 }
 0x450   :  { %12192 = vmatprep.subr.msk.bf16.mxu0 %vm21700_vm5, %v21023_v29  ;;  %12224 = vmatprep.subr.msk.bf16.mxu1 %vm21705_vm0, %v21023_v29  ;;  %vm21720_vm12 = vmpackc.low %vm21717_vm2, %vm21719_vm10  ;;  %vm21727_vm5 = vnez %v21726_v50  ;;  %vm21732_vm0 = vnez %v21731_v56  ;;  %vm21744_vm2 = vnez %v21743_v11  ;;  %v21773_v13 = vld [vmem:[#allocation172_spill] sm:$0xff]  ;;  %v4373_v5 = vadd.f32 %v4372_v3, %v4371_v27  ;;  %v12690_v50 = vld [vmem:[%s20217_s5 + $0x4] ss:$16 sps:$4 sm:$0xff]  }
 0x451   :  { %vm21725_vm14 = vmpackc.low %vm21722_vm3, %vm21724_vm8  ;;  %vm21749_vm3 = vnez %v21748_v49  ;;  %v12693_v34 = vld [vmem:[%s20217_s5 + $0xc] ss:$16 sps:$4 sm:$0xff]   ;;  %v12688_v56 = vld [vmem:[%s20217_s5] ss:$16 sps:$4 sm:$0xff]  }
 0x452   :  { %vm21730_vm7 = vmpackc.low %vm21727_vm5, %vm21729_vm13  ;;  %vm21754_vm5 = vnez %v21753_v24  ;;  %v12691_v33 = vld [vmem:[%s20217_s5 + $0x8] ss:$16 sps:$4 sm:$0xff]   ;;  %v12705_v40 = vld [vmem:[%s20217_s5 + $0x4c] ss:$16 sps:$4 sm:$0xff]  }
 0x453   :  { %12194 = vmatpush3.bf16.msk.msra.mxu0 %vm21710_vm15, %v21023_v29  ;;  %12226 = vmatpush3.bf16.msk.msra.mxu1 %vm21715_vm9, %v21023_v29  ;;  %vm21735_vm1 = vmpackc.low %vm21732_vm0, %vm21734_vm6  ;;  %vm21737_vm15 = vnez %v21736_v14  ;;  %vm21742_vm9 = vnez %v21741_v38  ;;  %vm21759_vm0 = vnez %v21758_v16  ;;  %v12702_v14 = vld [vmem:[%s20217_s5 + $0x44] ss:$16 sps:$4 sm:$0xff]   ;;  %v12700_v38 = vld [vmem:[%s20217_s5 + $0x40] ss:$16 sps:$4 sm:$0xff]  }
 0x454   :  { %12196 = vmatprep.subr.msk.bf16.mxu0 %vm21720_vm12, %v21023_v29  ;;  %12228 = vmatprep.subr.msk.bf16.mxu1 %vm21725_vm14, %v21023_v29  ;;  %vm21740_vm11 = vmpackc.low %vm21737_vm15, %vm21739_vm4  ;;  %vm21747_vm12 = vnez %v21746_v41  ;;  %vm21752_vm14 = vnez %v21751_v6  ;;  %vm21764_vm15 = vnez %v21763_v54  ;;  %v12703_v11 = vld [vmem:[%s20217_s5 + $0x48] ss:$16 sps:$4 sm:$0xff]   ;;  %v12708_v32 = vld [vmem:[%s20217_s5 + $0x64] ss:$16 sps:$4 sm:$0xff]  }
 0x455   :  { %vm21745_vm10 = vmpackc.low %vm21742_vm9, %vm21744_vm2  ;;  %vm21769_vm9 = vnez %v21768_v52  ;;  %v12711_v27 = vld [vmem:[%s20217_s5 + $0x6c] ss:$16 sps:$4 sm:$0xff]   ;;  %v12706_v41 = vld [vmem:[%s20217_s5 + $0x60] ss:$16 sps:$4 sm:$0xff]  }
 0x456   :  { %vm21750_vm8 = vmpackc.low %vm21747_vm12, %vm21749_vm3  ;;  %vm21774_vm12 = vnez %v21773_v13  ;;  %v12709_v49 = vld [vmem:[%s20217_s5 + $0x68] ss:$16 sps:$4 sm:$0xff]   ;;  %v12714_v6 = vld [vmem:[%s20217_s5 + $0x84] ss:$16 sps:$4 sm:$0xff]  }
 0x457   :  { %12198 = vmatpush3.bf16.msk.msra.mxu0 %vm21730_vm7, %v21023_v29  ;;  %12230 = vmatpush3.bf16.msk.msra.mxu1 %vm21735_vm1, %v21023_v29  ;;  %vm21755_vm13 = vmpackc.low %vm21752_vm14, %vm21754_vm5  ;;  %vm21757_vm7 = vnez %v21756_v9  ;;  %vm21762_vm1 = vnez %v21761_v59  ;;  %vm21777_vm14 = vnez %v21435_v31  ;;  %v12717_v24 = vld [vmem:[%s20217_s5 + $0x8c] ss:$16 sps:$4 sm:$0xff]   ;;  %v12712_v9 = vld [vmem:[%s20217_s5 + $0x80] ss:$16 sps:$4 sm:$0xff]  }
 0x458   :  { %12200 = vmatprep.subr.msk.bf16.mxu0 %vm21740_vm11, %v21023_v29  ;;  %12232 = vmatprep.subr.msk.bf16.mxu1 %vm21745_vm10, %v21023_v29  ;;  %vm21760_vm6 = vmpackc.low %vm21757_vm7, %vm21759_vm0  ;;  %vm21767_vm11 = vnez %v21766_v35  ;;  %vm21772_vm10 = vnez %v21771_v8  ;;  %vm21780_vm7 = vnez %v21439_v20  ;;  %v12715_v16 = vld [vmem:[%s20217_s5 + $0x88] ss:$16 sps:$4 sm:$0xff]   ;;  %v12720_v59 = vld [vmem:[%s20217_s5 + $0xa4] ss:$16 sps:$4 sm:$0xff]  }
 0x459   :  { %vm21765_vm4 = vmpackc.low %vm21762_vm1, %vm21764_vm15  ;;  %vm21783_vm1 = vnez %v21443_v0  ;;  %v12723_v54 = vld [vmem:[%s20217_s5 + $0xac] ss:$16 sps:$4 sm:$0xff]   ;;  %v12718_v1 = vld [vmem:[%s20217_s5 + $0xa0] ss:$16 sps:$4 sm:$0xff]  }
 0x45a   :  { %vm21770_vm2 = vmpackc.low %vm21767_vm11, %vm21769_vm9  ;;  %vm21786_vm11 = vnez %v21447_v46  ;;  %v12721_v3 = vld [vmem:[%s20217_s5 + $0xa8] ss:$16 sps:$4 sm:$0xff]   ;;  %v12726_v35 = vld [vmem:[%s20217_s5 + $0xc4] ss:$16 sps:$4 sm:$0xff]  }
 0x45b   :  { %12202 = vmatpush3.bf16.msk.msra.mxu0 %vm21750_vm8, %v21023_v29  ;;  %12234 = vmatpush3.bf16.msk.msra.mxu1 %vm21755_vm13, %v21023_v29  ;;  %vm21775_vm3 = vmpackc.low %vm21772_vm10, %vm21774_vm12  ;;  %vm21776_vm8 = vnez %v21437_v28  ;;  %vm21779_vm13 = vnez %v21441_v22  ;;  %vm21789_vm10 = vnez %v21451_v47  ;;  %v12729_v52 = vld [vmem:[%s20217_s5 + $0xcc] ss:$16 sps:$4 sm:$0xff]   ;;  %v12724_v8 = vld [vmem:[%s20217_s5 + $0xc0] ss:$16 sps:$4 sm:$0xff]  }
 0x45c   :  { %12204 = vmatprep.subr.msk.bf16.mxu0 %vm21760_vm6, %v21023_v29  ;;  %12236 = vmatprep.subr.msk.bf16.mxu1 %vm21765_vm4, %v21023_v29  ;;  %vm21778_vm5 = vmpackc.low %vm21776_vm8, %vm21777_vm14  ;;  %vm21782_vm6 = vnez %v21445_v15  ;;  %vm21785_vm4 = vnez %v21449_v45  ;;  %vm21792_vm8 = vnez %v21455_v17  ;;  %v4662_v17 = vld [vmem:[%s20215_s3] sm:$0x1]  ;;  %v12727_v13 = vld [vmem:[%s20217_s5 + $0xc8] ss:$16 sps:$4 sm:$0xff]  }
 0x45d   :  { %vm21781_vm0 = vmpackc.low %vm21779_vm13, %vm21780_vm7  ;;  %vm21796_vm7 = vnez %v21461_v39  ;;  %v12699_v39 = vld [vmem:[%s20217_s5 + $0x2c] ss:$16 sps:$4 sm:$0xff]  }
 0x45e   :  { %vm21784_vm15 = vmpackc.low %vm21782_vm6, %vm21783_vm1  ;;  %vm21799_vm1 = vnez %v21465_v19  ;;  %v12697_v19 = vld [vmem:[%s20217_s5 + $0x28] ss:$16 sps:$4 sm:$0xff]  }
 0x45f   :  { %12206 = vmatpush3.bf16.msk.msra.mxu0 %vm21770_vm2, %v21023_v29  ;;  %12238 = vmatpush3.bf16.msk.msra.mxu1 %vm21775_vm3, %v21023_v29  ;;  %vm21787_vm9 = vmpackc.low %vm21785_vm4, %vm21786_vm11  ;;  %vm21788_vm2 = vnez %v21453_v57  ;;  %vm21791_vm3 = vnez %v21457_v55 }
 0x460   :  { %12240 = vmatprep.subr.msk.bf16.mxu0 %vm21778_vm5, %v21023_v29  ;;  %12244 = vmatprep.subr.msk.bf16.mxu1 %vm21781_vm0, %v21023_v29  ;;  %vm21790_vm12 = vmpackc.low %vm21788_vm2, %vm21789_vm10  ;;  %vm21794_vm5 = vcmask 130048   ;;  %vm21797_vm0 = vnez %v21459_v58  ;;  %v12696_v58 = vld [vmem:[%s20217_s5 + $0x24] ss:$16 sps:$4 sm:$0xff]  }
 0x461   :  { %vm21793_vm14 = vmpackc.low %vm21791_vm3, %vm21792_vm8 }
 0x462   :  { %4586 = vmatmul.mubr.f32.vlgmr.msra.gmra.mrb[18].mxu0 %v4359_v10  ;;  %4656 = vmatmul.mubr.f32.vlgmr.msra.gmra.mrb[18].mxu1 %v4373_v5  ;;  %vm21795_vm13 = vmmov %vm21794_vm5  ;;  %v12732_v10 = vld [vmem:[%s20217_s5 + $0xe4] ss:$16 sps:$4 sm:$0xff]   ;;  %v12735_v5 = vld [vmem:[%s20217_s5 + $0xec] ss:$16 sps:$4 sm:$0xff]  }
 0x463   :  { %12242 = vmatpush1.bf16.msk.msra.mxu0 %vm21784_vm15, %v21023_v29  ;;  %12246 = vmatpush1.bf16.msk.msra.mxu1 %vm21787_vm9, %v21023_v29  ;;  %vm21798_vm6 = vmpackc.low %vm21796_vm7, %vm21797_vm0  ;;  %vm21800_vm15 = vnez %v21463_v60  ;;  %v12694_v60 = vld [vmem:[%s20217_s5 + $0x20] ss:$16 sps:$4 sm:$0xff]  }
 0x464   :  { %4733 = vmatprep.mubr.f32.mxu0 %v21466_v61  ;;  %4804 = vmatprep.mubr.f32.mxu1 %v21466_v61  ;;  %vm21801_vm4 = vmpackc.low %vm21799_vm1, %vm21800_vm15 }
 0x465   :  { %12248 = vmatprep.subr.msk.bf16.mxu0 %vm21790_vm12, %v21023_v29  ;;  %12252 = vmatprep.subr.msk.bf16.mxu1 %vm21793_vm14, %v21023_v29  ;;  %vm21802_vm11 = vmmov %vm21794_vm5 }
 0x466   :  { %vm21803_vm9 = vmmov %vm21794_vm5 }
 0x515   :  { %v11419_v31 = vpop.f32.mrb[16].mxu0  ;;  %v11454_v28 = vpop.f32.mrb[16].mxu1 }
 0x516   :  { %v11420_v20 = vpop.f32.mrb[17].mxu0  ;;  %v11455_v22 = vpop.f32.mrb[17].mxu1 }
 0x517   :  { %v11421_v0 = vadd.f32 %v11420_v20, %v11419_v31  ;;  %v11456_v15 = vadd.f32 %v11455_v22, %v11454_v28  ;;  %v12730_v31 = vld [vmem:[%s20217_s5 + $0xe0] ss:$16 sps:$4 sm:$0xff]   ;;  %v12733_v28 = vld [vmem:[%s20217_s5 + $0xe8] ss:$16 sps:$4 sm:$0xff]   ;;  %v12738_v20 = vld [vmem:[%s20217_s5 + $0x104] ss:$16 sps:$4 sm:$0xff]  }
 0x518   :  { %v12741_v22 = vld [vmem:[%s20217_s5 + $0x10c] ss:$16 sps:$4 sm:$0xff]  }
 0x519   :  { %v4518_v46 = vadd.f32 %v11456_v15, %v11421_v0  ;;  %v12736_v0 = vld [vmem:[%s20217_s5 + $0x100] ss:$16 sps:$4 sm:$0xff]   ;;  %v12739_v15 = vld [vmem:[%s20217_s5 + $0x108] ss:$16 sps:$4 sm:$0xff]  }
 0x535   :  { %v11489_v45 = vpop.f32.mrb[18].mxu0  ;;  %v11524_v57 = vpop.f32.mrb[18].mxu1 }
 0x536   :  { %v11490_v43 = vpop.f32.mrb[19].mxu0  ;;  %v11525_v47 = vpop.f32.mrb[19].mxu1 }
 0x537   :  { %v11491_v12 = vadd.f32 %v11490_v43, %v11489_v45  ;;  %v11526_v63 = vadd.f32 %v11525_v47, %v11524_v57  ;;  %v12747_v45 = vld [vmem:[%s20217_s5 + $0x12c] ss:$16 sps:$4 sm:$0xff]   ;;  %v12742_v57 = vld [vmem:[%s20217_s5 + $0x120] ss:$16 sps:$4 sm:$0xff]   ;;  %v12745_v43 = vld [vmem:[%s20217_s5 + $0x128] ss:$16 sps:$4 sm:$0xff]  }
 0x538   :  { %v12750_v47 = vld [vmem:[%s20217_s5 + $0x144] ss:$16 sps:$4 sm:$0xff]  }
 0x539   :  { %v4588_v7 = vadd.f32 %v11491_v12, %v4518_v46  ;;  %v12744_v46 = vld [vmem:[%s20217_s5 + $0x124] ss:$16 sps:$4 sm:$0xff]   ;;  %v12753_v12 = vld [vmem:[%s20217_s5 + $0x14c] ss:$16 sps:$4 sm:$0xff]  }
 0x53b   :  { %v4658_v62 = vadd.f32 %v11526_v63, %v4588_v7  ;;  %v12748_v63 = vld [vmem:[%s20217_s5 + $0x140] ss:$16 sps:$4 sm:$0xff]   ;;  %v12751_v7 = vld [vmem:[%s20217_s5 + $0x148] ss:$16 sps:$4 sm:$0xff]  }
 0x53d   :  { %v4661_v55 = vmul.f32 0.0078125, %v4658_v62  ;;  %v12756_v62 = vld [vmem:[%s20217_s5 + $0x164] ss:$16 sps:$4 sm:$0xff]  }
 0x53f   :  { %v4663_v42 = vadd.f32 1e-05, %v4661_v55  ;;  %v12759_v55 = vld [vmem:[%s20217_s5 + $0x16c] ss:$16 sps:$4 sm:$0xff]  }
 0x541   :  { %13184 = vrsqrt.f32 %v4663_v42  ;;  %v12754_v42 = vld [vmem:[%s20217_s5 + $0x160] ss:$16 sps:$4 sm:$0xff]  }
 0x54b   :  { %v13185_v25 = vpop.eup %13184 }
 0x54c   :  { %v4665_v36 = vmul.f32 %v13185_v25, %v4662_v17  ;;  %v12757_v17 = vld [vmem:[%s20217_s5 + $0x168] ss:$16 sps:$4 sm:$0xff]   ;;  %v12762_v25 = vld [vmem:[%s20217_s5 + $0x184] ss:$16 sps:$4 sm:$0xff]  }
 0x54e   :  { %10407 = vmatmul.mubr.msk.f32.vlgmr.msra.gmra.mrb[20].mxu0 %vm21794_vm5, %v4665_v36  ;;  %10412 = vmatmul.mubr.msk.f32.vlgmr.msra.gmra.mrb[20].mxu1 %vm21795_vm13, %v4665_v36 }
 0x54f   :  { %12250 = vmatpush1.bf16.msk.msra.mxu0 %vm21798_vm6, %v21023_v29  ;;  %12254 = vmatpush1.bf16.msk.msra.mxu1 %vm21801_vm4, %v21023_v29 }
 0x550   :  { %4875 = vmatprep.mubr.f32.mxu0 %v21466_v61  ;;  %4946 = vmatprep.mubr.f32.mxu1 %v21466_v61 }
 0x551   :  { %6609 = vmatprep.subr.bf16.mxu0 %v12690_v50  ;;  %6773 = vmatprep.subr.bf16.mxu1 %v12693_v34  ;;  %v12760_v50 = vld [vmem:[%s20217_s5 + $0x180] ss:$16 sps:$4 sm:$0xff]   ;;  %v12763_v34 = vld [vmem:[%s20217_s5 + $0x188] ss:$16 sps:$4 sm:$0xff]  }
 0x552   :  { %10417 = vmatmul.mubr.msk.f32.vlgmr.msra.gmra.mrb[22].mxu0 %vm21802_vm11, %v4665_v36  ;;  %10422 = vmatmul.mubr.msk.f32.vlgmr.msra.gmra.mrb[22].mxu1 %vm21803_vm9, %v4665_v36  ;;  %v12765_v36 = vld [vmem:[%s20217_s5 + $0x18c] ss:$16 sps:$4 sm:$0xff]  }
 0x553   :  { %6610 = vmatpush1.bf16.msra.mxu0 %v12688_v56  ;;  %6774 = vmatpush1.bf16.msra.mxu1 %v12691_v33  ;;  %v12768_v56 = vld [vmem:[%s20217_s5 + $0x1a4] ss:$16 sps:$4 sm:$0xff]   ;;  %v12771_v33 = vld [vmem:[%s20217_s5 + $0x1ac] ss:$16 sps:$4 sm:$0xff]  }
 0x554   :  { %6611 = vmatprep.subr.bf16.mxu0 %v12696_v58  ;;  %6775 = vmatprep.subr.bf16.mxu1 %v12699_v39  ;;  %v12766_v58 = vld [vmem:[%s20217_s5 + $0x1a0] ss:$16 sps:$4 sm:$0xff]   ;;  %v12769_v39 = vld [vmem:[%s20217_s5 + $0x1a8] ss:$16 sps:$4 sm:$0xff]  }
 0x557   :  { %6612 = vmatpush1.bf16.msra.mxu0 %v12694_v60  ;;  %6776 = vmatpush1.bf16.msra.mxu1 %v12697_v19  ;;  %v12774_v60 = vld [vmem:[%s20217_s5 + $0x1c4] ss:$16 sps:$4 sm:$0xff]   ;;  %v12777_v19 = vld [vmem:[%s20217_s5 + $0x1cc] ss:$16 sps:$4 sm:$0xff]  }
 0x558   :  { %6613 = vmatprep.subr.bf16.mxu0 %v12702_v14  ;;  %6777 = vmatprep.subr.bf16.mxu1 %v12705_v40  ;;  %v12772_v14 = vld [vmem:[%s20217_s5 + $0x1c0] ss:$16 sps:$4 sm:$0xff]   ;;  %v12775_v40 = vld [vmem:[%s20217_s5 + $0x1c8] ss:$16 sps:$4 sm:$0xff]  }
 0x55b   :  { %6614 = vmatpush1.bf16.msra.mxu0 %v12700_v38  ;;  %6778 = vmatpush1.bf16.msra.mxu1 %v12703_v11  ;;  %v12780_v38 = vld [vmem:[%s20217_s5 + $0x1e4] ss:$16 sps:$4 sm:$0xff]   ;;  %v12783_v11 = vld [vmem:[%s20217_s5 + $0x1ec] ss:$16 sps:$4 sm:$0xff]  }
 0x55c   :  { %6615 = vmatprep.subr.bf16.mxu0 %v12708_v32  ;;  %6779 = vmatprep.subr.bf16.mxu1 %v12711_v27  ;;  %v12778_v32 = vld [vmem:[%s20217_s5 + $0x1e0] ss:$16 sps:$4 sm:$0xff]   ;;  %v12781_v27 = vld [vmem:[%s20217_s5 + $0x1e8] ss:$16 sps:$4 sm:$0xff]  }
 0x55f   :  { %6616 = vmatpush1.bf16.msra.mxu0 %v12706_v41  ;;  %6780 = vmatpush1.bf16.msra.mxu1 %v12709_v49  ;;  %v12786_v41 = vld [vmem:[%s20217_s5 + $0x204] ss:$16 sps:$4 sm:$0xff]   ;;  %v12789_v49 = vld [vmem:[%s20217_s5 + $0x20c] ss:$16 sps:$4 sm:$0xff]  }
 0x560   :  { %6617 = vmatprep.subr.bf16.mxu0 %v12714_v6  ;;  %6781 = vmatprep.subr.bf16.mxu1 %v12717_v24  ;;  %v4993_v6 = vld [vmem:[%s20216_s4] sm:$0xff]  ;;  %s13193_s4 = scalar_lea.vmem %s9591_s18, 32 }
 0x561   :  { %p13194_p0 = scmp.ne.s32.totalorder %s9591_s18, %s13193_s4  ;;  %p13199_p2 = scmp.lt.s32.totalorder %s13193_s4, %s13193_s4 }
 0x563   :  { %6618 = vmatpush1.bf16.msra.mxu0 %v12712_v9  ;;  %6782 = vmatpush1.bf16.msra.mxu1 %v12715_v16  ;;  %p13200_p3 = por %p13199_p2, %p13198_p1 }
 0x564   :  { %6619 = vmatprep.subr.bf16.mxu0 %v12720_v59  ;;  %6783 = vmatprep.subr.bf16.mxu1 %v12723_v54  ;;  %v4998_v59 = vrot.slane %v4993_v6, %v21616_v4 }
 0x565   :  { %p13201_p4 = pnand %p13200_p3, %p13194_p0 }
 0x567   :  { %6620 = vmatpush1.bf16.msra.mxu0 %v12718_v1  ;;  %6784 = vmatpush1.bf16.msra.mxu1 %v12721_v3  ;;  %v21804_v1 = vld [vmem:[#allocation29_spill] sm:$0xff] }
 0x568   :  { %6621 = vmatprep.subr.bf16.mxu0 %v12726_v35  ;;  %6785 = vmatprep.subr.bf16.mxu1 %v12729_v52  ;;  %v5006_v3 = vrot.slane %v4993_v6, %v21804_v1 }
 0x56b   :  { %6622 = vmatpush1.bf16.msra.mxu0 %v12724_v8  ;;  %6786 = vmatpush1.bf16.msra.mxu1 %v12727_v13 }
 0x56c   :  { %6623 = vmatprep.subr.bf16.mxu0 %v12732_v10  ;;  %6787 = vmatprep.subr.bf16.mxu1 %v12735_v5  ;;  %v21805_v10 = vld [vmem:[#allocation35_spill] sm:$0xff] }
 0x56d   :  { %v5002_v5 = vrot.slane %v4993_v6, %v21805_v10 }
 0x56f   :  { %6624 = vmatpush1.bf16.msra.mxu0 %v12730_v31  ;;  %6788 = vmatpush1.bf16.msra.mxu1 %v12733_v28 }
 0x570   :  { %6625 = vmatprep.subr.bf16.mxu0 %v12738_v20  ;;  %6789 = vmatprep.subr.bf16.mxu1 %v12741_v22  ;;  %v21806_v20 = vsub.s32 4, %v13380_v44 }
 0x572   :  { %v5014_v22 = vrot.slane %v4993_v6, %v21806_v20  ;;  %v12817_v20 = vld [vmem:[%s20217_s5 + $0x2a8] ss:$16 sps:$4 sm:$0xff]  }
 0x573   :  { %6626 = vmatpush1.bf16.msra.mxu0 %v12736_v0  ;;  %6790 = vmatpush1.bf16.msra.mxu1 %v12739_v15  ;;  %v21807_v0 = vld [vmem:[#allocation36_spill] sm:$0xff] }
 0x574   :  { %6627 = vmatprep.subr.bf16.mxu0 %v12744_v46  ;;  %6791 = vmatprep.subr.bf16.mxu1 %v12747_v45  ;;  %v5010_v15 = vrot.slane %v4993_v6, %v21807_v0 }
 0x577   :  { %6628 = vmatpush1.bf16.msra.mxu0 %v12742_v57  ;;  %6792 = vmatpush1.bf16.msra.mxu1 %v12745_v43 }
 0x578   :  { %6629 = vmatprep.subr.bf16.mxu0 %v12750_v47  ;;  %6793 = vmatprep.subr.bf16.mxu1 %v12753_v12  ;;  %v21808_v47 = vsub.s32 6, %v13380_v44 }
 0x57a   :  { %v5022_v12 = vrot.slane %v4993_v6, %v21808_v47  ;;  %v12826_v47 = vld [vmem:[%s20217_s5 + $0x2e0] ss:$16 sps:$4 sm:$0xff]  }
 0x57b   :  { %6630 = vmatpush1.bf16.msra.mxu0 %v12748_v63  ;;  %6794 = vmatpush1.bf16.msra.mxu1 %v12751_v7  ;;  %v21809_v63 = vsub.s32 5, %v13380_v44 }
 0x57c   :  { %6631 = vmatprep.subr.bf16.mxu0 %v12756_v62  ;;  %6795 = vmatprep.subr.bf16.mxu1 %v12759_v55 }
 0x57d   :  { %v5018_v7 = vrot.slane %v4993_v6, %v21809_v63  ;;  %v12834_v63 = vld [vmem:[%s20217_s5 + $0x304] ss:$16 sps:$4 sm:$0xff]  }
 0x57f   :  { %6632 = vmatpush1.bf16.msra.mxu0 %v12754_v42  ;;  %6796 = vmatpush1.bf16.msra.mxu1 %v12757_v17 }
 0x580   :  { %6633 = vmatprep.subr.bf16.mxu0 %v12762_v25  ;;  %6797 = vmatprep.subr.bf16.mxu1 %v12765_v36  ;;  %v21810_v36 = vsub.s32 7, %v13380_v44 }
 0x583   :  { %6634 = vmatpush1.bf16.msra.mxu0 %v12760_v50  ;;  %6798 = vmatpush1.bf16.msra.mxu1 %v12763_v34  ;;  %v5026_v50 = vrot.slane %v4993_v6, %v21810_v36  ;;  %v12801_v6 = vld [vmem:[%s20217_s5 + $0x24c] ss:$16 sps:$4 sm:$0xff]   ;;  %v12844_v36 = vld [vmem:[%s20217_s5 + $0x340] ss:$16 sps:$4 sm:$0xff]  }
 0x584   :  { %6635 = vmatprep.subr.bf16.mxu0 %v12768_v56  ;;  %6799 = vmatprep.subr.bf16.mxu1 %v12771_v33 }
 0x587   :  { %6636 = vmatpush1.bf16.msra.mxu0 %v12766_v58  ;;  %6800 = vmatpush1.bf16.msra.mxu1 %v12769_v39 }
 0x588   :  { %6637 = vmatprep.subr.bf16.mxu0 %v12774_v60  ;;  %6801 = vmatprep.subr.bf16.mxu1 %v12777_v19  ;;  %v12784_v19 = vld [vmem:[%s20217_s5 + $0x200] ss:$16 sps:$4 sm:$0xff]  }
 0x58b   :  { %6638 = vmatpush1.bf16.msra.mxu0 %v12772_v14  ;;  %6802 = vmatpush1.bf16.msra.mxu1 %v12775_v40  ;;  %v12787_v14 = vld [vmem:[%s20217_s5 + $0x208] ss:$16 sps:$4 sm:$0xff]  }
 0x58c   :  { %6639 = vmatprep.subr.bf16.mxu0 %v12780_v38  ;;  %6803 = vmatprep.subr.bf16.mxu1 %v12783_v11 }
 0x58f   :  { %6640 = vmatpush1.bf16.msra.mxu0 %v12778_v32  ;;  %6804 = vmatpush1.bf16.msra.mxu1 %v12781_v27  ;;  %v12790_v27 = vld [vmem:[%s20217_s5 + $0x220] ss:$16 sps:$4 sm:$0xff]  }
 0x590   :  { %6650 = vmatprep.subr.bf16.mxu0 %v12786_v41  ;;  %6814 = vmatprep.subr.bf16.mxu1 %v12789_v49  ;;  %v12793_v41 = vld [vmem:[%s20217_s5 + $0x228] ss:$16 sps:$4 sm:$0xff]   ;;  %v12798_v49 = vld [vmem:[%s20217_s5 + $0x244] ss:$16 sps:$4 sm:$0xff]  }
 0x621   :  { %v4735_v24 = vpop.f32.mrb[20].mxu0  ;;  %v4806_v9 = vpop.f32.mrb[20].mxu1 }
 0x622   :  { %v4956_v16 = vrot.slane %v4735_v24, %v21616_v4  ;;  %v4964_v54 = vrot.slane %v4806_v9, %v21616_v4  ;;  %v4737_v35 = vpop.f32.mrb[21].mxu0  ;;  %v4808_v52 = vpop.f32.mrb[21].mxu1  ;;  %v12796_v24 = vld [vmem:[%s20217_s5 + $0x240] ss:$16 sps:$4 sm:$0xff]   ;;  %v12799_v9 = vld [vmem:[%s20217_s5 + $0x248] ss:$16 sps:$4 sm:$0xff]  }
 0x623   :  { %v4960_v8 = vrot.slane %v4737_v35, %v21616_v4  ;;  %v4968_v13 = vrot.slane %v4808_v52, %v21616_v4  ;;  %v12810_v35 = vld [vmem:[%s20217_s5 + $0x284] ss:$16 sps:$4 sm:$0xff]   ;;  %v12813_v52 = vld [vmem:[%s20217_s5 + $0x28c] ss:$16 sps:$4 sm:$0xff]  }
 0x624   :  { %v4985_v31 = vmul.f32 %v4956_v16, %v16771_v23  ;;  %v4987_v28 = vmul.f32 %v4964_v54, %v16775_v18  ;;  %v12804_v16 = vld [vmem:[%s20217_s5 + $0x264] ss:$16 sps:$4 sm:$0xff]   ;;  %v12802_v54 = vld [vmem:[%s20217_s5 + $0x260] ss:$16 sps:$4 sm:$0xff]  }
 0x625   :  { %v4986_v46 = vmul.f32 %v4960_v8, %v16779_v26  ;;  %v4988_v45 = vmul.f32 %v4968_v13, %v16783_v51  ;;  %v4877_v57 = vpop.f32.mrb[22].mxu0  ;;  %v4948_v43 = vpop.f32.mrb[22].mxu1  ;;  %v12808_v8 = vld [vmem:[%s20217_s5 + $0x280] ss:$16 sps:$4 sm:$0xff]   ;;  %v12811_v13 = vld [vmem:[%s20217_s5 + $0x288] ss:$16 sps:$4 sm:$0xff]  }
 0x626   :  { %v5035_v23 = vadd.f32 %v4998_v59, %v4985_v31  ;;  %v17287_v62 = vadd.f32 %v5006_v3, %v4987_v28  ;;  %v4972_v18 = vrot.slane %v4877_v57, %v21616_v4  ;;  %v4980_v55 = vrot.slane %v4948_v43, %v21616_v4  ;;  %v4879_v42 = vpop.f32.mrb[23].mxu0  ;;  %v4950_v17 = vpop.f32.mrb[23].mxu1  ;;  %v12807_v59 = vld [vmem:[%s20217_s5 + $0x26c] ss:$16 sps:$4 sm:$0xff]   ;;  %v12805_v3 = vld [vmem:[%s20217_s5 + $0x268] ss:$16 sps:$4 sm:$0xff]  }
 0x627   :  { %v4976_v26 = vrot.slane %v4879_v42, %v21616_v4  ;;  %v4984_v51 = vrot.slane %v4950_v17, %v21616_v4  ;;  %v5036_v25 = vadd.f32 %v5002_v5, %v4986_v46  ;;  %v5038_v33 = vadd.f32 %v5010_v15, %v4988_v45  ;;  %v12816_v5 = vld [vmem:[%s20217_s5 + $0x2a4] ss:$16 sps:$4 sm:$0xff]   ;;  %v12819_v31 = vld [vmem:[%s20217_s5 + $0x2ac] ss:$16 sps:$4 sm:$0xff]   ;;  %v12814_v28 = vld [vmem:[%s20217_s5 + $0x2a0] ss:$16 sps:$4 sm:$0xff]  }
 0x628   :  { %v4989_v34 = vmul.f32 %v4972_v18, %v16817_v37  ;;  %v4991_v56 = vmul.f32 %v4980_v55, %v16821_v21  ;;  %v5299_v40 = vpack.c.bf16 %v5035_v23, %v5035_v23  ;;  %v12825_v15 = vld [vmem:[%s20217_s5 + $0x2cc] ss:$16 sps:$4 sm:$0xff]   ;;  %v12820_v46 = vld [vmem:[%s20217_s5 + $0x2c0] ss:$16 sps:$4 sm:$0xff]   ;;  %v12823_v45 = vld [vmem:[%s20217_s5 + $0x2c8] ss:$16 sps:$4 sm:$0xff]  }
 0x629   :  { %v4990_v58 = vmul.f32 %v4976_v26, %v16801_v2  ;;  %v4992_v39 = vmul.f32 %v4984_v51, %v16805_v30  ;;  %v5300_v60 = vpack.c.bf16 %v5036_v25, %v5036_v25  ;;  %v12792_v2 = vld [vmem:[%s20217_s5 + $0x224] ss:$16 sps:$4 sm:$0xff]   ;;  %v12795_v30 = vld [vmem:[%s20217_s5 + $0x22c] ss:$16 sps:$4 sm:$0xff]   ;;  %v5302_v32 = vpack.c.bf16 %v5038_v33, %v5038_v33  ;;  %v12832_v23 = vld [vmem:[%s20217_s5 + $0x300] ss:$16 sps:$4 sm:$0xff]  }
 0x62a   :  { %v17305_v38 = vadd.f32 %v5014_v22, %v4989_v34  ;;  %v17307_v37 = vadd.f32 %v5022_v12, %v4991_v56  ;;  %v12822_v22 = vld [vmem:[%s20217_s5 + $0x2c4] ss:$16 sps:$4 sm:$0xff]   ;;  %v12831_v43 = vld [vmem:[%s20217_s5 + $0x2ec] ss:$16 sps:$4 sm:$0xff]   ;;  %v12829_v12 = vld [vmem:[%s20217_s5 + $0x2e8] ss:$16 sps:$4 sm:$0xff]  }
 0x62b   :  { %6641 = vmatprep.mubr.bf16.mxu0 %v5300_v60  ;;  %6805 = vmatprep.mubr.bf16.mxu1 %v5300_v60  ;;  %v17315_v21 = vadd.f32 %v5018_v7, %v4990_v58  ;;  %v17317_v11 = vadd.f32 %v5026_v50, %v4992_v39  ;;  %v12828_v57 = vld [vmem:[%s20217_s5 + $0x2e4] ss:$16 sps:$4 sm:$0xff]   ;;  %v12837_v7 = vld [vmem:[%s20217_s5 + $0x30c] ss:$16 sps:$4 sm:$0xff]   ;;  %v12835_v18 = vld [vmem:[%s20217_s5 + $0x308] ss:$16 sps:$4 sm:$0xff]  }
 0x62c   :  { %6642 = vmatmul.mubr.bf16.vlgmr.msra.gmra.mrb[24].mxu0 %v5299_v40  ;;  %6806 = vmatmul.mubr.bf16.vlgmr.msra.gmra.mrb[24].mxu1 %v5299_v40  ;;  %v12840_v55 = vld [vmem:[%s20217_s5 + $0x324] ss:$16 sps:$4 sm:$0xff]   ;;  %v12843_v42 = vld [vmem:[%s20217_s5 + $0x32c] ss:$16 sps:$4 sm:$0xff]   ;;  %v12838_v17 = vld [vmem:[%s20217_s5 + $0x320] ss:$16 sps:$4 sm:$0xff]  }
 0x62d   :  { %6651 = vmatpush1.bf16.msra.mxu0 %v12784_v19  ;;  %6815 = vmatpush1.bf16.msra.mxu1 %v12787_v14  ;;  %v12841_v26 = vld [vmem:[%s20217_s5 + $0x328] ss:$16 sps:$4 sm:$0xff]   ;;  %v12846_v51 = vld [vmem:[%s20217_s5 + $0x344] ss:$16 sps:$4 sm:$0xff]   ;;  %v12849_v25 = vld [vmem:[%s20217_s5 + $0x34c] ss:$16 sps:$4 sm:$0xff]  }
 0x62e   :  { %6682 = vmatprep.mubr.bf16.mxu0 %v5302_v32  ;;  %6846 = vmatprep.mubr.bf16.mxu1 %v5302_v32  ;;  %v12847_v50 = vld [vmem:[%s20217_s5 + $0x348] ss:$16 sps:$4 sm:$0xff]   ;;  %v12852_v34 = vld [vmem:[%s20217_s5 + $0x364] ss:$16 sps:$4 sm:$0xff]   ;;  %v12855_v56 = vld [vmem:[%s20217_s5 + $0x36c] ss:$16 sps:$4 sm:$0xff]  }
 0x62f   :  { %6652 = vmatprep.subr.bf16.mxu0 %v12792_v2  ;;  %6816 = vmatprep.subr.bf16.mxu1 %v12795_v30  ;;  %v12850_v33 = vld [vmem:[%s20217_s5 + $0x360] ss:$16 sps:$4 sm:$0xff]   ;;  %v12853_v58 = vld [vmem:[%s20217_s5 + $0x368] ss:$16 sps:$4 sm:$0xff]   ;;  %v12858_v39 = vld [vmem:[%s20217_s5 + $0x384] ss:$16 sps:$4 sm:$0xff]  }
 0x630   :  { %v12861_v60 = vld [vmem:[%s20217_s5 + $0x38c] ss:$16 sps:$4 sm:$0xff]   ;;  %v12856_v19 = vld [vmem:[%s20217_s5 + $0x380] ss:$16 sps:$4 sm:$0xff]   ;;  %v12859_v14 = vld [vmem:[%s20217_s5 + $0x388] ss:$16 sps:$4 sm:$0xff]  }
 0x631   :  { %6653 = vmatpush1.bf16.msra.mxu0 %v12790_v27  ;;  %6817 = vmatpush1.bf16.msra.mxu1 %v12793_v41  ;;  %v12864_v40 = vld [vmem:[%s20217_s5 + $0x3a4] ss:$16 sps:$4 sm:$0xff]   ;;  %v12867_v2 = vld [vmem:[%s20217_s5 + $0x3ac] ss:$16 sps:$4 sm:$0xff]   ;;  %v12862_v30 = vld [vmem:[%s20217_s5 + $0x3a0] ss:$16 sps:$4 sm:$0xff]  }
 0x632   :  { %6654 = vmatprep.subr.bf16.mxu0 %v12798_v49  ;;  %6818 = vmatprep.subr.bf16.mxu1 %v12801_v6  ;;  %v12865_v32 = vld [vmem:[%s20217_s5 + $0x3a8] ss:$16 sps:$4 sm:$0xff]   ;;  %v12870_v27 = vld [vmem:[%s20217_s5 + $0x3c4] ss:$16 sps:$4 sm:$0xff]   ;;  %v12873_v41 = vld [vmem:[%s20217_s5 + $0x3cc] ss:$16 sps:$4 sm:$0xff]  }
 0x633   :  { %v12868_v49 = vld [vmem:[%s20217_s5 + $0x3c0] ss:$16 sps:$4 sm:$0xff]   ;;  %v12871_v6 = vld [vmem:[%s20217_s5 + $0x3c8] ss:$16 sps:$4 sm:$0xff]  }
 0x635   :  { %6655 = vmatpush1.bf16.msra.mxu0 %v12796_v24  ;;  %6819 = vmatpush1.bf16.msra.mxu1 %v12799_v9  ;;  %v12876_v24 = vld [vmem:[%s20217_s5 + $0x3e4] ss:$16 sps:$4 sm:$0xff]   ;;  %v12879_v9 = vld [vmem:[%s20217_s5 + $0x3ec] ss:$16 sps:$4 sm:$0xff]  }
 0x636   :  { %6656 = vmatprep.subr.bf16.mxu0 %v12804_v16  ;;  %6820 = vmatprep.subr.bf16.mxu1 %v12807_v59  ;;  %v12874_v16 = vld [vmem:[%s20217_s5 + $0x3e0] ss:$16 sps:$4 sm:$0xff]   ;;  %v12877_v59 = vld [vmem:[%s20217_s5 + $0x3e8] ss:$16 sps:$4 sm:$0xff]  }
 0x639   :  { %6657 = vmatpush1.bf16.msra.mxu0 %v12802_v54  ;;  %6821 = vmatpush1.bf16.msra.mxu1 %v12805_v3  ;;  %v12882_v54 = vld [vmem:[%s20217_s5 + $0x404] ss:$16 sps:$4 sm:$0xff]   ;;  %v12885_v3 = vld [vmem:[%s20217_s5 + $0x40c] ss:$16 sps:$4 sm:$0xff]  }
 0x63a   :  { %6658 = vmatprep.subr.bf16.mxu0 %v12810_v35  ;;  %6822 = vmatprep.subr.bf16.mxu1 %v12813_v52  ;;  %v12880_v35 = vld [vmem:[%s20217_s5 + $0x400] ss:$16 sps:$4 sm:$0xff]   ;;  %v5301_v52 = vpack.c.bf16 %v17287_v62, %v17287_v62 }
 0x63b   :  { %v12886_v62 = vld [vmem:[%s20217_s5 + $0x420] ss:$16 sps:$4 sm:$0xff]  }
 0x63d   :  { %6659 = vmatpush1.bf16.msra.mxu0 %v12808_v8  ;;  %6823 = vmatpush1.bf16.msra.mxu1 %v12811_v13  ;;  %v12883_v8 = vld [vmem:[%s20217_s5 + $0x408] ss:$16 sps:$4 sm:$0xff]   ;;  %v5304_v13 = vpack.c.bf16 %v17315_v21, %v17315_v21 }
 0x63e   :  { %6660 = vmatprep.subr.bf16.mxu0 %v12816_v5  ;;  %6824 = vmatprep.subr.bf16.mxu1 %v12819_v31  ;;  %v12888_v5 = vld [vmem:[%s20217_s5 + $0x424] ss:$16 sps:$4 sm:$0xff]   ;;  %v12891_v31 = vld [vmem:[%s20217_s5 + $0x42c] ss:$16 sps:$4 sm:$0xff]   ;;  %v12889_v21 = vld [vmem:[%s20217_s5 + $0x428] ss:$16 sps:$4 sm:$0xff]  }
 0x641   :  { %6661 = vmatpush1.bf16.msra.mxu0 %v12814_v28  ;;  %6825 = vmatpush1.bf16.msra.mxu1 %v12817_v20  ;;  %v12894_v28 = vld [vmem:[%s20217_s5 + $0x444] ss:$16 sps:$4 sm:$0xff]   ;;  %v12897_v20 = vld [vmem:[%s20217_s5 + $0x44c] ss:$16 sps:$4 sm:$0xff]  }
 0x642   :  { %6662 = vmatprep.subr.bf16.mxu0 %v12822_v22  ;;  %6826 = vmatprep.subr.bf16.mxu1 %v12825_v15  ;;  %v12892_v22 = vld [vmem:[%s20217_s5 + $0x440] ss:$16 sps:$4 sm:$0xff]   ;;  %v12895_v15 = vld [vmem:[%s20217_s5 + $0x448] ss:$16 sps:$4 sm:$0xff]  }
 0x645   :  { %6663 = vmatpush1.bf16.msra.mxu0 %v12820_v46  ;;  %6827 = vmatpush1.bf16.msra.mxu1 %v12823_v45  ;;  %v12900_v46 = vld [vmem:[%s20217_s5 + $0x464] ss:$16 sps:$4 sm:$0xff]   ;;  %v12903_v45 = vld [vmem:[%s20217_s5 + $0x46c] ss:$16 sps:$4 sm:$0xff]  }
 0x646   :  { %6664 = vmatprep.subr.bf16.mxu0 %v12828_v57  ;;  %6828 = vmatprep.subr.bf16.mxu1 %v12831_v43  ;;  %v12898_v57 = vld [vmem:[%s20217_s5 + $0x460] ss:$16 sps:$4 sm:$0xff]   ;;  %v12901_v43 = vld [vmem:[%s20217_s5 + $0x468] ss:$16 sps:$4 sm:$0xff]  }
 0x649   :  { %6665 = vmatpush1.bf16.msra.mxu0 %v12826_v47  ;;  %6829 = vmatpush1.bf16.msra.mxu1 %v12829_v12  ;;  %v12906_v47 = vld [vmem:[%s20217_s5 + $0x484] ss:$16 sps:$4 sm:$0xff]   ;;  %v12909_v12 = vld [vmem:[%s20217_s5 + $0x48c] ss:$16 sps:$4 sm:$0xff]  }
 0x64a   :  { %6666 = vmatprep.subr.bf16.mxu0 %v12834_v63  ;;  %6830 = vmatprep.subr.bf16.mxu1 %v12837_v7  ;;  %v12904_v63 = vld [vmem:[%s20217_s5 + $0x480] ss:$16 sps:$4 sm:$0xff]   ;;  %v12907_v7 = vld [vmem:[%s20217_s5 + $0x488] ss:$16 sps:$4 sm:$0xff]  }
 0x64d   :  { %6667 = vmatpush1.bf16.msra.mxu0 %v12832_v23  ;;  %6831 = vmatpush1.bf16.msra.mxu1 %v12835_v18  ;;  %v12912_v23 = vld [vmem:[%s20217_s5 + $0x4a4] ss:$16 sps:$4 sm:$0xff]   ;;  %v12915_v18 = vld [vmem:[%s20217_s5 + $0x4ac] ss:$16 sps:$4 sm:$0xff]  }
 0x64e   :  { %6668 = vmatprep.subr.bf16.mxu0 %v12840_v55  ;;  %6832 = vmatprep.subr.bf16.mxu1 %v12843_v42  ;;  %v12910_v55 = vld [vmem:[%s20217_s5 + $0x4a0] ss:$16 sps:$4 sm:$0xff]   ;;  %v12913_v42 = vld [vmem:[%s20217_s5 + $0x4a8] ss:$16 sps:$4 sm:$0xff]  }
 0x651   :  { %6669 = vmatpush1.bf16.msra.mxu0 %v12838_v17  ;;  %6833 = vmatpush1.bf16.msra.mxu1 %v12841_v26  ;;  %v12918_v17 = vld [vmem:[%s20217_s5 + $0x4c4] ss:$16 sps:$4 sm:$0xff]   ;;  %v12921_v26 = vld [vmem:[%s20217_s5 + $0x4cc] ss:$16 sps:$4 sm:$0xff]  }
 0x652   :  { %6670 = vmatprep.subr.bf16.mxu0 %v12846_v51  ;;  %6834 = vmatprep.subr.bf16.mxu1 %v12849_v25  ;;  %v12916_v51 = vld [vmem:[%s20217_s5 + $0x4c0] ss:$16 sps:$4 sm:$0xff]   ;;  %v12919_v25 = vld [vmem:[%s20217_s5 + $0x4c8] ss:$16 sps:$4 sm:$0xff]  }
 0x655   :  { %6671 = vmatpush1.bf16.msra.mxu0 %v12844_v36  ;;  %6835 = vmatpush1.bf16.msra.mxu1 %v12847_v50  ;;  %v12924_v36 = vld [vmem:[%s20217_s5 + $0x4e4] ss:$16 sps:$4 sm:$0xff]   ;;  %v12927_v50 = vld [vmem:[%s20217_s5 + $0x4ec] ss:$16 sps:$4 sm:$0xff]  }
 0x656   :  { %6672 = vmatprep.subr.bf16.mxu0 %v12852_v34  ;;  %6836 = vmatprep.subr.bf16.mxu1 %v12855_v56  ;;  %v12922_v34 = vld [vmem:[%s20217_s5 + $0x4e0] ss:$16 sps:$4 sm:$0xff]   ;;  %v12925_v56 = vld [vmem:[%s20217_s5 + $0x4e8] ss:$16 sps:$4 sm:$0xff]  }
 0x659   :  { %6673 = vmatpush1.bf16.msra.mxu0 %v12850_v33  ;;  %6837 = vmatpush1.bf16.msra.mxu1 %v12853_v58  ;;  %v12930_v33 = vld [vmem:[%s20217_s5 + $0x504] ss:$16 sps:$4 sm:$0xff]   ;;  %v12933_v58 = vld [vmem:[%s20217_s5 + $0x50c] ss:$16 sps:$4 sm:$0xff]  }
 0x65a   :  { %6674 = vmatprep.subr.bf16.mxu0 %v12858_v39  ;;  %6838 = vmatprep.subr.bf16.mxu1 %v12861_v60  ;;  %v12928_v39 = vld [vmem:[%s20217_s5 + $0x500] ss:$16 sps:$4 sm:$0xff]   ;;  %v12931_v60 = vld [vmem:[%s20217_s5 + $0x508] ss:$16 sps:$4 sm:$0xff]  }
 0x65d   :  { %6675 = vmatpush1.bf16.msra.mxu0 %v12856_v19  ;;  %6839 = vmatpush1.bf16.msra.mxu1 %v12859_v14  ;;  %v12936_v19 = vld [vmem:[%s20217_s5 + $0x524] ss:$16 sps:$4 sm:$0xff]   ;;  %v12939_v14 = vld [vmem:[%s20217_s5 + $0x52c] ss:$16 sps:$4 sm:$0xff]  }
 0x65e   :  { %6676 = vmatprep.subr.bf16.mxu0 %v12864_v40  ;;  %6840 = vmatprep.subr.bf16.mxu1 %v12867_v2  ;;  %v12934_v40 = vld [vmem:[%s20217_s5 + $0x520] ss:$16 sps:$4 sm:$0xff]   ;;  %v12937_v2 = vld [vmem:[%s20217_s5 + $0x528] ss:$16 sps:$4 sm:$0xff]  }
 0x661   :  { %6677 = vmatpush1.bf16.msra.mxu0 %v12862_v30  ;;  %6841 = vmatpush1.bf16.msra.mxu1 %v12865_v32  ;;  %v12942_v30 = vld [vmem:[%s20217_s5 + $0x544] ss:$16 sps:$4 sm:$0xff]   ;;  %v12945_v32 = vld [vmem:[%s20217_s5 + $0x54c] ss:$16 sps:$4 sm:$0xff]  }
 0x662   :  { %6678 = vmatprep.subr.bf16.mxu0 %v12870_v27  ;;  %6842 = vmatprep.subr.bf16.mxu1 %v12873_v41  ;;  %v12940_v27 = vld [vmem:[%s20217_s5 + $0x540] ss:$16 sps:$4 sm:$0xff]   ;;  %v12943_v41 = vld [vmem:[%s20217_s5 + $0x548] ss:$16 sps:$4 sm:$0xff]  }
 0x665   :  { %6679 = vmatpush1.bf16.msra.mxu0 %v12868_v49  ;;  %6843 = vmatpush1.bf16.msra.mxu1 %v12871_v6  ;;  %v12948_v49 = vld [vmem:[%s20217_s5 + $0x564] ss:$16 sps:$4 sm:$0xff]   ;;  %v12951_v6 = vld [vmem:[%s20217_s5 + $0x56c] ss:$16 sps:$4 sm:$0xff]  }
 0x666   :  { %6680 = vmatprep.subr.bf16.mxu0 %v12876_v24  ;;  %6844 = vmatprep.subr.bf16.mxu1 %v12879_v9  ;;  %v12946_v24 = vld [vmem:[%s20217_s5 + $0x560] ss:$16 sps:$4 sm:$0xff]   ;;  %v12949_v9 = vld [vmem:[%s20217_s5 + $0x568] ss:$16 sps:$4 sm:$0xff]  }
 0x669   :  { %6681 = vmatpush1.bf16.msra.mxu0 %v12874_v16  ;;  %6845 = vmatpush1.bf16.msra.mxu1 %v12877_v59  ;;  %v12954_v16 = vld [vmem:[%s20217_s5 + $0x584] ss:$16 sps:$4 sm:$0xff]   ;;  %v12957_v59 = vld [vmem:[%s20217_s5 + $0x58c] ss:$16 sps:$4 sm:$0xff]  }
 0x66a   :  { %6691 = vmatprep.subr.bf16.mxu0 %v12882_v54  ;;  %6855 = vmatprep.subr.bf16.mxu1 %v12885_v3  ;;  %v12952_v54 = vld [vmem:[%s20217_s5 + $0x580] ss:$16 sps:$4 sm:$0xff]   ;;  %v12955_v3 = vld [vmem:[%s20217_s5 + $0x588] ss:$16 sps:$4 sm:$0xff]  }
 0x66c   :  { %6683 = vmatmul.mubr.bf16.vlgmr.msra.gmra.mrb[24].mxu0 %v5301_v52  ;;  %6847 = vmatmul.mubr.bf16.vlgmr.msra.gmra.mrb[24].mxu1 %v5301_v52  ;;  %v12963_v52 = vld [vmem:[%s20217_s5 + $0x5ac] ss:$16 sps:$4 sm:$0xff]  }
 0x66d   :  { %6692 = vmatpush1.bf16.msra.mxu0 %v12880_v35  ;;  %6723 = vmatprep.mubr.bf16.mxu0 %v5304_v13  ;;  %v12960_v35 = vld [vmem:[%s20217_s5 + $0x5a4] ss:$16 sps:$4 sm:$0xff]  }
 0x66e   :  { %6856 = vmatpush1.bf16.msra.mxu1 %v12883_v8  ;;  %6887 = vmatprep.mubr.bf16.mxu1 %v5304_v13  ;;  %v12958_v8 = vld [vmem:[%s20217_s5 + $0x5a0] ss:$16 sps:$4 sm:$0xff]   ;;  %v12961_v13 = vld [vmem:[%s20217_s5 + $0x5a8] ss:$16 sps:$4 sm:$0xff]  }
 0x66f   :  { %6693 = vmatprep.subr.bf16.mxu0 %v12888_v5  ;;  %6857 = vmatprep.subr.bf16.mxu1 %v12891_v31  ;;  %v12966_v5 = vld [vmem:[%s20217_s5 + $0x5c4] ss:$16 sps:$4 sm:$0xff]   ;;  %v12969_v31 = vld [vmem:[%s20217_s5 + $0x5cc] ss:$16 sps:$4 sm:$0xff]  }
 0x671   :  { %6694 = vmatpush1.bf16.msra.mxu0 %v12886_v62  ;;  %v12964_v62 = vld [vmem:[%s20217_s5 + $0x5c0] ss:$16 sps:$4 sm:$0xff]  }
 0x672   :  { %6858 = vmatpush1.bf16.msra.mxu1 %v12889_v21  ;;  %6695 = vmatprep.subr.bf16.mxu0 %v12894_v28  ;;  %v12967_v21 = vld [vmem:[%s20217_s5 + $0x5c8] ss:$16 sps:$4 sm:$0xff]   ;;  %v12972_v28 = vld [vmem:[%s20217_s5 + $0x5e4] ss:$16 sps:$4 sm:$0xff]  }
 0x673   :  { %6859 = vmatprep.subr.bf16.mxu1 %v12897_v20  ;;  %v12975_v20 = vld [vmem:[%s20217_s5 + $0x5ec] ss:$16 sps:$4 sm:$0xff]  }
 0x675   :  { %6696 = vmatpush1.bf16.msra.mxu0 %v12892_v22  ;;  %v12970_v22 = vld [vmem:[%s20217_s5 + $0x5e0] ss:$16 sps:$4 sm:$0xff]  }
 0x676   :  { %6860 = vmatpush1.bf16.msra.mxu1 %v12895_v15  ;;  %6697 = vmatprep.subr.bf16.mxu0 %v12900_v46  ;;  %v12973_v15 = vld [vmem:[%s20217_s5 + $0x5e8] ss:$16 sps:$4 sm:$0xff]   ;;  %v12978_v46 = vld [vmem:[%s20217_s5 + $0x604] ss:$16 sps:$4 sm:$0xff]  }
 0x677   :  { %6861 = vmatprep.subr.bf16.mxu1 %v12903_v45  ;;  %v12981_v45 = vld [vmem:[%s20217_s5 + $0x60c] ss:$16 sps:$4 sm:$0xff]  }
 0x679   :  { %6698 = vmatpush1.bf16.msra.mxu0 %v12898_v57  ;;  %v12976_v57 = vld [vmem:[%s20217_s5 + $0x600] ss:$16 sps:$4 sm:$0xff]  }
 0x67a   :  { %6862 = vmatpush1.bf16.msra.mxu1 %v12901_v43  ;;  %6699 = vmatprep.subr.bf16.mxu0 %v12906_v47  ;;  %v5303_v43 = vpack.c.bf16 %v17305_v38, %v17305_v38  ;;  %v12979_v47 = vld [vmem:[%s20217_s5 + $0x608] ss:$16 sps:$4 sm:$0xff]   ;;  %v12982_v38 = vld [vmem:[%s20217_s5 + $0x620] ss:$16 sps:$4 sm:$0xff]  }
 0x67b   :  { %6863 = vmatprep.subr.bf16.mxu1 %v12909_v12  ;;  %v12984_v12 = vld [vmem:[%s20217_s5 + $0x624] ss:$16 sps:$4 sm:$0xff]  }
 0x67d   :  { %6700 = vmatpush1.bf16.msra.mxu0 %v12904_v63  ;;  %v5306_v63 = vpack.c.bf16 %v17317_v11, %v17317_v11  ;;  %v12990_v11 = vld [vmem:[%s20217_s5 + $0x644] ss:$16 sps:$4 sm:$0xff]  }
 0x67e   :  { %6864 = vmatpush1.bf16.msra.mxu1 %v12907_v7  ;;  %6701 = vmatprep.subr.bf16.mxu0 %v12912_v23  ;;  %v12987_v7 = vld [vmem:[%s20217_s5 + $0x62c] ss:$16 sps:$4 sm:$0xff]   ;;  %v12985_v23 = vld [vmem:[%s20217_s5 + $0x628] ss:$16 sps:$4 sm:$0xff]  }
 0x67f   :  { %6865 = vmatprep.subr.bf16.mxu1 %v12915_v18  ;;  %v12993_v18 = vld [vmem:[%s20217_s5 + $0x64c] ss:$16 sps:$4 sm:$0xff]  }
 0x681   :  { %6702 = vmatpush1.bf16.msra.mxu0 %v12910_v55  ;;  %v12988_v55 = vld [vmem:[%s20217_s5 + $0x640] ss:$16 sps:$4 sm:$0xff]  }
 0x682   :  { %6866 = vmatpush1.bf16.msra.mxu1 %v12913_v42  ;;  %6703 = vmatprep.subr.bf16.mxu0 %v12918_v17  ;;  %v12991_v42 = vld [vmem:[%s20217_s5 + $0x648] ss:$16 sps:$4 sm:$0xff]   ;;  %v12996_v17 = vld [vmem:[%s20217_s5 + $0x664] ss:$16 sps:$4 sm:$0xff]  }
 0x683   :  { %6867 = vmatprep.subr.bf16.mxu1 %v12921_v26  ;;  %v12999_v26 = vld [vmem:[%s20217_s5 + $0x66c] ss:$16 sps:$4 sm:$0xff]  }
 0x685   :  { %6704 = vmatpush1.bf16.msra.mxu0 %v12916_v51  ;;  %v12994_v51 = vld [vmem:[%s20217_s5 + $0x660] ss:$16 sps:$4 sm:$0xff]  }
 0x686   :  { %6868 = vmatpush1.bf16.msra.mxu1 %v12919_v25  ;;  %6705 = vmatprep.subr.bf16.mxu0 %v12924_v36  ;;  %v12997_v25 = vld [vmem:[%s20217_s5 + $0x668] ss:$16 sps:$4 sm:$0xff]   ;;  %v13002_v36 = vld [vmem:[%s20217_s5 + $0x684] ss:$16 sps:$4 sm:$0xff]  }
 0x687   :  { %6869 = vmatprep.subr.bf16.mxu1 %v12927_v50  ;;  %v13005_v50 = vld [vmem:[%s20217_s5 + $0x68c] ss:$16 sps:$4 sm:$0xff]  }
 0x689   :  { %6706 = vmatpush1.bf16.msra.mxu0 %v12922_v34  ;;  %v13000_v34 = vld [vmem:[%s20217_s5 + $0x680] ss:$16 sps:$4 sm:$0xff]  }
 0x68a   :  { %6870 = vmatpush1.bf16.msra.mxu1 %v12925_v56  ;;  %6707 = vmatprep.subr.bf16.mxu0 %v12930_v33  ;;  %v13003_v56 = vld [vmem:[%s20217_s5 + $0x688] ss:$16 sps:$4 sm:$0xff]   ;;  %v13008_v33 = vld [vmem:[%s20217_s5 + $0x6a4] ss:$16 sps:$4 sm:$0xff]  }
 0x68b   :  { %6871 = vmatprep.subr.bf16.mxu1 %v12933_v58  ;;  %v13011_v58 = vld [vmem:[%s20217_s5 + $0x6ac] ss:$16 sps:$4 sm:$0xff]  }
 0x68d   :  { %6708 = vmatpush1.bf16.msra.mxu0 %v12928_v39  ;;  %v13006_v39 = vld [vmem:[%s20217_s5 + $0x6a0] ss:$16 sps:$4 sm:$0xff]  }
 0x68e   :  { %6872 = vmatpush1.bf16.msra.mxu1 %v12931_v60  ;;  %6709 = vmatprep.subr.bf16.mxu0 %v12936_v19  ;;  %v13009_v60 = vld [vmem:[%s20217_s5 + $0x6a8] ss:$16 sps:$4 sm:$0xff]   ;;  %v13014_v19 = vld [vmem:[%s20217_s5 + $0x6c4] ss:$16 sps:$4 sm:$0xff]  }
 0x68f   :  { %6873 = vmatprep.subr.bf16.mxu1 %v12939_v14  ;;  %v13017_v14 = vld [vmem:[%s20217_s5 + $0x6cc] ss:$16 sps:$4 sm:$0xff]  }
 0x691   :  { %6710 = vmatpush1.bf16.msra.mxu0 %v12934_v40  ;;  %v13012_v40 = vld [vmem:[%s20217_s5 + $0x6c0] ss:$16 sps:$4 sm:$0xff]  }
 0x692   :  { %6874 = vmatpush1.bf16.msra.mxu1 %v12937_v2  ;;  %6711 = vmatprep.subr.bf16.mxu0 %v12942_v30  ;;  %v13015_v2 = vld [vmem:[%s20217_s5 + $0x6c8] ss:$16 sps:$4 sm:$0xff]   ;;  %v13020_v30 = vld [vmem:[%s20217_s5 + $0x6e4] ss:$16 sps:$4 sm:$0xff]  }
 0x693   :  { %6875 = vmatprep.subr.bf16.mxu1 %v12945_v32  ;;  %v13023_v32 = vld [vmem:[%s20217_s5 + $0x6ec] ss:$16 sps:$4 sm:$0xff]  }
 0x695   :  { %6712 = vmatpush1.bf16.msra.mxu0 %v12940_v27  ;;  %v13018_v27 = vld [vmem:[%s20217_s5 + $0x6e0] ss:$16 sps:$4 sm:$0xff]  }
 0x696   :  { %6876 = vmatpush1.bf16.msra.mxu1 %v12943_v41  ;;  %6713 = vmatprep.subr.bf16.mxu0 %v12948_v49  ;;  %v13021_v41 = vld [vmem:[%s20217_s5 + $0x6e8] ss:$16 sps:$4 sm:$0xff]   ;;  %v13026_v49 = vld [vmem:[%s20217_s5 + $0x704] ss:$16 sps:$4 sm:$0xff]  }
 0x697   :  { %6877 = vmatprep.subr.bf16.mxu1 %v12951_v6  ;;  %v13029_v6 = vld [vmem:[%s20217_s5 + $0x70c] ss:$16 sps:$4 sm:$0xff]  }
 0x699   :  { %6714 = vmatpush1.bf16.msra.mxu0 %v12946_v24  ;;  %v13024_v24 = vld [vmem:[%s20217_s5 + $0x700] ss:$16 sps:$4 sm:$0xff]  }
 0x69a   :  { %6878 = vmatpush1.bf16.msra.mxu1 %v12949_v9  ;;  %6715 = vmatprep.subr.bf16.mxu0 %v12954_v16  ;;  %v13027_v9 = vld [vmem:[%s20217_s5 + $0x708] ss:$16 sps:$4 sm:$0xff]   ;;  %v13032_v16 = vld [vmem:[%s20217_s5 + $0x724] ss:$16 sps:$4 sm:$0xff]  }
 0x69b   :  { %6879 = vmatprep.subr.bf16.mxu1 %v12957_v59  ;;  %v13035_v59 = vld [vmem:[%s20217_s5 + $0x72c] ss:$16 sps:$4 sm:$0xff]  }
 0x69d   :  { %6716 = vmatpush1.bf16.msra.mxu0 %v12952_v54  ;;  %v13030_v54 = vld [vmem:[%s20217_s5 + $0x720] ss:$16 sps:$4 sm:$0xff]  }
 0x69e   :  { %6880 = vmatpush1.bf16.msra.mxu1 %v12955_v3  ;;  %6717 = vmatprep.subr.bf16.mxu0 %v12960_v35  ;;  %v13033_v3 = vld [vmem:[%s20217_s5 + $0x728] ss:$16 sps:$4 sm:$0xff]   ;;  %v13038_v35 = vld [vmem:[%s20217_s5 + $0x744] ss:$16 sps:$4 sm:$0xff]  }
 0x69f   :  { %6881 = vmatprep.subr.bf16.mxu1 %v12963_v52  ;;  %v13041_v52 = vld [vmem:[%s20217_s5 + $0x74c] ss:$16 sps:$4 sm:$0xff]  }
 0x6a1   :  { %6718 = vmatpush1.bf16.msra.mxu0 %v12958_v8  ;;  %v13036_v8 = vld [vmem:[%s20217_s5 + $0x740] ss:$16 sps:$4 sm:$0xff]  }
 0x6a2   :  { %6882 = vmatpush1.bf16.msra.mxu1 %v12961_v13  ;;  %6719 = vmatprep.subr.bf16.mxu0 %v12966_v5  ;;  %v13039_v13 = vld [vmem:[%s20217_s5 + $0x748] ss:$16 sps:$4 sm:$0xff]   ;;  %v13044_v5 = vld [vmem:[%s20217_s5 + $0x764] ss:$16 sps:$4 sm:$0xff]  }
 0x6a3   :  { %6883 = vmatprep.subr.bf16.mxu1 %v12969_v31  ;;  %v13047_v31 = vld [vmem:[%s20217_s5 + $0x76c] ss:$16 sps:$4 sm:$0xff]  }
 0x6a5   :  { %6720 = vmatpush1.bf16.msra.mxu0 %v12964_v62  ;;  %v13042_v62 = vld [vmem:[%s20217_s5 + $0x760] ss:$16 sps:$4 sm:$0xff]  }
 0x6a6   :  { %6884 = vmatpush1.bf16.msra.mxu1 %v12967_v21  ;;  %6721 = vmatprep.subr.bf16.mxu0 %v12972_v28  ;;  %v13045_v21 = vld [vmem:[%s20217_s5 + $0x768] ss:$16 sps:$4 sm:$0xff]   ;;  %v13050_v28 = vld [vmem:[%s20217_s5 + $0x784] ss:$16 sps:$4 sm:$0xff]  }
 0x6a7   :  { %6885 = vmatprep.subr.bf16.mxu1 %v12975_v20  ;;  %v13053_v20 = vld [vmem:[%s20217_s5 + $0x78c] ss:$16 sps:$4 sm:$0xff]  }
 0x6a9   :  { %6722 = vmatpush1.bf16.msra.mxu0 %v12970_v22  ;;  %v13048_v22 = vld [vmem:[%s20217_s5 + $0x780] ss:$16 sps:$4 sm:$0xff]  }
 0x6aa   :  { %6886 = vmatpush1.bf16.msra.mxu1 %v12973_v15  ;;  %6732 = vmatprep.subr.bf16.mxu0 %v12978_v46  ;;  %v13051_v15 = vld [vmem:[%s20217_s5 + $0x788] ss:$16 sps:$4 sm:$0xff]   ;;  %v13056_v46 = vld [vmem:[%s20217_s5 + $0x7a4] ss:$16 sps:$4 sm:$0xff]  }
 0x6ab   :  { %6896 = vmatprep.subr.bf16.mxu1 %v12981_v45  ;;  %v13059_v45 = vld [vmem:[%s20217_s5 + $0x7ac] ss:$16 sps:$4 sm:$0xff]  }
 0x6ac   :  { %6724 = vmatmul.mubr.bf16.vlgmr.msra.gmra.mrb[24].mxu0 %v5303_v43 }
 0x6ad   :  { %6888 = vmatmul.mubr.bf16.vlgmr.msra.gmra.mrb[24].mxu1 %v5303_v43  ;;  %6733 = vmatpush1.bf16.msra.mxu0 %v12976_v57  ;;  %v13054_v57 = vld [vmem:[%s20217_s5 + $0x7a0] ss:$16 sps:$4 sm:$0xff]   ;;  %v13057_v43 = vld [vmem:[%s20217_s5 + $0x7a8] ss:$16 sps:$4 sm:$0xff]  }
 0x6ae   :  { %6764 = vmatprep.mubr.bf16.mxu0 %v5306_v63  ;;  %6897 = vmatpush1.bf16.msra.mxu1 %v12979_v47  ;;  %v13062_v47 = vld [vmem:[%s20217_s5 + $0x7c4] ss:$16 sps:$4 sm:$0xff]  }
 0x6af   :  { %6928 = vmatprep.mubr.bf16.mxu1 %v5306_v63  ;;  %6734 = vmatprep.subr.bf16.mxu0 %v12984_v12  ;;  %v13065_v12 = vld [vmem:[%s20217_s5 + $0x7cc] ss:$16 sps:$4 sm:$0xff]   ;;  %v21811_v63 = vld [vmem:[#allocation5_spill] sm:$0xff] }
 0x6b0   :  { %6898 = vmatprep.subr.bf16.mxu1 %v12987_v7  ;;  %v6957_v7 = vand.u32 31, %v21811_v63 }
 0x6b1   :  { %6735 = vmatpush1.bf16.msra.mxu0 %v12982_v38  ;;  %v21812_v38 = vld [vmem:[#allocation6_spill] sm:$0xff] }
 0x6b2   :  { %6899 = vmatpush1.bf16.msra.mxu1 %v12985_v23  ;;  %6736 = vmatprep.subr.bf16.mxu0 %v12990_v11  ;;  %v6958_v23 = vand.u32 31, %v21812_v38  ;;  %v13060_v11 = vld [vmem:[%s20217_s5 + $0x7c0] ss:$16 sps:$4 sm:$0xff]   ;;  %vm17888_vm2 = vcmp.eq.s32.totalorder %v6957_v7, %v14537_v48 }
 0x6b3   :  { %6900 = vmatprep.subr.bf16.mxu1 %v12993_v18  ;;  %v21813_v18 = vld [vmem:[#allocation7_spill] sm:$0xff]  ;;  %v21852_v7 = vld [vmem:[#allocation22_spill] sm:$0xff] }
 0x6b4   :  { %vm17893_vm10 = vcmp.eq.s32.totalorder %v6958_v23, %v14537_v48  ;;  %v6994_v23 = vand.u32 31, %v21852_v7  ;;  %v21898_v7 = vld [vmem:[#allocation43_spill] sm:$0xff] }
 0x6b5   :  { %6737 = vmatpush1.bf16.msra.mxu0 %v12988_v55  ;;  %v6989_v55 = vand.u32 31, %v21813_v18  ;;  %vm20677_vm5 = vmpackc.low %vm17893_vm10, %vm17888_vm2  ;;  %v21853_v18 = vmov 0 }
 0x6b6   :  { %6901 = vmatpush1.bf16.msra.mxu1 %v12991_v42  ;;  %6738 = vmatprep.subr.bf16.mxu0 %v12996_v17  ;;  %v21814_v42 = vld [vmem:[#allocation8_spill] sm:$0xff] }
 0x6b7   :  { %6902 = vmatprep.subr.bf16.mxu1 %v12999_v26  ;;  %v6990_v17 = vand.u32 31, %v21814_v42  ;;  %v13063_v26 = vld [vmem:[%s20217_s5 + $0x7c8] ss:$16 sps:$4 sm:$0xff]   ;;  %vm17903_vm12 = vcmp.eq.s32.totalorder %v6989_v55, %v14537_v48 }
 0x6b9   :  { %6739 = vmatpush1.bf16.msra.mxu0 %v12994_v51  ;;  %v13068_v51 = vld [vmem:[%s20217_s5 + $0x7e4] ss:$16 sps:$4 sm:$0xff]   ;;  %vm17908_vm3 = vcmp.eq.s32.totalorder %v6990_v17, %v14537_v48 }
 0x6ba   :  { %6903 = vmatpush1.bf16.msra.mxu1 %v12997_v25  ;;  %6740 = vmatprep.subr.bf16.mxu0 %v13002_v36  ;;  %v6941_v25 = vand.u32 31, %v13380_v44  ;;  %v6942_v36 = vand.u32 31, %v14646_v53  ;;  %v21862_v17 = vld [vmem:[#allocation23_spill] sm:$0xff] }
 0x6bb   :  { %6904 = vmatprep.subr.bf16.mxu1 %v13005_v50  ;;  %v13071_v50 = vld [vmem:[%s20217_s5 + $0x7ec] ss:$16 sps:$4 sm:$0xff]  }
 0x6bc   :  { %vm17918_vm8 = vcmp.eq.s32.totalorder %v6941_v25, %v14537_v48  ;;  %vm17923_vm14 = vcmp.eq.s32.totalorder %v6942_v36, %v14537_v48  ;;  %v21864_v36 = vmov 0 }
 0x6bd   :  { %6741 = vmatpush1.bf16.msra.mxu0 %v13000_v34  ;;  %v21815_v34 = vld [vmem:[#allocation9_spill] sm:$0xff] }
 0x6be   :  { %6905 = vmatpush1.bf16.msra.mxu1 %v13003_v56  ;;  %6742 = vmatprep.subr.bf16.mxu0 %v13008_v33  ;;  %v6973_v56 = vand.u32 31, %v21815_v34  ;;  %v21816_v33 = vld [vmem:[#allocation10_spill] sm:$0xff]  ;;  %v21868_v34 = vld [vmem:[#allocation25_spill] sm:$0xff] }
 0x6bf   :  { %6906 = vmatprep.subr.bf16.mxu1 %v13011_v58  ;;  %v6974_v58 = vand.u32 31, %v21816_v33  ;;  %v21869_v33 = vld [vmem:[#allocation26_spill] sm:$0xff] }
 0x6c0   :  { %vm17934_vm13 = vcmp.eq.s32.totalorder %v6973_v56, %v14537_v48  ;;  %v6977_v56 = vand.u32 31, %v21868_v34  ;;  %v21902_v34 = vmov 0 }
 0x6c1   :  { %6743 = vmatpush1.bf16.msra.mxu0 %v13006_v39  ;;  %v21817_v39 = vmov 0  ;;  %vm17939_vm7 = vcmp.eq.s32.totalorder %v6974_v58, %v14537_v48  ;;  %v6978_v58 = vand.u32 31, %v21869_v33  ;;  %v21906_v33 = vmov 0 }
 0x6c2   :  { %6907 = vmatpush1.bf16.msra.mxu1 %v13009_v60  ;;  %6744 = vmatprep.subr.bf16.mxu0 %v13014_v19  ;;  %v21818_v39 = vsel %vm17888_vm2, 4294967295, %v21817_v39  ;;  %v21819_v60 = vmov 0  ;;  %v21821_v19 = vld [vmem:[#allocation11_spill] sm:$0xff] }
 0x6c3   :  { %6908 = vmatprep.subr.bf16.mxu1 %v13017_v14  ;;  %v21820_v60 = vsel %vm17893_vm10, 4294967295, %v21819_v60  ;;  %v6959_v14 = vand.u32 31, %v21821_v19  ;;  %v21960_v19 = vld [vmem:[#allocation72_spill] sm:$0xff] }
 0x6c4   :  { %v6984_v38 = vand.u32 31, %v21960_v19  ;;  %v21964_v19 = vmov 0 }
 0x6c5   :  { %6745 = vmatpush1.bf16.msra.mxu0 %v13012_v40  ;;  %v21822_v40 = vld [vmem:[#allocation12_spill] sm:$0xff]  ;;  %vm17950_vm6 = vcmp.eq.s32.totalorder %v6959_v14, %v14537_v48  ;;  %v21871_v14 = vmov 0 }
 0x6c6   :  { %6909 = vmatpush1.bf16.msra.mxu1 %v13015_v2  ;;  %6746 = vmatprep.subr.bf16.mxu0 %v13020_v30  ;;  %v6960_v2 = vand.u32 31, %v21822_v40  ;;  %v13066_v30 = vld [vmem:[%s20217_s5 + $0x7e0] ss:$16 sps:$4 sm:$0xff]  }
 0x6c7   :  { %6910 = vmatprep.subr.bf16.mxu1 %v13023_v32  ;;  %v21823_v32 = vmov 0 }
 0x6c8   :  { %v21824_v32 = vsel %vm17903_vm12, 4294967295, %v21823_v32  ;;  %vm17955_vm1 = vcmp.eq.s32.totalorder %v6960_v2, %v14537_v48  ;;  %v21873_v2 = vmov 0 }
 0x6c9   :  { %6747 = vmatpush1.bf16.msra.mxu0 %v13018_v27  ;;  %v21825_v27 = vmov 0 }
 0x6ca   :  { %6911 = vmatpush1.bf16.msra.mxu1 %v13021_v41  ;;  %6748 = vmatprep.subr.bf16.mxu0 %v13026_v49  ;;  %v21826_v27 = vsel %vm17908_vm3, 4294967295, %v21825_v27  ;;  %v21827_v41 = vld [vmem:[#allocation13_spill] sm:$0xff] }
 0x6cb   :  { %6912 = vmatprep.subr.bf16.mxu1 %v13029_v6  ;;  %v6991_v49 = vand.u32 31, %v21827_v41  ;;  %v21828_v6 = vld [vmem:[#allocation14_spill] sm:$0xff]  ;;  %v21882_v41 = vmov 0 }
 0x6cd   :  { %6749 = vmatpush1.bf16.msra.mxu0 %v13024_v24  ;;  %v6992_v24 = vand.u32 31, %v21828_v6  ;;  %vm17966_vm4 = vcmp.eq.s32.totalorder %v6991_v49, %v14537_v48  ;;  %v21884_v49 = vmov 0  ;;  %v21886_v6 = vmov 0 }
 0x6ce   :  { %6913 = vmatpush1.bf16.msra.mxu1 %v13027_v9  ;;  %6750 = vmatprep.subr.bf16.mxu0 %v13032_v16  ;;  %v13069_v9 = vld [vmem:[%s20217_s5 + $0x7e8] ss:$16 sps:$4 sm:$0xff]   ;;  %v21829_v16 = vmov 0 }
 0x6cf   :  { %6914 = vmatprep.subr.bf16.mxu1 %v13035_v59  ;;  %v21830_v16 = vsel %vm17918_vm8, 4294967295, %v21829_v16  ;;  %v21831_v59 = vmov 0  ;;  %vm17971_vm11 = vcmp.eq.s32.totalorder %v6992_v24, %v14537_v48  ;;  %v21892_v24 = vld [vmem:[#allocation30_spill] sm:$0xff] }
 0x6d0   :  { %v21832_v59 = vsel %vm17923_vm14, 4294967295, %v21831_v59 }
 0x6d1   :  { %6751 = vmatpush1.bf16.msra.mxu0 %v13030_v54  ;;  %v21833_v54 = vld [vmem:[#allocation15_spill] sm:$0xff] }
 0x6d2   :  { %6915 = vmatpush1.bf16.msra.mxu1 %v13033_v3  ;;  %6752 = vmatprep.subr.bf16.mxu0 %v13038_v35  ;;  %v6943_v3 = vand.u32 31, %v21833_v54  ;;  %v21834_v35 = vld [vmem:[#allocation16_spill] sm:$0xff] }
 0x6d3   :  { %6916 = vmatprep.subr.bf16.mxu1 %v13041_v52  ;;  %v6944_v52 = vand.u32 31, %v21834_v35 }
 0x6d4   :  { %vm17990_vm15 = vcmp.eq.s32.totalorder %v6943_v3, %v14537_v48  ;;  %v21893_v3 = vld [vmem:[#allocation31_spill] sm:$0xff] }
 0x6d5   :  { %6753 = vmatpush1.bf16.msra.mxu0 %v13036_v8  ;;  %v21835_v8 = vmov 0  ;;  %v21854_v18 = vsel %vm17990_vm15, 4294967295, %v21853_v18  ;;  %vm17995_vm0 = vcmp.eq.s32.totalorder %v6944_v52, %v14537_v48  ;;  %v6964_v52 = vand.u32 31, %v21893_v3 }
 0x6d6   :  { %6917 = vmatpush1.bf16.msra.mxu1 %v13039_v13  ;;  %6754 = vmatprep.subr.bf16.mxu0 %v13044_v5  ;;  %v21836_v8 = vsel %vm17934_vm13, 4294967295, %v21835_v8  ;;  %v21837_v13 = vmov 0  ;;  %v21839_v5 = vld [vmem:[#allocation17_spill] sm:$0xff] }
 0x6d7   :  { %6918 = vmatprep.subr.bf16.mxu1 %v13047_v31  ;;  %v21838_v13 = vsel %vm17939_vm7, 4294967295, %v21837_v13  ;;  %v6975_v31 = vand.u32 31, %v21839_v5  ;;  %v21894_v5 = vld [vmem:[#allocation32_spill] sm:$0xff] }
 0x6d9   :  { %6755 = vmatpush1.bf16.msra.mxu0 %v13042_v62  ;;  %v21840_v62 = vld [vmem:[#allocation18_spill] sm:$0xff]  ;;  %vm18010_vm2 = vcmp.eq.s32.totalorder %v6975_v31, %v14537_v48  ;;  %v6995_v31 = vand.u32 31, %v21894_v5  ;;  %v21915_v5 = vmov 0 }
 0x6da   :  { %6919 = vmatpush1.bf16.msra.mxu1 %v13045_v21  ;;  %6756 = vmatprep.subr.bf16.mxu0 %v13050_v28  ;;  %v6976_v21 = vand.u32 31, %v21840_v62  ;;  %v21841_v28 = vmov 0  ;;  %v21895_v62 = vld [vmem:[#allocation33_spill] sm:$0xff] }
 0x6db   :  { %6920 = vmatprep.subr.bf16.mxu1 %v13053_v20  ;;  %v21842_v28 = vsel %vm17950_vm6, 4294967295, %v21841_v28 }
 0x6dc   :  { %vm18015_vm10 = vcmp.eq.s32.totalorder %v6976_v21, %v14537_v48  ;;  %v6996_v21 = vand.u32 31, %v21895_v62 }
 0x6dd   :  { %6757 = vmatpush1.bf16.msra.mxu0 %v13048_v22  ;;  %v21845_v22 = vld [vmem:[#allocation19_spill] sm:$0xff] }
 0x6de   :  { %6921 = vmatpush1.bf16.msra.mxu1 %v13051_v15  ;;  %6758 = vmatprep.subr.bf16.mxu0 %v13056_v46  ;;  %v6961_v15 = vand.u32 31, %v21845_v22  ;;  %v21846_v46 = vld [vmem:[#allocation20_spill] sm:$0xff]  ;;  %v21954_v22 = vld [vmem:[#allocation69_spill] sm:$0xff] }
 0x6df   :  { %6922 = vmatprep.subr.bf16.mxu1 %v13059_v45  ;;  %v6962_v45 = vand.u32 31, %v21846_v46 }
 0x6e0   :  { %vm18026_vm9 = vcmp.eq.s32.totalorder %v6961_v15, %v14537_v48  ;;  %v21896_v15 = vld [vmem:[#allocation39_spill] sm:$0xff] }
 0x6e1   :  { %6759 = vmatpush1.bf16.msra.mxu0 %v13054_v57  ;;  %v21847_v57 = vmov 0  ;;  %v21865_v36 = vsel %vm18026_vm9, 4294967295, %v21864_v36 }
 0x6e2   :  { %6923 = vmatpush1.bf16.msra.mxu1 %v13057_v43  ;;  %6760 = vmatprep.subr.bf16.mxu0 %v13062_v47  ;;  %v21848_v57 = vsel %vm17966_vm4, 4294967295, %v21847_v57  ;;  %v21849_v43 = vmov 0  ;;  %v21851_v47 = vld [vmem:[#allocation21_spill] sm:$0xff] }
 0x6e3   :  { %6924 = vmatprep.subr.bf16.mxu1 %v13065_v12  ;;  %v21850_v43 = vsel %vm17971_vm11, 4294967295, %v21849_v43  ;;  %v6993_v12 = vand.u32 31, %v21851_v47  ;;  %v21897_v47 = vld [vmem:[#allocation40_spill] sm:$0xff] }
 0x6e5   :  { %6761 = vmatpush1.bf16.msra.mxu0 %v13060_v11  ;;  %v5305_v11 = vpack.c.bf16 %v17307_v37, %v17307_v37  ;;  %vm18048_vm9 = vcmp.eq.s32.totalorder %v6993_v12, %v14537_v48  ;;  %v6948_v12 = vand.u32 31, %v21897_v47 }
 0x6e6   :  { %6925 = vmatpush1.bf16.msra.mxu1 %v13063_v26  ;;  %6762 = vmatprep.subr.bf16.mxu0 %v13068_v51  ;;  %v6945_v26 = vand.u32 31, %v21862_v17  ;;  %v21863_v51 = vld [vmem:[#allocation24_spill] sm:$0xff]  ;;  %v21872_v14 = vsel %vm18048_vm9, 4294967295, %v21871_v14 }
 0x6e7   :  { %6926 = vmatprep.subr.bf16.mxu1 %v13071_v50  ;;  %v6946_v25 = vand.u32 31, %v21863_v51  ;;  %v21866_v50 = vmov 0  ;;  %v21953_v17 = vld [vmem:[#allocation68_spill] sm:$0xff] }
 0x6e8   :  { %v7000_v46 = vand.u32 31, %v21953_v17  ;;  %v21958_v17 = vld [vmem:[#allocation70_spill] sm:$0xff] }
 0x6e9   :  { %6763 = vmatpush1.bf16.msra.mxu0 %v13066_v30  ;;  %v21880_v30 = vmov 0 }
 0x6ea   :  { %6927 = vmatpush1.bf16.msra.mxu1 %v13069_v9  ;;  %12256 = vmatprep.subr.msk.bf16.mxu0 %vm20677_vm5, %v21023_v29  ;;  %vm21857_vm5 = vmpackc.low %vm17908_vm3, %vm17903_vm12  ;;  %vm18031_vm12 = vcmp.eq.s32.totalorder %v6962_v45, %v14537_v48  ;;  %v6963_v9 = vand.u32 31, %v21892_v24  ;;  %v6947_v45 = vand.u32 31, %v21896_v15  ;;  %v21928_v15 = vld [vmem:[#allocation60_spill] sm:$0xff]  ;;  %v21929_v24 = vmov 0 }
 0x6eb   :  { %12288 = vmatprep.subr.msk.bf16.mxu1 %vm21857_vm5, %v21023_v29  ;;  %v21867_v50 = vsel %vm18031_vm12, 4294967295, %v21866_v50  ;;  %vm21870_vm5 = vmpackc.low %vm17923_vm14, %vm17918_vm8  ;;  %vm18053_vm12 = vcmp.eq.s32.totalorder %v6994_v23, %v14537_v48  ;;  %vm18098_vm8 = vcmp.eq.s32.totalorder %v6977_v56, %v14537_v48  ;;  %v6979_v23 = vand.u32 31, %v21898_v7 }
 0x6ec   :  { %6765 = vmatmul.mubr.bf16.vlgmr.msra.gmra.mrb[24].mxu0 %v5305_v11  ;;  %v21874_v2 = vsel %vm18053_vm12, 4294967295, %v21873_v2  ;;  %vm21876_vm3 = vmpackc.low %vm17955_vm1, %vm17950_vm6  ;;  %vm18084_vm6 = vcmp.eq.s32.totalorder %v6945_v26, %v14537_v48  ;;  %v21885_v49 = vsel %vm18098_vm8, 4294967295, %v21884_v49  ;;  %v21904_v56 = vmov 0 }
 0x6ed   :  { %6929 = vmatmul.mubr.bf16.vlgmr.msra.gmra.mrb[24].mxu1 %v5305_v11  ;;  %12258 = vmatpush3.bf16.msk.msra.mxu0 %vm21870_vm5, %v21023_v29  ;;  %vm21875_vm5 = vmpackc.low %vm17939_vm7, %vm17934_vm13  ;;  %vm21879_vm13 = vnez %v21867_v50  ;;  %v21881_v30 = vsel %vm18084_vm6, 4294967295, %v21880_v30  ;;  %vm18103_vm7 = vcmp.eq.s32.totalorder %v6978_v58, %v14537_v48  ;;  %v21899_v11 = vld [vmem:[#allocation44_spill] sm:$0xff]  ;;  %v21908_v58 = vmov 0 }
 0x6ee   :  { %12290 = vmatpush3.bf16.msk.msra.mxu1 %vm21875_vm5, %v21023_v29  ;;  %12260 = vmatprep.subr.msk.bf16.mxu0 %vm21876_vm3, %v21023_v29  ;;  %vm21877_vm14 = vmpackc.low %vm17971_vm11, %vm17966_vm4  ;;  %vm21878_vm5 = vnez %v21865_v36  ;;  %vm18089_vm3 = vcmp.eq.s32.totalorder %v6946_v25, %v14537_v48  ;;  %v21887_v6 = vsel %vm18103_vm7, 4294967295, %v21886_v6  ;;  %v6980_v26 = vand.u32 31, %v21899_v11 }
 0x6ef   :  { %12292 = vmatprep.subr.msk.bf16.mxu1 %vm21877_vm14, %v21023_v29  ;;  %v21883_v41 = vsel %vm18089_vm3, 4294967295, %v21882_v41  ;;  %vm21888_vm4 = vmpackc.low %vm17995_vm0, %vm17990_vm15  ;;  %v21900_v25 = vmov 0  ;;  %v6982_v3 = vand.u32 31, %v21928_v15  ;;  %v21935_v15 = vmov 0 }
 0x6f0   :  { %vm21889_vm14 = vmpackc.low %vm18015_vm10, %vm18010_vm2 }
 0x6f1   :  { %12262 = vmatpush3.bf16.msk.msra.mxu0 %vm21888_vm4, %v21023_v29  ;;  %vm21890_vm11 = vmpackc.low %vm21879_vm13, %vm21878_vm5  ;;  %vm18375_vm13 = vcmp.eq.s32.totalorder %v6984_v38, %v14537_v48  ;;  %v21984_v38 = vld [vmem:[#allocation79_spill] sm:$0xff] }
 0x6f2   :  { %12294 = vmatpush3.bf16.msk.msra.mxu1 %vm21889_vm14, %v21023_v29  ;;  %12264 = vmatprep.subr.msk.bf16.mxu0 %vm21890_vm11, %v21023_v29  ;;  %vm20693_vm15 = vmpackc.low %vm18089_vm3, %vm18084_vm6  ;;  %vm18160_vm11 = vcmp.eq.s32.totalorder %v6963_v9, %v14537_v48  ;;  %vm18189_vm6 = vcmp.eq.s32.totalorder %v6948_v12, %v14537_v48  ;;  %v21910_v9 = vmov 0  ;;  %vm18194_vm3 = vcmp.eq.s32.totalorder %v6979_v23, %v14537_v48  ;;  %v21920_v12 = vld [vmem:[#allocation51_spill] sm:$0xff]  ;;  %v21921_v23 = vld [vmem:[#allocation52_spill] sm:$0xff] }
 0x6f3   :  { %vm21891_vm4 = vmpackc.low %vm18053_vm12, %vm18048_vm9  ;;  %v21901_v25 = vsel %vm18160_vm11, 4294967295, %v21900_v25  ;;  %v21911_v9 = vsel %vm18189_vm6, 4294967295, %v21910_v9  ;;  %vm18209_vm12 = vcmp.eq.s32.totalorder %v6980_v26, %v14537_v48  ;;  %v6997_v7 = vand.u32 31, %v21920_v12  ;;  %v21922_v26 = vld [vmem:[#allocation55_spill] sm:$0xff]  ;;  %v21926_v12 = vld [vmem:[#allocation56_spill] sm:$0xff] }
 0x6f4   :  { %12296 = vmatprep.subr.msk.bf16.mxu1 %vm21891_vm4, %v21023_v29  ;;  %vm20692_vm14 = vmpackc.low %vm18103_vm7, %vm18098_vm8  ;;  %vm18165_vm4 = vcmp.eq.s32.totalorder %v6964_v52, %v14537_v48  ;;  %vm18184_vm7 = vcmp.eq.s32.totalorder %v6947_v45, %v14537_v48  ;;  %v21912_v52 = vmov 0  ;;  %v21916_v5 = vsel %vm18209_vm12, 4294967295, %v21915_v5 }
 0x6f5   :  { %12266 = vmatpush3.bf16.msk.msra.mxu0 %vm20693_vm15, %v21023_v29  ;;  %v21903_v34 = vsel %vm18165_vm4, 4294967295, %v21902_v34  ;;  %vm18175_vm15 = vcmp.eq.s32.totalorder %v6996_v21, %v14537_v48  ;;  %vm20700_vm8 = vmpackc.low %vm18165_vm4, %vm18160_vm11  ;;  %v21909_v58 = vsel %vm18184_vm7, 4294967295, %v21908_v58  ;;  %v21913_v52 = vsel %vm18194_vm3, 4294967295, %v21912_v52  ;;  %21917 = vst [vmem:[#allocation34_spill] sm:$0xff] %v21916_v5  ;;  %v21919_v21 = vld [vmem:[#allocation48_spill] sm:$0xff] }
 0x6f6   :  { %12298 = vmatpush3.bf16.msk.msra.mxu1 %vm20692_vm14, %v21023_v29  ;;  %vm18170_vm14 = vcmp.eq.s32.totalorder %v6995_v31, %v14537_v48  ;;  %v21907_v33 = vsel %vm18175_vm15, 4294967295, %v21906_v33  ;;  %21914 = vst [vmem:[#allocation27_spill] sm:$0xff] %v21913_v52  ;;  %12268 = vmatprep.subr.msk.bf16.mxu0 %vm20700_vm8, %v21023_v29  ;;  %v21918_v31 = vld [vmem:[#allocation47_spill] sm:$0xff]  ;;  %vm20703_vm8 = vmpackc.low %vm18189_vm6, %vm18184_vm7  ;;  %v6966_v45 = vand.u32 31, %v21919_v21  ;;  %v6998_v11 = vand.u32 31, %v21921_v23 }
 0x6f7   :  { %v21905_v56 = vsel %vm18170_vm14, 4294967295, %v21904_v56  ;;  %vm20701_vm9 = vmpackc.low %vm18175_vm15, %vm18170_vm14  ;;  %v6965_v62 = vand.u32 31, %v21918_v31  ;;  %v6949_v31 = vand.u32 31, %v21922_v26  ;;  %v21923_v21 = vmov 0  ;;  %v21927_v26 = vld [vmem:[#allocation59_spill] sm:$0xff] }
 0x6f8   :  { %12300 = vmatprep.subr.msk.bf16.mxu1 %vm20701_vm9, %v21023_v29  ;;  %vm20707_vm9 = vmpackc.low %vm18209_vm12, %vm18194_vm3  ;;  %v6950_v23 = vand.u32 31, %v21926_v12  ;;  %v6981_v47 = vand.u32 31, %v21927_v26  ;;  %vm18258_vm7 = vcmp.eq.s32.totalorder %v6997_v7, %v14537_v48  ;;  %vm18263_vm6 = vcmp.eq.s32.totalorder %v6998_v11, %v14537_v48  ;;  %v21950_v11 = vld [vmem:[#allocation63_spill] sm:$0xff] }
 0x6f9   :  { %12270 = vmatpush3.bf16.msk.msra.mxu0 %vm20703_vm8, %v21023_v29  ;;  %vm18239_vm14 = vcmp.eq.s32.totalorder %v6965_v62, %v14537_v48  ;;  %vm18253_vm8 = vcmp.eq.s32.totalorder %v6966_v45, %v14537_v48  ;;  %v21932_v62 = vmov 0  ;;  %v21936_v15 = vsel %vm18263_vm6, 4294967295, %v21935_v15  ;;  %vm20714_vm4 = vmpackc.low %vm18263_vm6, %vm18258_vm7 }
 0x6fa   :  { %v21924_v21 = vsel %vm18239_vm14, 4294967295, %v21923_v21  ;;  %12302 = vmatpush3.bf16.msk.msra.mxu1 %vm20707_vm9, %v21023_v29  ;;  %v21930_v24 = vsel %vm18253_vm8, 4294967295, %v21929_v24  ;;  %v21933_v62 = vsel %vm18258_vm7, 4294967295, %v21932_v62  ;;  %21937 = vst [vmem:[#allocation41_spill] sm:$0xff] %v21936_v15  ;;  %vm18268_vm15 = vcmp.eq.s32.totalorder %v6949_v31, %v14537_v48  ;;  %vm20712_vm9 = vmpackc.low %vm18253_vm8, %vm18239_vm14 }
 0x6fb   :  { %21925 = vst [vmem:[#allocation38_spill] sm:$0xff] %v21924_v21  ;;  %21931 = vst [vmem:[#allocation37_spill] sm:$0xff] %v21930_v24  ;;  %v21938_v26 = vmov 0  ;;  %vm18277_vm3 = vcmp.eq.s32.totalorder %v6950_v23, %v14537_v48  ;;  %v21941_v45 = vmov 0  ;;  %vm18282_vm12 = vcmp.eq.s32.totalorder %v6981_v47, %v14537_v48  ;;  %12272 = vmatprep.subr.msk.bf16.mxu0 %vm20712_vm9, %v21023_v29  ;;  %v21951_v47 = vld [vmem:[#allocation64_spill] sm:$0xff]  ;;  %12304 = vmatprep.subr.msk.bf16.mxu1 %vm20714_vm4, %v21023_v29 }
 0x6fc   :  { %21934 = vst [vmem:[#allocation42_spill] sm:$0xff] %v21933_v62  ;;  %v21939_v26 = vsel %vm18268_vm15, 4294967295, %v21938_v26  ;;  %v21942_v45 = vsel %vm18277_vm3, 4294967295, %v21941_v45  ;;  %v21944_v7 = vmov 0  ;;  %vm18287_vm11 = vcmp.eq.s32.totalorder %v6982_v3, %v14537_v48  ;;  %v21952_v3 = vld [vmem:[#allocation67_spill] sm:$0xff]  ;;  %vm20718_vm9 = vmpackc.low %vm18277_vm3, %vm18268_vm15 }
 0x6fd   :  { %21940 = vst [vmem:[#allocation46_spill] sm:$0xff] %v21939_v26  ;;  %21943 = vst [vmem:[#allocation45_spill] sm:$0xff] %v21942_v45  ;;  %v21945_v7 = vsel %vm18282_vm12, 4294967295, %v21944_v7  ;;  %v21947_v31 = vmov 0  ;;  %v6967_v12 = vand.u32 31, %v21950_v11  ;;  %v6968_v23 = vand.u32 31, %v21951_v47  ;;  %12274 = vmatpush3.bf16.msk.msra.mxu0 %vm20718_vm9, %v21023_v29 }
 0x6fe   :  { %21946 = vst [vmem:[#allocation50_spill] sm:$0xff] %v21945_v7  ;;  %v21948_v31 = vsel %vm18287_vm11, 4294967295, %v21947_v31  ;;  %v6999_v51 = vand.u32 31, %v21952_v3  ;;  %v6951_v11 = vand.u32 31, %v21954_v22  ;;  %v21955_v47 = vmov 0  ;;  %v21959_v22 = vld [vmem:[#allocation71_spill] sm:$0xff]  ;;  %vm20723_vm4 = vmpackc.low %vm18287_vm11, %vm18282_vm12 }
 0x6ff   :  { %21949 = vst [vmem:[#allocation49_spill] sm:$0xff] %v21948_v31  ;;  %vm18317_vm14 = vcmp.eq.s32.totalorder %v6967_v12, %v14537_v48  ;;  %v6952_v3 = vand.u32 31, %v21958_v17  ;;  %v6983_v40 = vand.u32 31, %v21959_v22  ;;  %vm18335_vm7 = vcmp.eq.s32.totalorder %v6968_v23, %v14537_v48  ;;  %12306 = vmatpush3.bf16.msk.msra.mxu1 %vm20723_vm4, %v21023_v29  ;;  %v21982_v23 = vld [vmem:[#allocation75_spill] sm:$0xff]  ;;  %v21985_v31 = vld [vmem:[#allocation80_spill] sm:$0xff]  ;;  %v21986_v45 = vld [vmem:[#allocation89_spill] sm:$0xff] }
 0x700   :  { %v21956_v47 = vsel %vm18317_vm14, 4294967295, %v21955_v47  ;;  %v21961_v12 = vmov 0  ;;  %vm18340_vm6 = vcmp.eq.s32.totalorder %v6999_v51, %v14537_v48  ;;  %vm18345_vm8 = vcmp.eq.s32.totalorder %v7000_v46, %v14537_v48  ;;  %vm20728_vm15 = vmpackc.low %vm18335_vm7, %vm18317_vm14 }
 0x701   :  { %21957 = vst [vmem:[#allocation54_spill] sm:$0xff] %v21956_v47  ;;  %v21962_v12 = vsel %vm18335_vm7, 4294967295, %v21961_v12  ;;  %v21965_v19 = vsel %vm18340_vm6, 4294967295, %v21964_v19  ;;  %v21967_v22 = vmov 0  ;;  %vm18350_vm9 = vcmp.eq.s32.totalorder %v6951_v11, %v14537_v48  ;;  %12276 = vmatprep.subr.msk.bf16.mxu0 %vm20728_vm15, %v21023_v29  ;;  %vm20733_vm4 = vmpackc.low %vm18345_vm8, %vm18340_vm6 }
 0x702   :  { %21963 = vst [vmem:[#allocation53_spill] sm:$0xff] %v21962_v12  ;;  %21966 = vst [vmem:[#allocation58_spill] sm:$0xff] %v21965_v19  ;;  %v21968_v22 = vsel %vm18345_vm8, 4294967295, %v21967_v22  ;;  %v21970_v17 = vmov 0  ;;  %vm18365_vm3 = vcmp.eq.s32.totalorder %v6952_v3, %v14537_v48  ;;  %v21973_v46 = vmov 0  ;;  %12308 = vmatprep.subr.msk.bf16.mxu1 %vm20733_vm4, %v21023_v29  ;;  %v21992_v12 = vld [vmem:[#allocation92_spill] sm:$0xff] }
 0x703   :  { %21969 = vst [vmem:[#allocation57_spill] sm:$0xff] %v21968_v22  ;;  %v21971_v17 = vsel %vm18350_vm9, 4294967295, %v21970_v17  ;;  %v21974_v46 = vsel %vm18365_vm3, 4294967295, %v21973_v46  ;;  %vm18370_vm5 = vcmp.eq.s32.totalorder %v6983_v40, %v14537_v48  ;;  %v21976_v51 = vmov 0  ;;  %v21983_v40 = vld [vmem:[#allocation76_spill] sm:$0xff]  ;;  %vm20737_vm15 = vmpackc.low %vm18365_vm3, %vm18350_vm9  ;;  %v22018_v19 = vld [vmem:[#allocation97_spill] sm:$0xff] }
 0x704   :  { %21972 = vst [vmem:[#allocation62_spill] sm:$0xff] %v21971_v17  ;;  %21975 = vst [vmem:[#allocation61_spill] sm:$0xff] %v21974_v46  ;;  %v21977_v51 = vsel %vm18370_vm5, 4294967295, %v21976_v51  ;;  %v21979_v11 = vmov 0  ;;  %v6969_v63 = vand.u32 31, %v21982_v23  ;;  %v6970_v3 = vand.u32 31, %v21983_v40  ;;  %12278 = vmatpush3.bf16.msk.msra.mxu0 %vm20737_vm15, %v21023_v29 }
 0x705   :  { %21978 = vst [vmem:[#allocation66_spill] sm:$0xff] %v21977_v51  ;;  %v21980_v11 = vsel %vm18375_vm13, 4294967295, %v21979_v11  ;;  %v7001_v7 = vand.u32 31, %v21984_v38  ;;  %v7002_v26 = vand.u32 31, %v21985_v31  ;;  %v6953_v23 = vand.u32 31, %v21986_v45  ;;  %v21990_v31 = vld [vmem:[#allocation90_spill] sm:$0xff]  ;;  %vm20743_vm4 = vmpackc.low %vm18375_vm13, %vm18370_vm5 }
 0x706   :  { %21981 = vst [vmem:[#allocation65_spill] sm:$0xff] %v21980_v11  ;;  %vm18405_vm14 = vcmp.eq.s32.totalorder %v6969_v63, %v14537_v48  ;;  %v21987_v40 = vmov 0  ;;  %v6954_v38 = vand.u32 31, %v21990_v31  ;;  %v21991_v45 = vld [vmem:[#allocation91_spill] sm:$0xff]  ;;  %v6986_v22 = vand.u32 31, %v21992_v12  ;;  %12310 = vmatpush3.bf16.msk.msra.mxu1 %vm20743_vm4, %v21023_v29  ;;  %v22017_v17 = vld [vmem:[#allocation96_spill] sm:$0xff] }
 0x707   :  { %v21988_v40 = vsel %vm18405_vm14, 4294967295, %v21987_v40  ;;  %v6985_v47 = vand.u32 31, %v21991_v45  ;;  %vm18423_vm6 = vcmp.eq.s32.totalorder %v6970_v3, %v14537_v48  ;;  %v21993_v63 = vmov 0  ;;  %v22014_v3 = vld [vmem:[#allocation93_spill] sm:$0xff] }
 0x708   :  { %21989 = vst [vmem:[#allocation74_spill] sm:$0xff] %v21988_v40  ;;  %v21994_v63 = vsel %vm18423_vm6, 4294967295, %v21993_v63  ;;  %vm18428_vm8 = vcmp.eq.s32.totalorder %v7001_v7, %v14537_v48  ;;  %v21996_v45 = vmov 0  ;;  %vm18433_vm7 = vcmp.eq.s32.totalorder %v7002_v26, %v14537_v48  ;;  %vm20748_vm9 = vmpackc.low %vm18423_vm6, %vm18405_vm14  ;;  %v22134_v20 = vld [vmem:[#allocation49_spill] sm:$0xff] }
 0x709   :  { %21995 = vst [vmem:[#allocation73_spill] sm:$0xff] %v21994_v63  ;;  %v21997_v45 = vsel %vm18428_vm8, 4294967295, %v21996_v45  ;;  %v21999_v12 = vmov 0  ;;  %vm18438_vm15 = vcmp.eq.s32.totalorder %v6953_v23, %v14537_v48  ;;  %v22002_v31 = vmov 0  ;;  %12280 = vmatprep.subr.msk.bf16.mxu0 %vm20748_vm9, %v21023_v29  ;;  %vm20753_vm4 = vmpackc.low %vm18433_vm7, %vm18428_vm8  ;;  %v22024_v63 = vld [vmem:[#allocation100_spill] sm:$0xff]  ;;  %v22146_v55 = vld [vmem:[#allocation58_spill] sm:$0xff] }
 0x70a   :  { %21998 = vst [vmem:[#allocation78_spill] sm:$0xff] %v21997_v45  ;;  %v22000_v12 = vsel %vm18433_vm7, 4294967295, %v21999_v12  ;;  %v22003_v31 = vsel %vm18438_vm15, 4294967295, %v22002_v31  ;;  %vm18453_vm3 = vcmp.eq.s32.totalorder %v6954_v38, %v14537_v48  ;;  %v22005_v26 = vmov 0  ;;  %12312 = vmatprep.subr.msk.bf16.mxu1 %vm20753_vm4, %v21023_v29  ;;  %v22144_v37 = vld [vmem:[#allocation57_spill] sm:$0xff] }
 0x70b   :  { %22001 = vst [vmem:[#allocation77_spill] sm:$0xff] %v22000_v12  ;;  %22004 = vst [vmem:[#allocation82_spill] sm:$0xff] %v22003_v31  ;;  %v22006_v26 = vsel %vm18453_vm3, 4294967295, %v22005_v26  ;;  %vm18458_vm12 = vcmp.eq.s32.totalorder %v6985_v47, %v14537_v48  ;;  %v22008_v7 = vmov 0  ;;  %vm18463_vm11 = vcmp.eq.s32.totalorder %v6986_v22, %v14537_v48  ;;  %v22015_v47 = vld [vmem:[#allocation94_spill] sm:$0xff]  ;;  %v22016_v22 = vld [vmem:[#allocation95_spill] sm:$0xff] }
 0x70c   :  { %22007 = vst [vmem:[#allocation81_spill] sm:$0xff] %v22006_v26  ;;  %v22009_v7 = vsel %vm18458_vm12, 4294967295, %v22008_v7  ;;  %v22011_v23 = vmov 0  ;;  %v6971_v51 = vand.u32 31, %v22014_v3  ;;  %v6972_v38 = vand.u32 31, %v22015_v47  ;;  %vm20757_vm9 = vmpackc.low %vm18453_vm3, %vm18438_vm15  ;;  %v22149_v42 = vld [vmem:[#allocation61_spill] sm:$0xff] }
 0x70d   :  { %22010 = vst [vmem:[#allocation84_spill] sm:$0xff] %v22009_v7  ;;  %v22012_v23 = vsel %vm18463_vm11, 4294967295, %v22011_v23  ;;  %v7003_v11 = vand.u32 31, %v22016_v22  ;;  %v7004_v46 = vand.u32 31, %v22017_v17  ;;  %v6955_v3 = vand.u32 31, %v22018_v19  ;;  %v22022_v17 = vld [vmem:[#allocation98_spill] sm:$0xff]  ;;  %12282 = vmatpush3.bf16.msk.msra.mxu0 %vm20757_vm9, %v21023_v29  ;;  %vm20762_vm4 = vmpackc.low %vm18463_vm11, %vm18458_vm12 }
 0x70e   :  { %22013 = vst [vmem:[#allocation83_spill] sm:$0xff] %v22012_v23  ;;  %vm18493_vm14 = vcmp.eq.s32.totalorder %v6971_v51, %v14537_v48  ;;  %v22019_v47 = vmov 0  ;;  %v6956_v22 = vand.u32 31, %v22022_v17  ;;  %v22023_v19 = vld [vmem:[#allocation99_spill] sm:$0xff]  ;;  %v6988_v12 = vand.u32 31, %v22024_v63  ;;  %12314 = vmatpush3.bf16.msk.msra.mxu1 %vm20762_vm4, %v21023_v29 }
 0x70f   :  { %v22020_v47 = vsel %vm18493_vm14, 4294967295, %v22019_v47  ;;  %v6987_v40 = vand.u32 31, %v22023_v19  ;;  %vm18511_vm8 = vcmp.eq.s32.totalorder %v6972_v38, %v14537_v48  ;;  %v22025_v51 = vmov 0 }
 0x710   :  { %22021 = vst [vmem:[#allocation86_spill] sm:$0xff] %v22020_v47  ;;  %v22026_v51 = vsel %vm18511_vm8, 4294967295, %v22025_v51  ;;  %vm18516_vm7 = vcmp.eq.s32.totalorder %v7003_v11, %v14537_v48  ;;  %v22028_v19 = vmov 0  ;;  %vm18521_vm6 = vcmp.eq.s32.totalorder %v7004_v46, %v14537_v48  ;;  %vm20764_vm15 = vmpackc.low %vm18511_vm8, %vm18493_vm14 }
 0x711   :  { %22027 = vst [vmem:[#allocation85_spill] sm:$0xff] %v22026_v51  ;;  %v22029_v19 = vsel %vm18516_vm7, 4294967295, %v22028_v19  ;;  %v22031_v63 = vmov 0  ;;  %vm18526_vm9 = vcmp.eq.s32.totalorder %v6955_v3, %v14537_v48  ;;  %v22034_v17 = vmov 0  ;;  %12284 = vmatprep.subr.msk.bf16.mxu0 %vm20764_vm15, %v21023_v29  ;;  %vm20781_vm4 = vmpackc.low %vm18521_vm6, %vm18516_vm7 }
 0x712   :  { %22030 = vst [vmem:[#allocation88_spill] sm:$0xff] %v22029_v19  ;;  %v22032_v63 = vsel %vm18521_vm6, 4294967295, %v22031_v63  ;;  %v22035_v17 = vsel %vm18526_vm9, 4294967295, %v22034_v17  ;;  %vm18541_vm3 = vcmp.eq.s32.totalorder %v6956_v22, %v14537_v48  ;;  %v22037_v46 = vmov 0  ;;  %12316 = vmatprep.subr.msk.bf16.mxu1 %vm20781_vm4, %v21023_v29 }
 0x713   :  { %22033 = vst [vmem:[#allocation87_spill] sm:$0xff] %v22032_v63  ;;  %22036 = vst [vmem:[#allocation101_spill] sm:$0xff] %v22035_v17  ;;  %v22038_v46 = vsel %vm18541_vm3, 4294967295, %v22037_v46  ;;  %vm18546_vm5 = vcmp.eq.s32.totalorder %v6987_v40, %v14537_v48  ;;  %v22040_v11 = vmov 0  ;;  %vm18551_vm13 = vcmp.eq.s32.totalorder %v6988_v12, %v14537_v48  ;;  %v5307_v40 = vld [vmem:[%s20218_s6] sm:$0xf] }
 0x714   :  { %22039 = vst [vmem:[#allocation103_spill] sm:$0xff] %v22038_v46  ;;  %v22041_v11 = vsel %vm18546_vm5, 4294967295, %v22040_v11  ;;  %v22043_v3 = vmov 0  ;;  %vm20780_vm12 = vmpackc.low %vm18541_vm3, %vm18526_vm9  ;;  %v5312_v12 = vrot.slane %v5307_v40, %v21616_v4  ;;  %v5320_v38 = vrot.slane %v5307_v40, %v21804_v1 }
 0x715   :  { %22042 = vst [vmem:[#allocation102_spill] sm:$0xff] %v22041_v11  ;;  %v22044_v3 = vsel %vm18551_vm13, 4294967295, %v22043_v3  ;;  %12286 = vmatpush3.bf16.msk.msra.mxu0 %vm20780_vm12, %v21023_v29  ;;  %vm20779_vm15 = vmpackc.low %vm18551_vm13, %vm18546_vm5  ;;  %v5316_v22 = vrot.slane %v5307_v40, %v21805_v10  ;;  %v5324_v17 = vrot.slane %v5307_v40, %v21807_v0 }
 0x716   :  { %22045 = vst [vmem:[#allocation105_spill] sm:$0xff] %v22044_v3  ;;  %12318 = vmatpush3.bf16.msk.msra.mxu1 %vm20779_vm15, %v21023_v29  ;;  %vm22050_vm15 = vcmask 1041408  }
 0x717   :  { %vm22051_vm12 = vmmov %vm22050_vm15 }
 0x718   :  { %vm22052_vm4 = vmmov %vm22051_vm12 }
 0x719   :  { %vm22053_vm5 = vmmov %vm22052_vm4 }
 0x7bf   :  { %v6766_v46 = vpop.f32.mrb[24].mxu0 }
 0x7c0   :  { %v18598_v19 = vadd.f32 %v6766_v46, %v5312_v12  ;;  %v6930_v3 = vpop.f32.mrb[24].mxu1  ;;  %v6768_v63 = vpop.f32.mrb[25].mxu0 }
 0x7c1   :  { %v18600_v11 = vadd.f32 %v6930_v3, %v5320_v38  ;;  %v18602_v47 = vadd.f32 %v6768_v63, %v5316_v22  ;;  %v6932_v51 = vpop.f32.mrb[25].mxu1  ;;  %v6770_v7 = vpop.f32.mrb[26].mxu0 }
 0x7c2   :  { %22046 = vst [vmem:[#allocation104_spill] sm:$0xff] %v18598_v19  ;;  %v20783_v23 = vmax.f32 %v18598_v19, 0.0  ;;  %v18605_v4 = vadd.f32 %v6932_v51, %v5324_v17  ;;  %v6934_v1 = vpop.f32.mrb[26].mxu1  ;;  %v6771_v31 = vpop.f32.mrb[27].mxu0 }
 0x7c3   :  { %22047 = vst [vmem:[#allocation107_spill] sm:$0xff] %v18600_v11  ;;  %22048 = vst [vmem:[#allocation106_spill] sm:$0xff] %v18602_v47  ;;  %v20789_v10 = vmax.f32 %v18600_v11, 0.0  ;;  %v20793_v40 = vmax.f32 %v18602_v47, 0.0  ;;  %v6935_v46 = vpop.f32.mrb[27].mxu1 }
 0x7c4   :  { %22049 = vst [vmem:[#allocation109_spill] sm:$0xff] %v18605_v4  ;;  %v7249_v3 = vsel %vm22050_vm15, %v20783_v23, 0.0  ;;  %v20799_v63 = vmax.f32 %v18605_v4, 0.0 }
 0x7c5   :  { %v7250_v12 = vrot.slane %v7249_v3, 4  ;;  %v7263_v7 = vsel %vm22051_vm12, %v20789_v10, 0.0  ;;  %v7256_v1 = vsel %vm22052_vm4, %v20793_v40, 0.0 }
 0x7c6   :  { %v7264_v31 = vrot.slane %v7263_v7, 4  ;;  %v7257_v17 = vrot.slane %v7256_v1, 4  ;;  %v7270_v51 = vsel %vm22053_vm5, %v20799_v63, 0.0 }
 0x7c7   :  { %v7251_v38 = vadd.f32 %v7250_v12, %v7249_v3  ;;  %v7271_v22 = vrot.slane %v7270_v51, 4  ;;  %v7197_v12 = vand.u32 31, %v14537_v48 }
 0x7c8   :  { %v7265_v46 = vadd.f32 %v7264_v31, %v7263_v7  ;;  %v7258_v23 = vadd.f32 %v7257_v17, %v7256_v1 }
 0x7c9   :  { %v7252_v0 = vrot.slane %v7251_v38, 2  ;;  %v7272_v19 = vadd.f32 %v7271_v22, %v7270_v51  ;;  %vm7201_vm9 = vcmp.eq.s32.totalorder %v7197_v12, %v13380_v44  ;;  %vm7205_vm3 = vcmp.eq.s32.totalorder %v7197_v12, %v14646_v53  ;;  %v22185_v51 = vld [vmem:[#allocation88_spill] sm:$0xff]  ;;  %v22190_v22 = vld [vmem:[#allocation101_spill] sm:$0xff] }
 0x7ca   :  { %v7266_v26 = vrot.slane %v7265_v46, 2  ;;  %v7259_v11 = vrot.slane %v7258_v23, 2 }
 0x7cb   :  { %v7253_v45 = vadd.f32 %v7252_v0, %v7251_v38  ;;  %v7273_v10 = vrot.slane %v7272_v19, 2  ;;  %v22054_v0 = vld [vmem:[#allocation175_spill] sm:$0xff] }
 0x7cc   :  { %v7267_v62 = vadd.f32 %v7266_v26, %v7265_v46  ;;  %v7260_v47 = vadd.f32 %v7259_v11, %v7258_v23  ;;  %v7200_v26 = vand.u32 31, %v22054_v0  ;;  %v22055_v23 = vld [vmem:[#allocation176_spill] sm:$0xff]  ;;  %v22188_v38 = vld [vmem:[#allocation103_spill] sm:$0xff]  ;;  %v22193_v46 = vld [vmem:[#allocation105_spill] sm:$0xff] }
 0x7cd   :  { %v7254_v15 = vrot.slane %v7253_v45, 1  ;;  %v7274_v40 = vadd.f32 %v7273_v10, %v7272_v19  ;;  %v7199_v11 = vand.u32 31, %v22055_v23  ;;  %v22056_v10 = vld [vmem:[#allocation174_spill] sm:$0xff]  ;;  %v22200_v23 = vld [vmem:[#allocation28_spill] sm:$0xff] }
 0x7ce   :  { %v7268_v21 = vrot.slane %v7267_v62, 1  ;;  %v7261_v24 = vrot.slane %v7260_v47, 1  ;;  %v7198_v19 = vand.u32 31, %v22056_v10  ;;  %vm7204_vm5 = vcmp.eq.s32.totalorder %v7200_v26, %v13380_v44 }
 0x7cf   :  { %v7275_v52 = vrot.slane %v7274_v40, 1  ;;  %v7255_v63 = vadd.f32 %v7254_v15, %v7253_v45  ;;  %vm7208_vm4 = vcmp.eq.s32.totalorder %v7200_v26, %v14646_v53  ;;  %vm7203_vm7 = vcmp.eq.s32.totalorder %v7199_v11, %v13380_v44 }
 0x7d0   :  { %v7262_v4 = vadd.f32 %v7261_v24, %v7260_v47  ;;  %v7269_v3 = vadd.f32 %v7268_v21, %v7267_v62  ;;  %vm7202_vm12 = vcmp.eq.s32.totalorder %v7198_v19, %v13380_v44  ;;  %vm7206_vm15 = vcmp.eq.s32.totalorder %v7198_v19, %v14646_v53  ;;  %vm18643_vm14 = vmpackc.low %vm7208_vm4, %vm7204_vm5 }
 0x7d1   :  { %v7276_v5 = vadd.f32 %v7275_v52, %v7274_v40  ;;  %vm18632_vm13 = vmpackc.low %vm7206_vm15, %vm7202_vm12  ;;  %vm7207_vm6 = vcmp.eq.s32.totalorder %v7199_v11, %v14646_v53  ;;  %v22059_v24 = vmov 0  ;;  %12328 = vmatprep.subr.msk.bf16.mxu1 %vm18643_vm14, %v21023_v29  ;;  %v22061_v52 = vmov 0 }
 0x7d2   :  { %7341 = vmatprep.mubr.f32.mxu0 %v7262_v4  ;;  %v22057_v4 = vmov 0  ;;  %12320 = vmatprep.subr.msk.bf16.mxu0 %vm18632_vm13, %v21023_v29  ;;  %v22060_v24 = vsel %vm18643_vm14, 4294967295, %v22059_v24  ;;  %vm18650_vm12 = vmpackc.low %vm7205_vm3, %vm7201_vm9  ;;  %vm7210_vm5 = vcmp.eq.s32.totalorder %v7198_v19, %v21833_v54  ;;  %vm7214_vm4 = vcmp.eq.s32.totalorder %v7198_v19, %v21834_v35 }
 0x7d3   :  { %7411 = vmatprep.mubr.f32.mxu1 %v7276_v5  ;;  %7342 = vmatmul.mubr.f32.vlgmr.msra.gmra.mrb[28].mxu0 %v7255_v63  ;;  %v22058_v4 = vsel %vm18632_vm13, 4294967295, %v22057_v4  ;;  %v22062_v52 = vsel %vm18650_vm12, 4294967295, %v22061_v52  ;;  %vm18657_vm15 = vmpackc.low %vm7207_vm6, %vm7203_vm7  ;;  %vm7212_vm13 = vcmp.eq.s32.totalorder %v7200_v26, %v21833_v54  ;;  %vm7216_vm14 = vcmp.eq.s32.totalorder %v7200_v26, %v21834_v35 }
 0x7d4   :  { %7412 = vmatmul.mubr.f32.vlgmr.msra.gmra.mrb[28].mxu1 %v7269_v3  ;;  %7486 = vmatprep.mubr.f32.mxu0 %v21466_v61  ;;  %vm18668_vm9 = vmpackc.low %vm7214_vm4, %vm7210_vm5  ;;  %vm7209_vm7 = vcmp.eq.s32.totalorder %v7197_v12, %v21833_v54  ;;  %vm7213_vm6 = vcmp.eq.s32.totalorder %v7197_v12, %v21834_v35  ;;  %vm7211_vm3 = vcmp.eq.s32.totalorder %v7199_v11, %v21833_v54  ;;  %v22067_v62 = vmov 0  ;;  %v22195_v3 = vld [vmem:[#allocation102_spill] sm:$0xff] }
 0x7d5   :  { %7557 = vmatprep.mubr.f32.mxu1 %v21466_v61  ;;  %12322 = vmatpush1.bf16.msk.msra.mxu0 %vm18650_vm12, %v21023_v29  ;;  %vm7215_vm12 = vcmp.eq.s32.totalorder %v7199_v11, %v21834_v35  ;;  %vm18679_vm8 = vmpackc.low %vm7216_vm14, %vm7212_vm13  ;;  %v22069_v15 = vmov 0  ;;  %v22071_v45 = vmov 0  ;;  %vm22073_vm13 = vnez %v21820_v60 }
 0x7d6   :  { %12330 = vmatpush1.bf16.msk.msra.mxu1 %vm18657_vm15, %v21023_v29  ;;  %12324 = vmatprep.subr.msk.bf16.mxu0 %vm18668_vm9, %v21023_v29  ;;  %v22068_v62 = vsel %vm18679_vm8, 4294967295, %v22067_v62  ;;  %vm18686_vm5 = vmpackc.low %vm7213_vm6, %vm7209_vm7  ;;  %vm22074_vm14 = vnez %v21818_v39  ;;  %vm22076_vm6 = vnez %v21826_v27  ;;  %v22114_v39 = vld [vmem:[#allocation34_spill] sm:$0xff]  ;;  %v22119_v27 = vld [vmem:[#allocation37_spill] sm:$0xff] }
 0x7d7   :  { %12332 = vmatprep.subr.msk.bf16.mxu1 %vm18679_vm8, %v21023_v29  ;;  %v22070_v15 = vsel %vm18686_vm5, 4294967295, %v22069_v15  ;;  %vm18693_vm4 = vmpackc.low %vm7215_vm12, %vm7211_vm3  ;;  %vm20812_vm3 = vcmask 261120   ;;  %vm22087_vm8 = vnez %v21850_v43  ;;  %v22139_v43 = vld [vmem:[#allocation53_spill] sm:$0xff] }
 0x7d8   :  { %v22072_v45 = vsel %vm18693_vm4, 4294967295, %v22071_v45  ;;  %vm22075_vm7 = vmpackc.low %vm22073_vm13, %vm22074_vm14  ;;  %vm22079_vm13 = vnez %v21832_v59  ;;  %vm22080_vm14 = vnez %v21830_v16  ;;  %v22121_v16 = vld [vmem:[#allocation38_spill] sm:$0xff]  ;;  %v22124_v59 = vld [vmem:[#allocation41_spill] sm:$0xff] }
 0x7d9   :  { %12326 = vmatpush1.bf16.msk.msra.mxu0 %vm18686_vm5, %v21023_v29  ;;  %vm22077_vm5 = vnez %v21824_v32  ;;  %v22116_v32 = vld [vmem:[#allocation27_spill] sm:$0xff] }
 0x7da   :  { %12334 = vmatpush1.bf16.msk.msra.mxu1 %vm18693_vm4, %v21023_v29  ;;  %12336 = vmatprep.subr.msk.bf16.mxu0 %vm22075_vm7, %v21023_v29  ;;  %vm22078_vm12 = vmpackc.low %vm22076_vm6, %vm22077_vm5  ;;  %vm22082_vm7 = vnez %v21838_v13  ;;  %vm22083_vm6 = vnez %v21836_v8  ;;  %vm22085_vm4 = vnez %v21842_v28  ;;  %v22126_v8 = vld [vmem:[#allocation42_spill] sm:$0xff]  ;;  %v22129_v13 = vld [vmem:[#allocation45_spill] sm:$0xff] }
 0x7db   :  { %12368 = vmatprep.subr.msk.bf16.mxu1 %vm22078_vm12, %v21023_v29  ;;  %vm22081_vm5 = vmpackc.low %vm22079_vm13, %vm22080_vm14  ;;  %vm22088_vm13 = vnez %v21848_v57  ;;  %v22131_v28 = vld [vmem:[#allocation46_spill] sm:$0xff] }
 0x7dc   :  { %vm22084_vm12 = vmpackc.low %vm22082_vm7, %vm22083_vm6  ;;  %vm22096_vm6 = vnez %v21874_v2  ;;  %v22136_v57 = vld [vmem:[#allocation50_spill] sm:$0xff]  ;;  %v22159_v2 = vld [vmem:[#allocation73_spill] sm:$0xff] }
 0x7dd   :  { %vm22089_vm14 = vmpackc.low %vm22087_vm8, %vm22088_vm13  ;;  %vm22094_vm8 = vnez %v21865_v36  ;;  %vm22099_vm13 = vnez %v21883_v41  ;;  %v22151_v36 = vld [vmem:[#allocation62_spill] sm:$0xff]  ;;  %v22164_v41 = vld [vmem:[#allocation77_spill] sm:$0xff] }
 0x8a6   :  { %v11559_v47 = vpop.f32.mrb[28].mxu0 }
 0x8a7   :  { %v11594_v40 = vpop.f32.mrb[28].mxu1  ;;  %v11560_v63 = vpop.f32.mrb[29].mxu0 }
 0x8a8   :  { %v11561_v7 = vadd.f32 %v11560_v63, %v11559_v47  ;;  %v11595_v1 = vpop.f32.mrb[29].mxu1 }
 0x8a9   :  { %v11596_v31 = vadd.f32 %v11595_v1, %v11594_v40 }
 0x8ab   :  { %v7414_v17 = vadd.f32 %v11596_v31, %v11561_v7  ;;  %v22201_v7 = vld [vmem:[#allocation104_spill] sm:$0xff]  ;;  %v22203_v31 = vld [vmem:[#allocation107_spill] sm:$0xff] }
 0x8ac   :  { %v22202_v1 = vmax.f32 %v22201_v7, 0.0 }
 0x8ad   :  { %v7417_v60 = vmul.f32 0.03125, %v7414_v17  ;;  %v22204_v17 = vmax.f32 %v22203_v31, 0.0 }
 0x8af   :  { %10831 = vmatmul.mubr.msk.f32.vlgmr.msra.gmra.mrb[30].mxu0 %vm20812_vm3, %v7417_v60  ;;  %10840 = vmatmul.mubr.msk.f32.vlgmr.msra.gmra.mrb[30].mxu1 %vm20812_vm3, %v7417_v60  ;;  %vm22086_vm3 = vmpackc.low %vm17955_vm1, %vm22085_vm4  ;;  %vm22093_vm4 = vnez %v21867_v50  ;;  %v22154_v50 = vld [vmem:[#allocation65_spill] sm:$0xff]  ;;  %v22205_v60 = vld [vmem:[#allocation106_spill] sm:$0xff] }
 0x8b0   :  { %12338 = vmatpush3.bf16.msk.msra.mxu0 %vm22081_vm5, %v21023_v29  ;;  %12370 = vmatpush3.bf16.msk.msra.mxu1 %vm22084_vm12, %v21023_v29  ;;  %vm22090_vm5 = vnez %v21854_v18  ;;  %vm22092_vm1 = vmpackc.low %vm18015_vm10, %vm18010_vm2  ;;  %vm22100_vm2 = vnez %v21881_v30  ;;  %v22141_v18 = vld [vmem:[#allocation54_spill] sm:$0xff] }
 0x8b1   :  { %12340 = vmatprep.subr.msk.bf16.mxu0 %vm22086_vm3, %v21023_v29  ;;  %12372 = vmatprep.subr.msk.bf16.mxu1 %vm22089_vm14, %v21023_v29  ;;  %vm22091_vm7 = vmpackc.low %vm17995_vm0, %vm22090_vm5  ;;  %vm22097_vm0 = vnez %v21872_v14  ;;  %vm22102_vm14 = vnez %v21887_v6  ;;  %vm22103_vm5 = vnez %v21885_v49  ;;  %v22156_v14 = vld [vmem:[#allocation66_spill] sm:$0xff]  ;;  %v22169_v6 = vld [vmem:[#allocation81_spill] sm:$0xff] }
 0x8b2   :  { %vm22095_vm3 = vmpackc.low %vm22093_vm4, %vm22094_vm8  ;;  %vm22106_vm4 = vnez %v21901_v25  ;;  %v22161_v30 = vld [vmem:[#allocation74_spill] sm:$0xff] }
 0x8b3   :  { %vm22098_vm12 = vmpackc.low %vm22096_vm6, %vm22097_vm0  ;;  %vm22109_vm6 = vnez %v21905_v56  ;;  %v22166_v49 = vld [vmem:[#allocation78_spill] sm:$0xff]  ;;  %v22175_v56 = vld [vmem:[#allocation84_spill] sm:$0xff] }
 0x8b4   :  { %12342 = vmatpush3.bf16.msk.msra.mxu0 %vm22091_vm7, %v21023_v29  ;;  %12374 = vmatpush3.bf16.msk.msra.mxu1 %vm22092_vm1, %v21023_v29  ;;  %vm22101_vm10 = vmpackc.low %vm22099_vm13, %vm22100_vm2  ;;  %vm22105_vm1 = vnez %v21903_v34  ;;  %vm22112_vm13 = vnez %v21909_v58  ;;  %v22171_v25 = vld [vmem:[#allocation82_spill] sm:$0xff] }
 0x8b5   :  { %12344 = vmatprep.subr.msk.bf16.mxu0 %vm22095_vm3, %v21023_v29  ;;  %12376 = vmatprep.subr.msk.bf16.mxu1 %vm22098_vm12, %v21023_v29  ;;  %vm22104_vm7 = vmpackc.low %vm22102_vm14, %vm22103_vm5  ;;  %vm22108_vm3 = vnez %v21907_v33  ;;  %vm22111_vm12 = vnez %v21911_v9  ;;  %vm22117_vm14 = vnez %v22116_v32  ;;  %v22178_v33 = vld [vmem:[#allocation85_spill] sm:$0xff]  ;;  %v22180_v58 = vld [vmem:[#allocation86_spill] sm:$0xff] }
 0x8b6   :  { %vm22107_vm8 = vmpackc.low %vm22105_vm1, %vm22106_vm4  ;;  %vm22122_vm1 = vnez %v22121_v16  ;;  %v22183_v9 = vld [vmem:[#allocation87_spill] sm:$0xff] }
 0x8b7   :  { %vm22110_vm0 = vmpackc.low %vm22108_vm3, %vm22109_vm6  ;;  %vm22127_vm3 = vnez %v22126_v8 }
 0x8b8   :  { %12346 = vmatpush3.bf16.msk.msra.mxu0 %vm22101_vm10, %v21023_v29  ;;  %12378 = vmatpush3.bf16.msk.msra.mxu1 %vm22104_vm7, %v21023_v29  ;;  %vm22113_vm2 = vmpackc.low %vm22111_vm12, %vm22112_vm13  ;;  %vm22115_vm10 = vnez %v22114_v39  ;;  %vm22120_vm7 = vnez %v22119_v27  ;;  %vm22132_vm12 = vnez %v22131_v28  ;;  %v22206_v39 = vmax.f32 %v22205_v60, 0.0  ;;  %v22207_v27 = vld [vmem:[#allocation109_spill] sm:$0xff]  ;;  %v13075_v60 = vld [vmem:[%s20221_s9 + $0x10] ss:$8 sps:$4 sm:$0xff]  }
 0x8b9   :  { %12348 = vmatprep.subr.msk.bf16.mxu0 %vm22107_vm8, %v21023_v29  ;;  %12380 = vmatprep.subr.msk.bf16.mxu1 %vm22110_vm0, %v21023_v29  ;;  %vm22118_vm5 = vmpackc.low %vm22115_vm10, %vm22117_vm14  ;;  %vm22125_vm8 = vnez %v22124_v59  ;;  %vm22130_vm0 = vnez %v22129_v13  ;;  %vm22137_vm10 = vnez %v22136_v57  ;;  %v22208_v16 = vmax.f32 %v22207_v27, 0.0  ;;  %v13078_v27 = vld [vmem:[%s20221_s9 + $0x20] ss:$8 sps:$4 sm:$0xff]  }
 0x8ba   :  { %vm22123_vm4 = vmpackc.low %vm22120_vm7, %vm22122_vm1  ;;  %vm22142_vm7 = vnez %v22141_v18 }
 0x8bb   :  { %vm22128_vm6 = vmpackc.low %vm22125_vm8, %vm22127_vm3  ;;  %vm22147_vm8 = vnez %v22146_v55 }
 0x8bc   :  { %12350 = vmatpush3.bf16.msk.msra.mxu0 %vm22113_vm2, %v21023_v29  ;;  %12382 = vmatpush3.bf16.msk.msra.mxu1 %vm22118_vm5, %v21023_v29  ;;  %vm22133_vm13 = vmpackc.low %vm22130_vm0, %vm22132_vm12  ;;  %vm22135_vm2 = vnez %v22134_v20  ;;  %vm22140_vm5 = vnez %v22139_v43  ;;  %vm22152_vm0 = vnez %v22151_v36 }
 0x8bd   :  { %12352 = vmatprep.subr.msk.bf16.mxu0 %vm22123_vm4, %v21023_v29  ;;  %12384 = vmatprep.subr.msk.bf16.mxu1 %vm22128_vm6, %v21023_v29  ;;  %vm22138_vm14 = vmpackc.low %vm22135_vm2, %vm22137_vm10  ;;  %vm22145_vm4 = vnez %v22144_v37  ;;  %vm22150_vm6 = vnez %v22149_v42  ;;  %vm22157_vm2 = vnez %v22156_v14 }
 0x8be   :  { %vm22143_vm1 = vmpackc.low %vm22140_vm5, %vm22142_vm7  ;;  %vm22162_vm5 = vnez %v22161_v30 }
 0x8bf   :  { %vm22148_vm3 = vmpackc.low %vm22145_vm4, %vm22147_vm8  ;;  %vm22167_vm4 = vnez %v22166_v49 }
 0x8c0   :  { %12354 = vmatpush3.bf16.msk.msra.mxu0 %vm22133_vm13, %v21023_v29  ;;  %12386 = vmatpush3.bf16.msk.msra.mxu1 %vm22138_vm14, %v21023_v29  ;;  %vm22153_vm12 = vmpackc.low %vm22150_vm6, %vm22152_vm0  ;;  %vm22155_vm13 = vnez %v22154_v50  ;;  %vm22160_vm14 = vnez %v22159_v2  ;;  %vm22172_vm6 = vnez %v22171_v25 }
 0x8c1   :  { %12356 = vmatprep.subr.msk.bf16.mxu0 %vm22143_vm1, %v21023_v29  ;;  %12388 = vmatprep.subr.msk.bf16.mxu1 %vm22148_vm3, %v21023_v29  ;;  %vm22158_vm10 = vmpackc.low %vm22155_vm13, %vm22157_vm2  ;;  %vm22165_vm1 = vnez %v22164_v41  ;;  %vm22170_vm3 = vnez %v22169_v6  ;;  %vm22179_vm2 = vnez %v22178_v33 }
 0x8c2   :  { %vm22163_vm7 = vmpackc.low %vm22160_vm14, %vm22162_vm5  ;;  %vm22184_vm5 = vnez %v22183_v9 }
 0x8c3   :  { %vm22168_vm8 = vmpackc.low %vm22165_vm1, %vm22167_vm4  ;;  %vm22189_vm4 = vnez %v22188_v38 }
 0x8c4   :  { %12358 = vmatpush3.bf16.msk.msra.mxu0 %vm22153_vm12, %v21023_v29  ;;  %12390 = vmatpush3.bf16.msk.msra.mxu1 %vm22158_vm10, %v21023_v29  ;;  %vm22173_vm0 = vmpackc.low %vm22170_vm3, %vm22172_vm6  ;;  %vm22176_vm12 = vnez %v22175_v56  ;;  %vm22181_vm10 = vnez %v22180_v58  ;;  %vm22194_vm3 = vnez %v22193_v46  ;;  %vm22196_vm6 = vnez %v22195_v3 }
 0x8c5   :  { %12360 = vmatprep.subr.msk.bf16.mxu0 %vm22163_vm7, %v21023_v29  ;;  %12392 = vmatprep.subr.msk.bf16.mxu1 %vm22168_vm8, %v21023_v29  ;;  %vm22177_vm13 = vmpackc.low %vm18463_vm11, %vm22176_vm12  ;;  %vm22186_vm7 = vnez %v22185_v51  ;;  %vm22191_vm11 = vnez %v22190_v22  ;;  %vm22198_vm12 = vnez %v22058_v4 }
 0x8c6   :  { %vm22182_vm14 = vmpackc.low %vm22179_vm2, %vm22181_vm10  ;;  %vm22209_vm2 = vcmask 1041408  }
 0x8c7   :  { %vm22187_vm1 = vmpackc.low %vm22184_vm5, %vm22186_vm7  ;;  %vm22213_vm7 = vnez %v22062_v52  ;;  %v13074_v52 = vld [vmem:[%s20221_s9 + $0x4] ss:$8 sps:$4 sm:$0xff]  }
 0x8c8   :  { %12362 = vmatpush3.bf16.msk.msra.mxu0 %vm22173_vm0, %v21023_v29  ;;  %12394 = vmatpush3.bf16.msk.msra.mxu1 %vm22177_vm13, %v21023_v29  ;;  %vm22192_vm8 = vmpackc.low %vm22189_vm4, %vm22191_vm11  ;;  %vm22199_vm13 = vnez %v22060_v24  ;;  %vm22215_vm4 = vnez %v22070_v15  ;;  %vm22216_vm11 = vnez %v22072_v45  ;;  %v7757_v15 = vld [vmem:[%s20219_s7] sm:$0x1] }
 0x8c9   :  { %12364 = vmatprep.subr.msk.bf16.mxu0 %vm22182_vm14, %v21023_v29  ;;  %12396 = vmatprep.subr.msk.bf16.mxu1 %vm22187_vm1, %v21023_v29  ;;  %vm22197_vm0 = vmpackc.low %vm22194_vm3, %vm22196_vm6  ;;  %vm22214_vm1 = vnez %v22068_v62 }
 0x8ca   :  { %vm22210_vm10 = vmmov %vm22209_vm2 }
 0x8cb   :  { %vm22211_vm14 = vmmov %vm22209_vm2 }
 0x8cc   :  { %12366 = vmatpush3.bf16.msk.msra.mxu0 %vm22192_vm8, %v21023_v29  ;;  %12398 = vmatpush3.bf16.msk.msra.mxu1 %vm22197_vm0, %v21023_v29  ;;  %vm22212_vm5 = vmmov %vm22209_vm2 }
 0x8cd   :  { %12400 = vmatprep.subr.msk.bf16.mxu0 %vm22198_vm12, %v21023_v29  ;;  %12408 = vmatprep.subr.msk.bf16.mxu1 %vm22199_vm13, %v21023_v29 }
 0x982   :  { %v7488_v0 = vpop.f32.mrb[30].mxu0  ;;  %v7559_v26 = vpop.f32.mrb[30].mxu1 }
 0x983   :  { %v7567_v11 = vrot.slane %v7488_v0, %v22200_v23  ;;  %v7575_v19 = vrot.slane %v7559_v26, %v22200_v23  ;;  %v7490_v12 = vpop.f32.mrb[31].mxu0  ;;  %v7561_v47 = vpop.f32.mrb[31].mxu1 }
 0x984   :  { %v7571_v40 = vrot.slane %v7490_v12, %v22200_v23  ;;  %v7579_v63 = vrot.slane %v7561_v47, %v22200_v23 }
 0x985   :  { %v18906_v4 = vsub.f32 %v22202_v1, %v7567_v11  ;;  %v18910_v24 = vsub.f32 %v22204_v17, %v7575_v19  ;;  %v13072_v1 = vld [vmem:[%s20221_s9] ss:$8 sps:$4 sm:$0xff]   ;;  %v13077_v17 = vld [vmem:[%s20221_s9 + $0x14] ss:$8 sps:$4 sm:$0xff]  }
 0x986   :  { %v18914_v32 = vsub.f32 %v22206_v39, %v7571_v40  ;;  %v18918_v59 = vsub.f32 %v22208_v16, %v7579_v63  ;;  %v13080_v39 = vld [vmem:[%s20221_s9 + $0x24] ss:$8 sps:$4 sm:$0xff]   ;;  %v13083_v16 = vld [vmem:[%s20221_s9 + $0x34] ss:$8 sps:$4 sm:$0xff]  }
 0x987   :  { %v7584_v8 = vmul.f32 %v18906_v4, %v18906_v4  ;;  %v7586_v13 = vmul.f32 %v18910_v24, %v18910_v24 }
 0x988   :  { %v7585_v28 = vmul.f32 %v18914_v32, %v18914_v32  ;;  %v7587_v20 = vmul.f32 %v18918_v59, %v18918_v59 }
 0x989   :  { %v7588_v57 = vsel %vm22209_vm2, %v7584_v8, 0.0  ;;  %v7602_v43 = vsel %vm22210_vm10, %v7586_v13, 0.0  ;;  %v13081_v8 = vld [vmem:[%s20221_s9 + $0x30] ss:$8 sps:$4 sm:$0xff]   ;;  %v13086_v13 = vld [vmem:[%s20221_s9 + $0x44] ss:$8 sps:$4 sm:$0xff]  }
 0x98a   :  { %v7589_v18 = vrot.slane %v7588_v57, 4  ;;  %v7603_v37 = vrot.slane %v7602_v43, 4  ;;  %v7595_v55 = vsel %vm22211_vm14, %v7585_v28, 0.0  ;;  %v7609_v42 = vsel %vm22212_vm5, %v7587_v20, 0.0  ;;  %v13084_v28 = vld [vmem:[%s20221_s9 + $0x40] ss:$8 sps:$4 sm:$0xff]  }
 0x98b   :  { %v7596_v36 = vrot.slane %v7595_v55, 4  ;;  %v7610_v50 = vrot.slane %v7609_v42, 4  ;;  %v13089_v20 = vld [vmem:[%s20221_s9 + $0x54] ss:$8 sps:$4 sm:$0xff]  }
 0x98c   :  { %v7590_v14 = vadd.f32 %v7589_v18, %v7588_v57  ;;  %v7604_v2 = vadd.f32 %v7603_v37, %v7602_v43  ;;  %v13087_v57 = vld [vmem:[%s20221_s9 + $0x50] ss:$8 sps:$4 sm:$0xff]   ;;  %v13092_v43 = vld [vmem:[%s20221_s9 + $0x64] ss:$8 sps:$4 sm:$0xff]   ;;  %v13090_v18 = vld [vmem:[%s20221_s9 + $0x60] ss:$8 sps:$4 sm:$0xff]  }
 0x98d   :  { %v7597_v30 = vadd.f32 %v7596_v36, %v7595_v55  ;;  %v7611_v41 = vadd.f32 %v7610_v50, %v7609_v42  ;;  %v13095_v37 = vld [vmem:[%s20221_s9 + $0x74] ss:$8 sps:$4 sm:$0xff]   ;;  %v13093_v55 = vld [vmem:[%s20221_s9 + $0x70] ss:$8 sps:$4 sm:$0xff]   ;;  %v13098_v42 = vld [vmem:[%s20221_s9 + $0x84] ss:$8 sps:$4 sm:$0xff]  }
 0x98e   :  { %v7591_v49 = vrot.slane %v7590_v14, 2  ;;  %v7605_v6 = vrot.slane %v7604_v2, 2  ;;  %v13096_v36 = vld [vmem:[%s20221_s9 + $0x80] ss:$8 sps:$4 sm:$0xff]   ;;  %v13101_v50 = vld [vmem:[%s20221_s9 + $0x94] ss:$8 sps:$4 sm:$0xff]  }
 0x98f   :  { %v7598_v25 = vrot.slane %v7597_v30, 2  ;;  %v7612_v34 = vrot.slane %v7611_v41, 2 }
 0x990   :  { %v7592_v56 = vadd.f32 %v7591_v49, %v7590_v14  ;;  %v7606_v33 = vadd.f32 %v7605_v6, %v7604_v2  ;;  %v13099_v14 = vld [vmem:[%s20221_s9 + $0x90] ss:$8 sps:$4 sm:$0xff]   ;;  %v13104_v2 = vld [vmem:[%s20221_s9 + $0xa4] ss:$8 sps:$4 sm:$0xff]  }
 0x991   :  { %v7599_v58 = vadd.f32 %v7598_v25, %v7597_v30  ;;  %v7613_v9 = vadd.f32 %v7612_v34, %v7611_v41  ;;  %v13102_v30 = vld [vmem:[%s20221_s9 + $0xa0] ss:$8 sps:$4 sm:$0xff]   ;;  %v13107_v41 = vld [vmem:[%s20221_s9 + $0xb4] ss:$8 sps:$4 sm:$0xff]   ;;  %v13105_v49 = vld [vmem:[%s20221_s9 + $0xb0] ss:$8 sps:$4 sm:$0xff]  }
 0x992   :  { %v7593_v51 = vrot.slane %v7592_v56, 1  ;;  %v7607_v38 = vrot.slane %v7606_v33, 1  ;;  %v13110_v6 = vld [vmem:[%s20221_s9 + $0xc4] ss:$8 sps:$4 sm:$0xff]   ;;  %v13108_v25 = vld [vmem:[%s20221_s9 + $0xc0] ss:$8 sps:$4 sm:$0xff]  }
 0x993   :  { %v7600_v22 = vrot.slane %v7599_v58, 1  ;;  %v7614_v46 = vrot.slane %v7613_v9, 1  ;;  %v13113_v34 = vld [vmem:[%s20221_s9 + $0xd4] ss:$8 sps:$4 sm:$0xff]  }
 0x994   :  { %v7594_v26 = vadd.f32 %v7593_v51, %v7592_v56  ;;  %v7608_v11 = vadd.f32 %v7607_v38, %v7606_v33  ;;  %v13111_v56 = vld [vmem:[%s20221_s9 + $0xd0] ss:$8 sps:$4 sm:$0xff]   ;;  %v13116_v33 = vld [vmem:[%s20221_s9 + $0xe4] ss:$8 sps:$4 sm:$0xff]  }
 0x995   :  { %v7601_v3 = vadd.f32 %v7600_v22, %v7599_v58  ;;  %v7615_v0 = vadd.f32 %v7614_v46, %v7613_v9  ;;  %v13114_v58 = vld [vmem:[%s20221_s9 + $0xe0] ss:$8 sps:$4 sm:$0xff]   ;;  %v13119_v9 = vld [vmem:[%s20221_s9 + $0xf4] ss:$8 sps:$4 sm:$0xff]   ;;  %v13117_v51 = vld [vmem:[%s20221_s9 + $0xf0] ss:$8 sps:$4 sm:$0xff]  }
 0x996   :  { %v13122_v38 = vld [vmem:[%s20221_s9 + $0x104] ss:$8 sps:$4 sm:$0xff]  }
 0x997   :  { %7680 = vmatprep.mubr.f32.mxu0 %v7601_v3  ;;  %7750 = vmatprep.mubr.f32.mxu1 %v7615_v0  ;;  %v22219_v22 = vld [vmem:[#allocation5_spill] sm:$0xff]  ;;  %v22220_v3 = vld [vmem:[#allocation6_spill] sm:$0xff] }
 0x998   :  { %7681 = vmatmul.mubr.f32.vlgmr.msra.gmra.mrb[32].mxu0 %v7594_v26  ;;  %7751 = vmatmul.mubr.f32.vlgmr.msra.gmra.mrb[32].mxu1 %v7608_v11  ;;  %v8452_v46 = vand.u32 63, %v22219_v22  ;;  %v8453_v0 = vand.u32 63, %v22220_v3  ;;  %v8436_v26 = vand.u32 63, %v13380_v44  ;;  %v8437_v11 = vand.u32 63, %v14646_v53 }
 0x999   :  { %12402 = vmatpush1.bf16.msk.msra.mxu0 %vm22213_vm7, %v21023_v29  ;;  %12410 = vmatpush1.bf16.msk.msra.mxu1 %vm18657_vm15, %v21023_v29  ;;  %vm22217_vm15 = vcmask 261120  }
 0x99a   :  { %12404 = vmatprep.subr.msk.bf16.mxu0 %vm18668_vm9, %v21023_v29  ;;  %12412 = vmatprep.subr.msk.bf16.mxu1 %vm22214_vm1, %v21023_v29  ;;  %vm22218_vm9 = vmmov %vm22217_vm15  ;;  %vm19065_vm8 = vcmp.eq.s32.totalorder %v8452_v46, %v14537_v48  ;;  %vm19070_vm3 = vcmp.eq.s32.totalorder %v8453_v0, %v14537_v48  ;;  %vm19075_vm6 = vcmp.eq.s32.totalorder %v8436_v26, %v14537_v48 }
 0x99b   :  { %7828 = vmatprep.mubr.f32.mxu0 %v21466_v61  ;;  %7899 = vmatprep.mubr.f32.mxu1 %v21466_v61  ;;  %vm19080_vm0 = vcmp.eq.s32.totalorder %v8437_v11, %v14537_v48  ;;  %vm20819_vm12 = vmpackc.low %vm19070_vm3, %vm19065_vm8 }
 0x99c   :  { %vm20815_vm5 = vmpackc.low %vm19080_vm0, %vm19075_vm6 }
 0x99d   :  { %12406 = vmatpush1.bf16.msk.msra.mxu0 %vm22215_vm4, %v21023_v29  ;;  %12414 = vmatpush1.bf16.msk.msra.mxu1 %vm22216_vm11, %v21023_v29 }
 0x99e   :  { %8352 = vmatprep.subr.bf16.mxu0 %v13074_v52  ;;  %v22221_v52 = vld [vmem:[#allocation11_spill] sm:$0xff]  ;;  %12416 = vmatprep.subr.msk.bf16.mxu1 %vm20819_vm12, %v21023_v29 }
 0xa6b   :  { %v11629_v5 = vpop.f32.mrb[32].mxu0  ;;  %v11664_v21 = vpop.f32.mrb[32].mxu1 }
 0xa6c   :  { %v11630_v62 = vpop.f32.mrb[33].mxu0  ;;  %v11665_v19 = vpop.f32.mrb[33].mxu1 }
 0xa6d   :  { %v11631_v12 = vadd.f32 %v11630_v62, %v11629_v5  ;;  %v11666_v47 = vadd.f32 %v11665_v19, %v11664_v21  ;;  %v8454_v5 = vand.u32 63, %v22221_v52  ;;  %v22222_v21 = vld [vmem:[#allocation12_spill] sm:$0xff]  ;;  %v8438_v19 = vand.u32 63, %v21833_v54 }
 0xa6e   :  { %v8455_v62 = vand.u32 63, %v22222_v21  ;;  %v13120_v52 = vld [vmem:[%s20221_s9 + $0x100] ss:$8 sps:$4 sm:$0xff]  }
 0xa6f   :  { %v7753_v40 = vadd.f32 %v11666_v47, %v11631_v12  ;;  %v8439_v12 = vand.u32 63, %v21834_v35  ;;  %vm19089_vm13 = vcmp.eq.s32.totalorder %v8454_v5, %v14537_v48  ;;  %vm19099_vm10 = vcmp.eq.s32.totalorder %v8438_v19, %v14537_v48  ;;  %v13126_v21 = vld [vmem:[%s20221_s9 + $0x120] ss:$8 sps:$4 sm:$0xff]   ;;  %v13129_v19 = vld [vmem:[%s20221_s9 + $0x130] ss:$8 sps:$4 sm:$0xff]  }
 0xa70   :  { %vm19094_vm2 = vcmp.eq.s32.totalorder %v8455_v62, %v14537_v48  ;;  %v13131_v62 = vld [vmem:[%s20221_s9 + $0x134] ss:$8 sps:$4 sm:$0xff]  }
 0xa71   :  { %v7756_v63 = vmul.f32 0.03125, %v7753_v40  ;;  %vm19104_vm14 = vcmp.eq.s32.totalorder %v8439_v12, %v14537_v48  ;;  %vm20814_vm7 = vmpackc.low %vm19094_vm2, %vm19089_vm13  ;;  %v13134_v12 = vld [vmem:[%s20221_s9 + $0x144] ss:$8 sps:$4 sm:$0xff]  }
 0xa72   :  { %vm20818_vm1 = vmpackc.low %vm19104_vm14, %vm19099_vm10 }
 0xa73   :  { %v7758_v7 = vadd.f32 1e-05, %v7756_v63 }
 0xa75   :  { %13186 = vrsqrt.f32 %v7758_v7 }
 0xa7f   :  { %v13187_v45 = vpop.eup %13186 }
 0xa80   :  { %v7760_v31 = vmul.f32 %v13187_v45, %v7757_v15 }
 0xa82   :  { %10913 = vmatmul.mubr.msk.f32.vlgmr.msra.gmra.mrb[34].mxu0 %vm22217_vm15, %v7760_v31  ;;  %10922 = vmatmul.mubr.msk.f32.vlgmr.msra.gmra.mrb[34].mxu1 %vm22218_vm9, %v7760_v31  ;;  %v22237_v31 = vmov 0 }
 0xa83   :  { %8353 = vmatpush1.bf16.msra.mxu0 %v13072_v1  ;;  %v22235_v1 = vmov 0  ;;  %v22238_v31 = vsel %vm19104_vm14, 4294967295, %v22237_v31  ;;  %12418 = vmatpush3.bf16.msk.msra.mxu1 %vm20815_vm5, %v21023_v29 }
 0xa84   :  { %8354 = vmatprep.subr.bf16.mxu0 %v13077_v17  ;;  %v22236_v1 = vsel %vm19099_vm10, 4294967295, %v22235_v1  ;;  %v22239_v17 = vld [vmem:[#allocation19_spill] sm:$0xff]  ;;  %12420 = vmatprep.subr.msk.bf16.mxu1 %vm20814_vm7, %v21023_v29 }
 0xa87   :  { %8355 = vmatpush1.bf16.msra.mxu0 %v13075_v60  ;;  %v8456_v60 = vand.u32 63, %v22239_v17  ;;  %12422 = vmatpush3.bf16.msk.msra.mxu1 %vm20818_vm1, %v21023_v29  ;;  %v13132_v17 = vld [vmem:[%s20221_s9 + $0x140] ss:$8 sps:$4 sm:$0xff]  }
 0xa88   :  { %8356 = vmatprep.subr.bf16.mxu0 %v13080_v39  ;;  %v22240_v39 = vld [vmem:[#allocation20_spill] sm:$0xff] }
 0xa89   :  { %vm19143_vm4 = vcmp.eq.s32.totalorder %v8456_v60, %v14537_v48  ;;  %v13137_v60 = vld [vmem:[%s20221_s9 + $0x154] ss:$8 sps:$4 sm:$0xff]  }
 0xa8b   :  { %8357 = vmatpush1.bf16.msra.mxu0 %v13078_v27  ;;  %v8457_v27 = vand.u32 63, %v22240_v39  ;;  %v13135_v39 = vld [vmem:[%s20221_s9 + $0x150] ss:$8 sps:$4 sm:$0xff]  }
 0xa8c   :  { %8358 = vmatprep.subr.bf16.mxu0 %v13083_v16  ;;  %v22241_v16 = vld [vmem:[#allocation23_spill] sm:$0xff] }
 0xa8d   :  { %vm19148_vm11 = vcmp.eq.s32.totalorder %v8457_v27, %v14537_v48  ;;  %v13140_v27 = vld [vmem:[%s20221_s9 + $0x164] ss:$8 sps:$4 sm:$0xff]  }
 0xa8e   :  { %vm20817_vm15 = vmpackc.low %vm19148_vm11, %vm19143_vm4 }
 0xa8f   :  { %8359 = vmatpush1.bf16.msra.mxu0 %v13081_v8  ;;  %v8440_v8 = vand.u32 63, %v22241_v16  ;;  %12424 = vmatprep.subr.msk.bf16.mxu1 %vm20817_vm15, %v21023_v29 }
 0xa90   :  { %8360 = vmatprep.subr.bf16.mxu0 %v13086_v13  ;;  %v22242_v13 = vld [vmem:[#allocation24_spill] sm:$0xff] }
 0xa91   :  { %vm19157_vm9 = vcmp.eq.s32.totalorder %v8440_v8, %v14537_v48  ;;  %v13138_v8 = vld [vmem:[%s20221_s9 + $0x160] ss:$8 sps:$4 sm:$0xff]  }
 0xa93   :  { %8361 = vmatpush1.bf16.msra.mxu0 %v13084_v28  ;;  %v8441_v28 = vand.u32 63, %v22242_v13 }
 0xa94   :  { %8362 = vmatprep.subr.bf16.mxu0 %v13089_v20  ;;  %v22243_v20 = vmov 0 }
 0xa95   :  { %v22244_v20 = vsel %vm19143_vm4, 4294967295, %v22243_v20  ;;  %vm19162_vm7 = vcmp.eq.s32.totalorder %v8441_v28, %v14537_v48  ;;  %v13143_v28 = vld [vmem:[%s20221_s9 + $0x174] ss:$8 sps:$4 sm:$0xff]  }
 0xa96   :  { %vm20816_vm5 = vmpackc.low %vm19162_vm7, %vm19157_vm9 }
 0xa97   :  { %8363 = vmatpush1.bf16.msra.mxu0 %v13087_v57  ;;  %v22245_v57 = vmov 0  ;;  %12426 = vmatpush3.bf16.msk.msra.mxu1 %vm20816_vm5, %v21023_v29 }
 0xa98   :  { %8364 = vmatprep.subr.bf16.mxu0 %v13092_v43  ;;  %v22246_v57 = vsel %vm19148_vm11, 4294967295, %v22245_v57  ;;  %v22247_v43 = vmov 0 }
 0xa99   :  { %v22248_v43 = vsel %vm19157_vm9, 4294967295, %v22247_v43 }
 0xa9b   :  { %8365 = vmatpush1.bf16.msra.mxu0 %v13090_v18  ;;  %v22249_v18 = vmov 0 }
 0xa9c   :  { %8366 = vmatprep.subr.bf16.mxu0 %v13095_v37  ;;  %v22250_v18 = vsel %vm19162_vm7, 4294967295, %v22249_v18  ;;  %v7926_v37 = vld [vmem:[%s20220_s8] sm:$0xf] }
 0xa9f   :  { %8367 = vmatpush1.bf16.msra.mxu0 %v13093_v55 }
 0xaa0   :  { %8368 = vmatprep.subr.bf16.mxu0 %v13098_v42 }
 0xaa3   :  { %8369 = vmatpush1.bf16.msra.mxu0 %v13096_v36 }
 0xaa4   :  { %8370 = vmatprep.subr.bf16.mxu0 %v13101_v50  ;;  %v7931_v50 = vrot.slane %v7926_v37, %v22200_v23 }
 0xaa7   :  { %8371 = vmatpush1.bf16.msra.mxu0 %v13099_v14 }
 0xaa8   :  { %8372 = vmatprep.subr.bf16.mxu0 %v13104_v2  ;;  %v22251_v2 = vld [vmem:[#allocation29_spill] sm:$0xff] }
 0xaab   :  { %8373 = vmatpush1.bf16.msra.mxu0 %v13102_v30  ;;  %v7939_v30 = vrot.slane %v7926_v37, %v22251_v2  ;;  %v13150_v2 = vld [vmem:[%s20221_s9 + $0x1a0] ss:$8 sps:$4 sm:$0xff]  }
 0xaac   :  { %8374 = vmatprep.subr.bf16.mxu0 %v13107_v41 }
 0xaaf   :  { %8375 = vmatpush1.bf16.msra.mxu0 %v13105_v49 }
 0xab0   :  { %8376 = vmatprep.subr.bf16.mxu0 %v13110_v6 }
 0xab3   :  { %8377 = vmatpush1.bf16.msra.mxu0 %v13108_v25 }
 0xab4   :  { %8378 = vmatprep.subr.bf16.mxu0 %v13113_v34  ;;  %v22252_v34 = vld [vmem:[#allocation35_spill] sm:$0xff] }
 0xab7   :  { %8379 = vmatpush1.bf16.msra.mxu0 %v13111_v56  ;;  %v7935_v56 = vrot.slane %v7926_v37, %v22252_v34 }
 0xab8   :  { %8380 = vmatprep.subr.bf16.mxu0 %v13116_v33  ;;  %v22253_v33 = vld [vmem:[#allocation36_spill] sm:$0xff] }
 0xabb   :  { %8381 = vmatpush1.bf16.msra.mxu0 %v13114_v58  ;;  %v7943_v58 = vrot.slane %v7926_v37, %v22253_v33  ;;  %v13141_v37 = vld [vmem:[%s20221_s9 + $0x170] ss:$8 sps:$4 sm:$0xff]   ;;  %v13164_v33 = vld [vmem:[%s20221_s9 + $0x1e4] ss:$8 sps:$4 sm:$0xff]  }
 0xabc   :  { %8382 = vmatprep.subr.bf16.mxu0 %v13119_v9 }
 0xabf   :  { %8383 = vmatpush1.bf16.msra.mxu0 %v13117_v51 }
 0xac0   :  { %8393 = vmatprep.subr.bf16.mxu0 %v13122_v38 }
 0xb55   :  { %v7830_v55 = vpop.f32.mrb[34].mxu0  ;;  %v7901_v42 = vpop.f32.mrb[34].mxu1 }
 0xb56   :  { %v7909_v36 = vrot.slane %v7830_v55, %v22200_v23  ;;  %v7917_v14 = vrot.slane %v7901_v42, %v22200_v23  ;;  %v7832_v41 = vpop.f32.mrb[35].mxu0  ;;  %v7903_v49 = vpop.f32.mrb[35].mxu1  ;;  %v13146_v55 = vld [vmem:[%s20221_s9 + $0x184] ss:$8 sps:$4 sm:$0xff]   ;;  %v13144_v42 = vld [vmem:[%s20221_s9 + $0x180] ss:$8 sps:$4 sm:$0xff]  }
 0xb57   :  { %v7913_v6 = vrot.slane %v7832_v41, %v22200_v23  ;;  %v7921_v25 = vrot.slane %v7903_v49, %v22200_v23  ;;  %v13153_v41 = vld [vmem:[%s20221_s9 + $0x1b0] ss:$8 sps:$4 sm:$0xff]   ;;  %v13158_v49 = vld [vmem:[%s20221_s9 + $0x1c4] ss:$8 sps:$4 sm:$0xff]  }
 0xb58   :  { %v7922_v9 = vmul.f32 %v7909_v36, %v18906_v4  ;;  %v7924_v51 = vmul.f32 %v7917_v14, %v18910_v24  ;;  %v13125_v4 = vld [vmem:[%s20221_s9 + $0x114] ss:$8 sps:$4 sm:$0xff]   ;;  %v13152_v14 = vld [vmem:[%s20221_s9 + $0x1a4] ss:$8 sps:$4 sm:$0xff]  }
 0xb59   :  { %v7923_v38 = vmul.f32 %v7913_v6, %v18914_v32  ;;  %v7925_v22 = vmul.f32 %v7921_v25, %v18918_v59  ;;  %v13123_v32 = vld [vmem:[%s20221_s9 + $0x110] ss:$8 sps:$4 sm:$0xff]   ;;  %v13128_v59 = vld [vmem:[%s20221_s9 + $0x124] ss:$8 sps:$4 sm:$0xff]   ;;  %v13149_v36 = vld [vmem:[%s20221_s9 + $0x194] ss:$8 sps:$4 sm:$0xff]  }
 0xb5a   :  { %v7948_v46 = vadd.f32 %v7931_v50, %v7922_v9  ;;  %v19203_v3 = vadd.f32 %v7939_v30, %v7924_v51  ;;  %v13147_v50 = vld [vmem:[%s20221_s9 + $0x190] ss:$8 sps:$4 sm:$0xff]   ;;  %v13155_v30 = vld [vmem:[%s20221_s9 + $0x1b4] ss:$8 sps:$4 sm:$0xff]   ;;  %v13156_v6 = vld [vmem:[%s20221_s9 + $0x1c0] ss:$8 sps:$4 sm:$0xff]  }
 0xb5b   :  { %v7949_v0 = vadd.f32 %v7935_v56, %v7923_v38  ;;  %v7951_v26 = vadd.f32 %v7943_v58, %v7925_v22  ;;  %v13161_v25 = vld [vmem:[%s20221_s9 + $0x1d4] ss:$8 sps:$4 sm:$0xff]   ;;  %v13159_v56 = vld [vmem:[%s20221_s9 + $0x1d0] ss:$8 sps:$4 sm:$0xff]   ;;  %v13162_v58 = vld [vmem:[%s20221_s9 + $0x1e0] ss:$8 sps:$4 sm:$0xff]  }
 0xb5c   :  { %v8016_v5 = vpack.c.bf16 %v7948_v46, %v7948_v46  ;;  %v13167_v9 = vld [vmem:[%s20221_s9 + $0x1f4] ss:$8 sps:$4 sm:$0xff]   ;;  %v13165_v51 = vld [vmem:[%s20221_s9 + $0x1f0] ss:$8 sps:$4 sm:$0xff]   ;;  %v8018_v38 = vpack.c.bf16 %v19203_v3, %v19203_v3  ;;  %v22262_v3 = vmov 0 }
 0xb5d   :  { %v8017_v11 = vpack.c.bf16 %v7949_v0, %v7949_v0  ;;  %v8019_v24 = vpack.c.bf16 %v7951_v26, %v7951_v26  ;;  %v22254_v22 = vld [vmem:[#allocation30_spill] sm:$0xff]  ;;  %v22255_v0 = vld [vmem:[#allocation31_spill] sm:$0xff] }
 0xb5e   :  { %v8458_v46 = vand.u32 63, %v22254_v22  ;;  %v8459_v26 = vand.u32 63, %v22255_v0  ;;  %v22292_v22 = vld [vmem:[#allocation89_spill] sm:$0xff]  ;;  %v22293_v0 = vld [vmem:[#allocation90_spill] sm:$0xff] }
 0xb5f   :  { %8384 = vmatprep.mubr.bf16.mxu0 %v8017_v11  ;;  %v22256_v11 = vld [vmem:[#allocation39_spill] sm:$0xff] }
 0xb60   :  { %8385 = vmatmul.mubr.bf16.vlgmr.msra.gmra.mrb[36].mxu0 %v8016_v5  ;;  %v22257_v5 = vld [vmem:[#allocation40_spill] sm:$0xff]  ;;  %vm19305_vm5 = vcmp.eq.s32.totalorder %v8458_v46, %v14537_v48  ;;  %vm19310_vm15 = vcmp.eq.s32.totalorder %v8459_v26, %v14537_v48  ;;  %v8448_v46 = vand.u32 63, %v22292_v22  ;;  %v8449_v26 = vand.u32 63, %v22293_v0 }
 0xb61   :  { %8394 = vmatpush1.bf16.msra.mxu0 %v13120_v52  ;;  %8425 = vmatprep.mubr.bf16.mxu0 %v8019_v24  ;;  %v8442_v52 = vand.u32 63, %v22256_v11  ;;  %v22258_v24 = vmov 0  ;;  %vm20822_vm1 = vmpackc.low %vm19310_vm15, %vm19305_vm5 }
 0xb62   :  { %8395 = vmatprep.subr.bf16.mxu0 %v13125_v4  ;;  %v8443_v4 = vand.u32 63, %v22257_v5  ;;  %v22259_v24 = vsel %vm19305_vm5, 4294967295, %v22258_v24  ;;  %12428 = vmatprep.subr.msk.bf16.mxu1 %vm20822_vm1, %v21023_v29 }
 0xb63   :  { %vm19319_vm12 = vcmp.eq.s32.totalorder %v8442_v52, %v14537_v48  ;;  %v22294_v52 = vmov 0 }
 0xb64   :  { %v22263_v3 = vsel %vm19319_vm12, 4294967295, %v22262_v3  ;;  %vm19324_vm9 = vcmp.eq.s32.totalorder %v8443_v4, %v14537_v48  ;;  %v22296_v4 = vmov 0 }
 0xb65   :  { %8396 = vmatpush1.bf16.msra.mxu0 %v13123_v32  ;;  %v22260_v32 = vmov 0  ;;  %vm20825_vm7 = vmpackc.low %vm19324_vm9, %vm19319_vm12 }
 0xb66   :  { %8397 = vmatprep.subr.bf16.mxu0 %v13128_v59  ;;  %v22261_v32 = vsel %vm19310_vm15, 4294967295, %v22260_v32  ;;  %v22264_v59 = vmov 0  ;;  %12430 = vmatpush3.bf16.msk.msra.mxu1 %vm20825_vm7, %v21023_v29 }
 0xb67   :  { %v22265_v59 = vsel %vm19324_vm9, 4294967295, %v22264_v59 }
 0xb69   :  { %8398 = vmatpush1.bf16.msra.mxu0 %v13126_v21  ;;  %v22266_v21 = vld [vmem:[#allocation47_spill] sm:$0xff] }
 0xb6a   :  { %8399 = vmatprep.subr.bf16.mxu0 %v13131_v62  ;;  %v8460_v62 = vand.u32 63, %v22266_v21  ;;  %v22298_v21 = vmov 0 }
 0xb6c   :  { %vm19349_vm1 = vcmp.eq.s32.totalorder %v8460_v62, %v14537_v48  ;;  %v22300_v62 = vmov 0 }
 0xb6d   :  { %8400 = vmatpush1.bf16.msra.mxu0 %v13129_v19  ;;  %v22267_v19 = vld [vmem:[#allocation48_spill] sm:$0xff] }
 0xb6e   :  { %8401 = vmatprep.subr.bf16.mxu0 %v13134_v12  ;;  %v8461_v12 = vand.u32 63, %v22267_v19  ;;  %v22302_v19 = vld [vmem:[#allocation93_spill] sm:$0xff] }
 0xb70   :  { %vm19354_vm5 = vcmp.eq.s32.totalorder %v8461_v12, %v14537_v48  ;;  %v8466_v12 = vand.u32 63, %v22302_v19 }
 0xb71   :  { %8402 = vmatpush1.bf16.msra.mxu0 %v13132_v17  ;;  %v22268_v17 = vld [vmem:[#allocation55_spill] sm:$0xff]  ;;  %vm20828_vm12 = vmpackc.low %vm19354_vm5, %vm19349_vm1 }
 0xb72   :  { %8403 = vmatprep.subr.bf16.mxu0 %v13137_v60  ;;  %v8444_v60 = vand.u32 63, %v22268_v17  ;;  %12432 = vmatprep.subr.msk.bf16.mxu1 %vm20828_vm12, %v21023_v29 }
 0xb74   :  { %vm19363_vm7 = vcmp.eq.s32.totalorder %v8444_v60, %v14537_v48  ;;  %v22303_v60 = vld [vmem:[#allocation94_spill] sm:$0xff] }
 0xb75   :  { %8404 = vmatpush1.bf16.msra.mxu0 %v13135_v39  ;;  %v22269_v39 = vld [vmem:[#allocation56_spill] sm:$0xff] }
 0xb76   :  { %8405 = vmatprep.subr.bf16.mxu0 %v13140_v27  ;;  %v8445_v27 = vand.u32 63, %v22269_v39 }
 0xb78   :  { %vm19368_vm9 = vcmp.eq.s32.totalorder %v8445_v27, %v14537_v48  ;;  %v8467_v27 = vand.u32 63, %v22303_v60 }
 0xb79   :  { %8406 = vmatpush1.bf16.msra.mxu0 %v13138_v8  ;;  %v22270_v8 = vmov 0  ;;  %vm20831_vm15 = vmpackc.low %vm19368_vm9, %vm19363_vm7 }
 0xb7a   :  { %8407 = vmatprep.subr.bf16.mxu0 %v13143_v28  ;;  %v22271_v8 = vsel %vm19349_vm1, 4294967295, %v22270_v8  ;;  %v22272_v28 = vmov 0  ;;  %12434 = vmatpush3.bf16.msk.msra.mxu1 %vm20831_vm15, %v21023_v29 }
 0xb7b   :  { %v22273_v28 = vsel %vm19354_vm5, 4294967295, %v22272_v28 }
 0xb7d   :  { %8408 = vmatpush1.bf16.msra.mxu0 %v13141_v37  ;;  %v22274_v37 = vmov 0 }
 0xb7e   :  { %8409 = vmatprep.subr.bf16.mxu0 %v13146_v55  ;;  %v22275_v37 = vsel %vm19363_vm7, 4294967295, %v22274_v37  ;;  %v22276_v55 = vmov 0 }
 0xb7f   :  { %v22277_v55 = vsel %vm19368_vm9, 4294967295, %v22276_v55 }
 0xb81   :  { %8410 = vmatpush1.bf16.msra.mxu0 %v13144_v42  ;;  %v22278_v42 = vld [vmem:[#allocation63_spill] sm:$0xff] }
 0xb82   :  { %8411 = vmatprep.subr.bf16.mxu0 %v13149_v36  ;;  %v8462_v36 = vand.u32 63, %v22278_v42  ;;  %v22304_v42 = vld [vmem:[#allocation97_spill] sm:$0xff] }
 0xb84   :  { %vm19393_vm12 = vcmp.eq.s32.totalorder %v8462_v36, %v14537_v48  ;;  %v8450_v36 = vand.u32 63, %v22304_v42 }
 0xb85   :  { %8412 = vmatpush1.bf16.msra.mxu0 %v13147_v50  ;;  %v22279_v50 = vld [vmem:[#allocation64_spill] sm:$0xff] }
 0xb86   :  { %8413 = vmatprep.subr.bf16.mxu0 %v13152_v14  ;;  %v8463_v14 = vand.u32 63, %v22279_v50  ;;  %v22305_v50 = vld [vmem:[#allocation98_spill] sm:$0xff] }
 0xb88   :  { %vm19398_vm1 = vcmp.eq.s32.totalorder %v8463_v14, %v14537_v48  ;;  %v8451_v14 = vand.u32 63, %v22305_v50 }
 0xb89   :  { %8414 = vmatpush1.bf16.msra.mxu0 %v13150_v2  ;;  %v22280_v2 = vld [vmem:[#allocation69_spill] sm:$0xff]  ;;  %vm20834_vm7 = vmpackc.low %vm19398_vm1, %vm19393_vm12 }
 0xb8a   :  { %8415 = vmatprep.subr.bf16.mxu0 %v13155_v30  ;;  %v8446_v30 = vand.u32 63, %v22280_v2  ;;  %12436 = vmatprep.subr.msk.bf16.mxu1 %vm20834_vm7, %v21023_v29 }
 0xb8c   :  { %vm19407_vm15 = vcmp.eq.s32.totalorder %v8446_v30, %v14537_v48  ;;  %v22306_v30 = vmov 0 }
 0xb8d   :  { %8416 = vmatpush1.bf16.msra.mxu0 %v13153_v41  ;;  %v22281_v41 = vld [vmem:[#allocation70_spill] sm:$0xff] }
 0xb8e   :  { %8417 = vmatprep.subr.bf16.mxu0 %v13158_v49  ;;  %v8447_v49 = vand.u32 63, %v22281_v41 }
 0xb90   :  { %vm19412_vm9 = vcmp.eq.s32.totalorder %v8447_v49, %v14537_v48  ;;  %v22308_v49 = vmov 0 }
 0xb91   :  { %8418 = vmatpush1.bf16.msra.mxu0 %v13156_v6  ;;  %v22282_v6 = vmov 0  ;;  %vm20837_vm5 = vmpackc.low %vm19412_vm9, %vm19407_vm15 }
 0xb92   :  { %8419 = vmatprep.subr.bf16.mxu0 %v13161_v25  ;;  %v22283_v6 = vsel %vm19393_vm12, 4294967295, %v22282_v6  ;;  %v22284_v25 = vmov 0  ;;  %12438 = vmatpush3.bf16.msk.msra.mxu1 %vm20837_vm5, %v21023_v29  ;;  %vm19451_vm5 = vcmp.eq.s32.totalorder %v8448_v46, %v14537_v48 }
 0xb93   :  { %v22285_v25 = vsel %vm19398_vm1, 4294967295, %v22284_v25  ;;  %v22299_v21 = vsel %vm19451_vm5, 4294967295, %v22298_v21 }
 0xb95   :  { %8420 = vmatpush1.bf16.msra.mxu0 %v13159_v56  ;;  %v22286_v56 = vmov 0 }
 0xb96   :  { %8421 = vmatprep.subr.bf16.mxu0 %v13164_v33  ;;  %v22287_v56 = vsel %vm19407_vm15, 4294967295, %v22286_v56  ;;  %v22288_v33 = vmov 0 }
 0xb97   :  { %v22289_v33 = vsel %vm19412_vm9, 4294967295, %v22288_v33  ;;  %vm19456_vm9 = vcmp.eq.s32.totalorder %v8449_v26, %v14537_v48 }
 0xb98   :  { %v22301_v62 = vsel %vm19456_vm9, 4294967295, %v22300_v62  ;;  %vm20843_vm1 = vmpackc.low %vm19456_vm9, %vm19451_vm5  ;;  %vm19500_vm9 = vcmp.eq.s32.totalorder %v8451_v14, %v14537_v48 }
 0xb99   :  { %8422 = vmatpush1.bf16.msra.mxu0 %v13162_v58  ;;  %v22290_v58 = vld [vmem:[#allocation75_spill] sm:$0xff] }
 0xb9a   :  { %8423 = vmatprep.subr.bf16.mxu0 %v13167_v9  ;;  %v8464_v9 = vand.u32 63, %v22290_v58  ;;  %v22310_v58 = vmov 0 }
 0xb9c   :  { %vm19437_vm7 = vcmp.eq.s32.totalorder %v8464_v9, %v14537_v48  ;;  %v22312_v9 = vmov 0 }
 0xb9d   :  { %8424 = vmatpush1.bf16.msra.mxu0 %v13165_v51  ;;  %v22291_v51 = vld [vmem:[#allocation76_spill] sm:$0xff]  ;;  %v22295_v52 = vsel %vm19437_vm7, 4294967295, %v22294_v52  ;;  %v22313_v9 = vsel %vm19500_vm9, 4294967295, %v22312_v9 }
 0xba0   :  { %8426 = vmatmul.mubr.bf16.vlgmr.msra.gmra.mrb[36].mxu0 %v8018_v38  ;;  %v8465_v38 = vand.u32 63, %v22291_v51  ;;  %v8565_v51 = vand.u32 63, %v22056_v10  ;;  %v22314_v10 = vmov 0 }
 0xba2   :  { %vm19442_vm12 = vcmp.eq.s32.totalorder %v8465_v38, %v14537_v48  ;;  %vm8567_vm4 = vcmp.eq.s32.totalorder %v8565_v51, %v13380_v44  ;;  %vm8569_vm11 = vcmp.eq.s32.totalorder %v8565_v51, %v14646_v53  ;;  %v8020_v38 = vld [vmem:[%s20222_s10] sm:$0x3]  ;;  %vm8577_vm14 = vcmp.eq.s32.totalorder %v8565_v51, %v22242_v13 }
 0xba3   :  { %v22297_v4 = vsel %vm19442_vm12, 4294967295, %v22296_v4  ;;  %vm20840_vm15 = vmpackc.low %vm19442_vm12, %vm19437_vm7  ;;  %vm19486_vm7 = vcmp.eq.s32.totalorder %v8467_v27, %v14537_v48  ;;  %v8025_v46 = vrot.slane %v8020_v38, %v22200_v23  ;;  %v8029_v26 = vrot.slane %v8020_v38, %v22252_v34 }
 0xba4   :  { %12440 = vmatprep.subr.msk.bf16.mxu1 %vm20840_vm15, %v21023_v29  ;;  %vm19481_vm15 = vcmp.eq.s32.totalorder %v8466_v12, %v14537_v48  ;;  %v22309_v49 = vsel %vm19486_vm7, 4294967295, %v22308_v49  ;;  %vm19523_vm10 = vmpackc.low %vm8569_vm11, %vm8567_vm4  ;;  %vm22316_vm4 = vcmask 1041408  }
 0xba5   :  { %12442 = vmatpush3.bf16.msk.msra.mxu1 %vm20843_vm1, %v21023_v29  ;;  %v22307_v30 = vsel %vm19481_vm15, 4294967295, %v22306_v30  ;;  %vm20850_vm5 = vmpackc.low %vm19486_vm7, %vm19481_vm15  ;;  %vm19495_vm1 = vcmp.eq.s32.totalorder %v8450_v36, %v14537_v48  ;;  %v22315_v10 = vsel %vm19523_vm10, 4294967295, %v22314_v10  ;;  %vm8575_vm7 = vcmp.eq.s32.totalorder %v8565_v51, %v22241_v16 }
 0xba6   :  { %v22311_v58 = vsel %vm19495_vm1, 4294967295, %v22310_v58  ;;  %12444 = vmatprep.subr.msk.bf16.mxu1 %vm20850_vm5, %v21023_v29  ;;  %vm20849_vm12 = vmpackc.low %vm19500_vm9, %vm19495_vm1  ;;  %vm8571_vm5 = vcmp.eq.s32.totalorder %v8565_v51, %v21833_v54 }
 0xba7   :  { %vm22317_vm11 = vmmov %vm22316_vm4 }
 0xba9   :  { %12446 = vmatpush3.bf16.msk.msra.mxu1 %vm20849_vm12, %v21023_v29 }
 0xbaa   :  { %12448 = vmatprep.subr.msk.bf16.mxu1 %vm19523_vm10, %v21023_v29  ;;  %vm8573_vm10 = vcmp.eq.s32.totalorder %v8565_v51, %v21834_v35 }
 0xbab   :  { %vm19556_vm1 = vmpackc.low %vm8573_vm10, %vm8571_vm5 }
 0xbac   :  { %vm19575_vm10 = vmpackc.low %vm8577_vm14, %vm8575_vm7  ;;  %vm8579_vm14 = vcmp.eq.s32.totalorder %v8565_v51, %v22256_v11  ;;  %vm8581_vm7 = vcmp.eq.s32.totalorder %v8565_v51, %v22257_v5 }
 0xc73   :  { %v8427_v19 = vpop.f32.mrb[36].mxu0 }
 0xc74   :  { %v19535_v12 = vadd.f32 %v8427_v19, %v8025_v46  ;;  %v8429_v60 = vpop.f32.mrb[37].mxu0 }
 0xc75   :  { %v19537_v27 = vadd.f32 %v8429_v60, %v8029_v26  ;;  %v8431_v36 = vpop.f32.mrb[38].mxu0 }
 0xc76   :  { %v20853_v14 = vmax.f32 %v19535_v12, 0.0  ;;  %v8432_v50 = vpop.f32.mrb[39].mxu0  ;;  %v8564_v36 = vand.u32 63, %v14537_v48  ;;  %v22375_v15 = vmax.f32 %v19535_v12, 0.0 }
 0xc77   :  { %v20852_v42 = vmax.f32 %v19537_v27, 0.0 }
 0xc78   :  { %v8614_v0 = vsel %vm22316_vm4, %v20853_v14, 0.0  ;;  %vm8566_vm12 = vcmp.eq.s32.totalorder %v8564_v36, %v13380_v44  ;;  %vm8568_vm4 = vcmp.eq.s32.totalorder %v8564_v36, %v14646_v53  ;;  %vm8570_vm9 = vcmp.eq.s32.totalorder %v8564_v36, %v21833_v54 }
 0xc79   :  { %v8615_v22 = vrot.slane %v8614_v0, 4  ;;  %v8621_v38 = vsel %vm22317_vm11, %v20852_v42, 0.0  ;;  %vm19552_vm11 = vmpackc.low %vm8568_vm4, %vm8566_vm12  ;;  %vm8572_vm15 = vcmp.eq.s32.totalorder %v8564_v36, %v21834_v35  ;;  %vm8574_vm5 = vcmp.eq.s32.totalorder %v8564_v36, %v22241_v16 }
 0xc7a   :  { %v8622_v46 = vrot.slane %v8621_v38, 4  ;;  %vm19571_vm12 = vmpackc.low %vm8572_vm15, %vm8570_vm9  ;;  %vm8576_vm4 = vcmp.eq.s32.totalorder %v8564_v36, %v22242_v13 }
 0xc7b   :  { %v8616_v19 = vadd.f32 %v8615_v22, %v8614_v0  ;;  %vm19587_vm15 = vmpackc.low %vm8576_vm4, %vm8574_vm5  ;;  %v13176_v22 = vld [vmem:[%s20225_s13 + $0x60] sm:$0xff]  }
 0xc7c   :  { %v8623_v41 = vadd.f32 %v8622_v46, %v8621_v38  ;;  %vm19596_vm9 = vmpackc.low %vm8581_vm7, %vm8579_vm14  ;;  %vm8699_vm14 = vcmask 523264   ;;  %v13177_v0 = vld [vmem:[%s20225_s13 + $0x20] sm:$0xff]  }
 0xc7d   :  { %v8617_v26 = vrot.slane %v8616_v19, 2  ;;  %vm22332_vm4 = vmpackc.low %vm19070_vm3, %vm19065_vm8  ;;  %vm22335_vm3 = vnez %v22238_v31 }
 0xc7e   :  { %v8624_v60 = vrot.slane %v8623_v41, 2  ;;  %vm22334_vm8 = vmpackc.low %vm19094_vm2, %vm19089_vm13  ;;  %vm22342_vm13 = vnez %v22248_v43 }
 0xc7f   :  { %v8618_v2 = vadd.f32 %v8617_v26, %v8616_v19  ;;  %v13171_v19 = vld [vmem:[%s20225_s13 + $0x8] sm:$0xff]   ;;  %v13172_v26 = vld [vmem:[%s20225_s13 + $0x50] sm:$0xff]  }
 0xc80   :  { %v8625_v50 = vadd.f32 %v8624_v60, %v8623_v41  ;;  %v13173_v60 = vld [vmem:[%s20225_s13 + $0x10] sm:$0xff]  }
 0xc81   :  { %v8619_v39 = vrot.slane %v8618_v2, 1  ;;  %v13181_v41 = vld [vmem:[%s20225_s13 + $0x30] sm:$0xff]  }
 0xc82   :  { %v8626_v17 = vrot.slane %v8625_v50, 1 }
 0xc83   :  { %v8620_v14 = vadd.f32 %v8619_v39, %v8618_v2  ;;  %v22324_v39 = vmov 0  ;;  %v13180_v2 = vld [vmem:[%s20225_s13 + $0x70] sm:$0xff]  }
 0xc84   :  { %v8627_v42 = vadd.f32 %v8626_v17, %v8625_v50  ;;  %v22322_v17 = vmov 0  ;;  %v22325_v39 = vsel %vm19575_vm10, 4294967295, %v22324_v39  ;;  %v13175_v50 = vld [vmem:[%s20225_s13 + $0x18] sm:$0xff]  }
 0xc85   :  { %v22323_v17 = vsel %vm19571_vm12, 4294967295, %v22322_v17 }
 0xc86   :  { %8692 = vmatprep.mubr.f32.mxu1 %v8627_v42  ;;  %v13182_v42 = vld [vmem:[%s20225_s13 + $0x78] sm:$0xff]  }
 0xc87   :  { %8693 = vmatmul.mubr.f32.vlgmr.msra.gmra.mrb[36].mxu1 %v8620_v14 }
 0xc88   :  { %12450 = vmatpush1.bf16.msk.msra.mxu1 %vm19552_vm11, %v21023_v29  ;;  %8767 = vmatprep.mubr.f32.mxu1 %v21466_v61 }
 0xc89   :  { %12452 = vmatprep.subr.msk.bf16.mxu1 %vm19556_vm1, %v21023_v29 }
 0xc8c   :  { %12454 = vmatpush1.bf16.msk.msra.mxu1 %vm19571_vm12, %v21023_v29  ;;  %vm8578_vm12 = vcmp.eq.s32.totalorder %v8564_v36, %v22256_v11 }
 0xc8d   :  { %12456 = vmatprep.subr.msk.bf16.mxu1 %vm19575_vm10, %v21023_v29  ;;  %vm8580_vm10 = vcmp.eq.s32.totalorder %v8564_v36, %v22257_v5  ;;  %v13174_v36 = vld [vmem:[%s20225_s13 + $0x58] sm:$0xff]  }
 0xc8e   :  { %vm19605_vm5 = vmpackc.low %vm8580_vm10, %vm8578_vm12  ;;  %vm22336_vm10 = vnez %v22236_v1  ;;  %v22376_v1 = vmax.f32 %v19537_v27, 0.0  ;;  %v13170_v27 = vld [vmem:[%s20225_s13 + $0x48] sm:$0xff]  }
 0xc8f   :  { %vm22333_vm12 = vmpackc.low %vm19080_vm0, %vm19075_vm6  ;;  %vm22339_vm6 = vnez %v22244_v20 }
 0xc90   :  { %12458 = vmatpush1.bf16.msk.msra.mxu1 %vm19587_vm15, %v21023_v29  ;;  %vm22337_vm7 = vmpackc.low %vm22335_vm3, %vm22336_vm10  ;;  %vm22345_vm3 = vnez %v22259_v24 }
 0xc91   :  { %12460 = vmatprep.subr.msk.bf16.mxu1 %vm19596_vm9, %v21023_v29 }
 0xc94   :  { %12462 = vmatpush1.bf16.msk.msra.mxu1 %vm19605_vm5, %v21023_v29 }
 0xc95   :  { %12464 = vmatprep.subr.msk.bf16.mxu1 %vm22332_vm4, %v21023_v29  ;;  %vm22338_vm4 = vnez %v22246_v57 }
 0xc96   :  { %vm22340_vm0 = vmpackc.low %vm22338_vm4, %vm22339_vm6  ;;  %vm22348_vm4 = vnez %v22263_v3 }
 0xd5a   :  { %v11699_v51 = vpop.f32.mrb[36].mxu1 }
 0xd5b   :  { %v11700_v14 = vpop.f32.mrb[37].mxu1 }
 0xd5c   :  { %v11701_v38 = vadd.f32 %v11700_v14, %v11699_v51  ;;  %v13183_v51 = vld [vmem:[%s20225_s13 + $0x38] sm:$0xff]   ;;  %v9151_v14 = vand.u32 127, %v13380_v44 }
 0xd5e   :  { %v8698_v46 = vmul.f32 0.125, %v11701_v38  ;;  %v9152_v38 = vand.u32 127, %v14646_v53 }
 0xd60   :  { %11083 = vmatmul.mubr.msk.f32.vlgmr.msra.gmra.mrb[38].mxu1 %vm8699_vm14, %v8698_v46  ;;  %v9153_v46 = vand.u32 127, %v21833_v54 }
 0xd61   :  { %12466 = vmatpush3.bf16.msk.msra.mxu1 %vm22333_vm12, %v21023_v29  ;;  %vm22341_vm12 = vnez %v22250_v18 }
 0xd62   :  { %12468 = vmatprep.subr.msk.bf16.mxu1 %vm22334_vm8, %v21023_v29  ;;  %vm22343_vm2 = vmpackc.low %vm22341_vm12, %vm22342_vm13  ;;  %vm22344_vm8 = vnez %v22261_v32  ;;  %vm22351_vm12 = vnez %v22271_v8 }
 0xd63   :  { %vm22346_vm10 = vmpackc.low %vm22344_vm8, %vm22345_vm3  ;;  %vm22354_vm8 = vnez %v22275_v37 }
 0xd65   :  { %12470 = vmatpush3.bf16.msk.msra.mxu1 %vm22337_vm7, %v21023_v29  ;;  %vm22347_vm7 = vnez %v22265_v59 }
 0xd66   :  { %12472 = vmatprep.subr.msk.bf16.mxu1 %vm22340_vm0, %v21023_v29  ;;  %vm22349_vm6 = vmpackc.low %vm22347_vm7, %vm22348_vm4  ;;  %vm22350_vm0 = vnez %v22273_v28  ;;  %vm22357_vm7 = vnez %v22283_v6 }
 0xd67   :  { %vm22352_vm13 = vmpackc.low %vm22350_vm0, %vm22351_vm12  ;;  %vm22360_vm0 = vnez %v22287_v56 }
 0xd69   :  { %12474 = vmatpush3.bf16.msk.msra.mxu1 %vm22343_vm2, %v21023_v29  ;;  %vm22353_vm2 = vnez %v22277_v55 }
 0xd6a   :  { %12476 = vmatprep.subr.msk.bf16.mxu1 %vm22346_vm10, %v21023_v29  ;;  %vm22355_vm3 = vmpackc.low %vm22353_vm2, %vm22354_vm8  ;;  %vm22356_vm10 = vnez %v22285_v25  ;;  %vm22363_vm2 = vnez %v22295_v52  ;;  %v13168_v52 = vld [vmem:[%s20225_s13 + $0x40] sm:$0xff]  }
 0xd6b   :  { %vm22358_vm4 = vmpackc.low %vm22356_vm10, %vm22357_vm7  ;;  %vm22366_vm10 = vnez %v22299_v21 }
 0xd6d   :  { %12478 = vmatpush3.bf16.msk.msra.mxu1 %vm22349_vm6, %v21023_v29  ;;  %vm22359_vm6 = vnez %v22289_v33 }
 0xd6e   :  { %12480 = vmatprep.subr.msk.bf16.mxu1 %vm22352_vm13, %v21023_v29  ;;  %vm22361_vm12 = vmpackc.low %vm22359_vm6, %vm22360_vm0  ;;  %vm22362_vm13 = vnez %v22297_v4  ;;  %vm22369_vm6 = vnez %v22307_v30 }
 0xd6f   :  { %vm22364_vm8 = vmpackc.low %vm22362_vm13, %vm22363_vm2  ;;  %vm22372_vm13 = vnez %v22311_v58  ;;  %v8871_v58 = vld [vmem:[%s20223_s11] sm:$0x1] }
 0xd71   :  { %12482 = vmatpush3.bf16.msk.msra.mxu1 %vm22355_vm3, %v21023_v29  ;;  %vm22365_vm3 = vnez %v22301_v62 }
 0xd72   :  { %12484 = vmatprep.subr.msk.bf16.mxu1 %vm22358_vm4, %v21023_v29  ;;  %vm22367_vm7 = vmpackc.low %vm22365_vm3, %vm22366_vm10  ;;  %vm22368_vm4 = vnez %v22309_v49  ;;  %vm22377_vm3 = vcmask 1041408  }
 0xd73   :  { %vm22370_vm0 = vmpackc.low %vm22368_vm4, %vm22369_vm6  ;;  %vm22380_vm4 = vnez %v22325_v39  ;;  %v13179_v39 = vld [vmem:[%s20225_s13 + $0x28] sm:$0xff]  }
 0xd74   :  { %vm22378_vm10 = vmmov %vm22377_vm3 }
 0xd75   :  { %12486 = vmatpush3.bf16.msk.msra.mxu1 %vm22361_vm12, %v21023_v29  ;;  %vm22371_vm12 = vnez %v22313_v9 }
 0xd76   :  { %12488 = vmatprep.subr.msk.bf16.mxu1 %vm22364_vm8, %v21023_v29  ;;  %vm22373_vm2 = vmpackc.low %vm22371_vm12, %vm22372_vm13  ;;  %vm22374_vm8 = vnez %v22315_v10  ;;  %v13169_v10 = vld [vmem:[%s20225_s13] sm:$0xff]  }
 0xd79   :  { %12490 = vmatpush3.bf16.msk.msra.mxu1 %vm22367_vm7, %v21023_v29  ;;  %vm22379_vm7 = vnez %v22323_v17  ;;  %v13178_v17 = vld [vmem:[%s20225_s13 + $0x68] sm:$0xff]  }
 0xd7a   :  { %12492 = vmatprep.subr.msk.bf16.mxu1 %vm22370_vm0, %v21023_v29 }
 0xd7d   :  { %12494 = vmatpush3.bf16.msk.msra.mxu1 %vm22373_vm2, %v21023_v29 }
 0xd7e   :  { %12496 = vmatprep.subr.msk.bf16.mxu1 %vm22374_vm8, %v21023_v29 }
 0xe33   :  { %v8769_v47 = vpop.f32.mrb[38].mxu1 }
 0xe34   :  { %v8777_v40 = vrot.slane %v8769_v47, %v22200_v23  ;;  %v8771_v63 = vpop.f32.mrb[39].mxu1  ;;  %v13220_v47 = vmov 0.0|0.0  }
 0xe35   :  { %v8781_v7 = vrot.slane %v8771_v63, %v22200_v23  ;;  %12511 = vmatprep.subr.bf16.mxu0 %v13220_v47  ;;  %v9155_v63 = vand.u32 127, %v22241_v16 }
 0xe36   :  { %v19716_v45 = vsub.f32 %v22375_v15, %v8777_v40  ;;  %v9154_v40 = vand.u32 127, %v21834_v35 }
 0xe37   :  { %v19720_v31 = vsub.f32 %v22376_v1, %v8781_v7  ;;  %vm19846_vm6 = vcmp.eq.s32.totalorder %v9155_v63, %v14537_v48 }
 0xe38   :  { %v8784_v20 = vmul.f32 %v19716_v45, %v19716_v45 }
 0xe39   :  { %v8785_v57 = vmul.f32 %v19720_v31, %v19720_v31 }
 0xe3a   :  { %v8786_v43 = vsel %vm22377_vm3, %v8784_v20, 0.0  ;;  %v9156_v20 = vand.u32 127, %v22242_v13 }
 0xe3b   :  { %v8787_v18 = vrot.slane %v8786_v43, 4  ;;  %v8793_v24 = vsel %vm22378_vm10, %v8785_v57, 0.0 }
 0xe3c   :  { %v8794_v32 = vrot.slane %v8793_v24, 4  ;;  %vm19851_vm0 = vcmp.eq.s32.totalorder %v9156_v20, %v14537_v48 }
 0xe3d   :  { %v8788_v3 = vadd.f32 %v8787_v18, %v8786_v43  ;;  %vm20863_vm12 = vmpackc.low %vm19851_vm0, %vm19846_vm6 }
 0xe3e   :  { %v8795_v59 = vadd.f32 %v8794_v32, %v8793_v24  ;;  %v8959_v24 = vld [vmem:[%s20224_s12] sm:$0x3] }
 0xe3f   :  { %v8789_v8 = vrot.slane %v8788_v3, 2 }
 0xe40   :  { %v8796_v28 = vrot.slane %v8795_v59, 2 }
 0xe41   :  { %v8790_v37 = vadd.f32 %v8789_v8, %v8788_v3 }
 0xe42   :  { %v8797_v55 = vadd.f32 %v8796_v28, %v8795_v59  ;;  %v8964_v59 = vrot.slane %v8959_v24, %v22200_v23 }
 0xe43   :  { %v8791_v6 = vrot.slane %v8790_v37, 1 }
 0xe44   :  { %v8798_v25 = vrot.slane %v8797_v55, 1 }
 0xe45   :  { %v8792_v33 = vadd.f32 %v8791_v6, %v8790_v37  ;;  %v8968_v37 = vrot.slane %v8959_v24, %v22252_v34 }
 0xe46   :  { %v8799_v56 = vadd.f32 %v8798_v25, %v8797_v55 }
 0xe48   :  { %8864 = vmatprep.mubr.f32.mxu1 %v8799_v56 }
 0xe49   :  { %8865 = vmatmul.mubr.f32.vlgmr.msra.gmra.mrb[40].mxu1 %v8792_v33 }
 0xe4a   :  { %12498 = vmatpush1.bf16.msk.msra.mxu1 %vm19552_vm11, %v21023_v29  ;;  %8942 = vmatprep.mubr.f32.mxu1 %v21466_v61  ;;  %vm19815_vm11 = vcmp.eq.s32.totalorder %v9152_v38, %v14537_v48  ;;  %v22419_v38 = vmov 0 }
 0xe4b   :  { %12500 = vmatprep.subr.msk.bf16.mxu1 %vm19556_vm1, %v21023_v29  ;;  %vm19810_vm1 = vcmp.eq.s32.totalorder %v9151_v14, %v14537_v48  ;;  %v22417_v14 = vmov 0 }
 0xe4e   :  { %12502 = vmatpush1.bf16.msk.msra.mxu1 %vm22379_vm7, %v21023_v29 }
 0xe4f   :  { %12504 = vmatprep.subr.msk.bf16.mxu1 %vm22380_vm4, %v21023_v29 }
 0xe52   :  { %12506 = vmatpush1.bf16.msk.msra.mxu1 %vm19587_vm15, %v21023_v29  ;;  %vm19820_vm15 = vcmp.eq.s32.totalorder %v9153_v46, %v14537_v48 }
 0xe53   :  { %12508 = vmatprep.subr.msk.bf16.mxu1 %vm19596_vm9, %v21023_v29  ;;  %vm20866_vm9 = vmpackc.low %vm19815_vm11, %vm19810_vm1 }
 0xe54   :  { %12513 = vmatpush3.bf16.msk.msra.mxu0 %vm20866_vm9, %v21023_v29 }
 0xe55   :  { %12514 = vmatprep.subr.bf16.mxu0 %v13220_v47 }
 0xe56   :  { %12510 = vmatpush1.bf16.msk.msra.mxu1 %vm19605_vm5, %v21023_v29  ;;  %vm19830_vm5 = vcmp.eq.s32.totalorder %v9154_v40, %v14537_v48 }
 0xe57   :  { %11737 = vmatprep.subr.bf16.mxu1 %v13168_v52 }
 0xf1c   :  { %v11734_v4 = vpop.f32.mrb[40].mxu1 }
 0xf1d   :  { %v11735_v21 = vpop.f32.mrb[41].mxu1 }
 0xf1e   :  { %v11736_v62 = vadd.f32 %v11735_v21, %v11734_v4  ;;  %v9157_v4 = vand.u32 127, %v22256_v11  ;;  %v9158_v21 = vand.u32 127, %v22257_v5 }
 0xf20   :  { %v8870_v30 = vmul.f32 0.125, %v11736_v62  ;;  %vm19885_vm13 = vcmp.eq.s32.totalorder %v9157_v4, %v14537_v48  ;;  %vm19890_vm2 = vcmp.eq.s32.totalorder %v9158_v21, %v14537_v48 }
 0xf21   :  { %vm20861_vm8 = vmpackc.low %vm19890_vm2, %vm19885_vm13 }
 0xf22   :  { %v8872_v49 = vadd.f32 1e-05, %v8870_v30  ;;  %v22398_v30 = vld [vmem:[#allocation56_spill] sm:$0xff] }
 0xf24   :  { %13188 = vrsqrt.f32 %v8872_v49  ;;  %v9160_v49 = vand.u32 127, %v22398_v30 }
 0xf26   :  { %vm19913_vm10 = vcmp.eq.s32.totalorder %v9160_v49, %v14537_v48 }
 0xf2e   :  { %v13189_v9 = vpop.eup %13188 }
 0xf2f   :  { %v8874_v12 = vmul.f32 %v13189_v9, %v8871_v58  ;;  %v22399_v58 = vmov 0  ;;  %v22401_v9 = vmov 0 }
 0xf30   :  { %v22402_v9 = vsel %vm19913_vm10, 4294967295, %v22401_v9 }
 0xf31   :  { %11132 = vmatmul.mubr.msk.f32.vlgmr.msra.gmra.mrb[42].mxu1 %vm8699_vm14, %v8874_v12  ;;  %vm20864_vm14 = vmpackc.low %vm19830_vm5, %vm19820_vm15 }
 0xf32   :  { %11738 = vmatpush3.bf16.msra.mxu1 %v13169_v10  ;;  %12516 = vmatpush3.bf16.msk.msra.mxu0 %vm20864_vm14, %v21023_v29  ;;  %v22403_v10 = vld [vmem:[#allocation69_spill] sm:$0xff] }
 0xf33   :  { %11739 = vmatprep.subr.bf16.mxu1 %v13170_v27  ;;  %12517 = vmatprep.subr.bf16.mxu0 %v13220_v47  ;;  %v9161_v12 = vand.u32 127, %v22403_v10  ;;  %v22404_v27 = vld [vmem:[#allocation70_spill] sm:$0xff] }
 0xf35   :  { %vm19931_vm4 = vcmp.eq.s32.totalorder %v9161_v12, %v14537_v48 }
 0xf36   :  { %11740 = vmatpush3.bf16.msra.mxu1 %v13171_v19  ;;  %12519 = vmatpush3.bf16.msk.msra.mxu0 %vm20863_vm12, %v21023_v29  ;;  %v9162_v19 = vand.u32 127, %v22404_v27 }
 0xf37   :  { %11741 = vmatprep.subr.bf16.mxu1 %v13172_v26  ;;  %12520 = vmatprep.subr.bf16.mxu0 %v13220_v47  ;;  %v22405_v26 = vmov 0 }
 0xf38   :  { %v22406_v26 = vsel %vm19931_vm4, 4294967295, %v22405_v26 }
 0xf3a   :  { %11742 = vmatpush3.bf16.msra.mxu1 %v13173_v60  ;;  %12522 = vmatpush3.bf16.msk.msra.mxu0 %vm20861_vm8, %v21023_v29  ;;  %vm19936_vm8 = vcmp.eq.s32.totalorder %v9162_v19, %v14537_v48  ;;  %v22407_v60 = vmov 0  ;;  %v11246_v19 = vld [vmem:[%s20228_s16] ss:$0 sm:$0xff] }
 0xf3b   :  { %11743 = vmatprep.subr.bf16.mxu1 %v13174_v36  ;;  %12523 = vmatprep.subr.bf16.mxu0 %v13220_v47  ;;  %v22408_v60 = vsel %vm19936_vm8, 4294967295, %v22407_v60  ;;  %v22409_v36 = vld [vmem:[#allocation89_spill] sm:$0xff] }
 0xf3e   :  { %11744 = vmatpush3.bf16.msra.mxu1 %v13175_v50  ;;  %v9163_v50 = vand.u32 127, %v22409_v36 }
 0xf3f   :  { %11745 = vmatprep.subr.bf16.mxu1 %v13176_v22  ;;  %v22410_v22 = vld [vmem:[#allocation90_spill] sm:$0xff] }
 0xf40   :  { %vm19954_vm12 = vcmp.eq.s32.totalorder %v9163_v50, %v14537_v48 }
 0xf42   :  { %11746 = vmatpush3.bf16.msra.mxu1 %v13177_v0  ;;  %v9164_v0 = vand.u32 127, %v22410_v22 }
 0xf43   :  { %11747 = vmatprep.subr.bf16.mxu1 %v13178_v17  ;;  %v22411_v17 = vmov 0 }
 0xf44   :  { %v22412_v17 = vsel %vm19954_vm12, 4294967295, %v22411_v17  ;;  %vm19959_vm14 = vcmp.eq.s32.totalorder %v9164_v0, %v14537_v48 }
 0xf46   :  { %11748 = vmatpush3.bf16.msra.mxu1 %v13179_v39  ;;  %v22413_v39 = vmov 0 }
 0xf47   :  { %11749 = vmatprep.subr.bf16.mxu1 %v13180_v2  ;;  %v22414_v39 = vsel %vm19959_vm14, 4294967295, %v22413_v39  ;;  %v22415_v2 = vld [vmem:[#allocation97_spill] sm:$0xff] }
 0xf4a   :  { %11750 = vmatpush3.bf16.msra.mxu1 %v13181_v41  ;;  %v9165_v41 = vand.u32 127, %v22415_v2 }
 0xf4b   :  { %11751 = vmatprep.subr.bf16.mxu1 %v13182_v42  ;;  %v22416_v42 = vld [vmem:[#allocation98_spill] sm:$0xff] }
 0xf4c   :  { %vm19977_vm9 = vcmp.eq.s32.totalorder %v9165_v41, %v14537_v48 }
 0xf4d   :  { %v22418_v14 = vsel %vm19977_vm9, 4294967295, %v22417_v14 }
 0xf4e   :  { %11752 = vmatpush3.bf16.msra.mxu1 %v13183_v51  ;;  %v9166_v51 = vand.u32 127, %v22416_v42 }
 0xf4f   :  { %12535 = vmatprep.subr.bf16.mxu1 %v13220_v47 }
0x1004   :  { %v8944_v32 = vpop.f32.mrb[42].mxu1 }
0x1005   :  { %v8952_v3 = vrot.slane %v8944_v32, %v22200_v23  ;;  %v8946_v8 = vpop.f32.mrb[43].mxu1 }
0x1006   :  { %v8956_v28 = vrot.slane %v8946_v8, %v22200_v23 }
0x1007   :  { %v8957_v55 = vmul.f32 %v8952_v3, %v19716_v45  ;;  %v22397_v45 = vld [vmem:[#allocation55_spill] sm:$0xff] }
0x1008   :  { %v8958_v6 = vmul.f32 %v8956_v28, %v19720_v31  ;;  %v9159_v31 = vand.u32 127, %v22397_v45 }
0x1009   :  { %v8971_v25 = vadd.f32 %v8964_v59, %v8957_v55 }
0x100a   :  { %v8972_v56 = vadd.f32 %v8968_v37, %v8958_v6  ;;  %vm19908_vm3 = vcmp.eq.s32.totalorder %v9159_v31, %v14537_v48 }
0x100b   :  { %v9005_v52 = vpack.c.bf16 %v8971_v25, %v8971_v25  ;;  %v22400_v58 = vsel %vm19908_vm3, 4294967295, %v22399_v58  ;;  %vm20862_vm7 = vmpackc.low %vm19913_vm10, %vm19908_vm3  ;;  %vm9219_vm3 = vcmp.eq.s32.totalorder %v14537_v48, %v21834_v35 }
0x100c   :  { %v9006_v33 = vpack.c.bf16 %v8972_v56, %v8972_v56  ;;  %12525 = vmatpush3.bf16.msk.msra.mxu0 %vm20862_vm7, %v21023_v29  ;;  %vm20865_vm7 = vmpackc.low %vm19936_vm8, %vm19931_vm4  ;;  %vm19982_vm4 = vcmp.eq.s32.totalorder %v9166_v51, %v14537_v48  ;;  %vm20871_vm8 = vmmov 0  }
0x100d   :  { %12526 = vmatprep.subr.bf16.mxu0 %v13220_v47  ;;  %v22420_v38 = vsel %vm19982_vm4, 4294967295, %v22419_v38  ;;  %11859 = vmatprep.mubr.msk.f32.mxu0 %vm20871_vm8, %v21466_v61 }
0x100e   :  { %9142 = vmatprep.mubr.bf16.mxu1 %v9006_v33 }
0x100f   :  { %9143 = vmatmul.mubr.bf16.vlgmr.msra.gmra.mrb[44].mxu1 %v9005_v52 }
0x1010   :  { %12528 = vmatpush3.bf16.msk.msra.mxu0 %vm20865_vm7, %v21023_v29  ;;  %vm20869_vm7 = vmpackc.low %vm19959_vm14, %vm19954_vm12  ;;  %11894 = vmatprep.mubr.msk.f32.mxu1 %vm20871_vm8, %v21466_v61  ;;  %vm9216_vm12 = vcmp.eq.s32.totalorder %v14537_v48, %v13380_v44  ;;  %vm9217_vm8 = vcmp.eq.s32.totalorder %v14537_v48, %v14646_v53  ;;  %vm9218_vm14 = vcmp.eq.s32.totalorder %v14537_v48, %v21833_v54  ;;  %v22423_v44 = vmov 0 }
0x1011   :  { %12529 = vmatprep.subr.bf16.mxu0 %v13220_v47  ;;  %vm20009_vm10 = vmpackc.low %vm9217_vm8, %vm9216_vm12  ;;  %v22425_v53 = vmov 0  ;;  %vm9223_vm8 = vcmp.eq.s32.totalorder %v14537_v48, %v22257_v5  ;;  %v22427_v54 = vmov 0  ;;  %v11133_v5 = vld [vmem:[%s20226_s14] ss:$0 sm:$0xff] }
0x1012   :  { %12537 = vmatpush3.bf16.msk.msra.mxu1 %vm20009_vm10, %v21023_v29 }
0x1013   :  { %12538 = vmatprep.subr.bf16.mxu1 %v13220_v47 }
0x1014   :  { %12531 = vmatpush3.bf16.msk.msra.mxu0 %vm20869_vm7, %v21023_v29  ;;  %vm20876_vm7 = vmpackc.low %vm19982_vm4, %vm19977_vm9  ;;  %vm9220_vm9 = vcmp.eq.s32.totalorder %v14537_v48, %v22241_v16  ;;  %vm9221_vm4 = vcmp.eq.s32.totalorder %v14537_v48, %v22242_v13 }
0x1015   :  { %12532 = vmatprep.subr.bf16.mxu0 %v13220_v47  ;;  %vm20029_vm12 = vmpackc.low %vm9221_vm4, %vm9220_vm9  ;;  %vm9224_vm9 = vcmp.eq.s32.totalorder %v14537_v48, %v22397_v45  ;;  %vm9225_vm4 = vcmp.eq.s32.totalorder %v14537_v48, %v22398_v30 }
0x1016   :  { %v22426_v53 = vsel %vm20029_vm12, 4294967295, %v22425_v53 }
0x1018   :  { %12534 = vmatpush3.bf16.msk.msra.mxu0 %vm20876_vm7, %v21023_v29  ;;  %vm20017_vm7 = vmpackc.low %vm9219_vm3, %vm9218_vm14  ;;  %vm9222_vm14 = vcmp.eq.s32.totalorder %v14537_v48, %v22256_v11 }
0x1019   :  { %12559 = vmatprep.subr.bf16.mxu0 %v13220_v47  ;;  %v22424_v44 = vsel %vm20017_vm7, 4294967295, %v22423_v44  ;;  %12540 = vmatpush3.bf16.msk.msra.mxu1 %vm20017_vm7, %v21023_v29  ;;  %vm20041_vm3 = vmpackc.low %vm9223_vm8, %vm9222_vm14  ;;  %vm9226_vm14 = vcmp.eq.s32.totalorder %v14537_v48, %v22403_v10  ;;  %vm9227_vm8 = vcmp.eq.s32.totalorder %v14537_v48, %v22404_v27 }
0x101a   :  { %12541 = vmatprep.subr.bf16.mxu1 %v13220_v47  ;;  %v22428_v54 = vsel %vm20041_vm3, 4294967295, %v22427_v54  ;;  %vm20053_vm7 = vmpackc.low %vm9225_vm4, %vm9224_vm9  ;;  %vm9228_vm9 = vcmp.eq.s32.totalorder %v14537_v48, %v22409_v36  ;;  %vm9229_vm4 = vcmp.eq.s32.totalorder %v14537_v48, %v22410_v22 }
0x101d   :  { %12543 = vmatpush3.bf16.msk.msra.mxu1 %vm20029_vm12, %v21023_v29  ;;  %vm20065_vm12 = vmpackc.low %vm9227_vm8, %vm9226_vm14  ;;  %vm22435_vm14 = vcmask 1041408  }
0x101e   :  { %12544 = vmatprep.subr.bf16.mxu1 %v13220_v47  ;;  %vm22436_vm8 = vmpackc.low %vm19815_vm11, %vm19810_vm1 }
0x101f   :  { %vm22439_vm1 = vmpackc.low %vm19851_vm0, %vm19846_vm6  ;;  %vm22444_vm6 = vnez %v22408_v60  ;;  %vm22445_vm0 = vnez %v22406_v26 }
0x1020   :  { %vm22440_vm11 = vmpackc.low %vm19890_vm2, %vm19885_vm13  ;;  %vm22447_vm13 = vnez %v22414_v39  ;;  %vm22448_vm2 = vnez %v22412_v17 }
0x1021   :  { %12546 = vmatpush3.bf16.msk.msra.mxu1 %vm20041_vm3, %v21023_v29  ;;  %vm20077_vm3 = vmpackc.low %vm9229_vm4, %vm9228_vm9  ;;  %vm22437_vm9 = vmmov 0  }
0x1022   :  { %12547 = vmatprep.subr.bf16.mxu1 %v13220_v47  ;;  %vm22438_vm4 = vmpackc.low %vm19830_vm5, %vm19820_vm15  ;;  %vm22441_vm15 = vnez %v22402_v9  ;;  %vm22442_vm5 = vnez %v22400_v58 }
0x1025   :  { %12549 = vmatpush3.bf16.msk.msra.mxu1 %vm20053_vm7, %v21023_v29 }
0x1026   :  { %12550 = vmatprep.subr.bf16.mxu1 %v13220_v47 }
0x1029   :  { %12552 = vmatpush3.bf16.msk.msra.mxu1 %vm20065_vm12, %v21023_v29 }
0x102a   :  { %12553 = vmatprep.subr.bf16.mxu1 %v13220_v47 }
0x102d   :  { %12555 = vmatpush3.bf16.msk.msra.mxu1 %vm20077_vm3, %v21023_v29 }
0x102e   :  { %12556 = vmatprep.subr.bf16.mxu1 %v13220_v47 }
0x10e2   :  { %v11753_v11 = vpop.f32.mrb[44].mxu1 }
0x10e3   :  { %v11754_v40 = vpop.f32.mrb[45].mxu1 }
0x10e4   :  { %v11755_v63 = vadd.f32 %v11754_v40, %v11753_v11  ;;  %v11756_v20 = vpop.f32.mrb[46].mxu1 }
0x10e5   :  { %v11757_v24 = vpop.f32.mrb[47].mxu1 }
0x10e6   :  { %v9145_v32 = vadd.f32 %v11755_v63, %v11133_v5 }
0x10e8   :  { %v9150_v3 = vmax.f32 %v9145_v32, 0.0 }
0x10ea   :  { %v9264_v59 = vsel %vm22435_vm14, %v9150_v3, 0.0  ;;  %vm22443_vm14 = vmpackc.low %vm22441_vm15, %vm22442_vm5  ;;  %vm9230_vm5 = vcmp.eq.s32.totalorder %v14537_v48, %v22415_v2 }
0x10eb   :  { %v9265_v8 = vrot.slane %v9264_v59, 4 }
0x10ed   :  { %v9266_v28 = vadd.f32 %v9265_v8, %v9264_v59 }
0x10ef   :  { %v9267_v37 = vrot.slane %v9266_v28, 2 }
0x10f1   :  { %v9268_v55 = vadd.f32 %v9267_v37, %v9266_v28 }
0x10f3   :  { %v9269_v6 = vrot.slane %v9268_v55, 1 }
0x10f5   :  { %v9270_v25 = vadd.f32 %v9269_v6, %v9268_v55 }
0x10f7   :  { %11860 = vmatmul.mubr.f32.vlgmr.msra.gmra.mrb[40].mxu0 %v9270_v25 }
0x10f8   :  { %12561 = vmatpush3.bf16.msk.msra.mxu0 %vm22436_vm8, %v21023_v29  ;;  %11929 = vmatprep.mubr.msk.f32.mxu0 %vm22437_vm9, %v21466_v61  ;;  %vm22446_vm8 = vmpackc.low %vm22444_vm6, %vm22445_vm0  ;;  %vm22455_vm0 = vnez %v22424_v44 }
0x10f9   :  { %12562 = vmatprep.subr.bf16.mxu0 %v13220_v47 }
0x10fc   :  { %12564 = vmatpush3.bf16.msk.msra.mxu0 %vm22438_vm4, %v21023_v29  ;;  %vm22449_vm4 = vmpackc.low %vm22447_vm13, %vm22448_vm2 }
0x10fd   :  { %12565 = vmatprep.subr.bf16.mxu0 %v13220_v47 }
0x1100   :  { %12567 = vmatpush3.bf16.msk.msra.mxu0 %vm22439_vm1, %v21023_v29  ;;  %vm22450_vm1 = vnez %v22420_v38 }
0x1101   :  { %12568 = vmatprep.subr.bf16.mxu0 %v13220_v47 }
0x1104   :  { %12570 = vmatpush3.bf16.msk.msra.mxu0 %vm22440_vm11, %v21023_v29  ;;  %vm22451_vm11 = vnez %v22418_v14 }
0x1105   :  { %12571 = vmatprep.subr.bf16.mxu0 %v13220_v47  ;;  %vm22452_vm15 = vmpackc.low %vm22450_vm1, %vm22451_vm11 }
0x1108   :  { %12573 = vmatpush3.bf16.msk.msra.mxu0 %vm22443_vm14, %v21023_v29  ;;  %vm9231_vm14 = vcmp.eq.s32.totalorder %v14537_v48, %v22416_v42 }
0x1109   :  { %12574 = vmatprep.subr.bf16.mxu0 %v13220_v47  ;;  %vm20150_vm6 = vmpackc.low %vm9231_vm14, %vm9230_vm5 }
0x110a   :  { %12558 = vmatpush3.bf16.msk.msra.mxu1 %vm20150_vm6, %v21023_v29 }
0x110b   :  { %12583 = vmatprep.subr.bf16.mxu1 %v13220_v47 }
0x110c   :  { %12576 = vmatpush3.bf16.msk.msra.mxu0 %vm22446_vm8, %v21023_v29  ;;  %vm22456_vm8 = vnez %v22426_v53 }
0x110d   :  { %12577 = vmatprep.subr.bf16.mxu0 %v13220_v47 }
0x1110   :  { %12579 = vmatpush3.bf16.msk.msra.mxu0 %vm22449_vm4, %v21023_v29 }
0x1111   :  { %12580 = vmatprep.subr.bf16.mxu0 %v13220_v47 }
0x1114   :  { %12582 = vmatpush3.bf16.msk.msra.mxu0 %vm22452_vm15, %v21023_v29 }
0x11ca   :  { %v9337_v15 = vpop.f32.mrb[40].mxu0 }
0x11cb   :  { %v9341_v1 = vmul.f32 0.5, %v9337_v15  ;;  %v11861_v57 = vpop.f32.mrb[41].mxu0 }
0x11cd   :  { %11895 = vmatmul.mubr.f32.vlgmr.msra.gmra.mrb[48].mxu1 %v9341_v1 }
0x11ce   :  { %12585 = vmatpush3.bf16.msk.msra.mxu1 %vm20009_vm10, %v21023_v29  ;;  %11964 = vmatprep.mubr.msk.f32.mxu1 %vm22437_vm9, %v21466_v61  ;;  %vm22457_vm10 = vnez %v22428_v54 }
0x11cf   :  { %12586 = vmatprep.subr.bf16.mxu1 %v13220_v47 }
0x11d2   :  { %12588 = vmatpush3.bf16.msk.msra.mxu1 %vm22455_vm0, %v21023_v29 }
0x11d3   :  { %12589 = vmatprep.subr.bf16.mxu1 %v13220_v47 }
0x11d6   :  { %12591 = vmatpush3.bf16.msk.msra.mxu1 %vm22456_vm8, %v21023_v29 }
0x11d7   :  { %12592 = vmatprep.subr.bf16.mxu1 %v13220_v47 }
0x11da   :  { %12594 = vmatpush3.bf16.msk.msra.mxu1 %vm22457_vm10, %v21023_v29 }
0x11db   :  { %12595 = vmatprep.subr.bf16.mxu1 %v13220_v47 }
0x11de   :  { %12597 = vmatpush3.bf16.msk.msra.mxu1 %vm20053_vm7, %v21023_v29  ;;  %vm22458_vm7 = vcmask 1041408  }
0x11df   :  { %12598 = vmatprep.subr.bf16.mxu1 %v13220_v47 }
0x11e2   :  { %12600 = vmatpush3.bf16.msk.msra.mxu1 %vm20065_vm12, %v21023_v29 }
0x11e3   :  { %12601 = vmatprep.subr.bf16.mxu1 %v13220_v47 }
0x11e6   :  { %12603 = vmatpush3.bf16.msk.msra.mxu1 %vm20077_vm3, %v21023_v29 }
0x11e7   :  { %12604 = vmatprep.subr.bf16.mxu1 %v13220_v47 }
0x11ea   :  { %12606 = vmatpush3.bf16.msk.msra.mxu1 %vm20150_vm6, %v21023_v29  ;;  %v9496_v29 = vld [vmem:[%s20227_s15] sm:$0x1] }
0x12a0   :  { %v9408_v48 = vpop.f32.mrb[48].mxu1 }
0x12a1   :  { %v9415_v61 = vrot.slane %v9408_v48, %v22200_v23  ;;  %v11896_v43 = vpop.f32.mrb[49].mxu1 }
0x12a3   :  { %v9416_v18 = vsub.f32 %v9150_v3, %v9415_v61 }
0x12a5   :  { %v9417_v56 = vmul.f32 %v9416_v18, %v9416_v18 }
0x12a7   :  { %v9418_v33 = vsel %vm22458_vm7, %v9417_v56, 0.0 }
0x12a8   :  { %v9419_v52 = vrot.slane %v9418_v33, 4 }
0x12aa   :  { %v9420_v4 = vadd.f32 %v9419_v52, %v9418_v33 }
0x12ac   :  { %v9421_v21 = vrot.slane %v9420_v4, 2 }
0x12ae   :  { %v9422_v62 = vadd.f32 %v9421_v21, %v9420_v4 }
0x12b0   :  { %v9423_v34 = vrot.slane %v9422_v62, 1 }
0x12b2   :  { %v9424_v45 = vadd.f32 %v9423_v34, %v9422_v62 }
0x12b4   :  { %11930 = vmatmul.mubr.f32.vlgmr.msra.gmra.mrb[42].mxu0 %v9424_v45 }
0x1387   :  { %v9491_v47 = vpop.f32.mrb[42].mxu0 }
0x1388   :  { %v9495_v31 = vmul.f32 0.5, %v9491_v47  ;;  %v11931_v30 = vpop.f32.mrb[43].mxu0 }
0x138a   :  { %v9497_v49 = vadd.f32 1e-05, %v9495_v31 }
0x138c   :  { %13190 = vrsqrt.f32 %v9497_v49 }
0x1396   :  { %v13191_v58 = vpop.eup %13190 }
0x1397   :  { %v9499_v9 = vmul.f32 %v13191_v58, %v9496_v29 }
0x1399   :  { %11965 = vmatmul.mubr.f32.vlgmr.msra.gmra.mrb[50].mxu1 %v9499_v9 }
0x146c   :  { %v9566_v10 = vpop.f32.mrb[50].mxu1 }
0x146d   :  { %v9573_v12 = vrot.slane %v9566_v10, %v22200_v23  ;;  %v11966_v27 = vpop.f32.mrb[51].mxu1 }
0x146f   :  { %v9574_v26 = vmul.f32 %v9573_v12, %v9416_v18 }
0x1471   :  { %v9582_v60 = vadd.f32 %v11246_v19, %v9574_v26 }
0x1473   :  { %9583 = vst [vmem:[#allocation2] sm:$0x3] %v9582_v60 }
0x1474   :  { %13204 = shalt.err (!%p13201_p4)
}
0x1475   :  { %s13205_s5 = scalar_lea.hbm %s20229_s17, 32 }
0x1476   :  { %p13206_p5 = scmp.ne.s32.totalorder %s20229_s17, %s13205_s5  ;;  %p13209_p6 = scmp.lt.u32.totalorder %s13205_s5, %s20229_s17 }
0x1478   :  { %p13211_p7 = pnand %p13209_p6, %p13206_p5 }
0x147a   :  { %13214 = shalt.err (!%p13211_p7)
}
0x147b   :  { %9593 = dma.vmem_to_hbm [thread:$0]  %s9591_s18, 32, %s20229_s17, [#allocation3]  }
0x147c   :  { %13215 = dma.done.wait [#allocation3], 32  }
0x147d   :  { %13216 = vsyncadd [#allocation3], 4294967264 }
0x147e   :  { %9597 = vsyncpa [#allocation3], 1 }

</bundles_post_ra>
